<compile_context>
chip_gen: v6e
topology: v6e:2x2x1
jax: 0.10.0
libtpu: 0.0.40
codegen_flags: <defaults>
</compile_context>

<pallas_src>
import numpy as np
import jax
import jax.numpy as jnp
from jax.experimental import pallas as pl
from jax.experimental.pallas import tpu as pltpu

C = 48        # channel count fixed by the module
EPS = 1e-5


# ----------------------- bilinear upsample factors (numpy) --------------------

def bilinear_matrix(size_out, size_in):
    """1-D factor of F.interpolate(mode='bilinear', align_corners=True)."""
    A = np.zeros((size_out, size_in), np.float32)
    if size_in == 1:
        A[:, 0] = 1.0
        return A
    if size_out == 1:
        A[0, 0] = 1.0
        return A
    scale = (size_in - 1) / (size_out - 1)
    for o in range(size_out):
        src = o * scale
        i0 = min(int(np.floor(src)), size_in - 1)
        i1 = min(i0 + 1, size_in - 1)
        f = src - i0
        A[o, i0] += 1.0 - f
        A[o, i1] += f
    return A


def upsample_matrix_fullgrid(H, W, hs, ws):
    """(hs*ws, H*W) right-multiply matrix.

    The branch output is kept in the *full* pooled-grid layout (the valid 3x3
    output at (io,jo), io<hs-2, jo<ws-2, lives in row io*ws+jo); the rows that
    belong to the 2-pixel 'valid' crop margin are zero, which folds the crop into
    the upsample and lets the branch kernel skip all interior masking."""
    ho, wo = hs - 2, ws - 2
    UH = bilinear_matrix(H, ho)          # (H, ho)
    UW = bilinear_matrix(W, wo)          # (W, wo)
    Kvalid = np.kron(UH.T, UW.T)         # (ho*wo, H*W)
    Kfull = np.zeros((hs * ws, H * W), np.float32)
    rows = (np.arange(ho)[:, None] * ws + np.arange(wo)[None, :]).ravel()
    Kfull[rows] = Kvalid
    return Kfull


# ------------------------------ fused branch kernel ---------------------------
# One kernel computes all three pyramid branches for one batch element:
#   1x1 conv (+folded BN) + ReLU  ->  depthwise 3x3 'valid' (+folded BN) + ReLU
#   ->  1x1 conv (+folded BN) + ReLU  ->  per-branch block of the merge conv.
# Everything stays lane-dense in the flat (48, hs*ws) channels-first layout; the
# depthwise conv is 9 lane-shifted taps.  Columns outside the valid interior hold
# (finite) garbage that the zero rows of the upsample matrix drop later.

def _make_branch_kernel(shapes):
    def kernel(p1_ref, p2_ref, p3_ref, wmat_ref, wsm_ref, o_ref):
        f32, bf16 = jnp.float32, jnp.bfloat16
        p_refs = (p1_ref, p2_ref, p3_ref)
        outs = []
        for bi, (hs, ws) in enumerate(shapes):
            sl = hs * ws
            w1 = wmat_ref[3 * bi + 0]                 # (48,48) bf16, BN folded
            w2 = wmat_ref[3 * bi + 1]                 # (48,48) bf16, BN folded
            wmm = wmat_ref[3 * bi + 2]                # (48,48) bf16, merge block
            small = wsm_ref[bi]                       # (48,12) f32: taps(9)|b1|bd|b2

            # 1x1 conv #1 + ReLU (MXU matmul, f32 accumulate).
            y1 = jnp.dot(w1, p_refs[bi][0], preferred_element_type=f32)
            y1 = jnp.maximum(y1 + small[:, 9:10], 0.0)            # (48, sl)

            # Depthwise 3x3 'valid' on the lane-dense layout: tap (dy,dx) reads
            # y1 shifted left by dy*ws+dx; the wrap-around only pollutes columns
            # outside the valid interior (dropped by K's zero rows).
            acc = small[:, 0:1] * y1
            for t in range(1, 9):
                dy, dx = divmod(t, 3)
                k = dy * ws + dx
                shifted = jnp.concatenate([y1[:, k:], y1[:, :k]], axis=1)
                acc = acc + small[:, t:t + 1] * shifted
            y2 = jnp.maximum(acc + small[:, 10:11], 0.0)           # (48, sl)

            # 1x1 conv #2 + ReLU, then the per-branch block of the merge conv
            # (hoisted out of the merge kernel's column-tile loop).
            y3 = jnp.dot(w2, y2.astype(bf16), preferred_element_type=f32)
            y3 = jnp.maximum(y3 + small[:, 11:12], 0.0)
            r = jnp.dot(wmm, y3.astype(bf16), preferred_element_type=f32)
            outs.append(r)
        o_ref[0] = jnp.concatenate(outs, axis=1).astype(o_ref.dtype)
    return kernel


def _branch_call(p1, p2, p3, wmat, wsmall, shapes):
    """p_i: (N, 48, hs_i*ws_i) bf16  ->  (N, 48, s1+s2+s3) bf16 (full-grid layout)."""
    N = p1.shape[0]
    sizes = [hs * ws for hs, ws in shapes]
    s_total = sum(sizes)
    return pl.pallas_call(
        _make_branch_kernel(shapes),
        grid=(N,),
        in_specs=[
            pl.BlockSpec((1, C, sizes[0]), lambda n: (n, 0, 0)),
            pl.BlockSpec((1, C, sizes[1]), lambda n: (n, 0, 0)),
            pl.BlockSpec((1, C, sizes[2]), lambda n: (n, 0, 0)),
            pl.BlockSpec((9, C, C), lambda n: (0, 0, 0)),     # stacked w1|w2|wm x3
            pl.BlockSpec((3, C, 12), lambda n: (0, 0, 0)),    # packed taps + biases
        ],
        out_specs=pl.BlockSpec((1, C, s_total), lambda n: (n, 0, 0)),
        out_shape=jax.ShapeDtypeStruct((N, C, s_total), jnp.bfloat16),
        compiler_params=pltpu.CompilerParams(dimension_semantics=("parallel",)),
    )(p1, p2, p3, wmat, wsmall)


# -------------------------------- merge kernel --------------------------------
# Per (batch, column-tile): ONE stacked upsample matmul (48,S)@(S,TS) for the
# three pyramid branches (merge conv already applied), + pool4/merge-bias vector,
# ReLU, then the merge2 conv as two (48,48) matmuls (merge path + x path), ReLU.

def _merge_kernel(x_ref, r_ref, p4_ref, k_ref, wa_ref, wb_ref, b2_ref, o_ref):
    f32, bf16 = jnp.float32, jnp.bfloat16
    m = jnp.dot(r_ref[0], k_ref[...], preferred_element_type=f32)     # (48, TS)
    m = jnp.maximum(m + p4_ref[0], 0.0)       # + pool4 block & merge bias, ReLU
    out = jnp.dot(wa_ref[...], m.astype(bf16), preferred_element_type=f32)
    out = out + jnp.dot(wb_ref[...], x_ref[0], preferred_element_type=f32)
    o_ref[0] = jnp.maximum(out + b2_ref[...], 0.0)                    # lane-dense


def _vmem_capacity():
    try:
        info = pltpu.get_tpu_info()
        return int(getattr(info, "vmem_capacity_bytes", 64 << 20))
    except Exception:
        return 64 << 20


def _pick_merge_tile(HW, s_total, c):
    """Largest 128-multiple column tile dividing HW whose double-buffered
    K / x / out blocks fit a conservative fraction of this chip's VMEM."""
    budget = max(_vmem_capacity() // 6, 4 << 20)

    def footprint(ts):  # bf16 K + bf16 x + f32 out, x2 for double-buffering
        return 2 * (s_total * ts * 2 + c * ts * 2 + c * ts * 4)

    cands = sorted({d for d in range(128, HW + 1, 128) if HW % d == 0} | {HW})
    best = cands[0]
    for ts in cands:
        if footprint(ts) <= budget:
            best = ts
    return best


def _merge_call(x_flat, r, p4v, K, wa, wb, b2):
    N, Cc, HW = x_flat.shape
    s_total = r.shape[2]
    TS = _pick_merge_tile(HW, s_total, Cc)
    T = HW // TS
    return pl.pallas_call(
        _merge_kernel,
        grid=(N, T),
        in_specs=[
            pl.BlockSpec((1, Cc, TS), lambda n, t: (n, 0, t)),        # x (bf16)
            pl.BlockSpec((1, Cc, s_total), lambda n, t: (n, 0, 0)),   # branches (bf16)
            pl.BlockSpec((1, Cc, 1), lambda n, t: (n, 0, 0)),         # pool4+bias
            pl.BlockSpec((s_total, TS), lambda n, t: (0, t)),         # stacked K
            pl.BlockSpec((Cc, Cc), lambda n, t: (0, 0)),              # merge2 wa
            pl.BlockSpec((Cc, Cc), lambda n, t: (0, 0)),              # merge2 wb
            pl.BlockSpec((Cc, 1), lambda n, t: (0, 0)),               # merge2 bias
        ],
        out_specs=pl.BlockSpec((1, Cc, TS), lambda n, t: (n, 0, t)),
        out_shape=jax.ShapeDtypeStruct((N, Cc, HW), jnp.float32),
        compiler_params=pltpu.CompilerParams(
            dimension_semantics=("parallel", "parallel")),
    )(x_flat, r, p4v, K, wa, wb, b2)


# --------------------------------- parameters ---------------------------------

def make_params(key, H, W):
    keys = iter(jax.random.split(key, 40))

    def conv_w(cout, cin):
        return (jax.random.normal(next(keys), (cout, cin)) * 0.2).astype(jnp.float32)

    def bn_fold(c):
        k1, k2, k3, k4 = jax.random.split(next(keys), 4)
        gamma = jax.random.uniform(k1, (c,), minval=0.5, maxval=1.5)
        beta = jax.random.normal(k2, (c,)) * 0.1
        mean = jax.random.normal(k3, (c,)) * 0.1
        var = jax.random.uniform(k4, (c,), minval=0.5, maxval=1.5)
        scale = gamma / jnp.sqrt(var + EPS)
        bias = beta - mean * scale
        return scale.astype(jnp.float32), bias.astype(jnp.float32)

    # merge: Conv2d(192->48,1) + BN fold, split into one 48x48 block per branch
    wm = conv_w(C, 4 * C)
    sm, bm = bn_fold(C)
    wmf = sm[:, None] * wm

    wmat_blocks, wsmall_blocks, k_blocks = [], [], []
    for idx, k in enumerate((2, 4, 8)):
        hs, ws = H // k, W // k
        w1 = conv_w(C, C); s1, b1 = bn_fold(C)
        wd = (jax.random.normal(next(keys), (9, C)) * 0.2).astype(jnp.float32)
        sd, bd = bn_fold(C)
        w2 = conv_w(C, C); s2, b2 = bn_fold(C)
        wmat_blocks.append(jnp.stack([
            s1[:, None] * w1,                        # 1x1 #1, BN scale folded
            s2[:, None] * w2,                        # 1x1 #2, BN scale folded
            wmf[:, idx * C:(idx + 1) * C],           # this branch's merge block
        ]))
        taps = (wd * sd[None, :]).T                  # (48, 9) dw taps, BN folded
        wsmall_blocks.append(jnp.concatenate(
            [taps, b1[:, None], bd[:, None], b2[:, None]], axis=1))   # (48, 12)
        k_blocks.append(jnp.asarray(upsample_matrix_fullgrid(H, W, hs, ws)))

    params = {
        "Wmat": jnp.concatenate(wmat_blocks, axis=0).astype(jnp.bfloat16),  # (9,48,48)
        "Wsmall": jnp.stack(wsmall_blocks).astype(jnp.float32),             # (3,48,12)
        "K": jnp.concatenate(k_blocks, axis=0).astype(jnp.bfloat16),        # (S, H*W)
    }

    # pool4: global avg -> 1x1 conv + BN + ReLU (evaluated in plain JAX)
    w4 = conv_w(C, C); s4, b4 = bn_fold(C)
    params["pool4_w"] = s4[:, None] * w4
    params["pool4_b"] = b4
    params["merge_w4"] = wmf[:, 3 * C:]
    params["merge_b"] = bm

    # merge2: Conv2d(96->48,1) split into (merge-out, x) blocks
    wm2 = conv_w(C, 2 * C); sm2, bm2 = bn_fold(C)
    wm2f = sm2[:, None] * wm2
    params["merge2_wa"] = wm2f[:, :C].astype(jnp.bfloat16)
    params["merge2_wb"] = wm2f[:, C:].astype(jnp.bfloat16)
    params["merge2_b"] = bm2[:, None]
    return params


# ----------------------------------- forward ----------------------------------

@jax.jit
def rpp_forward(x_nchw, params):
    N, Cc, H, W = x_nchw.shape
    x = x_nchw.astype(jnp.float32)
    x_flat = x.reshape(N, Cc, H * W)                 # free view, channels-first

    # hierarchical average pooling (exact: equal-size mean of means); x read once
    p1 = x.reshape(N, Cc, H // 2, 2, W // 2, 2).mean(axis=(3, 5))
    p2 = p1.reshape(N, Cc, H // 4, 2, W // 4, 2).mean(axis=(3, 5))
    p3 = p2.reshape(N, Cc, H // 8, 2, W // 8, 2).mean(axis=(3, 5))
    g = p3.mean(axis=(2, 3))                                              # (N,48)

    # pool4 branch (+ its merge-conv block + merge bias) -> one vector per batch
    v = jnp.maximum(g @ params["pool4_w"].T + params["pool4_b"][None, :], 0.0)
    p4v = (v @ params["merge_w4"].T + params["merge_b"][None, :])[:, :, None]

    shapes = ((H // 2, W // 2), (H // 4, W // 4), (H // 8, W // 8))
    r = _branch_call(
        p1.reshape(N, Cc, -1).astype(jnp.bfloat16),
        p2.reshape(N, Cc, -1).astype(jnp.bfloat16),
        p3.reshape(N, Cc, -1).astype(jnp.bfloat16),
        params["Wmat"], params["Wsmall"], shapes)

    out_flat = _merge_call(
        x_flat.astype(jnp.bfloat16), r, p4v.astype(jnp.float32),
        params["K"], params["merge2_wa"], params["merge2_wb"], params["merge2_b"])
    return out_flat.reshape(N, Cc, H, W)             # already NCHW layout


# -------------------------- plain-JAX reference (check) ------------------------

def reference_forward(x, params):
    N, Cc, H, W = x.shape
    xf = x.astype(jnp.float32)
    Wmat = params["Wmat"].astype(jnp.float32)
    Wsm = params["Wsmall"]

    pooled, p_prev = [], xf
    for _ in range(3):
        p_prev = p_prev.reshape(N, Cc, p_prev.shape[2] // 2, 2,
                                p_prev.shape[3] // 2, 2).mean(axis=(3, 5))
        pooled.append(p_prev)
    g = pooled[-1].mean(axis=(2, 3))
    v = jnp.maximum(g @ params["pool4_w"].T + params["pool4_b"][None, :], 0.0)
    m = (v @ params["merge_w4"].T + params["merge_b"][None, :])[:, :, None]

    for bi in range(3):
        p = pooled[bi]
        hs, ws = p.shape[2], p.shape[3]
        ho, wo = hs - 2, ws - 2
        w1, w2, wmm = Wmat[3 * bi], Wmat[3 * bi + 1], Wmat[3 * bi + 2]
        taps = Wsm[bi, :, :9]
        b1, bd, b2 = Wsm[bi, :, 9], Wsm[bi, :, 10], Wsm[bi, :, 11]
        y1 = jnp.maximum(jnp.einsum('oc,nchw->nohw', w1, p)
                         + b1[None, :, None, None], 0.0)
        acc = sum(taps[:, 3 * dy + dx][None, :, None, None]
                  * y1[:, :, dy:dy + ho, dx:dx + wo]
                  for dy in range(3) for dx in range(3))
        y2 = jnp.maximum(acc + bd[None, :, None, None], 0.0)
        y3 = jnp.maximum(jnp.einsum('oc,nchw->nohw', w2, y2)
                         + b2[None, :, None, None], 0.0)
        r = jnp.einsum('oc,nchw->nohw', wmm, y3).reshape(N, Cc, ho * wo)
        Kv = jnp.asarray(np.kron(bilinear_matrix(H, ho).T, bilinear_matrix(W, wo).T))
        m = m + jnp.einsum('ncs,sp->ncp', r, Kv)
    m = jnp.maximum(m, 0.0)

    wa = params["merge2_wa"].astype(jnp.float32)
    wb = params["merge2_wb"].astype(jnp.float32)
    out = (jnp.einsum('oc,ncp->nop', wa, m)
           + jnp.einsum('oc,ncp->nop', wb, xf.reshape(N, Cc, H * W))
           + params["merge2_b"][None])
    return jnp.maximum(out, 0.0).reshape(N, Cc, H, W)


# ------------------------------------- main ------------------------------------

if __name__ == "__main__":
    # smallest spatial size must satisfy H/8 >= 3 (valid 3x3 after 8x pooling)
    N, H, W = 2, 32, 32
    key = jax.random.PRNGKey(0)
    kx, kp = jax.random.split(key)
    x = jax.random.normal(kx, (N, C, H, W), dtype=jnp.float32)

    params = make_params(kp, H, W)
    y = jax.block_until_ready(rpp_forward(x, params))

    assert y.shape == (N, C, H, W), y.shape
    assert bool(jnp.all(jnp.isfinite(y)))

    # cross-check against a plain-JAX evaluation of the same folded-BN forward
    y_ref = reference_forward(x, params)
    err = float(jnp.max(jnp.abs(y - y_ref)) / (jnp.max(jnp.abs(y_ref)) + 1e-6))
    assert err < 0.08, f"kernel/reference mismatch: {err}"

    print("KERNEL_OK")
</pallas_src>

<mosaic_0001>
module attributes {stable_mosaic.version = 11 : i64} {
  func.func @kernel(%arg0: i32, %arg1: memref<1x48x256xbf16, #tpu.memory_space<vmem>>, %arg2: memref<1x48x64xbf16, #tpu.memory_space<vmem>>, %arg3: memref<1x48x16xbf16, #tpu.memory_space<vmem>>, %arg4: memref<9x48x48xbf16, #tpu.memory_space<vmem>>, %arg5: memref<3x48x12xf32, #tpu.memory_space<vmem>>, %arg6: memref<1x48x336xbf16, #tpu.memory_space<vmem>>) attributes {dimension_semantics = [#tpu.dimension_semantics<parallel>], iteration_bounds = array<i64: 2>, scalar_prefetch = 0 : i64, scratch_operands = 0 : i64, tpu.core_type = #tpu.core_type<tc>, window_params = [{transform_indices = @transform_0, window_bounds = array<i64: 1, 48, 256>}, {transform_indices = @transform_1, window_bounds = array<i64: 1, 48, 64>}, {transform_indices = @transform_2, window_bounds = array<i64: 1, 48, 16>}, {pipeline_mode = #tpu.pipeline_mode<synchronous>, transform_indices = @transform_3, window_bounds = array<i64: 9, 48, 48>}, {pipeline_mode = #tpu.pipeline_mode<synchronous>, transform_indices = @transform_4, window_bounds = array<i64: 3, 48, 12>}, {transform_indices = @transform_5, window_bounds = array<i64: 1, 48, 336>}]} {
    %c0 = arith.constant 0 : index
    %c0_0 = arith.constant 0 : index
    %c0_1 = arith.constant 0 : index
    %0 = vector.load %arg4[%c0, %c0_0, %c0_1] : memref<9x48x48xbf16, #tpu.memory_space<vmem>>, vector<1x48x48xbf16>
    %1 = vector.shape_cast %0 : vector<1x48x48xbf16> to vector<48x48xbf16>
    %c1 = arith.constant 1 : index
    %c0_2 = arith.constant 0 : index
    %c0_3 = arith.constant 0 : index
    %2 = vector.load %arg4[%c1, %c0_2, %c0_3] : memref<9x48x48xbf16, #tpu.memory_space<vmem>>, vector<1x48x48xbf16>
    %3 = vector.shape_cast %2 : vector<1x48x48xbf16> to vector<48x48xbf16>
    %c2 = arith.constant 2 : index
    %c0_4 = arith.constant 0 : index
    %c0_5 = arith.constant 0 : index
    %4 = vector.load %arg4[%c2, %c0_4, %c0_5] : memref<9x48x48xbf16, #tpu.memory_space<vmem>>, vector<1x48x48xbf16>
    %5 = vector.shape_cast %4 : vector<1x48x48xbf16> to vector<48x48xbf16>
    %c0_6 = arith.constant 0 : index
    %c0_7 = arith.constant 0 : index
    %c0_8 = arith.constant 0 : index
    %6 = vector.load %arg5[%c0_6, %c0_7, %c0_8] : memref<3x48x12xf32, #tpu.memory_space<vmem>>, vector<1x48x12xf32>
    %7 = vector.shape_cast %6 : vector<1x48x12xf32> to vector<48x12xf32>
    %c0_9 = arith.constant 0 : index
    %c0_10 = arith.constant 0 : index
    %c0_11 = arith.constant 0 : index
    %8 = vector.load %arg1[%c0_9, %c0_10, %c0_11] : memref<1x48x256xbf16, #tpu.memory_space<vmem>>, vector<1x48x256xbf16>
    %9 = vector.shape_cast %8 : vector<1x48x256xbf16> to vector<48x256xbf16>
    %cst = arith.constant dense<0.000000e+00> : vector<48x256xf32>
    %10 = tpu.matmul %1, %9, %cst {dimension_numbers = #tpu.dot_dimension_numbers<[1], [0], [0], [1], [0, 0, 1, 1], [], []>} : vector<48x48xbf16>, vector<48x256xbf16>, vector<48x256xf32> -> vector<48x256xf32>
    %11 = vector.extract_strided_slice %7 {offsets = [0, 9], sizes = [48, 1], strides = [1, 1]} : vector<48x12xf32> to vector<48x1xf32>
    %12 = vector.broadcast %11 : vector<48x1xf32> to vector<48x256xf32>
    %13 = arith.addf %10, %12 : vector<48x256xf32>
    %cst_12 = arith.constant 0.000000e+00 : f32
    %14 = vector.broadcast %cst_12 : f32 to vector<48x256xf32>
    %15 = arith.maximumf %13, %14 : vector<48x256xf32>
    %16 = vector.extract_strided_slice %7 {offsets = [0, 0], sizes = [48, 1], strides = [1, 1]} : vector<48x12xf32> to vector<48x1xf32>
    %17 = vector.broadcast %16 : vector<48x1xf32> to vector<48x256xf32>
    %18 = arith.mulf %17, %15 : vector<48x256xf32>
    %19 = vector.extract_strided_slice %15 {offsets = [0, 1], sizes = [48, 255], strides = [1, 1]} : vector<48x256xf32> to vector<48x255xf32>
    %20 = vector.extract_strided_slice %15 {offsets = [0, 0], sizes = [48, 1], strides = [1, 1]} : vector<48x256xf32> to vector<48x1xf32>
    %21 = tpu.concatenate %19, %20 in 1 : vector<48x255xf32>, vector<48x1xf32> -> vector<48x256xf32>
    %22 = vector.extract_strided_slice %7 {offsets = [0, 1], sizes = [48, 1], strides = [1, 1]} : vector<48x12xf32> to vector<48x1xf32>
    %23 = vector.broadcast %22 : vector<48x1xf32> to vector<48x256xf32>
    %24 = arith.mulf %23, %21 : vector<48x256xf32>
    %25 = arith.addf %18, %24 : vector<48x256xf32>
    %26 = vector.extract_strided_slice %15 {offsets = [0, 2], sizes = [48, 254], strides = [1, 1]} : vector<48x256xf32> to vector<48x254xf32>
    %27 = vector.extract_strided_slice %15 {offsets = [0, 0], sizes = [48, 2], strides = [1, 1]} : vector<48x256xf32> to vector<48x2xf32>
    %28 = tpu.concatenate %26, %27 in 1 : vector<48x254xf32>, vector<48x2xf32> -> vector<48x256xf32>
    %29 = vector.extract_strided_slice %7 {offsets = [0, 2], sizes = [48, 1], strides = [1, 1]} : vector<48x12xf32> to vector<48x1xf32>
    %30 = vector.broadcast %29 : vector<48x1xf32> to vector<48x256xf32>
    %31 = arith.mulf %30, %28 : vector<48x256xf32>
    %32 = arith.addf %25, %31 : vector<48x256xf32>
    %33 = vector.extract_strided_slice %15 {offsets = [0, 16], sizes = [48, 240], strides = [1, 1]} : vector<48x256xf32> to vector<48x240xf32>
    %34 = vector.extract_strided_slice %15 {offsets = [0, 0], sizes = [48, 16], strides = [1, 1]} : vector<48x256xf32> to vector<48x16xf32>
    %35 = tpu.concatenate %33, %34 in 1 : vector<48x240xf32>, vector<48x16xf32> -> vector<48x256xf32>
    %36 = vector.extract_strided_slice %7 {offsets = [0, 3], sizes = [48, 1], strides = [1, 1]} : vector<48x12xf32> to vector<48x1xf32>
    %37 = vector.broadcast %36 : vector<48x1xf32> to vector<48x256xf32>
    %38 = arith.mulf %37, %35 : vector<48x256xf32>
    %39 = arith.addf %32, %38 : vector<48x256xf32>
    %40 = vector.extract_strided_slice %15 {offsets = [0, 17], sizes = [48, 239], strides = [1, 1]} : vector<48x256xf32> to vector<48x239xf32>
    %41 = vector.extract_strided_slice %15 {offsets = [0, 0], sizes = [48, 17], strides = [1, 1]} : vector<48x256xf32> to vector<48x17xf32>
    %42 = tpu.concatenate %40, %41 in 1 : vector<48x239xf32>, vector<48x17xf32> -> vector<48x256xf32>
    %43 = vector.extract_strided_slice %7 {offsets = [0, 4], sizes = [48, 1], strides = [1, 1]} : vector<48x12xf32> to vector<48x1xf32>
    %44 = vector.broadcast %43 : vector<48x1xf32> to vector<48x256xf32>
    %45 = arith.mulf %44, %42 : vector<48x256xf32>
    %46 = arith.addf %39, %45 : vector<48x256xf32>
    %47 = vector.extract_strided_slice %15 {offsets = [0, 18], sizes = [48, 238], strides = [1, 1]} : vector<48x256xf32> to vector<48x238xf32>
    %48 = vector.extract_strided_slice %15 {offsets = [0, 0], sizes = [48, 18], strides = [1, 1]} : vector<48x256xf32> to vector<48x18xf32>
    %49 = tpu.concatenate %47, %48 in 1 : vector<48x238xf32>, vector<48x18xf32> -> vector<48x256xf32>
    %50 = vector.extract_strided_slice %7 {offsets = [0, 5], sizes = [48, 1], strides = [1, 1]} : vector<48x12xf32> to vector<48x1xf32>
    %51 = vector.broadcast %50 : vector<48x1xf32> to vector<48x256xf32>
    %52 = arith.mulf %51, %49 : vector<48x256xf32>
    %53 = arith.addf %46, %52 : vector<48x256xf32>
    %54 = vector.extract_strided_slice %15 {offsets = [0, 32], sizes = [48, 224], strides = [1, 1]} : vector<48x256xf32> to vector<48x224xf32>
    %55 = vector.extract_strided_slice %15 {offsets = [0, 0], sizes = [48, 32], strides = [1, 1]} : vector<48x256xf32> to vector<48x32xf32>
    %56 = tpu.concatenate %54, %55 in 1 : vector<48x224xf32>, vector<48x32xf32> -> vector<48x256xf32>
    %57 = vector.extract_strided_slice %7 {offsets = [0, 6], sizes = [48, 1], strides = [1, 1]} : vector<48x12xf32> to vector<48x1xf32>
    %58 = vector.broadcast %57 : vector<48x1xf32> to vector<48x256xf32>
    %59 = arith.mulf %58, %56 : vector<48x256xf32>
    %60 = arith.addf %53, %59 : vector<48x256xf32>
    %61 = vector.extract_strided_slice %15 {offsets = [0, 33], sizes = [48, 223], strides = [1, 1]} : vector<48x256xf32> to vector<48x223xf32>
    %62 = vector.extract_strided_slice %15 {offsets = [0, 0], sizes = [48, 33], strides = [1, 1]} : vector<48x256xf32> to vector<48x33xf32>
    %63 = tpu.concatenate %61, %62 in 1 : vector<48x223xf32>, vector<48x33xf32> -> vector<48x256xf32>
    %64 = vector.extract_strided_slice %7 {offsets = [0, 7], sizes = [48, 1], strides = [1, 1]} : vector<48x12xf32> to vector<48x1xf32>
    %65 = vector.broadcast %64 : vector<48x1xf32> to vector<48x256xf32>
    %66 = arith.mulf %65, %63 : vector<48x256xf32>
    %67 = arith.addf %60, %66 : vector<48x256xf32>
    %68 = vector.extract_strided_slice %15 {offsets = [0, 34], sizes = [48, 222], strides = [1, 1]} : vector<48x256xf32> to vector<48x222xf32>
    %69 = vector.extract_strided_slice %15 {offsets = [0, 0], sizes = [48, 34], strides = [1, 1]} : vector<48x256xf32> to vector<48x34xf32>
    %70 = tpu.concatenate %68, %69 in 1 : vector<48x222xf32>, vector<48x34xf32> -> vector<48x256xf32>
    %71 = vector.extract_strided_slice %7 {offsets = [0, 8], sizes = [48, 1], strides = [1, 1]} : vector<48x12xf32> to vector<48x1xf32>
    %72 = vector.broadcast %71 : vector<48x1xf32> to vector<48x256xf32>
    %73 = arith.mulf %72, %70 : vector<48x256xf32>
    %74 = arith.addf %67, %73 : vector<48x256xf32>
    %75 = vector.extract_strided_slice %7 {offsets = [0, 10], sizes = [48, 1], strides = [1, 1]} : vector<48x12xf32> to vector<48x1xf32>
    %76 = vector.broadcast %75 : vector<48x1xf32> to vector<48x256xf32>
    %77 = arith.addf %74, %76 : vector<48x256xf32>
    %cst_13 = arith.constant 0.000000e+00 : f32
    %78 = vector.broadcast %cst_13 : f32 to vector<48x256xf32>
    %79 = arith.maximumf %77, %78 : vector<48x256xf32>
    %80 = arith.truncf %79 : vector<48x256xf32> to vector<48x256xbf16>
    %cst_14 = arith.constant dense<0.000000e+00> : vector<48x256xf32>
    %81 = tpu.matmul %3, %80, %cst_14 {dimension_numbers = #tpu.dot_dimension_numbers<[1], [0], [0], [1], [0, 0, 1, 1], [], []>} : vector<48x48xbf16>, vector<48x256xbf16>, vector<48x256xf32> -> vector<48x256xf32>
    %82 = vector.extract_strided_slice %7 {offsets = [0, 11], sizes = [48, 1], strides = [1, 1]} : vector<48x12xf32> to vector<48x1xf32>
    %83 = vector.broadcast %82 : vector<48x1xf32> to vector<48x256xf32>
    %84 = arith.addf %81, %83 : vector<48x256xf32>
    %cst_15 = arith.constant 0.000000e+00 : f32
    %85 = vector.broadcast %cst_15 : f32 to vector<48x256xf32>
    %86 = arith.maximumf %84, %85 : vector<48x256xf32>
    %87 = arith.truncf %86 : vector<48x256xf32> to vector<48x256xbf16>
    %cst_16 = arith.constant dense<0.000000e+00> : vector<48x256xf32>
    %88 = tpu.matmul %5, %87, %cst_16 {dimension_numbers = #tpu.dot_dimension_numbers<[1], [0], [0], [1], [0, 0, 1, 1], [], []>} : vector<48x48xbf16>, vector<48x256xbf16>, vector<48x256xf32> -> vector<48x256xf32>
    %c3 = arith.constant 3 : index
    %c0_17 = arith.constant 0 : index
    %c0_18 = arith.constant 0 : index
    %89 = vector.load %arg4[%c3, %c0_17, %c0_18] : memref<9x48x48xbf16, #tpu.memory_space<vmem>>, vector<1x48x48xbf16>
    %90 = vector.shape_cast %89 : vector<1x48x48xbf16> to vector<48x48xbf16>
    %c4 = arith.constant 4 : index
    %c0_19 = arith.constant 0 : index
    %c0_20 = arith.constant 0 : index
    %91 = vector.load %arg4[%c4, %c0_19, %c0_20] : memref<9x48x48xbf16, #tpu.memory_space<vmem>>, vector<1x48x48xbf16>
    %92 = vector.shape_cast %91 : vector<1x48x48xbf16> to vector<48x48xbf16>
    %c5 = arith.constant 5 : index
    %c0_21 = arith.constant 0 : index
    %c0_22 = arith.constant 0 : index
    %93 = vector.load %arg4[%c5, %c0_21, %c0_22] : memref<9x48x48xbf16, #tpu.memory_space<vmem>>, vector<1x48x48xbf16>
    %94 = vector.shape_cast %93 : vector<1x48x48xbf16> to vector<48x48xbf16>
    %c1_23 = arith.constant 1 : index
    %c0_24 = arith.constant 0 : index
    %c0_25 = arith.constant 0 : index
    %95 = vector.load %arg5[%c1_23, %c0_24, %c0_25] : memref<3x48x12xf32, #tpu.memory_space<vmem>>, vector<1x48x12xf32>
    %96 = vector.shape_cast %95 : vector<1x48x12xf32> to vector<48x12xf32>
    %c0_26 = arith.constant 0 : index
    %c0_27 = arith.constant 0 : index
    %c0_28 = arith.constant 0 : index
    %97 = vector.load %arg2[%c0_26, %c0_27, %c0_28] : memref<1x48x64xbf16, #tpu.memory_space<vmem>>, vector<1x48x64xbf16>
    %98 = vector.shape_cast %97 : vector<1x48x64xbf16> to vector<48x64xbf16>
    %cst_29 = arith.constant dense<0.000000e+00> : vector<48x64xf32>
    %99 = tpu.matmul %90, %98, %cst_29 {dimension_numbers = #tpu.dot_dimension_numbers<[1], [0], [0], [1], [0, 0, 1, 1], [], []>} : vector<48x48xbf16>, vector<48x64xbf16>, vector<48x64xf32> -> vector<48x64xf32>
    %100 = vector.extract_strided_slice %96 {offsets = [0, 9], sizes = [48, 1], strides = [1, 1]} : vector<48x12xf32> to vector<48x1xf32>
    %101 = vector.broadcast %100 : vector<48x1xf32> to vector<48x64xf32>
    %102 = arith.addf %99, %101 : vector<48x64xf32>
    %cst_30 = arith.constant 0.000000e+00 : f32
    %103 = vector.broadcast %cst_30 : f32 to vector<48x64xf32>
    %104 = arith.maximumf %102, %103 : vector<48x64xf32>
    %105 = vector.extract_strided_slice %96 {offsets = [0, 0], sizes = [48, 1], strides = [1, 1]} : vector<48x12xf32> to vector<48x1xf32>
    %106 = vector.broadcast %105 : vector<48x1xf32> to vector<48x64xf32>
    %107 = arith.mulf %106, %104 : vector<48x64xf32>
    %108 = vector.extract_strided_slice %104 {offsets = [0, 1], sizes = [48, 63], strides = [1, 1]} : vector<48x64xf32> to vector<48x63xf32>
    %109 = vector.extract_strided_slice %104 {offsets = [0, 0], sizes = [48, 1], strides = [1, 1]} : vector<48x64xf32> to vector<48x1xf32>
    %110 = tpu.concatenate %108, %109 in 1 : vector<48x63xf32>, vector<48x1xf32> -> vector<48x64xf32>
    %111 = vector.extract_strided_slice %96 {offsets = [0, 1], sizes = [48, 1], strides = [1, 1]} : vector<48x12xf32> to vector<48x1xf32>
    %112 = vector.broadcast %111 : vector<48x1xf32> to vector<48x64xf32>
    %113 = arith.mulf %112, %110 : vector<48x64xf32>
    %114 = arith.addf %107, %113 : vector<48x64xf32>
    %115 = vector.extract_strided_slice %104 {offsets = [0, 2], sizes = [48, 62], strides = [1, 1]} : vector<48x64xf32> to vector<48x62xf32>
    %116 = vector.extract_strided_slice %104 {offsets = [0, 0], sizes = [48, 2], strides = [1, 1]} : vector<48x64xf32> to vector<48x2xf32>
    %117 = tpu.concatenate %115, %116 in 1 : vector<48x62xf32>, vector<48x2xf32> -> vector<48x64xf32>
    %118 = vector.extract_strided_slice %96 {offsets = [0, 2], sizes = [48, 1], strides = [1, 1]} : vector<48x12xf32> to vector<48x1xf32>
    %119 = vector.broadcast %118 : vector<48x1xf32> to vector<48x64xf32>
    %120 = arith.mulf %119, %117 : vector<48x64xf32>
    %121 = arith.addf %114, %120 : vector<48x64xf32>
    %122 = vector.extract_strided_slice %104 {offsets = [0, 8], sizes = [48, 56], strides = [1, 1]} : vector<48x64xf32> to vector<48x56xf32>
    %123 = vector.extract_strided_slice %104 {offsets = [0, 0], sizes = [48, 8], strides = [1, 1]} : vector<48x64xf32> to vector<48x8xf32>
    %124 = tpu.concatenate %122, %123 in 1 : vector<48x56xf32>, vector<48x8xf32> -> vector<48x64xf32>
    %125 = vector.extract_strided_slice %96 {offsets = [0, 3], sizes = [48, 1], strides = [1, 1]} : vector<48x12xf32> to vector<48x1xf32>
    %126 = vector.broadcast %125 : vector<48x1xf32> to vector<48x64xf32>
    %127 = arith.mulf %126, %124 : vector<48x64xf32>
    %128 = arith.addf %121, %127 : vector<48x64xf32>
    %129 = vector.extract_strided_slice %104 {offsets = [0, 9], sizes = [48, 55], strides = [1, 1]} : vector<48x64xf32> to vector<48x55xf32>
    %130 = vector.extract_strided_slice %104 {offsets = [0, 0], sizes = [48, 9], strides = [1, 1]} : vector<48x64xf32> to vector<48x9xf32>
    %131 = tpu.concatenate %129, %130 in 1 : vector<48x55xf32>, vector<48x9xf32> -> vector<48x64xf32>
    %132 = vector.extract_strided_slice %96 {offsets = [0, 4], sizes = [48, 1], strides = [1, 1]} : vector<48x12xf32> to vector<48x1xf32>
    %133 = vector.broadcast %132 : vector<48x1xf32> to vector<48x64xf32>
    %134 = arith.mulf %133, %131 : vector<48x64xf32>
    %135 = arith.addf %128, %134 : vector<48x64xf32>
    %136 = vector.extract_strided_slice %104 {offsets = [0, 10], sizes = [48, 54], strides = [1, 1]} : vector<48x64xf32> to vector<48x54xf32>
    %137 = vector.extract_strided_slice %104 {offsets = [0, 0], sizes = [48, 10], strides = [1, 1]} : vector<48x64xf32> to vector<48x10xf32>
    %138 = tpu.concatenate %136, %137 in 1 : vector<48x54xf32>, vector<48x10xf32> -> vector<48x64xf32>
    %139 = vector.extract_strided_slice %96 {offsets = [0, 5], sizes = [48, 1], strides = [1, 1]} : vector<48x12xf32> to vector<48x1xf32>
    %140 = vector.broadcast %139 : vector<48x1xf32> to vector<48x64xf32>
    %141 = arith.mulf %140, %138 : vector<48x64xf32>
    %142 = arith.addf %135, %141 : vector<48x64xf32>
    %143 = vector.extract_strided_slice %104 {offsets = [0, 16], sizes = [48, 48], strides = [1, 1]} : vector<48x64xf32> to vector<48x48xf32>
    %144 = vector.extract_strided_slice %104 {offsets = [0, 0], sizes = [48, 16], strides = [1, 1]} : vector<48x64xf32> to vector<48x16xf32>
    %145 = tpu.concatenate %143, %144 in 1 : vector<48x48xf32>, vector<48x16xf32> -> vector<48x64xf32>
    %146 = vector.extract_strided_slice %96 {offsets = [0, 6], sizes = [48, 1], strides = [1, 1]} : vector<48x12xf32> to vector<48x1xf32>
    %147 = vector.broadcast %146 : vector<48x1xf32> to vector<48x64xf32>
    %148 = arith.mulf %147, %145 : vector<48x64xf32>
    %149 = arith.addf %142, %148 : vector<48x64xf32>
    %150 = vector.extract_strided_slice %104 {offsets = [0, 17], sizes = [48, 47], strides = [1, 1]} : vector<48x64xf32> to vector<48x47xf32>
    %151 = vector.extract_strided_slice %104 {offsets = [0, 0], sizes = [48, 17], strides = [1, 1]} : vector<48x64xf32> to vector<48x17xf32>
    %152 = tpu.concatenate %150, %151 in 1 : vector<48x47xf32>, vector<48x17xf32> -> vector<48x64xf32>
    %153 = vector.extract_strided_slice %96 {offsets = [0, 7], sizes = [48, 1], strides = [1, 1]} : vector<48x12xf32> to vector<48x1xf32>
    %154 = vector.broadcast %153 : vector<48x1xf32> to vector<48x64xf32>
    %155 = arith.mulf %154, %152 : vector<48x64xf32>
    %156 = arith.addf %149, %155 : vector<48x64xf32>
    %157 = vector.extract_strided_slice %104 {offsets = [0, 18], sizes = [48, 46], strides = [1, 1]} : vector<48x64xf32> to vector<48x46xf32>
    %158 = vector.extract_strided_slice %104 {offsets = [0, 0], sizes = [48, 18], strides = [1, 1]} : vector<48x64xf32> to vector<48x18xf32>
    %159 = tpu.concatenate %157, %158 in 1 : vector<48x46xf32>, vector<48x18xf32> -> vector<48x64xf32>
    %160 = vector.extract_strided_slice %96 {offsets = [0, 8], sizes = [48, 1], strides = [1, 1]} : vector<48x12xf32> to vector<48x1xf32>
    %161 = vector.broadcast %160 : vector<48x1xf32> to vector<48x64xf32>
    %162 = arith.mulf %161, %159 : vector<48x64xf32>
    %163 = arith.addf %156, %162 : vector<48x64xf32>
    %164 = vector.extract_strided_slice %96 {offsets = [0, 10], sizes = [48, 1], strides = [1, 1]} : vector<48x12xf32> to vector<48x1xf32>
    %165 = vector.broadcast %164 : vector<48x1xf32> to vector<48x64xf32>
    %166 = arith.addf %163, %165 : vector<48x64xf32>
    %cst_31 = arith.constant 0.000000e+00 : f32
    %167 = vector.broadcast %cst_31 : f32 to vector<48x64xf32>
    %168 = arith.maximumf %166, %167 : vector<48x64xf32>
    %169 = arith.truncf %168 : vector<48x64xf32> to vector<48x64xbf16>
    %cst_32 = arith.constant dense<0.000000e+00> : vector<48x64xf32>
    %170 = tpu.matmul %92, %169, %cst_32 {dimension_numbers = #tpu.dot_dimension_numbers<[1], [0], [0], [1], [0, 0, 1, 1], [], []>} : vector<48x48xbf16>, vector<48x64xbf16>, vector<48x64xf32> -> vector<48x64xf32>
    %171 = vector.extract_strided_slice %96 {offsets = [0, 11], sizes = [48, 1], strides = [1, 1]} : vector<48x12xf32> to vector<48x1xf32>
    %172 = vector.broadcast %171 : vector<48x1xf32> to vector<48x64xf32>
    %173 = arith.addf %170, %172 : vector<48x64xf32>
    %cst_33 = arith.constant 0.000000e+00 : f32
    %174 = vector.broadcast %cst_33 : f32 to vector<48x64xf32>
    %175 = arith.maximumf %173, %174 : vector<48x64xf32>
    %176 = arith.truncf %175 : vector<48x64xf32> to vector<48x64xbf16>
    %cst_34 = arith.constant dense<0.000000e+00> : vector<48x64xf32>
    %177 = tpu.matmul %94, %176, %cst_34 {dimension_numbers = #tpu.dot_dimension_numbers<[1], [0], [0], [1], [0, 0, 1, 1], [], []>} : vector<48x48xbf16>, vector<48x64xbf16>, vector<48x64xf32> -> vector<48x64xf32>
    %c6 = arith.constant 6 : index
    %c0_35 = arith.constant 0 : index
    %c0_36 = arith.constant 0 : index
    %178 = vector.load %arg4[%c6, %c0_35, %c0_36] : memref<9x48x48xbf16, #tpu.memory_space<vmem>>, vector<1x48x48xbf16>
    %179 = vector.shape_cast %178 : vector<1x48x48xbf16> to vector<48x48xbf16>
    %c7 = arith.constant 7 : index
    %c0_37 = arith.constant 0 : index
    %c0_38 = arith.constant 0 : index
    %180 = vector.load %arg4[%c7, %c0_37, %c0_38] : memref<9x48x48xbf16, #tpu.memory_space<vmem>>, vector<1x48x48xbf16>
    %181 = vector.shape_cast %180 : vector<1x48x48xbf16> to vector<48x48xbf16>
    %c8 = arith.constant 8 : index
    %c0_39 = arith.constant 0 : index
    %c0_40 = arith.constant 0 : index
    %182 = vector.load %arg4[%c8, %c0_39, %c0_40] : memref<9x48x48xbf16, #tpu.memory_space<vmem>>, vector<1x48x48xbf16>
    %183 = vector.shape_cast %182 : vector<1x48x48xbf16> to vector<48x48xbf16>
    %c2_41 = arith.constant 2 : index
    %c0_42 = arith.constant 0 : index
    %c0_43 = arith.constant 0 : index
    %184 = vector.load %arg5[%c2_41, %c0_42, %c0_43] : memref<3x48x12xf32, #tpu.memory_space<vmem>>, vector<1x48x12xf32>
    %185 = vector.shape_cast %184 : vector<1x48x12xf32> to vector<48x12xf32>
    %c0_44 = arith.constant 0 : index
    %c0_45 = arith.constant 0 : index
    %c0_46 = arith.constant 0 : index
    %186 = vector.load %arg3[%c0_44, %c0_45, %c0_46] : memref<1x48x16xbf16, #tpu.memory_space<vmem>>, vector<1x48x16xbf16>
    %187 = vector.shape_cast %186 : vector<1x48x16xbf16> to vector<48x16xbf16>
    %cst_47 = arith.constant dense<0.000000e+00> : vector<48x16xf32>
    %188 = tpu.matmul %179, %187, %cst_47 {dimension_numbers = #tpu.dot_dimension_numbers<[1], [0], [0], [1], [0, 0, 1, 1], [], []>} : vector<48x48xbf16>, vector<48x16xbf16>, vector<48x16xf32> -> vector<48x16xf32>
    %189 = vector.extract_strided_slice %185 {offsets = [0, 9], sizes = [48, 1], strides = [1, 1]} : vector<48x12xf32> to vector<48x1xf32>
    %190 = vector.broadcast %189 : vector<48x1xf32> to vector<48x16xf32>
    %191 = arith.addf %188, %190 : vector<48x16xf32>
    %cst_48 = arith.constant 0.000000e+00 : f32
    %192 = vector.broadcast %cst_48 : f32 to vector<48x16xf32>
    %193 = arith.maximumf %191, %192 : vector<48x16xf32>
    %194 = vector.extract_strided_slice %185 {offsets = [0, 0], sizes = [48, 1], strides = [1, 1]} : vector<48x12xf32> to vector<48x1xf32>
    %195 = vector.broadcast %194 : vector<48x1xf32> to vector<48x16xf32>
    %196 = arith.mulf %195, %193 : vector<48x16xf32>
    %197 = vector.extract_strided_slice %193 {offsets = [0, 1], sizes = [48, 15], strides = [1, 1]} : vector<48x16xf32> to vector<48x15xf32>
    %198 = vector.extract_strided_slice %193 {offsets = [0, 0], sizes = [48, 1], strides = [1, 1]} : vector<48x16xf32> to vector<48x1xf32>
    %199 = tpu.concatenate %197, %198 in 1 : vector<48x15xf32>, vector<48x1xf32> -> vector<48x16xf32>
    %200 = vector.extract_strided_slice %185 {offsets = [0, 1], sizes = [48, 1], strides = [1, 1]} : vector<48x12xf32> to vector<48x1xf32>
    %201 = vector.broadcast %200 : vector<48x1xf32> to vector<48x16xf32>
    %202 = arith.mulf %201, %199 : vector<48x16xf32>
    %203 = arith.addf %196, %202 : vector<48x16xf32>
    %204 = vector.extract_strided_slice %193 {offsets = [0, 2], sizes = [48, 14], strides = [1, 1]} : vector<48x16xf32> to vector<48x14xf32>
    %205 = vector.extract_strided_slice %193 {offsets = [0, 0], sizes = [48, 2], strides = [1, 1]} : vector<48x16xf32> to vector<48x2xf32>
    %206 = tpu.concatenate %204, %205 in 1 : vector<48x14xf32>, vector<48x2xf32> -> vector<48x16xf32>
    %207 = vector.extract_strided_slice %185 {offsets = [0, 2], sizes = [48, 1], strides = [1, 1]} : vector<48x12xf32> to vector<48x1xf32>
    %208 = vector.broadcast %207 : vector<48x1xf32> to vector<48x16xf32>
    %209 = arith.mulf %208, %206 : vector<48x16xf32>
    %210 = arith.addf %203, %209 : vector<48x16xf32>
    %211 = vector.extract_strided_slice %193 {offsets = [0, 4], sizes = [48, 12], strides = [1, 1]} : vector<48x16xf32> to vector<48x12xf32>
    %212 = vector.extract_strided_slice %193 {offsets = [0, 0], sizes = [48, 4], strides = [1, 1]} : vector<48x16xf32> to vector<48x4xf32>
    %213 = tpu.concatenate %211, %212 in 1 : vector<48x12xf32>, vector<48x4xf32> -> vector<48x16xf32>
    %214 = vector.extract_strided_slice %185 {offsets = [0, 3], sizes = [48, 1], strides = [1, 1]} : vector<48x12xf32> to vector<48x1xf32>
    %215 = vector.broadcast %214 : vector<48x1xf32> to vector<48x16xf32>
    %216 = arith.mulf %215, %213 : vector<48x16xf32>
    %217 = arith.addf %210, %216 : vector<48x16xf32>
    %218 = vector.extract_strided_slice %193 {offsets = [0, 5], sizes = [48, 11], strides = [1, 1]} : vector<48x16xf32> to vector<48x11xf32>
    %219 = vector.extract_strided_slice %193 {offsets = [0, 0], sizes = [48, 5], strides = [1, 1]} : vector<48x16xf32> to vector<48x5xf32>
    %220 = tpu.concatenate %218, %219 in 1 : vector<48x11xf32>, vector<48x5xf32> -> vector<48x16xf32>
    %221 = vector.extract_strided_slice %185 {offsets = [0, 4], sizes = [48, 1], strides = [1, 1]} : vector<48x12xf32> to vector<48x1xf32>
    %222 = vector.broadcast %221 : vector<48x1xf32> to vector<48x16xf32>
    %223 = arith.mulf %222, %220 : vector<48x16xf32>
    %224 = arith.addf %217, %223 : vector<48x16xf32>
    %225 = vector.extract_strided_slice %193 {offsets = [0, 6], sizes = [48, 10], strides = [1, 1]} : vector<48x16xf32> to vector<48x10xf32>
    %226 = vector.extract_strided_slice %193 {offsets = [0, 0], sizes = [48, 6], strides = [1, 1]} : vector<48x16xf32> to vector<48x6xf32>
    %227 = tpu.concatenate %225, %226 in 1 : vector<48x10xf32>, vector<48x6xf32> -> vector<48x16xf32>
    %228 = vector.extract_strided_slice %185 {offsets = [0, 5], sizes = [48, 1], strides = [1, 1]} : vector<48x12xf32> to vector<48x1xf32>
    %229 = vector.broadcast %228 : vector<48x1xf32> to vector<48x16xf32>
    %230 = arith.mulf %229, %227 : vector<48x16xf32>
    %231 = arith.addf %224, %230 : vector<48x16xf32>
    %232 = vector.extract_strided_slice %193 {offsets = [0, 8], sizes = [48, 8], strides = [1, 1]} : vector<48x16xf32> to vector<48x8xf32>
    %233 = vector.extract_strided_slice %193 {offsets = [0, 0], sizes = [48, 8], strides = [1, 1]} : vector<48x16xf32> to vector<48x8xf32>
    %234 = tpu.concatenate %232, %233 in 1 : vector<48x8xf32>, vector<48x8xf32> -> vector<48x16xf32>
    %235 = vector.extract_strided_slice %185 {offsets = [0, 6], sizes = [48, 1], strides = [1, 1]} : vector<48x12xf32> to vector<48x1xf32>
    %236 = vector.broadcast %235 : vector<48x1xf32> to vector<48x16xf32>
    %237 = arith.mulf %236, %234 : vector<48x16xf32>
    %238 = arith.addf %231, %237 : vector<48x16xf32>
    %239 = vector.extract_strided_slice %193 {offsets = [0, 9], sizes = [48, 7], strides = [1, 1]} : vector<48x16xf32> to vector<48x7xf32>
    %240 = vector.extract_strided_slice %193 {offsets = [0, 0], sizes = [48, 9], strides = [1, 1]} : vector<48x16xf32> to vector<48x9xf32>
    %241 = tpu.concatenate %239, %240 in 1 : vector<48x7xf32>, vector<48x9xf32> -> vector<48x16xf32>
    %242 = vector.extract_strided_slice %185 {offsets = [0, 7], sizes = [48, 1], strides = [1, 1]} : vector<48x12xf32> to vector<48x1xf32>
    %243 = vector.broadcast %242 : vector<48x1xf32> to vector<48x16xf32>
    %244 = arith.mulf %243, %241 : vector<48x16xf32>
    %245 = arith.addf %238, %244 : vector<48x16xf32>
    %246 = vector.extract_strided_slice %193 {offsets = [0, 10], sizes = [48, 6], strides = [1, 1]} : vector<48x16xf32> to vector<48x6xf32>
    %247 = vector.extract_strided_slice %193 {offsets = [0, 0], sizes = [48, 10], strides = [1, 1]} : vector<48x16xf32> to vector<48x10xf32>
    %248 = tpu.concatenate %246, %247 in 1 : vector<48x6xf32>, vector<48x10xf32> -> vector<48x16xf32>
    %249 = vector.extract_strided_slice %185 {offsets = [0, 8], sizes = [48, 1], strides = [1, 1]} : vector<48x12xf32> to vector<48x1xf32>
    %250 = vector.broadcast %249 : vector<48x1xf32> to vector<48x16xf32>
    %251 = arith.mulf %250, %248 : vector<48x16xf32>
    %252 = arith.addf %245, %251 : vector<48x16xf32>
    %253 = vector.extract_strided_slice %185 {offsets = [0, 10], sizes = [48, 1], strides = [1, 1]} : vector<48x12xf32> to vector<48x1xf32>
    %254 = vector.broadcast %253 : vector<48x1xf32> to vector<48x16xf32>
    %255 = arith.addf %252, %254 : vector<48x16xf32>
    %cst_49 = arith.constant 0.000000e+00 : f32
    %256 = vector.broadcast %cst_49 : f32 to vector<48x16xf32>
    %257 = arith.maximumf %255, %256 : vector<48x16xf32>
    %258 = arith.truncf %257 : vector<48x16xf32> to vector<48x16xbf16>
    %cst_50 = arith.constant dense<0.000000e+00> : vector<48x16xf32>
    %259 = tpu.matmul %181, %258, %cst_50 {dimension_numbers = #tpu.dot_dimension_numbers<[1], [0], [0], [1], [0, 0, 1, 1], [], []>} : vector<48x48xbf16>, vector<48x16xbf16>, vector<48x16xf32> -> vector<48x16xf32>
    %260 = vector.extract_strided_slice %185 {offsets = [0, 11], sizes = [48, 1], strides = [1, 1]} : vector<48x12xf32> to vector<48x1xf32>
    %261 = vector.broadcast %260 : vector<48x1xf32> to vector<48x16xf32>
    %262 = arith.addf %259, %261 : vector<48x16xf32>
    %cst_51 = arith.constant 0.000000e+00 : f32
    %263 = vector.broadcast %cst_51 : f32 to vector<48x16xf32>
    %264 = arith.maximumf %262, %263 : vector<48x16xf32>
    %265 = arith.truncf %264 : vector<48x16xf32> to vector<48x16xbf16>
    %cst_52 = arith.constant dense<0.000000e+00> : vector<48x16xf32>
    %266 = tpu.matmul %183, %265, %cst_52 {dimension_numbers = #tpu.dot_dimension_numbers<[1], [0], [0], [1], [0, 0, 1, 1], [], []>} : vector<48x48xbf16>, vector<48x16xbf16>, vector<48x16xf32> -> vector<48x16xf32>
    %267 = tpu.concatenate %88, %177, %266 in 1 : vector<48x256xf32>, vector<48x64xf32>, vector<48x16xf32> -> vector<48x336xf32>
    %268 = arith.truncf %267 : vector<48x336xf32> to vector<48x336xbf16>
    %c0_53 = arith.constant 0 : index
    %c0_54 = arith.constant 0 : index
    %c0_55 = arith.constant 0 : index
    %269 = vector.load %arg6[%c0_53, %c0_54, %c0_55] : memref<1x48x336xbf16, #tpu.memory_space<vmem>>, vector<1x48x336xbf16>
    %270 = vector.shape_cast %269 : vector<1x48x336xbf16> to vector<48x336xbf16>
    %271 = vector.shape_cast %268 : vector<48x336xbf16> to vector<1x48x336xbf16>
    tpu.vector_store %arg6[%c0_53, %c0_54, %c0_55], %271 {strides = array<i32>} : memref<1x48x336xbf16, #tpu.memory_space<vmem>>, vector<1x48x336xbf16>,
    return
  }
  func.func @transform_0(%arg0: i32) -> (i32, i32, i32) {
    %c0_i32 = arith.constant 0 : i32
    %c0_i32_0 = arith.constant 0 : i32
    %c0_i32_1 = arith.constant 0 : i32
    return %arg0, %c0_i32, %c0_i32_0 : i32, i32, i32
  }
  func.func @transform_1(%arg0: i32) -> (i32, i32, i32) {
    %c0_i32 = arith.constant 0 : i32
    %c0_i32_0 = arith.constant 0 : i32
    %c0_i32_1 = arith.constant 0 : i32
    return %arg0, %c0_i32, %c0_i32_0 : i32, i32, i32
  }
  func.func @transform_2(%arg0: i32) -> (i32, i32, i32) {
    %c0_i32 = arith.constant 0 : i32
    %c0_i32_0 = arith.constant 0 : i32
    %c0_i32_1 = arith.constant 0 : i32
    return %arg0, %c0_i32, %c0_i32_0 : i32, i32, i32
  }
  func.func @transform_3(%arg0: i32) -> (i32, i32, i32) {
    %c0_i32 = arith.constant 0 : i32
    %c0_i32_0 = arith.constant 0 : i32
    %c0_i32_1 = arith.constant 0 : i32
    %c0_i32_2 = arith.constant 0 : i32
    return %c0_i32, %c0_i32_0, %c0_i32_1 : i32, i32, i32
  }
  func.func @transform_4(%arg0: i32) -> (i32, i32, i32) {
    %c0_i32 = arith.constant 0 : i32
    %c0_i32_0 = arith.constant 0 : i32
    %c0_i32_1 = arith.constant 0 : i32
    %c0_i32_2 = arith.constant 0 : i32
    return %c0_i32, %c0_i32_0, %c0_i32_1 : i32, i32, i32
  }
  func.func @transform_5(%arg0: i32) -> (i32, i32, i32) {
    %c0_i32 = arith.constant 0 : i32
    %c0_i32_0 = arith.constant 0 : i32
    %c0_i32_1 = arith.constant 0 : i32
    return %arg0, %c0_i32, %c0_i32_0 : i32, i32, i32
  }
}

module attributes {stable_mosaic.version = 11 : i64} {
  func.func @_merge_kernel(%arg0: i32, %arg1: i32, %arg2: memref<1x48x1024xbf16, #tpu.memory_space<vmem>>, %arg3: memref<1x48x336xbf16, #tpu.memory_space<vmem>>, %arg4: memref<1x48x1xf32, #tpu.memory_space<vmem>>, %arg5: memref<336x1024xbf16, #tpu.memory_space<vmem>>, %arg6: memref<48x48xbf16, #tpu.memory_space<vmem>>, %arg7: memref<48x48xbf16, #tpu.memory_space<vmem>>, %arg8: memref<48x1xf32, #tpu.memory_space<vmem>>, %arg9: memref<1x48x1024xf32, #tpu.memory_space<vmem>>) attributes {dimension_semantics = [#tpu.dimension_semantics<parallel>, #tpu.dimension_semantics<parallel>], iteration_bounds = array<i64: 2, 1>, scalar_prefetch = 0 : i64, scratch_operands = 0 : i64, tpu.core_type = #tpu.core_type<tc>, window_params = [{transform_indices = @transform_0, window_bounds = array<i64: 1, 48, 1024>}, {transform_indices = @transform_1, window_bounds = array<i64: 1, 48, 336>}, {transform_indices = @transform_2, window_bounds = array<i64: 1, 48, 1>}, {transform_indices = @transform_3, window_bounds = array<i64: 336, 1024>}, {pipeline_mode = #tpu.pipeline_mode<synchronous>, transform_indices = @transform_4, window_bounds = array<i64: 48, 48>}, {pipeline_mode = #tpu.pipeline_mode<synchronous>, transform_indices = @transform_5, window_bounds = array<i64: 48, 48>}, {pipeline_mode = #tpu.pipeline_mode<synchronous>, transform_indices = @transform_6, window_bounds = array<i64: 48, 1>}, {transform_indices = @transform_7, window_bounds = array<i64: 1, 48, 1024>}]} {
    %c0 = arith.constant 0 : index
    %c0_0 = arith.constant 0 : index
    %c0_1 = arith.constant 0 : index
    %0 = vector.load %arg3[%c0, %c0_0, %c0_1] : memref<1x48x336xbf16, #tpu.memory_space<vmem>>, vector<1x48x336xbf16>
    %1 = vector.shape_cast %0 : vector<1x48x336xbf16> to vector<48x336xbf16>
    %c0_2 = arith.constant 0 : index
    %c0_3 = arith.constant 0 : index
    %2 = vector.load %arg5[%c0_2, %c0_3] : memref<336x1024xbf16, #tpu.memory_space<vmem>>, vector<336x1024xbf16>
    %cst = arith.constant dense<0.000000e+00> : vector<48x1024xf32>
    %3 = tpu.matmul %1, %2, %cst {dimension_numbers = #tpu.dot_dimension_numbers<[1], [0], [0], [1], [0, 0, 1, 1], [], []>} : vector<48x336xbf16>, vector<336x1024xbf16>, vector<48x1024xf32> -> vector<48x1024xf32>
    %c0_4 = arith.constant 0 : index
    %c0_5 = arith.constant 0 : index
    %c0_6 = arith.constant 0 : index
    %4 = vector.load %arg4[%c0_4, %c0_5, %c0_6] : memref<1x48x1xf32, #tpu.memory_space<vmem>>, vector<1x48x1xf32>
    %5 = vector.shape_cast %4 : vector<1x48x1xf32> to vector<48x1xf32>
    %6 = vector.broadcast %5 : vector<48x1xf32> to vector<48x1024xf32>
    %7 = arith.addf %3, %6 : vector<48x1024xf32>
    %cst_7 = arith.constant 0.000000e+00 : f32
    %8 = vector.broadcast %cst_7 : f32 to vector<48x1024xf32>
    %9 = arith.maximumf %7, %8 : vector<48x1024xf32>
    %c0_8 = arith.constant 0 : index
    %c0_9 = arith.constant 0 : index
    %10 = vector.load %arg6[%c0_8, %c0_9] : memref<48x48xbf16, #tpu.memory_space<vmem>>, vector<48x48xbf16>
    %11 = arith.truncf %9 : vector<48x1024xf32> to vector<48x1024xbf16>
    %cst_10 = arith.constant dense<0.000000e+00> : vector<48x1024xf32>
    %12 = tpu.matmul %10, %11, %cst_10 {dimension_numbers = #tpu.dot_dimension_numbers<[1], [0], [0], [1], [0, 0, 1, 1], [], []>} : vector<48x48xbf16>, vector<48x1024xbf16>, vector<48x1024xf32> -> vector<48x1024xf32>
    %c0_11 = arith.constant 0 : index
    %c0_12 = arith.constant 0 : index
    %13 = vector.load %arg7[%c0_11, %c0_12] : memref<48x48xbf16, #tpu.memory_space<vmem>>, vector<48x48xbf16>
    %c0_13 = arith.constant 0 : index
    %c0_14 = arith.constant 0 : index
    %c0_15 = arith.constant 0 : index
    %14 = vector.load %arg2[%c0_13, %c0_14, %c0_15] : memref<1x48x1024xbf16, #tpu.memory_space<vmem>>, vector<1x48x1024xbf16>
    %15 = vector.shape_cast %14 : vector<1x48x1024xbf16> to vector<48x1024xbf16>
    %cst_16 = arith.constant dense<0.000000e+00> : vector<48x1024xf32>
    %16 = tpu.matmul %13, %15, %cst_16 {dimension_numbers = #tpu.dot_dimension_numbers<[1], [0], [0], [1], [0, 0, 1, 1], [], []>} : vector<48x48xbf16>, vector<48x1024xbf16>, vector<48x1024xf32> -> vector<48x1024xf32>
    %17 = arith.addf %12, %16 : vector<48x1024xf32>
    %c0_17 = arith.constant 0 : index
    %c0_18 = arith.constant 0 : index
    %18 = vector.load %arg8[%c0_17, %c0_18] : memref<48x1xf32, #tpu.memory_space<vmem>>, vector<48x1xf32>
    %19 = vector.broadcast %18 : vector<48x1xf32> to vector<48x1024xf32>
    %20 = arith.addf %17, %19 : vector<48x1024xf32>
    %cst_19 = arith.constant 0.000000e+00 : f32
    %21 = vector.broadcast %cst_19 : f32 to vector<48x1024xf32>
    %22 = arith.maximumf %20, %21 : vector<48x1024xf32>
    %c0_20 = arith.constant 0 : index
    %c0_21 = arith.constant 0 : index
    %c0_22 = arith.constant 0 : index
    %23 = vector.load %arg9[%c0_20, %c0_21, %c0_22] : memref<1x48x1024xf32, #tpu.memory_space<vmem>>, vector<1x48x1024xf32>
    %24 = vector.shape_cast %23 : vector<1x48x1024xf32> to vector<48x1024xf32>
    %25 = vector.shape_cast %22 : vector<48x1024xf32> to vector<1x48x1024xf32>
    tpu.vector_store %arg9[%c0_20, %c0_21, %c0_22], %25 {strides = array<i32>} : memref<1x48x1024xf32, #tpu.memory_space<vmem>>, vector<1x48x1024xf32>,
    return
  }
  func.func @transform_0(%arg0: i32, %arg1: i32) -> (i32, i32, i32) {
    %c0_i32 = arith.constant 0 : i32
    %c0_i32_0 = arith.constant 0 : i32
    return %arg0, %c0_i32, %arg1 : i32, i32, i32
  }
  func.func @transform_1(%arg0: i32, %arg1: i32) -> (i32, i32, i32) {
    %c0_i32 = arith.constant 0 : i32
    %c0_i32_0 = arith.constant 0 : i32
    %c0_i32_1 = arith.constant 0 : i32
    return %arg0, %c0_i32, %c0_i32_0 : i32, i32, i32
  }
  func.func @transform_2(%arg0: i32, %arg1: i32) -> (i32, i32, i32) {
    %c0_i32 = arith.constant 0 : i32
    %c0_i32_0 = arith.constant 0 : i32
    %c0_i32_1 = arith.constant 0 : i32
    return %arg0, %c0_i32, %c0_i32_0 : i32, i32, i32
  }
  func.func @transform_3(%arg0: i32, %arg1: i32) -> (i32, i32) {
    %c0_i32 = arith.constant 0 : i32
    %c0_i32_0 = arith.constant 0 : i32
    return %c0_i32, %arg1 : i32, i32
  }
  func.func @transform_4(%arg0: i32, %arg1: i32) -> (i32, i32) {
    %c0_i32 = arith.constant 0 : i32
    %c0_i32_0 = arith.constant 0 : i32
    %c0_i32_1 = arith.constant 0 : i32
    return %c0_i32, %c0_i32_0 : i32, i32
  }
  func.func @transform_5(%arg0: i32, %arg1: i32) -> (i32, i32) {
    %c0_i32 = arith.constant 0 : i32
    %c0_i32_0 = arith.constant 0 : i32
    %c0_i32_1 = arith.constant 0 : i32
    return %c0_i32, %c0_i32_0 : i32, i32
  }
  func.func @transform_6(%arg0: i32, %arg1: i32) -> (i32, i32) {
    %c0_i32 = arith.constant 0 : i32
    %c0_i32_0 = arith.constant 0 : i32
    %c0_i32_1 = arith.constant 0 : i32
    return %c0_i32, %c0_i32_0 : i32, i32
  }
  func.func @transform_7(%arg0: i32, %arg1: i32) -> (i32, i32, i32) {
    %c0_i32 = arith.constant 0 : i32
    %c0_i32_0 = arith.constant 0 : i32
    return %arg0, %c0_i32, %arg1 : i32, i32, i32
  }
}

</mosaic_0001>

<bundles_post_ra>
// kernel: rpp_forward.2
= control target key start
LH: loop header
LB: loop body
LE: loop exit
PB: predicated region body
PF: predicated region fallthrough
CT: control target
= control target key end

     0   :  { %s4569_s18 = smov 0   ;;  %s7447_s0 = inlined_call_operand.vmem [shape: bf16[2,48,256], index: 0, kind: input, shape index: {}]   ;;  %s7448_s1 = inlined_call_operand.vmem [shape: bf16[2,48,64], index: 1, kind: input, shape index: {}]   ;;  %s7449_s2 = inlined_call_operand.vmem [shape: bf16[2,48,16], index: 2, kind: input, shape index: {}]   ;;  %s7450_s3 = inlined_call_operand.vmem [shape: bf16[9,48,48], index: 3, kind: input, shape index: {}]   ;;  %s7451_s4 = inlined_call_operand.vmem [shape: f32[3,48,12], index: 4, kind: input, shape index: {}]   ;;  %s7452_s5 = inlined_call_operand.vmem [shape: bf16[2,48,336], index: 5, kind: output, shape index: {}]  }
   0x1 LB: > { %s3924_s19 = sadd.s32 4294967295, %s4492_s18   ;;  %p3928_p0 = scmp.ge.s32.totalorder %s4492_s18, 1  ;;  %s4492_s18 = sphi %s4569_s18, %s15_s18  }
   0x2   : > { %p207_p1 = scmp.lt.s32.totalorder %s4492_s18, 3 }
   0x4   : > { %p208_p2 = pnand %p3928_p0, %p207_p1 }
   0x6   : > { %211 = sbr.rel (%p208_p2) target bundleno = 2372 (0x944), region = 40 }
   0xb   : > { %p245_p3 = scmp.lt.s32.totalorder %s3924_s19, 1  ;;  %v7463_v0 = vmov 0   ;;  %v4584_v1 = vld [vmem:[%s7451_s4 + $0x10] sm:$0xff]  ;;  %v7465_v2 = vmov 9   ;;  %v4592_v3 = vld [vmem:[%s7451_s4] sm:$0xff]  ;;  %v4602_v5 = vld [vmem:[%s7451_s4 + $0x18] sm:$0xff] }
   0xc   : > { %415 = vmatprep.mubr.bf16.mxu0 %v7463_v0  ;;  %435 = vmatprep.mubr.bf16.mxu1 %v7463_v0  ;;  %v4607_v8 = vld [vmem:[%s7451_s4 + $0x8] sm:$0xff]  ;;  %vm373_vm0 = vcmask 392192   ;;  %v4617_v12 = vld [vmem:[%s7451_s4 + $0x20] sm:$0xff]  ;;  %v4436_v15 = vld [vmem:[%s7450_s3 + $0x10] sm:$0xff]   ;;  %v7461_v17 = vmov 1   ;;  %v7459_v18 = vmov 2  }
   0xd   : > { %s7950_s19 = smov (!%p245_p3, %s3924_s19), 1  ;;  %4292 = vset.pattern.permute.xlu1 %v7465_v2  ;;  %4291 = vset.pattern.permute.xlu0 %v7465_v2  ;;  %v4612_v11 = vld [vmem:[%s7451_s4 + $0x28] sm:$0xff]  ;;  %v4435_v14 = vld [vmem:[%s7450_s3] sm:$0xff]   ;;  %v7457_v19 = vmov 3   ;;  %v7455_v20 = vmov 4   ;;  %v7453_v21 = vmov 5  }
   0xe   : > { %s4235_s22 = smul.u32 48, %s7950_s19  ;;  %310 = vperm.xlu1 %4292, %v4584_v1   ;;  %300 = vperm.xlu0 %4291, %v4592_v3   ;;  %v4437_v16 = vld [vmem:[%s7450_s3 + $0x8] sm:$0xff]   ;;  %v7469_v22 = vmov 6   ;;  %v7471_v23 = vmov 7   ;;  %v7467_v24 = vmov 8   ;;  %s4504_s17 = smov 126  }
   0xf   : > { %s4505_s20 = smov 127   ;;  %s4506_s21 = smov 112   ;;  %vm530_vm1 = vcmask 1039360   ;;  %vm633_vm2 = vcmask 1031168   ;;  %vm736_vm3 = vcmask 916480   ;;  %vm839_vm4 = vcmask 908288  }
  0x10   : > { %s249_s27 = scalar_lea.vmem %s7447_s0, %s4235_s22  ;;  %s4507_s22 = smov 111   ;;  %vm942_vm5 = vcmask 900096   ;;  %vm1045_vm6 = vcmask 785408   ;;  %vm1148_vm7 = vcmask 777216   ;;  %vm1251_vm8 = vcmask 769024  }
  0x11   : > { %v4426_v4 = vld [vmem:[%s249_s27 + $0x24] ss:$8 sps:$4 sm:$0xff]   ;;  %v4428_v6 = vld [vmem:[%s249_s27 + $0x20] ss:$8 sps:$4 sm:$0xff]   ;;  %v4429_v7 = vld [vmem:[%s249_s27 + $0x14] ss:$8 sps:$4 sm:$0xff]  }
  0x12   : > { %393 = vmatprep.subr.bf16.mxu0 %v4426_v4  ;;  %4229 = vmatprep.subr.bf16.mxu1 %v4426_v4  ;;  %v4431_v9 = vld [vmem:[%s249_s27 + $0x10] ss:$8 sps:$4 sm:$0xff]   ;;  %v4432_v10 = vld [vmem:[%s249_s27 + $0x4] ss:$8 sps:$4 sm:$0xff]   ;;  %v4434_v13 = vld [vmem:[%s249_s27] ss:$8 sps:$4 sm:$0xff]  }
  0x13   : > { %394 = vmatpush1.bf16.msra.mxu0 %v4428_v6  ;;  %4232 = vmatpush1.bf16.msra.mxu1 %v4428_v6  ;;  %s4508_s23 = smov 110   ;;  %s4509_s24 = smov 96   ;;  %vm4515_vm9 = vmmov 0   ;;  %vm1841_vm10 = vcmask 515072   ;;  %vm1920_vm11 = vcmask 506880   ;;  %vm1999_vm12 = vcmask 457728  }
  0x14   : > { %395 = vmatprep.subr.bf16.mxu0 %v4429_v7  ;;  %4230 = vmatprep.subr.bf16.mxu1 %v4429_v7  ;;  %s4510_s25 = smov 95   ;;  %s4511_s26 = smov 94   ;;  %vm2078_vm13 = vcmask 449536   ;;  %vm2157_vm14 = vcmask 441344   ;;  %vm2314_vm15 = vcmask 384000  }
  0x15   : > { %315 = vperm.xlu1 %4292, %v4602_v5   ;;  %305 = vperm.xlu0 %4291, %v4607_v8   ;;  %s4236_s27 = smul.u32 24, %s7950_s19  ;;  %s4516_s9 = smov 63  }
  0x16   : > { %s4517_s10 = smov 62   ;;  %s4518_s11 = smov 120  }
  0x17   : > { %396 = vmatpush1.bf16.msra.mxu0 %v4431_v9  ;;  %4233 = vmatpush1.bf16.msra.mxu1 %v4431_v9  ;;  %s5189_s30 = scalar_lea.vmem %s7448_s1, %s4236_s27  ;;  %s4519_s12 = smov 56  }
  0x18   : > { %397 = vmatprep.subr.bf16.mxu0 %v4432_v10  ;;  %4231 = vmatprep.subr.bf16.mxu1 %v4432_v10  ;;  %s4520_s13 = smov 119   ;;  %s4521_s14 = smov 55  }
  0x19   : > { %325 = vperm.xlu1 %4292, %v4612_v11   ;;  %320 = vperm.xlu0 %4291, %v4617_v12   ;;  %s4522_s15 = smov 118   ;;  %s4523_s16 = smov 54  }
  0x1a   : > { %s4526_s6 = smov 46   ;;  %s4527_s28 = smov 15  }
  0x1b   : > { %398 = vmatpush1.bf16.msra.mxu0 %v4434_v13  ;;  %4234 = vmatpush1.bf16.msra.mxu1 %v4434_v13  ;;  %s4528_s29 = smov 14   ;;  %s4532_s7 = smov 11  }
  0x1c   : > { %s4536_s8 = smov 7  }
  0x1d   : > { %4294 = vset.pattern.permute.xlu1 %v7463_v0  ;;  %4293 = vset.pattern.permute.xlu0 %v7463_v0 }
  0x1e   : > { %3954 = vmatmul.mubr.msk.bf16.vlgmr.msra.gmra.mxu0 %vm373_vm0, %v4435_v14  ;;  %3956 = vmatmul.mubr.msk.bf16.vlgmr.msra.gmra.mxu1 %vm373_vm0, %v4436_v15 }
  0x1f   : > { %425 = vmatprep.mubr.bf16.mxu0 %v7463_v0  ;;  %463 = vperm.xlu1 %4294, %v4607_v8  }
  0x20   : > { %459 = vperm.xlu0 %4293, %v4592_v3   ;;  %1464 = vmatprep.mubr.bf16.mxu1 %v7463_v0 }
  0x23   : > { %467 = vperm.xlu1 %4294, %v4584_v1  }
  0x24   : > { %471 = vperm.xlu0 %4293, %v4602_v5  }
  0x26   : > { %3955 = vmatmul.mubr.msk.bf16.gmra.mxu0 %vm373_vm0, %v4437_v16 }
  0x27   : > { %475 = vperm.xlu1 %4294, %v4617_v12   ;;  %1569 = vmatprep.mubr.bf16.mxu0 %v7463_v0 }
  0x28   : > { %479 = vperm.xlu0 %4293, %v4612_v11  }
  0x2b   : > { %4295 = vset.pattern.permute.xlu1 %v7461_v17 }
  0x2c   : > { %562 = vperm.xlu1 %4295, %v4592_v3   ;;  %4296 = vset.pattern.permute.xlu0 %v7461_v17 }
  0x2d   : > { %566 = vperm.xlu0 %4296, %v4607_v8  }
  0x30   : > { %570 = vperm.xlu1 %4295, %v4584_v1  }
  0x31   : > { %578 = vperm.xlu0 %4296, %v4617_v12  }
  0x34   : > { %574 = vperm.xlu1 %4295, %v4602_v5  }
  0x35   : > { %4297 = vset.pattern.permute.xlu0 %v7459_v18 }
  0x36   : > { %665 = vperm.xlu0 %4297, %v4592_v3  }
  0x38   : > { %582 = vperm.xlu1 %4295, %v4612_v11  }
  0x3a   : > { %677 = vperm.xlu0 %4297, %v4602_v5  }
  0x3c   : > { %4298 = vset.pattern.permute.xlu1 %v7459_v18 }
  0x3d   : > { %669 = vperm.xlu1 %4298, %v4607_v8  }
  0x3e   : > { %685 = vperm.xlu0 %4297, %v4612_v11  }
  0x41   : > { %673 = vperm.xlu1 %4298, %v4584_v1  }
  0x42   : > { %4300 = vset.pattern.permute.xlu0 %v7457_v19 }
  0x43   : > { %772 = vperm.xlu0 %4300, %v4607_v8  }
  0x45   : > { %681 = vperm.xlu1 %4298, %v4617_v12  }
  0x47   : > { %784 = vperm.xlu0 %4300, %v4617_v12  }
  0x49   : > { %4299 = vset.pattern.permute.xlu1 %v7457_v19 }
  0x4a   : > { %768 = vperm.xlu1 %4299, %v4592_v3  }
  0x4b   : > { %4301 = vset.pattern.permute.xlu0 %v7455_v20 }
  0x4c   : > { %887 = vperm.xlu0 %4301, %v4617_v12  }
  0x4e   : > { %776 = vperm.xlu1 %4299, %v4584_v1  }
  0x50   : > { %879 = vperm.xlu0 %4301, %v4584_v1  }
  0x52   : > { %780 = vperm.xlu1 %4299, %v4602_v5  }
  0x54   : > { %871 = vperm.xlu0 %4301, %v4592_v3  }
  0x56   : > { %788 = vperm.xlu1 %4299, %v4612_v11  }
  0x58   : > { %4308 = vset.pattern.permute.xlu0 %v7453_v21 }
  0x59   : > { %994 = vperm.xlu0 %4308, %v4612_v11  }
  0x5a   : > { %4302 = vset.pattern.permute.xlu1 %v7455_v20 }
  0x5b   : > { %891 = vperm.xlu1 %4302, %v4612_v11  }
  0x5d   : > { %982 = vperm.xlu0 %4308, %v4584_v1  }
  0x5f   : > { %4303 = vset.pattern.permute.xlu1 %v7453_v21 }
  0x60   : > { %990 = vperm.xlu1 %4303, %v4617_v12  }
  0x61   : > { %974 = vperm.xlu0 %4308, %v4592_v3  }
  0x64   : > { %4304 = vset.pattern.permute.xlu1 %v7455_v20 }
  0x65   : > { %883 = vperm.xlu1 %4304, %v4602_v5   ;;  %4312 = vset.pattern.permute.xlu0 %v7469_v22 }
  0x66   : > { %1097 = vperm.xlu0 %4312, %v4612_v11  }
  0x69   : > { %4305 = vset.pattern.permute.xlu1 %v7469_v22 }
  0x6a   : > { %1093 = vperm.xlu1 %4305, %v4617_v12   ;;  %1089 = vperm.xlu0 %4312, %v4602_v5  }
  0x6e   : > { %4306 = vset.pattern.permute.xlu1 %v7453_v21 }
  0x6f   : > { %986 = vperm.xlu1 %4306, %v4602_v5  }
  0x73   : > { %4307 = vset.pattern.permute.xlu1 %v7471_v23 }
  0x74   : > { %1196 = vperm.xlu1 %4307, %v4617_v12  }
  0x78   : > { %4309 = vset.pattern.permute.xlu1 %v7455_v20 }
  0x79   : > { %875 = vperm.xlu1 %4309, %v4607_v8  }
  0x7d   : > { %4310 = vset.pattern.permute.xlu1 %v7469_v22 }
  0x7e   : > { %1085 = vperm.xlu1 %4310, %v4584_v1  }
  0x82   : > { %4311 = vset.pattern.permute.xlu1 %v7467_v24 }
  0x83   : > { %1299 = vperm.xlu1 %4311, %v4617_v12  }
  0x87   : > { %1303 = vperm.xlu1 %4311, %v4612_v11  }
  0x89   : > { %v4703_v25 = vpop.permute.xlu1 %310  ;;  %v301_v31 = vpop.permute.xlu0 %300 }
  0x8b   : > { %4313 = vset.pattern.permute.xlu1 %v7453_v21 }
  0x8c   : > { %978 = vperm.xlu1 %4313, %v4607_v8  }
  0x90   : > { %4314 = vset.pattern.permute.xlu1 %v7471_v23  ;;  %v4705_v26 = vpop.permute.xlu1 %315  ;;  %v306_v33 = vpop.permute.xlu0 %305 }
  0x94   : > { %v4707_v27 = vpop.permute.xlu1 %325  ;;  %v321_v38 = vpop.permute.xlu0 %320 }
  0x9a   : > { %v4709_v28 = vpop.permute.xlu1 %463 }
  0x9b   : > { %7573 = vst [vmem:[#allocation2_spill] sm:$0xff] %v4709_v28  ;;  %v4737_v49 = vpop.permute.xlu0 %459 }
  0x9c   : > { %7578 = vst [vmem:[#allocation7_spill] sm:$0xff] %v4737_v49 }
  0x9e   : > { %v4711_v29 = vpop.permute.xlu1 %467 }
  0x9f   : > { %7574 = vst [vmem:[#allocation3_spill] sm:$0xff] %v4711_v29  ;;  %v4751_v52 = vpop.permute.xlu0 %471  ;;  %v7614_v29 = vmov 8  }
  0xa0   : > { %7580 = vst [vmem:[#allocation9_spill] sm:$0xff] %v4751_v52 }
  0xa2   : > { %v4713_v30 = vpop.permute.xlu1 %475 }
  0xa3   : > { %v4759_v55 = vpop.permute.xlu0 %479 }
  0xa7   : > { %v4715_v32 = vpop.permute.xlu1 %562 }
  0xa8   : > { %7575 = vst [vmem:[#allocation4_spill] sm:$0xff] %v4715_v32  ;;  %v4771_v59 = vpop.permute.xlu0 %566  ;;  %v7507_v32 = vmov 10  }
  0xa9   : > { %7582 = vst [vmem:[#allocation11_spill] sm:$0xff] %v4771_v59 }
  0xab   : > { %v4717_v34 = vpop.permute.xlu1 %570 }
  0xac   : > { %7576 = vst [vmem:[#allocation5_spill] sm:$0xff] %v4717_v34  ;;  %v4784_v4 = vpop.permute.xlu0 %578 }
  0xaf   : > { %v4721_v41 = vpop.permute.xlu1 %574 }
  0xb0   : > { %7577 = vst [vmem:[#allocation6_spill] sm:$0xff] %v4721_v41 }
  0xb1   : > { %v4796_v9 = vpop.permute.xlu0 %665 }
  0xb2   : > { %7585 = vst [vmem:[#allocation14_spill] sm:$0xff] %v4796_v9 }
  0xb3   : > { %v4733_v46 = vpop.permute.xlu1 %582 }
  0xb8   : > { %v4743_v50 = vpop.permute.xlu1 %669 }
  0xb9   : > { %7579 = vst [vmem:[#allocation8_spill] sm:$0xff] %v4743_v50 }
  0xbc   : > { %v4753_v53 = vpop.permute.xlu1 %673 }
  0xbd   : > { %7581 = vst [vmem:[#allocation10_spill] sm:$0xff] %v4753_v53 }
  0xc0   : > { %v4765_v56 = vpop.permute.xlu1 %681 }
  0xc5   : > { %v4776_v62 = vpop.permute.xlu1 %768 }
  0xc6   : > { %7583 = vst [vmem:[#allocation12_spill] sm:$0xff] %v4776_v62 }
  0xc9   : > { %v4790_v6 = vpop.permute.xlu1 %776 }
  0xca   : > { %7584 = vst [vmem:[#allocation13_spill] sm:$0xff] %v4790_v6 }
  0xcd   : > { %v4798_v13 = vpop.permute.xlu1 %780 }
  0xce   : > { %7586 = vst [vmem:[#allocation15_spill] sm:$0xff] %v4798_v13 }
  0xde   : > { %v417_v35 = vpop.f32.mrf.mxu0  ;;  %v437_v36 = vpop.f32.mrf.mxu1 }
  0xdf   : > { %v418_v37 = vadd.f32 %v417_v35, %v301_v31  ;;  %v438_v40 = vadd.f32 %v437_v36, %v321_v38 }
  0xe0   : > { %v419_v42 = vpop.f32.mrf.mxu0  ;;  %v439_v45 = vpop.f32.mrf.mxu1 }
  0xe1   : > { %v4719_v39 = vmax.f32 %v418_v37, 0.0  ;;  %v4727_v43 = vmax.f32 %v438_v40, 0.0  ;;  %v420_v44 = vadd.f32 %v419_v42, %v301_v31  ;;  %v440_v48 = vadd.f32 %v439_v45, %v321_v38  ;;  %v4807_v31 = vpop.permute.xlu0 %677 }
  0xe2   : > { %v421_v54 = vpop.f32.mrf.mxu0  ;;  %v441_v58 = vpop.f32.mrf.mxu1  ;;  %7588 = vst [vmem:[#allocation17_spill] sm:$0xff] %v4807_v31 }
  0xe3   : > { %609 = vrot.lane.b32.xlu0 %v4719_v39, %s4504_s17  ;;  %506 = vrot.lane.b32.xlu1 %v4719_v39, %s4505_s20  ;;  %v4735_v47 = vmax.f32 %v420_v44, 0.0  ;;  %v4745_v51 = vmax.f32 %v440_v48, 0.0  ;;  %v422_v57 = vadd.f32 %v421_v54, %v306_v33  ;;  %v442_v61 = vadd.f32 %v441_v58, %v4707_v27 }
  0xe4   : > { %v423_v7 = vpop.f32.mrf.mxu0  ;;  %v443_v14 = vpop.f32.mrf.mxu1 }
  0xe5   : > { %v4773_v60 = vmax.f32 %v422_v57, 0.0  ;;  %v4782_v63 = vmax.f32 %v442_v61, 0.0  ;;  %v424_v10 = vadd.f32 %v423_v7, %v306_v33  ;;  %v444_v16 = vadd.f32 %v443_v14, %v4707_v27  ;;  %v4813_v33 = vpop.permute.xlu1 %788  ;;  %v4823_v27 = vpop.permute.xlu0 %685 }
  0xe6   : > { %v427_v40 = vpop.f32.mrf.mxu0 }
  0xe7   : > { %625 = vrot.lane.b32.xlu0 %v4727_v43, %s4504_s17  ;;  %522 = vrot.lane.b32.xlu1 %v4727_v43, %s4505_s20  ;;  %v4804_v15 = vmax.f32 %v424_v10, 0.0  ;;  %v4815_v35 = vmax.f32 %v444_v16, 0.0  ;;  %v428_v42 = vadd.f32 %v427_v40, %v4703_v25 }
  0xe8   : > { %v429_v54 = vpop.f32.mrf.mxu0 }
  0xe9   : > { %7587 = vst [vmem:[#allocation16_spill] sm:$0xff] %v4804_v15  ;;  %v4821_v36 = vpop.permute.xlu1 %891  ;;  %v4831_v38 = vpop.permute.xlu0 %772  ;;  %v4846_v48 = vmax.f32 %v428_v42, 0.0  ;;  %v430_v57 = vadd.f32 %v429_v54, %v4703_v25 }
  0xea   : > { %7589 = vst [vmem:[#allocation18_spill] sm:$0xff] %v4831_v38  ;;  %v431_v10 = vpop.f32.mrf.mxu0  ;;  %v7607_v38 = vmov 7  }
  0xeb   : > { %508 = vrot.lane.b32.xlu0 %v4735_v47, %s4505_s20  ;;  %712 = vrot.lane.b32.xlu1 %v4719_v39, %s4506_s21  ;;  %7591 = vst [vmem:[#allocation20_spill] sm:$0xff] %v4846_v48  ;;  %v4861_v7 = vmax.f32 %v430_v57, 0.0  ;;  %v432_v16 = vadd.f32 %v431_v10, %v4705_v26 }
  0xec   : > { %v433_v57 = vpop.f32.mrf.mxu0 }
  0xed   : > { %v4829_v37 = vpop.permute.xlu1 %990  ;;  %v4844_v45 = vpop.permute.xlu0 %784  ;;  %7592 = vst [vmem:[#allocation21_spill] sm:$0xff] %v4861_v7  ;;  %v4876_v40 = vmax.f32 %v432_v16, 0.0  ;;  %v434_v21 = vadd.f32 %v433_v57, %v4705_v26 }
  0xef   : > { %524 = vrot.lane.b32.xlu0 %v4745_v51, %s4505_s20  ;;  %728 = vrot.lane.b32.xlu1 %v4727_v43, %s4506_s21  ;;  %7595 = vst [vmem:[#allocation24_spill] sm:$0xff] %v4876_v40  ;;  %v4899_v20 = vmax.f32 %v434_v21, 0.0 }
  0xf1   : > { %v4842_v44 = vpop.permute.xlu1 %883  ;;  %v4855_v61 = vpop.permute.xlu0 %887  ;;  %7598 = vst [vmem:[#allocation27_spill] sm:$0xff] %v4899_v20 }
  0xf2   : > { %7590 = vst [vmem:[#allocation19_spill] sm:$0xff] %v4842_v44 }
  0xf3   : > { %714 = vrot.lane.b32.xlu0 %v4735_v47, %s4506_s21  ;;  %831 = vrot.lane.b32.xlu1 %v4727_v43, %s4507_s22 }
  0xf5   : > { %v4853_v58 = vpop.permute.xlu1 %1093  ;;  %v4869_v14 = vpop.permute.xlu0 %879 }
  0xf6   : > { %7594 = vst [vmem:[#allocation23_spill] sm:$0xff] %v4869_v14 }
  0xf7   : > { %730 = vrot.lane.b32.xlu0 %v4745_v51, %s4506_s21  ;;  %934 = vrot.lane.b32.xlu1 %v4727_v43, %s4508_s23 }
  0xf9   : > { %v4867_v25 = vpop.permute.xlu1 %986  ;;  %v4880_v54 = vpop.permute.xlu0 %871 }
  0xfa   : > { %7593 = vst [vmem:[#allocation22_spill] sm:$0xff] %v4867_v25  ;;  %7596 = vst [vmem:[#allocation25_spill] sm:$0xff] %v4880_v54 }
  0xfb   : > { %1039 = vrot.lane.b32.xlu0 %v4745_v51, %s4509_s24  ;;  %1037 = vrot.lane.b32.xlu1 %v4727_v43, %s4509_s24 }
  0xfd   : > { %v4878_v42 = vpop.permute.xlu1 %1196  ;;  %v4892_v16 = vpop.permute.xlu0 %994 }
  0xff   : > { %613 = vrot.lane.b32.xlu0 %v4773_v60, %s4504_s17  ;;  %611 = vrot.lane.b32.xlu1 %v4735_v47, %s4504_s17 }
 0x101   : > { %v4890_v10 = vpop.permute.xlu1 %875  ;;  %v4903_v18 = vpop.permute.xlu0 %982 }
 0x102   : > { %7597 = vst [vmem:[#allocation26_spill] sm:$0xff] %v4890_v10  ;;  %7600 = vst [vmem:[#allocation29_spill] sm:$0xff] %v4903_v18  ;;  %v7609_v18 = vmov 6  }
 0x103   : > { %629 = vrot.lane.b32.xlu0 %v4782_v63, %s4504_s17  ;;  %627 = vrot.lane.b32.xlu1 %v4745_v51, %s4504_s17 }
 0x105   : > { %v4901_v19 = vpop.permute.xlu1 %1085  ;;  %v4915_v21 = vpop.permute.xlu0 %974 }
 0x106   : > { %7599 = vst [vmem:[#allocation28_spill] sm:$0xff] %v4901_v19  ;;  %7601 = vst [vmem:[#allocation30_spill] sm:$0xff] %v4915_v21 }
 0x107   : > { %835 = vrot.lane.b32.xlu0 %v4782_v63, %s4507_s22  ;;  %833 = vrot.lane.b32.xlu1 %v4745_v51, %s4507_s22 }
 0x109   : > { %v4913_v26 = vpop.permute.xlu1 %1299  ;;  %v4923_v17 = vpop.permute.xlu0 %1097 }
 0x10b   : > { %938 = vrot.lane.b32.xlu0 %v4782_v63, %s4508_s23  ;;  %936 = vrot.lane.b32.xlu1 %v4745_v51, %s4508_s23 }
 0x10d   : > { %v4921_v57 = vpop.permute.xlu1 %1303  ;;  %v4935_v2 = vpop.permute.xlu0 %1089 }
 0x10e   : > { %7603 = vst [vmem:[#allocation32_spill] sm:$0xff] %v4935_v2 }
 0x10f   : > { %512 = vrot.lane.b32.xlu0 %v4804_v15, %s4505_s20  ;;  %510 = vrot.lane.b32.xlu1 %v4773_v60, %s4505_s20 }
 0x111   : > { %v4933_v0 = vpop.permute.xlu1 %978 }
 0x112   : > { %7602 = vst [vmem:[#allocation31_spill] sm:$0xff] %v4933_v0 }
 0x113   : > { %528 = vrot.lane.b32.xlu0 %v4815_v35, %s4505_s20  ;;  %526 = vrot.lane.b32.xlu1 %v4782_v63, %s4505_s20 }
 0x117   : > { %718 = vrot.lane.b32.xlu0 %v4804_v15, %s4506_s21  ;;  %716 = vrot.lane.b32.xlu1 %v4773_v60, %s4506_s21 }
 0x11b   : > { %734 = vrot.lane.b32.xlu0 %v4815_v35, %s4506_s21  ;;  %732 = vrot.lane.b32.xlu1 %v4782_v63, %s4506_s21 }
 0x11f   : > { %1043 = vrot.lane.b32.xlu0 %v4815_v35, %s4509_s24  ;;  %1041 = vrot.lane.b32.xlu1 %v4782_v63, %s4509_s24 }
 0x123   : > { %617 = vrot.lane.b32.xlu0 %v4846_v48, %s4504_s17  ;;  %615 = vrot.lane.b32.xlu1 %v4804_v15, %s4504_s17 }
 0x127   : > { %926 = vrot.lane.b32.xlu0 %v4846_v48, %s4508_s23  ;;  %631 = vrot.lane.b32.xlu1 %v4815_v35, %s4504_s17 }
 0x12b   : > { %516 = vrot.lane.b32.xlu0 %v4861_v7, %s4505_s20  ;;  %837 = vrot.lane.b32.xlu1 %v4815_v35, %s4507_s22 }
 0x12f   : > { %722 = vrot.lane.b32.xlu0 %v4861_v7, %s4506_s21  ;;  %940 = vrot.lane.b32.xlu1 %v4815_v35, %s4508_s23 }
 0x133   : > { %621 = vrot.lane.b32.xlu0 %v4876_v40, %s4504_s17  ;;  %514 = vrot.lane.b32.xlu1 %v4846_v48, %s4505_s20 }
 0x137   : > { %827 = vrot.lane.b32.xlu0 %v4876_v40, %s4507_s22  ;;  %720 = vrot.lane.b32.xlu1 %v4846_v48, %s4506_s21 }
 0x13b   : > { %930 = vrot.lane.b32.xlu0 %v4876_v40, %s4508_s23  ;;  %823 = vrot.lane.b32.xlu1 %v4846_v48, %s4507_s22 }
 0x13f   : > { %520 = vrot.lane.b32.xlu0 %v4899_v20, %s4505_s20  ;;  %619 = vrot.lane.b32.xlu1 %v4861_v7, %s4504_s17 }
 0x143   : > { %726 = vrot.lane.b32.xlu0 %v4899_v20, %s4506_s21  ;;  %825 = vrot.lane.b32.xlu1 %v4861_v7, %s4507_s22 }
 0x147   : > { %1142 = vrot.lane.b32.xlu0 %v4745_v51, %s4510_s25  ;;  %928 = vrot.lane.b32.xlu1 %v4861_v7, %s4508_s23 }
 0x14b   : > { %1146 = vrot.lane.b32.xlu0 %v4815_v35, %s4510_s25  ;;  %518 = vrot.lane.b32.xlu1 %v4876_v40, %s4505_s20 }
 0x14f   : > { %819 = vrot.lane.b32.xlu0 %v4773_v60, %s4507_s22  ;;  %724 = vrot.lane.b32.xlu1 %v4876_v40, %s4506_s21 }
 0x153   : > { %1029 = vrot.lane.b32.xlu0 %v4846_v48, %s4509_s24  ;;  %623 = vrot.lane.b32.xlu1 %v4899_v20, %s4504_s17 }
 0x155   : > { %v4941_v24 = vpop.permute.xlu0 %609  ;;  %v4943_v22 = vpop.permute.xlu1 %506 }
 0x156   : > { %7604 = vst [vmem:[#allocation33_spill] sm:$0xff] %v4941_v24 }
 0x157   : > { %1033 = vrot.lane.b32.xlu0 %v4876_v40, %s4509_s24  ;;  %829 = vrot.lane.b32.xlu1 %v4899_v20, %s4507_s22 }
 0x159   : > { %v4949_v23 = vpop.permute.xlu0 %625  ;;  %v4951_v0 = vpop.permute.xlu1 %522 }
 0x15b   : > { %1077 = vperm.xlu0 %4312, %v4592_v3   ;;  %932 = vrot.lane.b32.xlu1 %v4899_v20, %s4508_s23 }
 0x15d   : > { %v4956_v21 = vpop.permute.xlu0 %508  ;;  %v4958_v10 = vpop.permute.xlu1 %712 }
 0x15e   : > { %7605 = vst [vmem:[#allocation34_spill] sm:$0xff] %v4956_v21  ;;  %7606 = vst [vmem:[#allocation35_spill] sm:$0xff] %v4958_v10 }
 0x15f   : > { %4315 = vset.pattern.permute.xlu0 %v7607_v38  ;;  %1140 = vrot.lane.b32.xlu1 %v4727_v43, %s4510_s25 }
 0x160   : > { %1200 = vperm.xlu0 %4315, %v4612_v11  }
 0x161   : > { %v4964_v54 = vpop.permute.xlu0 %524  ;;  %v4966_v2 = vpop.permute.xlu1 %728 }
 0x163   : > { %1144 = vrot.lane.b32.xlu1 %v4782_v63, %s4510_s25 }
 0x164   : > { %1192 = vperm.xlu0 %4315, %v4602_v5  }
 0x165   : > { %v4971_v19 = vpop.permute.xlu0 %714  ;;  %v4973_v50 = vpop.permute.xlu1 %831 }
 0x166   : > { %7608 = vst [vmem:[#allocation36_spill] sm:$0xff] %v4971_v19 }
 0x167   : > { %1188 = vperm.xlu1 %4314, %v4584_v1  }
 0x168   : > { %1245 = vrot.lane.b32.xlu0 %v4745_v51, %s4511_s26 }
 0x169   : > { %v4978_v25 = vpop.permute.xlu0 %730  ;;  %v4980_v44 = vpop.permute.xlu1 %934 }
 0x16b   : > { %815 = vrot.lane.b32.xlu1 %v4719_v39, %s4507_s22 }
 0x16c   : > { %1249 = vrot.lane.b32.xlu0 %v4815_v35, %s4511_s26  ;;  %4316 = vset.pattern.permute.xlu1 %v7609_v18 }
 0x16d   : > { %v4987_v13 = vpop.permute.xlu0 %1039  ;;  %v4989_v14 = vpop.permute.xlu1 %1037 }
 0x16f   : > { %817 = vrot.lane.b32.xlu1 %v4735_v47, %s4507_s22 }
 0x170   : > { %918 = vrot.lane.b32.xlu0 %v4719_v39, %s4508_s23 }
 0x171   : > { %v4995_v6 = vpop.permute.xlu0 %613  ;;  %v4997_v31 = vpop.permute.xlu1 %611 }
 0x172   : > { %7610 = vst [vmem:[#allocation37_spill] sm:$0xff] %v4995_v6  ;;  %7611 = vst [vmem:[#allocation38_spill] sm:$0xff] %v4997_v31 }
 0x173   : > { %821 = vrot.lane.b32.xlu1 %v4804_v15, %s4507_s22 }
 0x174   : > { %922 = vrot.lane.b32.xlu0 %v4773_v60, %s4508_s23 }
 0x175   : > { %v5003_v18 = vpop.permute.xlu0 %629  ;;  %v5005_v41 = vpop.permute.xlu1 %627 }
 0x177   : > { %1031 = vrot.lane.b32.xlu1 %v4861_v7, %s4509_s24 }
 0x178   : > { %1132 = vrot.lane.b32.xlu0 %v4846_v48, %s4510_s25 }
 0x179   : > { %v5011_v59 = vpop.permute.xlu0 %835  ;;  %v5013_v6 = vpop.permute.xlu1 %833 }
 0x17b   : > { %1035 = vrot.lane.b32.xlu1 %v4899_v20, %s4509_s24 }
 0x17c   : > { %1136 = vrot.lane.b32.xlu0 %v4876_v40, %s4510_s25 }
 0x17d   : > { %v5019_v53 = vpop.permute.xlu0 %938  ;;  %v5021_v62 = vpop.permute.xlu1 %936 }
 0x17f   : > { %1081 = vperm.xlu1 %4316, %v4607_v8  }
 0x180   : > { %1180 = vperm.xlu0 %4315, %v4592_v3  }
 0x181   : > { %v5025_v34 = vpop.permute.xlu0 %512  ;;  %v5027_v52 = vpop.permute.xlu1 %510 }
 0x182   : > { %7612 = vst [vmem:[#allocation39_spill] sm:$0xff] %v5025_v34  ;;  %7613 = vst [vmem:[#allocation40_spill] sm:$0xff] %v5027_v52 }
 0x183   : > { %1243 = vrot.lane.b32.xlu1 %v4727_v43, %s4511_s26 }
 0x184   : > { %4319 = vset.pattern.permute.xlu0 %v7614_v29  ;;  %4317 = vset.pattern.permute.xlu1 %v7614_v29 }
 0x185   : > { %1295 = vperm.xlu0 %4319, %v4602_v5   ;;  %v5034_v9 = vpop.permute.xlu0 %528  ;;  %v5036_v10 = vpop.permute.xlu1 %526 }
 0x187   : > { %1247 = vrot.lane.b32.xlu1 %v4782_v63, %s4511_s26 }
 0x189   : > { %1023 = vrot.lane.b32.xlu0 %v4735_v47, %s4509_s24  ;;  %v5042_v52 = vpop.permute.xlu0 %718  ;;  %v5044_v34 = vpop.permute.xlu1 %716 }
 0x18a   : > { %7615 = vst [vmem:[#allocation41_spill] sm:$0xff] %v5042_v52  ;;  %7616 = vst [vmem:[#allocation42_spill] sm:$0xff] %v5044_v34 }
 0x18b   : > { %1291 = vperm.xlu1 %4317, %v4584_v1  }
 0x18d   : > { %1027 = vrot.lane.b32.xlu0 %v4804_v15, %s4509_s24  ;;  %v5049_v19 = vpop.permute.xlu0 %734  ;;  %v5051_v28 = vpop.permute.xlu1 %732 }
 0x18f   : > { %4318 = vset.pattern.permute.xlu1 %v7507_v32 }
 0x190   : > { %1347 = vperm.xlu1 %4318, %v4617_v12  }
 0x191   : > { %1237 = vrot.lane.b32.xlu0 %v4861_v7, %s4511_s26  ;;  %v5057_v52 = vpop.permute.xlu0 %1043  ;;  %v5059_v34 = vpop.permute.xlu1 %1041 }
 0x194   : > { %1351 = vperm.xlu1 %4318, %v4612_v11  }
 0x195   : > { %1241 = vrot.lane.b32.xlu0 %v4899_v20, %s4511_s26  ;;  %v5064_v49 = vpop.permute.xlu0 %617  ;;  %v5066_v31 = vpop.permute.xlu1 %615 }
 0x196   : > { %7617 = vst [vmem:[#allocation43_spill] sm:$0xff] %v5064_v49  ;;  %7618 = vst [vmem:[#allocation44_spill] sm:$0xff] %v5066_v31  ;;  %v7621_v49 = vmov 10  }
 0x198   : > { %920 = vrot.lane.b32.xlu1 %v4735_v47, %s4508_s23 }
 0x199   : > { %1287 = vperm.xlu0 %4319, %v4607_v8   ;;  %v5071_v12 = vpop.permute.xlu0 %926  ;;  %v5073_v32 = vpop.permute.xlu1 %631  ;;  %4320 = vset.pattern.permute.xlu1 %v7607_v38 }
 0x19a   : > { %7619 = vst [vmem:[#allocation45_spill] sm:$0xff] %v5071_v12 }
 0x19c   : > { %924 = vrot.lane.b32.xlu1 %v4804_v15, %s4508_s23 }
 0x19d   : > { %1124 = vrot.lane.b32.xlu0 %v4719_v39, %s4510_s25  ;;  %v5080_v11 = vpop.permute.xlu0 %516  ;;  %v5082_v31 = vpop.permute.xlu1 %837 }
 0x19e   : > { %7620 = vst [vmem:[#allocation46_spill] sm:$0xff] %v5080_v11  ;;  %4323 = vset.pattern.permute.xlu0 %v7621_v49 }
 0x1a0   : > { %1134 = vrot.lane.b32.xlu1 %v4861_v7, %s4510_s25 }
 0x1a1   : > { %1128 = vrot.lane.b32.xlu0 %v4773_v60, %s4510_s25  ;;  %v5089_v12 = vpop.permute.xlu0 %722  ;;  %v5091_v38 = vpop.permute.xlu1 %940 }
 0x1a2   : > { %7622 = vst [vmem:[#allocation47_spill] sm:$0xff] %v5089_v12 }
 0x1a4   : > { %1138 = vrot.lane.b32.xlu1 %v4899_v20, %s4510_s25 }
 0x1a5   : > { %1227 = vrot.lane.b32.xlu0 %v4719_v39, %s4511_s26  ;;  %v5097_v11 = vpop.permute.xlu0 %621  ;;  %v5099_v24 = vpop.permute.xlu1 %514 }
 0x1a6   : > { %7623 = vst [vmem:[#allocation48_spill] sm:$0xff] %v5097_v11  ;;  %7624 = vst [vmem:[#allocation49_spill] sm:$0xff] %v5099_v24  ;;  %v7630_v24 = vmov 9  }
 0x1a8   : > { %1184 = vperm.xlu1 %4320, %v4607_v8  }
 0x1a9   : > { %1231 = vrot.lane.b32.xlu0 %v4773_v60, %s4511_s26  ;;  %v5104_v7 = vpop.permute.xlu0 %827  ;;  %v5106_v12 = vpop.permute.xlu1 %720 }
 0x1aa   : > { %7625 = vst [vmem:[#allocation50_spill] sm:$0xff] %v5104_v7  ;;  %7626 = vst [vmem:[#allocation51_spill] sm:$0xff] %v5106_v12 }
 0x1ac   : > { %1021 = vrot.lane.b32.xlu1 %v4719_v39, %s4509_s24 }
 0x1ad   : > { %v5110_v20 = vpop.permute.xlu0 %930  ;;  %v5112_v21 = vpop.permute.xlu1 %823  ;;  %4321 = vset.pattern.permute.xlu1 %v7614_v29  ;;  %1331 = vperm.xlu0 %4323, %v4592_v3  }
 0x1ae   : > { %7627 = vst [vmem:[#allocation52_spill] sm:$0xff] %v5110_v20  ;;  %7628 = vst [vmem:[#allocation53_spill] sm:$0xff] %v5112_v21 }
 0x1b0   : > { %1025 = vrot.lane.b32.xlu1 %v4773_v60, %s4509_s24  ;;  %s4524_s24 = smov 48  }
 0x1b1   : > { %v5118_v11 = vpop.permute.xlu1 %619  ;;  %4325 = vset.pattern.permute.xlu0 %v7630_v24  ;;  %v5121_v7 = vpop.permute.xlu0 %520 }
 0x1b2   : > { %7629 = vst [vmem:[#allocation54_spill] sm:$0xff] %v5118_v11  ;;  %7631 = vst [vmem:[#allocation55_spill] sm:$0xff] %v5121_v7 }
 0x1b4   : > { %1235 = vrot.lane.b32.xlu1 %v4846_v48, %s4511_s26 }
 0x1b5   : > { %v5125_v12 = vpop.permute.xlu1 %825  ;;  %v5129_v29 = vpop.permute.xlu0 %726 }
 0x1b6   : > { %7632 = vst [vmem:[#allocation56_spill] sm:$0xff] %v5125_v12  ;;  %7633 = vst [vmem:[#allocation57_spill] sm:$0xff] %v5129_v29 }
 0x1b8   : > { %1239 = vrot.lane.b32.xlu1 %v4876_v40, %s4511_s26 }
 0x1b9   : > { %v5131_v20 = vpop.permute.xlu1 %928  ;;  %v5136_v11 = vpop.permute.xlu0 %1142 }
 0x1ba   : > { %7634 = vst [vmem:[#allocation58_spill] sm:$0xff] %v5131_v20 }
 0x1bc   : > { %1283 = vperm.xlu1 %4321, %v4592_v3  }
 0x1bd   : > { %v5134_v21 = vpop.permute.xlu1 %518  ;;  %v5142_v12 = vpop.permute.xlu0 %1146 }
 0x1be   : > { %7635 = vst [vmem:[#allocation59_spill] sm:$0xff] %v5134_v21 }
 0x1c0   : > { %4322 = vset.pattern.permute.xlu1 %v7621_v49 }
 0x1c1   : > { %1339 = vperm.xlu1 %4322, %v4584_v1   ;;  %v5140_v7 = vpop.permute.xlu1 %724  ;;  %v5149_v3 = vpop.permute.xlu0 %819 }
 0x1c2   : > { %7636 = vst [vmem:[#allocation60_spill] sm:$0xff] %v5140_v7  ;;  %7638 = vst [vmem:[#allocation62_spill] sm:$0xff] %v5149_v3 }
 0x1c5   : > { %1343 = vperm.xlu1 %4322, %v4602_v5   ;;  %v5145_v40 = vpop.permute.xlu1 %623  ;;  %v5155_v1 = vpop.permute.xlu0 %1029 }
 0x1c6   : > { %7637 = vst [vmem:[#allocation61_spill] sm:$0xff] %v5145_v40  ;;  %7640 = vst [vmem:[#allocation64_spill] sm:$0xff] %v5155_v1 }
 0x1c9   : > { %1126 = vrot.lane.b32.xlu1 %v4735_v47, %s4510_s25  ;;  %v5151_v20 = vpop.permute.xlu1 %829  ;;  %v5163_v49 = vpop.permute.xlu0 %1033 }
 0x1ca   : > { %7639 = vst [vmem:[#allocation63_spill] sm:$0xff] %v5151_v20  ;;  %7642 = vst [vmem:[#allocation66_spill] sm:$0xff] %v5163_v49 }
 0x1cd   : > { %1130 = vrot.lane.b32.xlu1 %v4804_v15, %s4510_s25  ;;  %v5159_v5 = vpop.permute.xlu1 %932  ;;  %s4525_s25 = smov 47  }
 0x1ce   : > { %7641 = vst [vmem:[#allocation65_spill] sm:$0xff] %v5159_v5 }
 0x1d1   : > { %1229 = vrot.lane.b32.xlu1 %v4735_v47, %s4511_s26  ;;  %v5165_v3 = vpop.permute.xlu1 %1140 }
 0x1d5   : > { %1233 = vrot.lane.b32.xlu1 %v4804_v15, %s4511_s26  ;;  %v5171_v1 = vpop.permute.xlu1 %1144  ;;  %s4538_s26 = smov 64  }
 0x1d6   : > { %v5168_v20 = vpop.permute.xlu0 %1077 }
 0x1d7   : > { %7643 = vst [vmem:[#allocation67_spill] sm:$0xff] %v5168_v20  ;;  %v638_v20 = vsel %vm633_vm2, %v4949_v23, %v5005_v41 }
 0x1d8   : > { %v696_v48 = vmul.f32 %v4765_v56, %v638_v20  ;;  %v765_v20 = vsel %vm736_vm3, %v4978_v25, %v4966_v2 }
 0x1d9   : > { %1335 = vperm.xlu1 %4322, %v4607_v8   ;;  %v535_v8 = vsel %vm530_vm1, %v4951_v0, %v4964_v54 }
 0x1db   : > { %v5173_v7 = vpop.permute.xlu0 %1200 }
 0x1dd   : > { %4324 = vset.pattern.permute.xlu1 %v7630_v24  ;;  %v559_v24 = vsel %vm530_vm1, %v4964_v54, %v4951_v0  ;;  %v490_v0 = vmul.f32 %v4713_v30, %v4727_v43  ;;  %v491_v54 = vmul.f32 %v4713_v30, %v4745_v51  ;;  %v741_v30 = vsel %vm736_vm3, %v4966_v2, %v4978_v25 }
 0x1de   : > { %v493_v25 = vmul.f32 %v4759_v55, %v4815_v35 }
 0x1df   : > { %v5179_v40 = vpop.permute.xlu0 %1192 }
 0x1e0   : > { %7646 = vst [vmem:[#allocation70_spill] sm:$0xff] %v5179_v40  ;;  %v662_v40 = vsel %vm633_vm2, %v5005_v41, %v4949_v23 }
 0x1e1   : > { %v697_v15 = vmul.f32 %v4765_v56, %v662_v40  ;;  %v639_v56 = vsel %vm633_vm2, %v5003_v18, %v5073_v32  ;;  %v492_v40 = vmul.f32 %v4759_v55, %v4782_v63 }
 0x1e2   : > { %v5175_v29 = vpop.permute.xlu1 %1188 }
 0x1e3   : > { %7644 = vst [vmem:[#allocation68_spill] sm:$0xff] %v5175_v29  ;;  %v5203_v29 = vpop.permute.xlu0 %1245 }
 0x1e6   : > { %v5177_v5 = vpop.permute.xlu1 %815 }
 0x1e7   : > { %7645 = vst [vmem:[#allocation69_spill] sm:$0xff] %v5177_v5  ;;  %v593_v5 = vmul.f32 %v4784_v4, %v535_v8  ;;  %v536_v8 = vsel %vm530_vm1, %v5036_v10, %v5034_v9  ;;  %v5229_v43 = vpop.permute.xlu0 %1249 }
 0x1e9   : > { %v605_v23 = vadd.f32 %v593_v5, %v490_v0  ;;  %v971_v0 = vsel %vm942_vm5, %v5021_v62, %v4980_v44 }
 0x1ea   : > { %v5182_v49 = vpop.permute.xlu1 %817 }
 0x1eb   : > { %7647 = vst [vmem:[#allocation71_spill] sm:$0xff] %v5182_v49  ;;  %v594_v49 = vmul.f32 %v4784_v4, %v559_v24  ;;  %v560_v24 = vsel %vm530_vm1, %v5034_v9, %v5036_v10  ;;  %v663_v9 = vsel %vm633_vm2, %v5073_v32, %v5003_v18  ;;  %v595_v10 = vmul.f32 %v4733_v46, %v536_v8 }
 0x1ec   : > { %v596_v2 = vmul.f32 %v4733_v46, %v560_v24  ;;  %v844_v18 = vsel %vm839_vm4, %v4973_v50, %v5013_v6  ;;  %v868_v32 = vsel %vm839_vm4, %v5013_v6, %v4973_v50  ;;  %v698_v46 = vmul.f32 %v4823_v27, %v639_v56 }
 0x1ed   : > { %v606_v41 = vadd.f32 %v594_v49, %v491_v54  ;;  %v708_v49 = vadd.f32 %v696_v48, %v605_v23  ;;  %v800_v48 = vmul.f32 %v4844_v45, %v765_v20  ;;  %v699_v63 = vmul.f32 %v4823_v27, %v663_v9 }
 0x1ee   : > { %v5207_v21 = vpop.permute.xlu1 %821  ;;  %v607_v54 = vadd.f32 %v595_v10, %v492_v40  ;;  %v608_v23 = vadd.f32 %v596_v2, %v493_v25  ;;  %v902_v50 = vmul.f32 %v4855_v61, %v844_v18  ;;  %v903_v6 = vmul.f32 %v4855_v61, %v868_v32 }
 0x1ef   : > { %v709_v51 = vadd.f32 %v697_v15, %v606_v41  ;;  %v799_v15 = vmul.f32 %v4844_v45, %v741_v30  ;;  %v947_v45 = vsel %vm942_vm5, %v4980_v44, %v5021_v62  ;;  %v5261_v41 = vpop.permute.xlu0 %918  ;;  %v742_v27 = vsel %vm736_vm3, %v5051_v28, %v5049_v19 }
 0x1f0   : > { %v766_v8 = vsel %vm736_vm3, %v5049_v19, %v5051_v28  ;;  %v710_v30 = vadd.f32 %v698_v46, %v607_v54  ;;  %v711_v62 = vadd.f32 %v699_v63, %v608_v23  ;;  %v1005_v44 = vmul.f32 %v4829_v37, %v947_v45 }
 0x1f1   : > { %v811_v55 = vadd.f32 %v799_v15, %v708_v49  ;;  %v812_v35 = vadd.f32 %v800_v48, %v709_v51  ;;  %v1006_v20 = vmul.f32 %v4829_v37, %v971_v0  ;;  %v845_v61 = vsel %vm839_vm4, %v5011_v59, %v5082_v31 }
 0x1f2   : > { %v5221_v4 = vpop.permute.xlu1 %1031  ;;  %v869_v49 = vsel %vm839_vm4, %v5082_v31, %v5011_v59  ;;  %v1050_v19 = vsel %vm1045_vm6, %v4989_v14, %v4987_v13  ;;  %v1074_v28 = vsel %vm1045_vm6, %v4987_v13, %v4989_v14  ;;  %v801_v51 = vmul.f32 %v4813_v33, %v742_v27 }
 0x1f3   : > { %v802_v37 = vmul.f32 %v4813_v33, %v766_v8  ;;  %v914_v56 = vadd.f32 %v902_v50, %v811_v55  ;;  %v915_v9 = vadd.f32 %v903_v6, %v812_v35  ;;  %v948_v40 = vsel %vm942_vm5, %v5019_v53, %v5091_v38  ;;  %v5297_v14 = vpop.permute.xlu0 %922 }
 0x1f4   : > { %v972_v59 = vsel %vm942_vm5, %v5091_v38, %v5019_v53  ;;  %v813_v10 = vadd.f32 %v801_v51, %v710_v30  ;;  %v904_v25 = vmul.f32 %v4821_v36, %v845_v61  ;;  %v905_v13 = vmul.f32 %v4821_v36, %v869_v49  ;;  %v5344_v49 = vld [vmem:[%s7451_s4 + $0x50] sm:$0xff] }
 0x1f5   : > { %v814_v2 = vadd.f32 %v802_v37, %v711_v62  ;;  %v1017_v33 = vadd.f32 %v1005_v44, %v914_v56  ;;  %v1018_v15 = vadd.f32 %v1006_v20, %v915_v9  ;;  %v1007_v48 = vmul.f32 %v4892_v16, %v948_v40  ;;  %1656 = vperm.xlu1 %4324, %v5344_v49   ;;  %v5363_v51 = vld [vmem:[%s7451_s4 + $0x30] sm:$0xff] }
 0x1f6   : > { %v5245_v5 = vpop.permute.xlu1 %1035  ;;  %v1008_v18 = vmul.f32 %v4892_v16, %v972_v59  ;;  %v1108_v32 = vmul.f32 %v4853_v58, %v1050_v19  ;;  %v1109_v53 = vmul.f32 %v4853_v58, %v1074_v28  ;;  %v916_v46 = vadd.f32 %v904_v25, %v813_v10  ;;  %v5358_v28 = vld [vmem:[%s7451_s4 + $0x40] sm:$0xff] }
 0x1f7   : > { %v917_v63 = vadd.f32 %v905_v13, %v814_v2  ;;  %v1153_v36 = vsel %vm1148_vm7, %v5165_v3, %v5136_v11  ;;  %v1177_v55 = vsel %vm1148_vm7, %v5136_v11, %v5165_v3  ;;  %v1051_v16 = vsel %vm1045_vm6, %v5059_v34, %v5057_v52  ;;  %v5315_v23 = vpop.permute.xlu0 %1132  ;;  %v5372_v13 = vld [vmem:[%s7451_s4 + $0x48] sm:$0xff] }
 0x1f8   : > { %v1075_v58 = vsel %vm1045_vm6, %v5057_v52, %v5059_v34  ;;  %v1120_v35 = vadd.f32 %v1108_v32, %v1017_v33  ;;  %v1121_v45 = vadd.f32 %v1109_v53, %v1018_v15  ;;  %v1019_v0 = vadd.f32 %v1007_v48, %v916_v46 }
 0x1f9   : > { %v1020_v54 = vadd.f32 %v1008_v18, %v917_v63  ;;  %v1211_v3 = vmul.f32 %v4878_v42, %v1153_v36  ;;  %v1212_v6 = vmul.f32 %v4878_v42, %v1177_v55  ;;  %v1154_v34 = vsel %vm1148_vm7, %v5171_v1, %v5142_v12  ;;  %1646 = vperm.xlu1 %4324, %v5358_v28   ;;  %v5381_v36 = vld [vmem:[%s7451_s4 + $0x38] sm:$0xff]  ;;  %v4468_v55 = vld [vmem:[%s7451_s4] sm:$0xff] }
 0x1fa   : > { %v5271_v24 = vpop.permute.xlu1 %1081  ;;  %v1110_v8 = vmul.f32 %v4923_v17, %v1051_v16  ;;  %v1178_v30 = vsel %vm1148_vm7, %v5142_v12, %v5171_v1  ;;  %v1111_v62 = vmul.f32 %v4923_v17, %v1075_v58  ;;  %v5349_v12 = vld [vmem:[%s7451_s4 + $0x58] sm:$0xff]  ;;  %v7549_v32 = vmov 11   ;;  %7648 = vst [vmem:[#allocation72_spill] sm:$0xff] %v5381_v36 }
 0x1fb   : > { %v1214_v44 = vmul.f32 %v5173_v7, %v1178_v30  ;;  %1661 = vperm.xlu0 %4325, %v5349_v12   ;;  %v1223_v17 = vadd.f32 %v1211_v3, %v1120_v35  ;;  %v5365_v56 = vpop.permute.xlu0 %1136  ;;  %v4471_v30 = vld [vmem:[%s7451_s4 + $0x28] sm:$0xff] }
 0x1fc   : > { %v1122_v1 = vadd.f32 %v1110_v8, %v1019_v0  ;;  %v4470_v8 = vld [vmem:[%s7451_s4 + $0x8] sm:$0xff] }
 0x1fd   : > { %1651 = vperm.xlu1 %4324, %v5372_v13  }
 0x1fe   : > { %v1244_v31 = vpop.permute.xlu1 %1243 }
 0x1ff   : > { %v1256_v50 = vsel %vm1251_vm8, %v1244_v31, %v5203_v29  ;;  %v1280_v11 = vsel %vm1251_vm8, %v5203_v29, %v1244_v31  ;;  %v1213_v29 = vmul.f32 %v5173_v7, %v1154_v34  ;;  %v1224_v7 = vadd.f32 %v1212_v6, %v1121_v45  ;;  %1636 = vperm.xlu0 %4325, %v5363_v51   ;;  %v5374_v18 = vpop.permute.xlu0 %1180  ;;  %v4469_v45 = vld [vmem:[%s7451_s4 + $0x18] sm:$0xff]  ;;  %v7651_v34 = vld [vmem:[#allocation38_spill] sm:$0xff] }
 0x200   : > { %v1314_v20 = vmul.f32 %v4913_v26, %v1256_v50  ;;  %v1315_v61 = vmul.f32 %v4913_v26, %v1280_v11  ;;  %v1123_v26 = vadd.f32 %v1111_v62, %v1020_v54  ;;  %v7649_v50 = vld [vmem:[#allocation34_spill] sm:$0xff]  ;;  %v7650_v6 = vld [vmem:[#allocation33_spill] sm:$0xff]  ;;  %v7653_v62 = vld [vmem:[#allocation4_spill] sm:$0xff] }
 0x201   : > { %v1225_v37 = vadd.f32 %v1213_v29, %v1122_v1  ;;  %1641 = vperm.xlu1 %4324, %v5381_v36   ;;  %v555_v11 = vsel %vm530_vm1, %v7649_v50, %v4943_v22  ;;  %v531_v3 = vsel %vm530_vm1, %v4943_v22, %v7649_v50  ;;  %v7652_v29 = vld [vmem:[#allocation7_spill] sm:$0xff] }
 0x202   : > { %v1248_v38 = vpop.permute.xlu1 %1247  ;;  %v1226_v40 = vadd.f32 %v1214_v44, %v1123_v26  ;;  %v1326_v59 = vadd.f32 %v1314_v20, %v1223_v17  ;;  %v1327_v31 = vadd.f32 %v1315_v61, %v1224_v7  ;;  %v482_v22 = vmul.f32 %v7652_v29, %v4719_v39  ;;  %v7655_v7 = vld [vmem:[#allocation16_spill] sm:$0xff] }
 0x203   : > { %v1257_v52 = vsel %vm1251_vm8, %v1248_v38, %v5229_v43  ;;  %v1281_v42 = vsel %vm1251_vm8, %v5229_v43, %v1248_v38  ;;  %4326 = vset.pattern.permute.xlu0 %v7549_v32  ;;  %v5392_v0 = vpop.permute.xlu0 %1295  ;;  %v586_v44 = vmul.f32 %v7653_v62, %v555_v11  ;;  %v634_v20 = vsel %vm633_vm2, %v7650_v6, %v7651_v34 }
 0x204   : > { %v1316_v43 = vmul.f32 %v4921_v57, %v1257_v52  ;;  %v1317_v19 = vmul.f32 %v4921_v57, %v1281_v42  ;;  %1385 = vperm.xlu0 %4326, %v4468_v55   ;;  %v658_v52 = vsel %vm633_vm2, %v7651_v34, %v7650_v6  ;;  %v483_v42 = vmul.f32 %v7652_v29, %v4735_v47  ;;  %v7656_v47 = vld [vmem:[#allocation46_spill] sm:$0xff]  ;;  %v7671_v29 = vld [vmem:[#allocation39_spill] sm:$0xff] }
 0x205   : > { %4327 = vset.pattern.permute.xlu1 %v7549_v32  ;;  %v585_v1 = vmul.f32 %v7653_v62, %v531_v3  ;;  %v7669_v3 = vld [vmem:[#allocation5_spill] sm:$0xff]  ;;  %v7672_v62 = vld [vmem:[#allocation40_spill] sm:$0xff] }
 0x206   : > { %v5328_v27 = vpop.permute.xlu1 %1291  ;;  %v1328_v10 = vadd.f32 %v1316_v43, %v1225_v37  ;;  %v1329_v25 = vadd.f32 %v1317_v19, %v1226_v40  ;;  %1389 = vperm.xlu1 %4327, %v4470_v8   ;;  %v7654_v43 = vld [vmem:[#allocation2_spill] sm:$0xff]  ;;  %v7657_v19 = vld [vmem:[#allocation49_spill] sm:$0xff]  ;;  %v7658_v37 = vld [vmem:[#allocation36_spill] sm:$0xff] }
 0x207   : > { %v484_v17 = vmul.f32 %v7654_v43, %v4773_v60  ;;  %v5427_v26 = vmul.f32 %v7654_v43, %v7655_v7  ;;  %v533_v39 = vsel %vm530_vm1, %v7657_v19, %v7656_v47  ;;  %v557_v11 = vsel %vm530_vm1, %v7656_v47, %v7657_v19  ;;  %v7670_v8 = vld [vmem:[#allocation12_spill] sm:$0xff]  ;;  %v7674_v47 = vld [vmem:[#allocation10_spill] sm:$0xff] }
 0x208   : > { %1397 = vperm.xlu0 %4326, %v4469_v45   ;;  %v598_v45 = vadd.f32 %v586_v44, %v483_v42  ;;  %v589_v6 = vmul.f32 %v7669_v3, %v533_v39  ;;  %v532_v42 = vsel %vm530_vm1, %v7672_v62, %v7671_v29  ;;  %v7673_v44 = vld [vmem:[#allocation27_spill] sm:$0xff] }
 0x209   : > { %v7675_v39 = vld [vmem:[#allocation55_spill] sm:$0xff] }
 0x20b   : > { %v1348_v9 = vpop.permute.xlu1 %1347 }
 0x20c   : > { %v1362_v57 = vadd.f32 %v1348_v9, %v1326_v59  ;;  %v1363_v2 = vadd.f32 %v1348_v9, %v1327_v31  ;;  %1405 = vperm.xlu0 %4326, %v4471_v30   ;;  %v7659_v9 = vld [vmem:[#allocation35_spill] sm:$0xff]  ;;  %v7660_v59 = vld [vmem:[#allocation14_spill] sm:$0xff] }
 0x20d   : > { %v737_v40 = vsel %vm736_vm3, %v7659_v9, %v7658_v37  ;;  %v689_v31 = vmul.f32 %v7660_v59, %v658_v52  ;;  %v761_v50 = vsel %vm736_vm3, %v7658_v37, %v7659_v9  ;;  %v597_v52 = vadd.f32 %v585_v1, %v482_v22  ;;  %v7676_v37 = vld [vmem:[#allocation59_spill] sm:$0xff] }
 0x20e   : > { %v1374_v53 = vmax.f32 %v1362_v57, 0.0  ;;  %v1375_v38 = vmax.f32 %v1363_v2, 0.0  ;;  %v7662_v57 = vld [vmem:[#allocation3_spill] sm:$0xff]  ;;  %v791_v30 = vmul.f32 %v7670_v8, %v737_v40  ;;  %v534_v22 = vsel %vm530_vm1, %v7676_v37, %v7675_v39 }
 0x20f   : > { %v1352_v33 = vpop.permute.xlu1 %1351  ;;  %v701_v43 = vadd.f32 %v689_v31, %v598_v45  ;;  %v792_v1 = vmul.f32 %v7670_v8, %v761_v50  ;;  %v590_v40 = vmul.f32 %v7669_v3, %v557_v11  ;;  %v4473_v31 = vld [vmem:[%s7451_s4 + $0x20] sm:$0xff]  ;;  %v7681_v45 = vld [vmem:[#allocation51_spill] sm:$0xff] }
 0x210   : > { %v1364_v15 = vadd.f32 %v1352_v33, %v1328_v10  ;;  %v1365_v48 = vadd.f32 %v1352_v33, %v1329_v25  ;;  %v7661_v10 = vld [vmem:[#allocation20_spill] sm:$0xff]  ;;  %v7663_v25 = vld [vmem:[#allocation21_spill] sm:$0xff]  ;;  %v5440_v33 = vpop.permute.xlu0 %1023  ;;  %v7682_v3 = vld [vmem:[#allocation6_spill] sm:$0xff] }
 0x211   : > { %v486_v2 = vmul.f32 %v7662_v57, %v7661_v10  ;;  %v487_v60 = vmul.f32 %v7662_v57, %v7663_v25  ;;  %v556_v10 = vsel %vm530_vm1, %v7671_v29, %v7672_v62  ;;  %v7677_v57 = vld [vmem:[#allocation11_spill] sm:$0xff]  ;;  %v5507_v62 = vadd.f32 %v792_v1, %v701_v43 }
 0x212   : > { %v1376_v46 = vmax.f32 %v1364_v15, 0.0  ;;  %v1377_v63 = vmax.f32 %v1365_v48, 0.0  ;;  %v688_v15 = vmul.f32 %v7660_v59, %v634_v20  ;;  %v7664_v48 = vld [vmem:[#allocation54_spill] sm:$0xff]  ;;  %v558_v59 = vsel %vm530_vm1, %v7675_v39, %v7676_v37  ;;  %v7683_v39 = vld [vmem:[#allocation17_spill] sm:$0xff] }
 0x213   : > { %v5386_v16 = vpop.permute.xlu1 %920  ;;  %v587_v25 = vmul.f32 %v7677_v57, %v532_v42  ;;  %v592_v29 = vmul.f32 %v7682_v3, %v558_v59  ;;  %v588_v42 = vmul.f32 %v7677_v57, %v556_v10  ;;  %v7684_v37 = vld [vmem:[#allocation13_spill] sm:$0xff]  ;;  %vm2393_vm1 = vcmask 375808  }
 0x214   : > { %v1382_v58 = vpack.c.bf16 %v1376_v46, %v1374_v53  ;;  %v1383_v35 = vpack.c.bf16 %v1377_v63, %v1375_v38  ;;  %v7665_v53 = vld [vmem:[#allocation43_spill] sm:$0xff]  ;;  %v7666_v46 = vld [vmem:[#allocation24_spill] sm:$0xff]  ;;  %v7667_v63 = vld [vmem:[#allocation9_spill] sm:$0xff]  ;;  %v700_v9 = vadd.f32 %v688_v15, %v597_v52  ;;  %v591_v52 = vmul.f32 %v7682_v3, %v534_v22 }
 0x215   : > { %v636_v38 = vsel %vm633_vm2, %v7665_v53, %v7664_v48  ;;  %v488_v55 = vmul.f32 %v7667_v63, %v7666_v46  ;;  %v489_v20 = vmul.f32 %v7667_v63, %v7673_v44  ;;  %v660_v7 = vsel %vm633_vm2, %v7664_v48, %v7665_v53  ;;  %v7678_v53 = vld [vmem:[#allocation61_spill] sm:$0xff]  ;;  %v7679_v15 = vld [vmem:[#allocation48_spill] sm:$0xff]  ;;  %v5490_v46 = vpop.permute.xlu0 %1027 }
 0x216   : > { %1442 = vmatprep.subr.bf16.mxu1 %v1383_v35  ;;  %v7668_v35 = vmov 0   ;;  %v692_v19 = vmul.f32 %v7674_v47, %v636_v38  ;;  %v601_v48 = vadd.f32 %v589_v6, %v486_v2  ;;  %v637_v38 = vsel %vm633_vm2, %v7679_v15, %v7678_v53  ;;  %v7687_v57 = vld [vmem:[#allocation57_spill] sm:$0xff] }
 0x217   : > { %1443 = vmatpush1.bf16.msra.mxu1 %v1382_v58  ;;  %v5394_v54 = vpop.permute.xlu1 %924  ;;  %v4472_v58 = vld [vmem:[%s7451_s4 + $0x10] sm:$0xff]  ;;  %4329 = vset.pattern.permute.xlu0 %v7668_v35  ;;  %v693_v11 = vmul.f32 %v7674_v47, %v660_v7  ;;  %v661_v2 = vsel %vm633_vm2, %v7678_v53, %v7679_v15  ;;  %v602_v44 = vadd.f32 %v590_v40, %v487_v60  ;;  %v7686_v53 = vld [vmem:[#allocation53_spill] sm:$0xff] }
 0x218   : > { %1393 = vperm.xlu1 %4327, %v4472_v58   ;;  %1774 = vperm.xlu0 %4329, %v5381_v36   ;;  %v7680_v58 = vld [vmem:[#allocation47_spill] sm:$0xff]  ;;  %v704_v8 = vadd.f32 %v692_v19, %v601_v48  ;;  %v694_v7 = vmul.f32 %v7683_v39, %v637_v38  ;;  %v5511_v47 = vadd.f32 %v791_v30, %v700_v9  ;;  %v7688_v48 = vld [vmem:[#allocation60_spill] sm:$0xff] }
 0x219   : > { %v739_v50 = vsel %vm736_vm3, %v7681_v45, %v7680_v58  ;;  %v763_v6 = vsel %vm736_vm3, %v7680_v58, %v7681_v45  ;;  %v695_v19 = vmul.f32 %v7683_v39, %v661_v2  ;;  %v5523_v60 = vadd.f32 %v587_v25, %v484_v17  ;;  %v5532_v58 = vpop.permute.xlu0 %1237  ;;  %v7689_v45 = vld [vmem:[#allocation23_spill] sm:$0xff]  ;;  %v7690_v17 = vld [vmem:[#allocation58_spill] sm:$0xff]  ;;  %v7691_v25 = vld [vmem:[#allocation45_spill] sm:$0xff] }
 0x21a   : > { %v795_v22 = vmul.f32 %v7684_v37, %v739_v50  ;;  %v796_v30 = vmul.f32 %v7684_v37, %v763_v6  ;;  %v705_v43 = vadd.f32 %v693_v11, %v602_v44  ;;  %v603_v1 = vadd.f32 %v591_v52, %v488_v55  ;;  %v7692_v2 = vld [vmem:[#allocation63_spill] sm:$0xff]  ;;  %v7693_v6 = vld [vmem:[#allocation50_spill] sm:$0xff] }
 0x21b   : > { %v5420_v61 = vpop.permute.xlu1 %1134  ;;  %v604_v10 = vadd.f32 %v592_v29, %v489_v20  ;;  %v740_v38 = vsel %vm736_vm3, %v7688_v48, %v7687_v57  ;;  %v945_v3 = vsel %vm942_vm5, %v7691_v25, %v7690_v17  ;;  %v764_v55 = vsel %vm736_vm3, %v7687_v57, %v7688_v48  ;;  %v7699_v48 = vld [vmem:[#allocation65_spill] sm:$0xff] }
 0x21c   : > { %1401 = vperm.xlu1 %4327, %v4473_v31   ;;  %1790 = vperm.xlu0 %4329, %v5349_v12   ;;  %v7685_v31 = vld [vmem:[#allocation56_spill] sm:$0xff]  ;;  %v807_v9 = vadd.f32 %v795_v22, %v704_v8  ;;  %v706_v11 = vadd.f32 %v694_v7, %v603_v1  ;;  %v969_v20 = vsel %vm942_vm5, %v7690_v17, %v7691_v25  ;;  %v7694_v44 = vmov 1   ;;  %v7695_v22 = vld [vmem:[#allocation15_spill] sm:$0xff]  ;;  %v7698_v1 = vld [vmem:[#allocation29_spill] sm:$0xff] }
 0x21d   : > { %v842_v15 = vsel %vm839_vm4, %v7686_v53, %v7685_v31  ;;  %v866_v40 = vsel %vm839_vm4, %v7685_v31, %v7686_v53  ;;  %v707_v52 = vadd.f32 %v695_v19, %v604_v10  ;;  %v843_v8 = vsel %vm839_vm4, %v7693_v6, %v7692_v2  ;;  %v7696_v53 = vld [vmem:[#allocation44_spill] sm:$0xff] }
 0x21e   : > { %v898_v50 = vmul.f32 %v7689_v45, %v842_v15  ;;  %v808_v39 = vadd.f32 %v796_v30, %v705_v43  ;;  %v899_v37 = vmul.f32 %v7689_v45, %v866_v40  ;;  %v797_v7 = vmul.f32 %v7695_v22, %v740_v38  ;;  %v7697_v15 = vld [vmem:[#allocation37_spill] sm:$0xff]  ;;  %v7700_v30 = vld [vmem:[#allocation52_spill] sm:$0xff]  ;;  %v7701_v45 = vld [vmem:[#allocation19_spill] sm:$0xff] }
 0x21f   : > { %v5459_v34 = vpop.permute.xlu1 %1138  ;;  %v867_v31 = vsel %vm839_vm4, %v7692_v2, %v7693_v6  ;;  %v635_v19 = vsel %vm633_vm2, %v7697_v15, %v7696_v53  ;;  %v1001_v10 = vmul.f32 %v7698_v1, %v945_v3  ;;  %v798_v57 = vmul.f32 %v7695_v22, %v764_v55  ;;  %v1242_v22 = vpop.permute.xlu0 %1241 }
 0x220   : > { %4328 = vset.pattern.permute.xlu1 %v7668_v35  ;;  %1782 = vperm.xlu0 %4329, %v5372_v13   ;;  %v946_v43 = vsel %vm942_vm5, %v7700_v30, %v7699_v48  ;;  %v1002_v40 = vmul.f32 %v7698_v1, %v969_v20  ;;  %v809_v38 = vadd.f32 %v797_v7, %v706_v11  ;;  %v7702_v20 = vld [vmem:[#allocation22_spill] sm:$0xff] }
 0x221   : > { %1770 = vperm.xlu1 %4328, %v5363_v51   ;;  %v900_v17 = vmul.f32 %v7701_v45, %v843_v8  ;;  %v970_v25 = vsel %vm942_vm5, %v7699_v48, %v7700_v30  ;;  %v5571_v2 = vadd.f32 %v588_v42, %v5427_v26  ;;  %v910_v6 = vadd.f32 %v898_v50, %v807_v9  ;;  %v7703_v8 = vld [vmem:[#allocation64_spill] sm:$0xff]  ;;  %v7704_v42 = vld [vmem:[#allocation41_spill] sm:$0xff]  ;;  %v7705_v9 = vld [vmem:[#allocation42_spill] sm:$0xff] }
 0x222   : > { %v810_v3 = vadd.f32 %v798_v57, %v707_v52  ;;  %v901_v55 = vmul.f32 %v7701_v45, %v867_v31  ;;  %v911_v35 = vadd.f32 %v899_v37, %v808_v39  ;;  %v1003_v11 = vmul.f32 %v7702_v20, %v946_v43  ;;  %v7706_v39 = vld [vmem:[#allocation8_spill] sm:$0xff]  ;;  %v7707_v30 = vld [vmem:[#allocation66_spill] sm:$0xff] }
 0x223   : > { %v5492_v63 = vpop.permute.xlu1 %1184  ;;  %v1048_v7 = vsel %vm1045_vm6, %v7703_v8, %v5221_v4  ;;  %v1072_v26 = vsel %vm1045_vm6, %v5221_v4, %v7703_v8  ;;  %v738_v50 = vsel %vm736_vm3, %v7705_v9, %v7704_v42  ;;  %v659_v52 = vsel %vm633_vm2, %v7696_v53, %v7697_v15  ;;  %v7708_v45 = vld [vmem:[#allocation28_spill] sm:$0xff] }
 0x224   : > { %4332 = vset.pattern.permute.xlu0 %v7694_v44  ;;  %v690_v37 = vmul.f32 %v7706_v39, %v635_v19  ;;  %v1004_v31 = vmul.f32 %v7702_v20, %v970_v25  ;;  %v1013_v1 = vadd.f32 %v1001_v10, %v910_v6  ;;  %v1014_v57 = vadd.f32 %v1002_v40, %v911_v35  ;;  %v7711_v25 = vld [vmem:[#allocation32_spill] sm:$0xff] }
 0x225   : > { %1778 = vperm.xlu1 %4328, %v5358_v28   ;;  %1869 = vperm.xlu0 %4332, %v5349_v12   ;;  %v912_v48 = vadd.f32 %v900_v17, %v809_v38  ;;  %v1049_v4 = vsel %vm1045_vm6, %v7707_v30, %v5245_v5  ;;  %v913_v43 = vadd.f32 %v901_v55, %v810_v3  ;;  %v7709_v38 = vld [vmem:[#allocation71_spill] sm:$0xff]  ;;  %v7710_v17 = vld [vmem:[#allocation69_spill] sm:$0xff]  ;;  %v5612_v3 = vpop.permute.xlu0 %1287  ;;  %vm2911_vm2 = vcmask 121856  }
 0x226   : > { %v1104_v8 = vmul.f32 %v7708_v45, %v1048_v7  ;;  %v1105_v36 = vmul.f32 %v7708_v45, %v1072_v26  ;;  %v1073_v53 = vsel %vm1045_vm6, %v5245_v5, %v7707_v30  ;;  %v1151_v35 = vsel %vm1148_vm7, %v5315_v23, %v5420_v61 }
 0x227   : > { %v5519_v59 = vpop.permute.xlu1 %1021  ;;  %v1015_v19 = vadd.f32 %v1003_v11, %v912_v48  ;;  %v1175_v10 = vsel %vm1148_vm7, %v5420_v61, %v5315_v23  ;;  %v1016_v40 = vadd.f32 %v1004_v31, %v913_v43  ;;  %v840_v5 = vsel %vm839_vm4, %v7710_v17, %v7709_v38  ;;  %v7712_v31 = vld [vmem:[#allocation68_spill] sm:$0xff]  ;;  %v7713_v43 = vld [vmem:[#allocation70_spill] sm:$0xff] }
 0x228   : > { %v1106_v6 = vmul.f32 %v7711_v25, %v1049_v4  ;;  %v1152_v55 = vsel %vm1148_vm7, %v5365_v56, %v5459_v34  ;;  %v1107_v20 = vmul.f32 %v7711_v25, %v1073_v53  ;;  %v1176_v23 = vsel %vm1148_vm7, %v5459_v34, %v5365_v56 }
 0x229   : > { %1786 = vperm.xlu1 %4328, %v5344_v49   ;;  %1857 = vperm.xlu0 %4332, %v5358_v28   ;;  %v1116_v7 = vadd.f32 %v1104_v8, %v1013_v1  ;;  %v1117_v26 = vadd.f32 %v1105_v36, %v1014_v57  ;;  %v1207_v48 = vmul.f32 %v7712_v31, %v1151_v35  ;;  %v7714_v34 = vmov 2  }
 0x22a   : > { %v1208_v30 = vmul.f32 %v7712_v31, %v1175_v10  ;;  %v1209_v45 = vmul.f32 %v7713_v43, %v1152_v55  ;;  %v762_v1 = vsel %vm736_vm3, %v7704_v42, %v7705_v9  ;;  %v1118_v57 = vadd.f32 %v1106_v6, %v1015_v19  ;;  %v7716_v19 = vld [vmem:[#allocation18_spill] sm:$0xff] }
 0x22b   : > { %v5547_v29 = vpop.permute.xlu1 %1025  ;;  %v1119_v8 = vadd.f32 %v1107_v20, %v1016_v40  ;;  %v1219_v35 = vadd.f32 %v1207_v48, %v1116_v7  ;;  %v691_v55 = vmul.f32 %v7706_v39, %v659_v52  ;;  %v793_v40 = vmul.f32 %v7716_v19, %v738_v50  ;;  %v7717_v52 = vld [vmem:[#allocation62_spill] sm:$0xff] }
 0x22c   : > { %v1220_v10 = vadd.f32 %v1208_v30, %v1117_v26  ;;  %v1221_v42 = vadd.f32 %v1209_v45, %v1118_v57  ;;  %v943_v50 = vsel %vm942_vm5, %v5261_v41, %v5386_v16  ;;  %v967_v30 = vsel %vm942_vm5, %v5386_v16, %v5261_v41  ;;  %v7720_v57 = vld [vmem:[#allocation30_spill] sm:$0xff] }
 0x22d   : > { %4330 = vset.pattern.permute.xlu1 %v7694_v44  ;;  %1849 = vperm.xlu0 %4332, %v5363_v51   ;;  %v703_v20 = vadd.f32 %v691_v55, %v5571_v2  ;;  %vm2990_vm3 = vcmask 113664  }
 0x22e   : > { %1865 = vperm.xlu1 %4330, %v5344_v49  }
 0x22f   : > { %v1236_v32 = vpop.permute.xlu1 %1235 }
 0x230   : > { %v1254_v61 = vsel %vm1251_vm8, %v1236_v32, %v5532_v58  ;;  %v1278_v11 = vsel %vm1251_vm8, %v5532_v58, %v1236_v32  ;;  %v1210_v32 = vmul.f32 %v7713_v43, %v1176_v23  ;;  %v702_v23 = vadd.f32 %v690_v37, %v5523_v60 }
 0x231   : > { %4337 = vset.pattern.permute.xlu0 %v7714_v34  ;;  %v1310_v36 = vmul.f32 %v5328_v27, %v1254_v61  ;;  %v1311_v58 = vmul.f32 %v5328_v27, %v1278_v11  ;;  %v7715_v61 = vld [vmem:[#allocation25_spill] sm:$0xff]  ;;  %v841_v60 = vsel %vm839_vm4, %v7717_v52, %v5207_v21 }
 0x232   : > { %4331 = vset.pattern.permute.xlu1 %v7714_v34  ;;  %1936 = vperm.xlu0 %4337, %v5358_v28   ;;  %v894_v11 = vmul.f32 %v7715_v61, %v840_v5  ;;  %v1222_v31 = vadd.f32 %v1210_v32, %v1119_v8  ;;  %v805_v26 = vadd.f32 %v793_v40, %v702_v23  ;;  %v7718_v32 = vmov 3  }
 0x233   : > { %v1240_v15 = vpop.permute.xlu1 %1239  ;;  %1944 = vperm.xlu1 %4331, %v5344_v49   ;;  %v1322_v43 = vadd.f32 %v1310_v36, %v1219_v35  ;;  %v7719_v36 = vld [vmem:[#allocation26_spill] sm:$0xff]  ;;  %v997_v8 = vmul.f32 %v7720_v57, %v943_v50  ;;  %v998_v35 = vmul.f32 %v7720_v57, %v967_v30 }
 0x234   : > { %v1255_v53 = vsel %vm1251_vm8, %v1240_v15, %v1242_v22  ;;  %v1279_v56 = vsel %vm1251_vm8, %v1242_v22, %v1240_v15  ;;  %v864_v22 = vsel %vm839_vm4, %v7709_v38, %v7710_v17  ;;  %v1125_v15 = vpop.permute.xlu0 %1124  ;;  %v1323_v38 = vadd.f32 %v1311_v58, %v1220_v10 }
 0x235   : > { %v1312_v25 = vmul.f32 %v5392_v0, %v1255_v53  ;;  %v1313_v27 = vmul.f32 %v5392_v0, %v1279_v56  ;;  %v794_v17 = vmul.f32 %v7716_v19, %v762_v1  ;;  %v895_v0 = vmul.f32 %v7715_v61, %v864_v22 }
 0x236   : > { %1928 = vperm.xlu0 %4337, %v5363_v51   ;;  %v906_v7 = vadd.f32 %v894_v11, %v5511_v47  ;;  %v865_v47 = vsel %vm839_vm4, %v5207_v21, %v7717_v52  ;;  %v896_v58 = vmul.f32 %v7719_v36, %v841_v60  ;;  %v1070_v21 = vsel %vm1045_vm6, %v5440_v33, %v5519_v59 }
 0x237   : > { %v5627_v4 = vpop.permute.xlu1 %1283  ;;  %1948 = vperm.xlu1 %4331, %v5349_v12   ;;  %v1324_v5 = vadd.f32 %v1312_v25, %v1221_v42  ;;  %v1325_v6 = vadd.f32 %v1313_v27, %v1222_v31  ;;  %v907_v2 = vadd.f32 %v895_v0, %v5507_v62  ;;  %v1046_v62 = vsel %vm1045_vm6, %v5519_v59, %v5440_v33 }
 0x238   : > { %v1129_v45 = vpop.permute.xlu0 %1128  ;;  %v944_v25 = vsel %vm942_vm5, %v5297_v14, %v5394_v54  ;;  %v968_v27 = vsel %vm942_vm5, %v5394_v54, %v5297_v14  ;;  %v897_v61 = vmul.f32 %v7719_v36, %v865_v47  ;;  %v806_v33 = vadd.f32 %v794_v17, %v703_v20 }
 0x239   : > { %v1009_v14 = vadd.f32 %v997_v8, %v906_v7  ;;  %v1010_v54 = vadd.f32 %v998_v35, %v907_v2  ;;  %v1047_v17 = vsel %vm1045_vm6, %v5547_v29, %v5490_v46  ;;  %v1071_v0 = vsel %vm1045_vm6, %v5490_v46, %v5547_v29 }
 0x23a   : > { %4341 = vset.pattern.permute.xlu0 %v7718_v32  ;;  %v1102_v46 = vmul.f32 %v5271_v24, %v1047_v17  ;;  %v1103_v29 = vmul.f32 %v5271_v24, %v1071_v0  ;;  %v4442_v17 = vld [vmem:[%s5189_s30 + $0x8] sm:$0xff]   ;;  %v4439_v0 = vld [vmem:[%s7450_s3 + $0x20] sm:$0xff]   ;;  %vm3069_vm4 = vcmask 97280   ;;  %vm3148_vm5 = vcmask 89088  }
 0x23b   : > { %4333 = vset.pattern.permute.xlu1 %v7694_v44  ;;  %2027 = vperm.xlu0 %4341, %v5349_v12   ;;  %vm3227_vm6 = vcmask 80896  }
 0x23c   : > { %v1340_v9 = vpop.permute.xlu1 %1339  ;;  %1861 = vperm.xlu1 %4333, %v5372_v13   ;;  %v1228_v59 = vpop.permute.xlu0 %1227 }
 0x23d   : > { %v1358_v39 = vadd.f32 %v1340_v9, %v1322_v43  ;;  %v1359_v37 = vadd.f32 %v1340_v9, %v1323_v38  ;;  %v7721_v9 = vld [vmem:[#allocation67_spill] sm:$0xff] }
 0x23e   : > { %v1100_v31 = vmul.f32 %v7721_v9, %v1046_v62  ;;  %v1101_v43 = vmul.f32 %v7721_v9, %v1070_v21  ;;  %v7722_v38 = vld [vmem:[#allocation31_spill] sm:$0xff] }
 0x23f   : > { %v1370_v41 = vmax.f32 %v1358_v39, 0.0  ;;  %v1371_v16 = vmax.f32 %v1359_v37, 0.0  ;;  %2019 = vperm.xlu0 %4341, %v5372_v13   ;;  %v999_v19 = vmul.f32 %v7722_v38, %v944_v25  ;;  %v1000_v40 = vmul.f32 %v7722_v38, %v968_v27  ;;  %v4438_v38 = vld [vmem:[%s7450_s3 + $0x18] sm:$0xff]  }
 0x240   : > { %v1344_v48 = vpop.permute.xlu1 %1343  ;;  %4334 = vset.pattern.permute.xlu1 %v7718_v32  ;;  %v908_v39 = vadd.f32 %v896_v58, %v805_v26  ;;  %v909_v37 = vadd.f32 %v897_v61, %v806_v33  ;;  %v7724_v33 = vld [vmem:[#allocation72_spill] sm:$0xff] }
 0x241   : > { %v1360_v53 = vadd.f32 %v1344_v48, %v1324_v5  ;;  %v1361_v56 = vadd.f32 %v1344_v48, %v1325_v6  ;;  %2023 = vperm.xlu1 %4334, %v5344_v49   ;;  %v1112_v5 = vadd.f32 %v1100_v31, %v1009_v14  ;;  %v1113_v6 = vadd.f32 %v1101_v43, %v1010_v54 }
 0x242   : > { %v1011_v50 = vadd.f32 %v999_v19, %v908_v39  ;;  %v1012_v48 = vadd.f32 %v1000_v40, %v909_v37  ;;  %v7725_v54 = vmov 5   ;;  %v4440_v19 = vld [vmem:[%s5189_s30 + $0x10] sm:$0xff]   ;;  %v7554_v40 = vmov 0.0   ;;  %v4446_v37 = vld [vmem:[%s7450_s3 + $0x58] sm:$0xff]  }
 0x243   : > { %v1372_v1 = vmax.f32 %v1360_v53, 0.0  ;;  %v1373_v22 = vmax.f32 %v1361_v56, 0.0  ;;  %2007 = vperm.xlu0 %4341, %v5363_v51   ;;  %v4445_v39 = vld [vmem:[%s7450_s3 + $0x50] sm:$0xff]  }
 0x244   : > { %v1127_v10 = vpop.permute.xlu1 %1126  ;;  %v1114_v24 = vadd.f32 %v1102_v46, %v1011_v50 }
 0x245   : > { %v1380_v55 = vpack.c.bf16 %v1372_v1, %v1370_v41  ;;  %v1381_v23 = vpack.c.bf16 %v1373_v22, %v1371_v16  ;;  %v1149_v11 = vsel %vm1148_vm7, %v1125_v15, %v1127_v10  ;;  %v1173_v42 = vsel %vm1148_vm7, %v1127_v10, %v1125_v15  ;;  %4335 = vset.pattern.permute.xlu1 %v7714_v34 }
 0x246   : > { %v1203_v52 = vmul.f32 %v5374_v18, %v1149_v11  ;;  %v1204_v60 = vmul.f32 %v5374_v18, %v1173_v42  ;;  %1940 = vperm.xlu1 %4335, %v5372_v13   ;;  %v1232_v18 = vpop.permute.xlu0 %1231  ;;  %v7723_v41 = vmov 4   ;;  %v1115_v16 = vadd.f32 %v1103_v29, %v1012_v48 }
 0x247   : > { %1444 = vmatprep.subr.bf16.mxu1 %v1381_v23  ;;  %4345 = vset.pattern.permute.xlu0 %v7723_v41 }
 0x248   : > { %1445 = vmatpush1.bf16.msra.mxu1 %v1380_v55  ;;  %v1131_v15 = vpop.permute.xlu1 %1130  ;;  %v1215_v26 = vadd.f32 %v1203_v52, %v1112_v5  ;;  %v1216_v53 = vadd.f32 %v1204_v60, %v1113_v6  ;;  %2106 = vperm.xlu0 %4345, %v5349_v12   ;;  %v4443_v52 = vld [vmem:[%s5189_s30] sm:$0xff]   ;;  %v7727_v60 = vmov 6   ;;  %v7728_v5 = vmov 7  }
 0x249   : > { %v1150_v20 = vsel %vm1148_vm7, %v1129_v45, %v1131_v15  ;;  %v1174_v7 = vsel %vm1148_vm7, %v1131_v15, %v1129_v45  ;;  %v7726_v15 = vmov 0   ;;  %v7729_v6 = vmov 8  }
 0x24a   : > { %v1205_v45 = vmul.f32 %v5492_v63, %v1150_v20  ;;  %v1206_v47 = vmul.f32 %v5492_v63, %v1174_v7  ;;  %4336 = vset.pattern.permute.xlu1 %v7723_v41  ;;  %v1332_v63 = vpop.permute.xlu0 %1331  ;;  %vm3306_vm7 = vcmask 64512  }
 0x24b   : > { %2102 = vperm.xlu1 %4336, %v5344_v49  }
 0x24c   : > { %v1230_v30 = vpop.permute.xlu1 %1229  ;;  %v1217_v62 = vadd.f32 %v1205_v45, %v1114_v24  ;;  %2098 = vperm.xlu0 %4345, %v5372_v13  }
 0x24d   : > { %v1252_v56 = vsel %vm1251_vm8, %v1228_v59, %v1230_v30  ;;  %v1276_v2 = vsel %vm1251_vm8, %v1230_v30, %v1228_v59 }
 0x24e   : > { %v1306_v36 = vmul.f32 %v5627_v4, %v1252_v56  ;;  %v1307_v58 = vmul.f32 %v5627_v4, %v1276_v2  ;;  %v1218_v4 = vadd.f32 %v1206_v47, %v1115_v16 }
 0x24f   : > { %4338 = vset.pattern.permute.xlu1 %v7694_v44 }
 0x250   : > { %v1234_v1 = vpop.permute.xlu1 %1233  ;;  %v1318_v22 = vadd.f32 %v1306_v36, %v1215_v26  ;;  %v1319_v57 = vadd.f32 %v1307_v58, %v1216_v53  ;;  %1853 = vperm.xlu1 %4338, %v7724_v33   ;;  %2086 = vperm.xlu0 %4345, %v5363_v51  }
 0x251   : > { %v1253_v8 = vsel %vm1251_vm8, %v1232_v18, %v1234_v1  ;;  %v1277_v35 = vsel %vm1251_vm8, %v1234_v1, %v1232_v18  ;;  %vm3385_vm8 = vcmask 56320  }
 0x252   : > { %v1308_v21 = vmul.f32 %v5612_v3, %v1253_v8  ;;  %v1309_v10 = vmul.f32 %v5612_v3, %v1277_v35  ;;  %v1354_v25 = vadd.f32 %v1332_v63, %v1318_v22  ;;  %v1355_v27 = vadd.f32 %v1332_v63, %v1319_v57 }
 0x254   : > { %v1320_v55 = vadd.f32 %v1308_v21, %v1217_v62  ;;  %v1321_v23 = vadd.f32 %v1309_v10, %v1218_v4  ;;  %v1336_v61 = vpop.permute.xlu1 %1335  ;;  %v1366_v59 = vmax.f32 %v1354_v25, 0.0  ;;  %v1367_v9 = vmax.f32 %v1355_v27, 0.0  ;;  %4339 = vset.pattern.permute.xlu1 %v7718_v32  ;;  %4349 = vset.pattern.permute.xlu0 %v7725_v54 }
 0x255   : > { %2015 = vperm.xlu1 %4339, %v5358_v28   ;;  %2177 = vperm.xlu0 %4349, %v5372_v13  }
 0x256   : > { %v1356_v11 = vadd.f32 %v1336_v61, %v1320_v55  ;;  %v1357_v42 = vadd.f32 %v1336_v61, %v1321_v23 }
 0x258   : > { %v1368_v31 = vmax.f32 %v1356_v11, 0.0  ;;  %v1369_v3 = vmax.f32 %v1357_v42, 0.0 }
 0x259   : > { %4340 = vset.pattern.permute.xlu1 %v7725_v54  ;;  %2165 = vperm.xlu0 %4349, %v5363_v51   ;;  %v4441_v51 = vld [vmem:[%s7450_s3 + $0x28] sm:$0xff]  }
 0x25a   : > { %v1378_v43 = vpack.c.bf16 %v1368_v31, %v1366_v59  ;;  %v1379_v14 = vpack.c.bf16 %v1369_v3, %v1367_v9  ;;  %2181 = vperm.xlu1 %4340, %v5344_v49  }
 0x25c   : > { %1446 = vmatprep.subr.bf16.mxu1 %v1379_v14 }
 0x25d   : > { %1447 = vmatpush1.bf16.msra.mxu1 %v1378_v43  ;;  %4353 = vset.pattern.permute.xlu0 %v7727_v60 }
 0x25e   : > { %4121 = vmatprep.subr.bf16.mxu1 %v7554_v40  ;;  %2185 = vperm.xlu1 %4340, %v5349_v12  }
 0x25f   : > { %2255 = vperm.xlu0 %4353, %v5372_v13   ;;  %v4444_v13 = vld [vmem:[%s7450_s3 + $0x48] sm:$0xff]  }
 0x260   : > { %3960 = vmatmul.mubr.msk.bf16.vlgmr.msra.gmra.mxu1 %vm373_vm0, %v4438_v38 }
 0x261   : > { %1474 = vmatprep.mubr.bf16.mxu1 %v7726_v15  ;;  %4122 = vmatpush3.bf16.msra.mxu1 %v4440_v19 }
 0x262   : > { %4123 = vmatprep.subr.bf16.mxu1 %v7554_v40  ;;  %4342 = vset.pattern.permute.xlu1 %v7714_v34 }
 0x263   : > { %1932 = vperm.xlu1 %4342, %v7724_v33  }
 0x265   : > { %4124 = vmatpush3.bf16.msra.mxu1 %v4442_v17 }
 0x266   : > { %4125 = vmatprep.subr.bf16.mxu1 %v7554_v40 }
 0x267   : > { %4343 = vset.pattern.permute.xlu1 %v7723_v41 }
 0x268   : > { %3961 = vmatmul.mubr.msk.bf16.gmra.mxu1 %vm373_vm0, %v4439_v0  ;;  %2094 = vperm.xlu1 %4343, %v5358_v28  }
 0x269   : > { %1484 = vmatprep.mubr.bf16.mxu1 %v7726_v15  ;;  %4126 = vmatpush3.bf16.msra.mxu1 %v4443_v52 }
 0x26a   : > { %4157 = vmatprep.subr.bf16.mxu1 %v7554_v40 }
 0x26c   : > { %4344 = vset.pattern.permute.xlu1 %v7727_v60 }
 0x26d   : > { %2259 = vperm.xlu1 %4344, %v5344_v49  }
 0x270   : > { %3962 = vmatmul.mubr.msk.bf16.gmra.mxu1 %vm373_vm0, %v4441_v51  ;;  %v5807_v20 = vpop.permute.xlu1 %1656 }
 0x271   : > { %4127 = vmatprep.mubr.msk.bf16.mxu1 %vm4515_vm9, %v7554_v40  ;;  %2263 = vperm.xlu1 %4344, %v5349_v12  }
 0x274   : > { %v5809_v7 = vpop.permute.xlu1 %1646 }
 0x275   : > { %4346 = vset.pattern.permute.xlu1 %v7718_v32 }
 0x276   : > { %2011 = vperm.xlu1 %4346, %v7724_v33  }
 0x278   : > { %4128 = vmatmul.mubr.msk.bf16.vlgmr.msra.gmra.mxu1 %vm373_vm0, %v4444_v13  ;;  %v5811_v50 = vpop.permute.xlu1 %1651 }
 0x279   : > { %4131 = vmatprep.mubr.msk.bf16.mxu1 %vm4515_vm9, %v7554_v40 }
 0x27a   : > { %4347 = vset.pattern.permute.xlu1 %v7725_v54 }
 0x27b   : > { %2173 = vperm.xlu1 %4347, %v5358_v28  }
 0x27c   : > { %v1642_v48 = vpop.permute.xlu1 %1641 }
 0x27f   : > { %4348 = vset.pattern.permute.xlu1 %v7728_v5 }
 0x280   : > { %4132 = vmatmul.mubr.msk.bf16.gmra.mxu1 %vm373_vm0, %v4445_v39  ;;  %2338 = vperm.xlu1 %4348, %v5344_v49  }
 0x281   : > { %4135 = vmatprep.mubr.msk.bf16.mxu1 %vm4515_vm9, %v7554_v40 }
 0x284   : > { %2342 = vperm.xlu1 %4348, %v5349_v12  }
 0x288   : > { %4136 = vmatmul.mubr.msk.bf16.gmra.mxu1 %vm373_vm0, %v4446_v37  ;;  %4350 = vset.pattern.permute.xlu1 %v7723_v41 }
 0x289   : > { %4163 = vmatprep.mubr.msk.bf16.mxu1 %vm4515_vm9, %v7554_v40  ;;  %2090 = vperm.xlu1 %4350, %v7724_v33  }
 0x28d   : > { %4351 = vset.pattern.permute.xlu1 %v7727_v60 }
 0x28e   : > { %2251 = vperm.xlu1 %4351, %v5358_v28   ;;  %v1390_v28 = vpop.permute.xlu1 %1389 }
 0x292   : > { %4352 = vset.pattern.permute.xlu1 %v7729_v6 }
 0x293   : > { %2417 = vperm.xlu1 %4352, %v5344_v49   ;;  %v1394_v46 = vpop.permute.xlu1 %1393  ;;  %v5815_v49 = vpop.permute.xlu0 %1661 }
 0x297   : > { %2421 = vperm.xlu1 %4352, %v5349_v12   ;;  %v1402_v29 = vpop.permute.xlu1 %1401  ;;  %v1637_v53 = vpop.permute.xlu0 %1636 }
 0x29b   : > { %4354 = vset.pattern.permute.xlu1 %v7725_v54  ;;  %v1386_v58 = vpop.permute.xlu0 %1385 }
 0x29c   : > { %2169 = vperm.xlu1 %4354, %v7724_v33   ;;  %v5813_v30 = vpop.permute.xlu1 %1770 }
 0x29d   : > { %7730 = vst [vmem:[#allocation34_spill] sm:$0xff] %v5813_v30 }
 0x29f   : > { %v1398_v1 = vpop.permute.xlu0 %1397 }
 0x2a0   : > { %4355 = vset.pattern.permute.xlu1 %v7728_v5  ;;  %v5817_v12 = vpop.permute.xlu1 %1778 }
 0x2a1   : > { %7731 = vst [vmem:[#allocation33_spill] sm:$0xff] %v5817_v12 }
 0x2a3   : > { %v1406_v63 = vpop.permute.xlu0 %1405 }
 0x2a4   : > { %v5819_v2 = vpop.permute.xlu1 %1786 }
 0x2a9   : > { %v5821_v36 = vpop.permute.xlu1 %1865 }
 0x2ae   : > { %v5823_v57 = vpop.permute.xlu1 %1944 }
 0x2b2   : > { %v5825_v25 = vpop.permute.xlu1 %1948 }
 0x2b7   : > { %v5827_v14 = vpop.permute.xlu1 %1861 }
 0x2b8   : > { %7732 = vst [vmem:[#allocation38_spill] sm:$0xff] %v5827_v14 }
 0x320   : > { %v1466_v18 = vpop.f32.mrf.mxu1 }
 0x322   : > { %v1468_v26 = vpop.f32.mrf.mxu1 }
 0x323   : > { %v1469_v0 = vadd.f32 %v1468_v26, %v1386_v58 }
 0x324   : > { %v1470_v56 = vpop.f32.mrf.mxu1 }
 0x325   : > { %v1471_v39 = vadd.f32 %v1470_v56, %v1390_v28  ;;  %v1496_v26 = vmax.f32 %v1469_v0, 0.0 }
 0x326   : > { %v1472_v45 = vpop.f32.mrf.mxu1 }
 0x327   : > { %v1473_v11 = vadd.f32 %v1472_v45, %v1390_v28  ;;  %v1497_v28 = vmax.f32 %v1471_v39, 0.0 }
 0x328   : > { %v1476_v47 = vpop.f32.mrf.mxu1 }
 0x329   : > { %v1477_v38 = vadd.f32 %v1476_v47, %v1394_v46 }
 0x32a   : > { %v1478_v24 = vpop.f32.mrf.mxu1 }
 0x32b   : > { %v1479_v23 = vadd.f32 %v1478_v24, %v1394_v46  ;;  %v1498_v24 = vmax.f32 %v1473_v11, 0.0  ;;  %v1499_v46 = vmax.f32 %v1477_v38, 0.0 }
 0x32c   : > { %v1480_v16 = vpop.f32.mrf.mxu1 }
 0x32d   : > { %v1481_v42 = vadd.f32 %v1480_v16, %v1398_v1  ;;  %v1500_v52 = vmax.f32 %v1479_v23, 0.0 }
 0x32e   : > { %v1482_v22 = vpop.f32.mrf.mxu1 }
 0x32f   : > { %v1483_v4 = vadd.f32 %v1482_v22, %v1398_v1  ;;  %v1501_v37 = vmax.f32 %v1481_v42, 0.0 }
 0x330   : > { %v1486_v8 = vpop.f32.mrf.mxu1 }
 0x331   : > { %v1487_v27 = vadd.f32 %v1486_v8, %v1402_v29  ;;  %v1502_v9 = vmax.f32 %v1483_v4, 0.0  ;;  %v5835_v8 = vpop.permute.xlu1 %2023  ;;  %v1509_v56 = vpack.c.bf16 %v1501_v37, %v1499_v46 }
 0x332   : > { %v1488_v35 = vpop.f32.mrf.mxu1 }
 0x333   : > { %v1489_v21 = vadd.f32 %v1488_v35, %v1402_v29  ;;  %v1503_v19 = vmax.f32 %v1487_v27, 0.0  ;;  %v1510_v16 = vpack.c.bf16 %v1502_v9, %v1500_v52 }
 0x334   : > { %v1490_v62 = vpop.f32.mrf.mxu1 }
 0x335   : > { %v1491_v10 = vadd.f32 %v1490_v62, %v1406_v63  ;;  %v1504_v31 = vmax.f32 %v1489_v21, 0.0  ;;  %v5845_v4 = vpop.permute.xlu1 %1940 }
 0x336   : > { %v1492_v55 = vpop.f32.mrf.mxu1  ;;  %7735 = vst [vmem:[#allocation2_spill] sm:$0xff] %v5845_v4 }
 0x337   : > { %v1493_v61 = vadd.f32 %v1492_v55, %v1406_v63  ;;  %v1505_v33 = vmax.f32 %v1491_v10, 0.0  ;;  %v1508_v63 = vpack.c.bf16 %v1498_v24, %v1496_v26  ;;  %v5852_v55 = vpop.permute.xlu0 %1774 }
 0x338   : > { %v1740_v59 = vpop.f32.mrf.mxu1  ;;  %7736 = vst [vmem:[#allocation16_spill] sm:$0xff] %v5852_v55 }
 0x339   : > { %v1506_v3 = vmax.f32 %v1493_v61, 0.0  ;;  %v1741_v43 = vadd.f32 %v1740_v59, %v1637_v53  ;;  %v1511_v29 = vpack.c.bf16 %v1505_v33, %v1503_v19  ;;  %v1467_v53 = vadd.f32 %v1466_v18, %v1386_v58  ;;  %v5854_v23 = vpop.permute.xlu1 %2102 }
 0x33a   : > { %v4129_v17 = vpop.f32.mrf.mxu1 }
 0x33b   : > { %v1512_v51 = vpack.c.bf16 %v1506_v3, %v1504_v31  ;;  %v5829_v13 = vmax.f32 %v1741_v43, 0.0  ;;  %v5861_v33 = vpop.permute.xlu0 %1790 }
 0x33c   : > { %v1743_v45 = vpop.f32.mrf.mxu1 }
 0x33d   : > { %7733 = vst [vmem:[#allocation7_spill] sm:$0xff] %v5829_v13  ;;  %v1744_v1 = vadd.f32 %v1743_v45, %v1642_v48  ;;  %1805 = vrot.lane.b32.xlu0 %v5829_v13, %s4505_s20  ;;  %1547 = vmatprep.subr.bf16.mxu0 %v1512_v51  ;;  %v1495_v48 = vmax.f32 %v1467_v53, 0.0  ;;  %v5867_v59 = vpop.permute.xlu1 %1853 }
 0x33e   : > { %1548 = vmatpush1.bf16.msra.mxu0 %v1511_v29  ;;  %v4130_v47 = vpop.f32.mrf.mxu1  ;;  %7737 = vst [vmem:[#allocation46_spill] sm:$0xff] %v5867_v59  ;;  %v6088_v59 = vld [vmem:[%s7451_s4 + $0x40] sm:$0xff] }
 0x33f   : > { %v5833_v22 = vmax.f32 %v1744_v1, 0.0  ;;  %1549 = vmatprep.subr.bf16.mxu0 %v1510_v16  ;;  %v1507_v58 = vpack.c.bf16 %v1497_v28, %v1495_v48  ;;  %v5876_v31 = vpop.permute.xlu0 %1782 }
 0x340   : > { %v1748_v35 = vpop.f32.mrf.mxu1  ;;  %7739 = vst [vmem:[#allocation36_spill] sm:$0xff] %v5876_v31 }
 0x341   : > { %7734 = vst [vmem:[#allocation4_spill] sm:$0xff] %v5833_v22  ;;  %1823 = vrot.lane.b32.xlu0 %v5829_v13, %s4516_s9  ;;  %1807 = vrot.lane.b32.xlu1 %v5833_v22, %s4505_s20  ;;  %v1749_v42 = vadd.f32 %v1748_v35, %v5809_v7  ;;  %v5878_v3 = vpop.permute.xlu1 %2015 }
 0x342   : > { %1550 = vmatpush1.bf16.msra.mxu0 %v1509_v56  ;;  %v4133_v18 = vpop.f32.mrf.mxu1  ;;  %7740 = vst [vmem:[#allocation35_spill] sm:$0xff] %v5878_v3 }
 0x343   : > { %1551 = vmatprep.subr.bf16.mxu0 %v1508_v63  ;;  %v5869_v9 = vmax.f32 %v1749_v42, 0.0  ;;  %v5886_v38 = vpop.permute.xlu0 %1869 }
 0x344   : > { %v1751_v62 = vpop.f32.mrf.mxu1 }
 0x345   : > { %1884 = vrot.lane.b32.xlu0 %v5829_v13, %s4504_s17  ;;  %1825 = vrot.lane.b32.xlu1 %v5833_v22, %s4516_s9  ;;  %7738 = vst [vmem:[#allocation49_spill] sm:$0xff] %v5869_v9  ;;  %v1752_v7 = vadd.f32 %v1751_v62, %v5811_v50  ;;  %v5892_v50 = vpop.permute.xlu1 %2181 }
 0x346   : > { %1552 = vmatpush1.bf16.msra.mxu0 %v1507_v58  ;;  %v4134_v21 = vpop.f32.mrf.mxu1 }
 0x347   : > { %4139 = vmatprep.subr.bf16.mxu0 %v7554_v40  ;;  %v5884_v43 = vmax.f32 %v1752_v7, 0.0  ;;  %v5898_v19 = vpop.permute.xlu0 %1857 }
 0x348   : > { %v1756_v10 = vpop.f32.mrf.mxu1  ;;  %7742 = vst [vmem:[#allocation20_spill] sm:$0xff] %v5898_v19 }
 0x349   : > { %1902 = vrot.lane.b32.xlu0 %v5829_v13, %s4517_s10  ;;  %1886 = vrot.lane.b32.xlu1 %v5833_v22, %s4504_s17  ;;  %7741 = vst [vmem:[#allocation14_spill] sm:$0xff] %v5884_v43  ;;  %v5900_v17 = vpop.permute.xlu1 %2185  ;;  %v1757_v37 = vadd.f32 %v1756_v10, %v5807_v20 }
 0x34a   : > { %v4137_v27 = vpop.f32.mrf.mxu1 }
 0x34b   : > { %v5908_v52 = vpop.permute.xlu0 %1849  ;;  %v5935_v24 = vmax.f32 %v1757_v37, 0.0 }
 0x34c   : > { %v1759_v61 = vpop.f32.mrf.mxu1  ;;  %7744 = vst [vmem:[#allocation21_spill] sm:$0xff] %v5908_v52  ;;  %v6140_v52 = vld [vmem:[%s7451_s4 + $0x38] sm:$0xff] }
 0x34d   : > { %1963 = vrot.lane.b32.xlu0 %v5829_v13, %s4518_s11  ;;  %1904 = vrot.lane.b32.xlu1 %v5833_v22, %s4517_s10  ;;  %v5906_v0 = vpop.permute.xlu1 %1932  ;;  %v1760_v1 = vadd.f32 %v1759_v61, %v5815_v49  ;;  %7785 = vst [vmem:[#allocation8_spill] sm:$0xff] %v6140_v52 }
 0x34e   : > { %v4138_v11 = vpop.f32.mrf.mxu1  ;;  %7743 = vst [vmem:[#allocation3_spill] sm:$0xff] %v5906_v0 }
 0x34f   : > { %v5920_v39 = vpop.permute.xlu0 %1936  ;;  %v5952_v46 = vmax.f32 %v1760_v1, 0.0  ;;  %v6047_v1 = vld [vmem:[%s7451_s4 + $0x30] sm:$0xff] }
 0x350   : > { %7746 = vst [vmem:[#allocation43_spill] sm:$0xff] %v5920_v39  ;;  %7763 = vst [vmem:[#allocation17_spill] sm:$0xff] %v6047_v1  ;;  %v7796_v39 = vmov 9  }
 0x351   : > { %1981 = vrot.lane.b32.xlu0 %v5829_v13, %s4519_s12  ;;  %1965 = vrot.lane.b32.xlu1 %v5833_v22, %s4518_s11  ;;  %v5918_v51 = vpop.permute.xlu1 %2094 }
 0x352   : > { %7745 = vst [vmem:[#allocation54_spill] sm:$0xff] %v5918_v51 }
 0x353   : > { %v5929_v45 = vpop.permute.xlu0 %1928 }
 0x354   : > { %7747 = vst [vmem:[#allocation24_spill] sm:$0xff] %v5929_v45 }
 0x355   : > { %1983 = vrot.lane.b32.xlu1 %v5833_v22, %s4519_s12  ;;  %1827 = vrot.lane.b32.xlu0 %v5869_v9, %s4516_s9  ;;  %v5927_v29 = vpop.permute.xlu1 %2259 }
 0x357   : > { %v5943_v16 = vpop.permute.xlu0 %2027 }
 0x359   : > { %1888 = vrot.lane.b32.xlu0 %v5869_v9, %s4504_s17  ;;  %1809 = vrot.lane.b32.xlu1 %v5869_v9, %s4505_s20  ;;  %v5941_v20 = vpop.permute.xlu1 %2263 }
 0x35b   : > { %v5954_v47 = vpop.permute.xlu0 %2019 }
 0x35c   : > { %7749 = vst [vmem:[#allocation5_spill] sm:$0xff] %v5954_v47 }
 0x35d   : > { %1906 = vrot.lane.b32.xlu0 %v5869_v9, %s4517_s10  ;;  %1811 = vrot.lane.b32.xlu1 %v5884_v43, %s4505_s20  ;;  %v5950_v53 = vpop.permute.xlu1 %2011 }
 0x35e   : > { %7748 = vst [vmem:[#allocation9_spill] sm:$0xff] %v5950_v53 }
 0x35f   : > { %v5966_v49 = vpop.permute.xlu0 %2007 }
 0x360   : > { %7751 = vst [vmem:[#allocation39_spill] sm:$0xff] %v5966_v49 }
 0x361   : > { %1967 = vrot.lane.b32.xlu0 %v5869_v9, %s4518_s11  ;;  %1829 = vrot.lane.b32.xlu1 %v5884_v43, %s4516_s9  ;;  %v5960_v26 = vpop.permute.xlu1 %2173 }
 0x362   : > { %7750 = vst [vmem:[#allocation12_spill] sm:$0xff] %v5960_v26  ;;  %v7793_v26 = vmov 10  }
 0x363   : > { %v5974_v56 = vpop.permute.xlu0 %2106 }
 0x365   : > { %1985 = vrot.lane.b32.xlu0 %v5869_v9, %s4519_s12  ;;  %1890 = vrot.lane.b32.xlu1 %v5884_v43, %s4504_s17  ;;  %v5972_v28 = vpop.permute.xlu1 %2338 }
 0x367   : > { %v5986_v63 = vpop.permute.xlu0 %2098 }
 0x368   : > { %7752 = vst [vmem:[#allocation40_spill] sm:$0xff] %v5986_v63  ;;  %v6177_v63 = vld [vmem:[%s7451_s4 + $0x50] sm:$0xff] }
 0x369   : > { %2046 = vrot.lane.b32.xlu0 %v5869_v9, %s4520_s13  ;;  %1908 = vrot.lane.b32.xlu1 %v5884_v43, %s4517_s10  ;;  %v5980_v35 = vpop.permute.xlu1 %2342 }
 0x36b   : > { %v5994_v18 = vpop.permute.xlu0 %2086 }
 0x36c   : > { %7754 = vst [vmem:[#allocation10_spill] sm:$0xff] %v5994_v18 }
 0x36d   : > { %2064 = vrot.lane.b32.xlu0 %v5869_v9, %s4521_s14  ;;  %1969 = vrot.lane.b32.xlu1 %v5884_v43, %s4518_s11  ;;  %v5992_v48 = vpop.permute.xlu1 %2090 }
 0x36e   : > { %7753 = vst [vmem:[#allocation27_spill] sm:$0xff] %v5992_v48 }
 0x36f   : > { %v6006_v62 = vpop.permute.xlu0 %2177 }
 0x370   : > { %7756 = vst [vmem:[#allocation59_spill] sm:$0xff] %v6006_v62 }
 0x371   : > { %2125 = vrot.lane.b32.xlu0 %v5869_v9, %s4522_s15  ;;  %1987 = vrot.lane.b32.xlu1 %v5884_v43, %s4519_s12  ;;  %v6000_v58 = vpop.permute.xlu1 %2251 }
 0x372   : > { %7755 = vst [vmem:[#allocation55_spill] sm:$0xff] %v6000_v58 }
 0x373   : > { %v6014_v10 = vpop.permute.xlu0 %2165 }
 0x374   : > { %7757 = vst [vmem:[#allocation11_spill] sm:$0xff] %v6014_v10 }
 0x375   : > { %2143 = vrot.lane.b32.xlu0 %v5869_v9, %s4523_s16  ;;  %2048 = vrot.lane.b32.xlu1 %v5884_v43, %s4520_s13  ;;  %v6012_v21 = vpop.permute.xlu1 %2417 }
 0x377   : > { %v6026_v61 = vpop.permute.xlu0 %2255 }
 0x378   : > { %7758 = vst [vmem:[#allocation61_spill] sm:$0xff] %v6026_v61 }
 0x379   : > { %2066 = vrot.lane.b32.xlu1 %v5884_v43, %s4521_s14  ;;  %1831 = vrot.lane.b32.xlu0 %v5935_v24, %s4516_s9  ;;  %v6020_v27 = vpop.permute.xlu1 %2421 }
 0x37d   : > { %2127 = vrot.lane.b32.xlu1 %v5884_v43, %s4522_s15  ;;  %1910 = vrot.lane.b32.xlu0 %v5935_v24, %s4517_s10  ;;  %v6032_v11 = vpop.permute.xlu1 %2169 }
 0x37e   : > { %7759 = vst [vmem:[#allocation48_spill] sm:$0xff] %v6032_v11  ;;  %v6062_v11 = vld [vmem:[%s7451_s4 + $0x48] sm:$0xff] }
 0x37f   : > { %7766 = vst [vmem:[#allocation53_spill] sm:$0xff] %v6062_v11 }
 0x381   : > { %2145 = vrot.lane.b32.xlu1 %v5884_v43, %s4523_s16  ;;  %1973 = vrot.lane.b32.xlu0 %v5952_v46, %s4518_s11 }
 0x385   : > { %1813 = vrot.lane.b32.xlu1 %v5935_v24, %s4505_s20  ;;  %1991 = vrot.lane.b32.xlu0 %v5952_v46, %s4519_s12 }
 0x389   : > { %1892 = vrot.lane.b32.xlu1 %v5935_v24, %s4504_s17  ;;  %2052 = vrot.lane.b32.xlu0 %v5952_v46, %s4520_s13 }
 0x38d   : > { %1971 = vrot.lane.b32.xlu1 %v5935_v24, %s4518_s11  ;;  %2070 = vrot.lane.b32.xlu0 %v5952_v46, %s4521_s14 }
 0x391   : > { %1989 = vrot.lane.b32.xlu1 %v5935_v24, %s4519_s12  ;;  %2131 = vrot.lane.b32.xlu0 %v5952_v46, %s4522_s15 }
 0x395   : > { %2050 = vrot.lane.b32.xlu1 %v5935_v24, %s4520_s13  ;;  %2149 = vrot.lane.b32.xlu0 %v5952_v46, %s4523_s16 }
 0x399   : > { %2068 = vrot.lane.b32.xlu1 %v5935_v24, %s4521_s14  ;;  %2210 = vrot.lane.b32.xlu0 %v5952_v46, %s4506_s21 }
 0x39d   : > { %2129 = vrot.lane.b32.xlu1 %v5935_v24, %s4522_s15  ;;  %2228 = vrot.lane.b32.xlu0 %v5952_v46, %s4524_s24 }
 0x3a1   : > { %2147 = vrot.lane.b32.xlu1 %v5935_v24, %s4523_s16  ;;  %2288 = vrot.lane.b32.xlu0 %v5952_v46, %s4507_s22 }
 0x3a5   : > { %2208 = vrot.lane.b32.xlu1 %v5935_v24, %s4506_s21  ;;  %2306 = vrot.lane.b32.xlu0 %v5952_v46, %s4525_s25 }
 0x3a9   : > { %2226 = vrot.lane.b32.xlu1 %v5935_v24, %s4524_s24  ;;  %2060 = vrot.lane.b32.xlu0 %v5829_v13, %s4521_s14 }
 0x3ad   : > { %2286 = vrot.lane.b32.xlu1 %v5935_v24, %s4507_s22  ;;  %2204 = vrot.lane.b32.xlu0 %v5869_v9, %s4506_s21 }
 0x3af   : > { %v6034_v42 = vpop.permute.xlu0 %1805 }
 0x3b0   : > { %7760 = vst [vmem:[#allocation47_spill] sm:$0xff] %v6034_v42 }
 0x3b1   : > { %2222 = vrot.lane.b32.xlu0 %v5869_v9, %s4524_s24  ;;  %1815 = vrot.lane.b32.xlu1 %v5952_v46, %s4505_s20 }
 0x3b3   : > { %v6040_v7 = vpop.permute.xlu0 %1823  ;;  %v6042_v37 = vpop.permute.xlu1 %1807 }
 0x3b4   : > { %7761 = vst [vmem:[#allocation51_spill] sm:$0xff] %v6040_v7  ;;  %7762 = vst [vmem:[#allocation6_spill] sm:$0xff] %v6042_v37 }
 0x3b5   : > { %2243 = vperm.xlu0 %4353, %v6047_v1   ;;  %1833 = vrot.lane.b32.xlu1 %v5952_v46, %s4516_s9 }
 0x3b7   : > { %v6052_v40 = vpop.permute.xlu0 %1884  ;;  %v6054_v54 = vpop.permute.xlu1 %1825 }
 0x3b8   : > { %7764 = vst [vmem:[#allocation13_spill] sm:$0xff] %v6052_v40  ;;  %7765 = vst [vmem:[#allocation56_spill] sm:$0xff] %v6054_v54 }
 0x3b9   : > { %4356 = vset.pattern.permute.xlu0 %v7728_v5  ;;  %1894 = vrot.lane.b32.xlu1 %v5952_v46, %s4504_s17 }
 0x3ba   : > { %2334 = vperm.xlu0 %4356, %v6062_v11  }
 0x3bb   : > { %v6065_v48 = vpop.permute.xlu0 %1902  ;;  %v6067_v10 = vpop.permute.xlu1 %1886 }
 0x3bc   : > { %7767 = vst [vmem:[#allocation57_spill] sm:$0xff] %v6065_v48  ;;  %7768 = vst [vmem:[#allocation60_spill] sm:$0xff] %v6067_v10 }
 0x3bd   : > { %1912 = vrot.lane.b32.xlu1 %v5952_v46, %s4517_s10 }
 0x3be   : > { %2367 = vrot.lane.b32.xlu0 %v5952_v46, %s4508_s23 }
 0x3bf   : > { %v6073_v53 = vpop.permute.xlu0 %1963  ;;  %v6075_v0 = vpop.permute.xlu1 %1904 }
 0x3c0   : > { %7769 = vst [vmem:[#allocation23_spill] sm:$0xff] %v6073_v53  ;;  %7770 = vst [vmem:[#allocation58_spill] sm:$0xff] %v6075_v0 }
 0x3c1   : > { %2304 = vrot.lane.b32.xlu1 %v5935_v24, %s4525_s25 }
 0x3c2   : > { %2385 = vrot.lane.b32.xlu0 %v5952_v46, %s4526_s6 }
 0x3c3   : > { %v6081_v55 = vpop.permute.xlu0 %1981  ;;  %v6083_v18 = vpop.permute.xlu1 %1965 }
 0x3c4   : > { %7771 = vst [vmem:[#allocation45_spill] sm:$0xff] %v6081_v55  ;;  %7772 = vst [vmem:[#allocation63_spill] sm:$0xff] %v6083_v18 }
 0x3c5   : > { %2330 = vperm.xlu1 %4355, %v6088_v59  }
 0x3c6   : > { %2121 = vrot.lane.b32.xlu0 %v5829_v13, %s4522_s15 }
 0x3c7   : > { %v6093_v10 = vpop.permute.xlu1 %1983  ;;  %v6095_v0 = vpop.permute.xlu0 %1827 }
 0x3c8   : > { %7773 = vst [vmem:[#allocation50_spill] sm:$0xff] %v6093_v10  ;;  %7774 = vst [vmem:[#allocation15_spill] sm:$0xff] %v6095_v0 }
 0x3c9   : > { %2042 = vrot.lane.b32.xlu1 %v5829_v13, %s4520_s13 }
 0x3ca   : > { %2139 = vrot.lane.b32.xlu0 %v5829_v13, %s4523_s16  ;;  %4357 = vset.pattern.permute.xlu1 %v7727_v60 }
 0x3cb   : > { %v6102_v18 = vpop.permute.xlu0 %1888  ;;  %v6104_v49 = vpop.permute.xlu1 %1809 }
 0x3cc   : > { %7775 = vst [vmem:[#allocation44_spill] sm:$0xff] %v6102_v18  ;;  %7776 = vst [vmem:[#allocation37_spill] sm:$0xff] %v6104_v49  ;;  %v4449_v18 = vld [vmem:[%s7450_s3 + $0x40] sm:$0xff]  }
 0x3cd   : > { %2044 = vrot.lane.b32.xlu1 %v5833_v22, %s4520_s13 }
 0x3ce   : > { %2282 = vrot.lane.b32.xlu0 %v5869_v9, %s4507_s22 }
 0x3cf   : > { %v6110_v10 = vpop.permute.xlu0 %1906  ;;  %v6112_v37 = vpop.permute.xlu1 %1811 }
 0x3d0   : > { %7777 = vst [vmem:[#allocation29_spill] sm:$0xff] %v6110_v10  ;;  %7778 = vst [vmem:[#allocation65_spill] sm:$0xff] %v6112_v37 }
 0x3d1   : > { %2062 = vrot.lane.b32.xlu1 %v5833_v22, %s4521_s14 }
 0x3d2   : > { %2300 = vrot.lane.b32.xlu0 %v5869_v9, %s4525_s25 }
 0x3d3   : > { %v6118_v60 = vpop.permute.xlu0 %1967  ;;  %v6120_v54 = vpop.permute.xlu1 %1829 }
 0x3d4   : > { %7779 = vst [vmem:[#allocation52_spill] sm:$0xff] %v6118_v60  ;;  %7780 = vst [vmem:[#allocation19_spill] sm:$0xff] %v6120_v54 }
 0x3d5   : > { %2206 = vrot.lane.b32.xlu1 %v5884_v43, %s4506_s21 }
 0x3d6   : > { %2322 = vperm.xlu0 %4356, %v6047_v1  }
 0x3d7   : > { %v6125_v45 = vpop.permute.xlu0 %1985  ;;  %v6127_v30 = vpop.permute.xlu1 %1890 }
 0x3d8   : > { %7781 = vst [vmem:[#allocation22_spill] sm:$0xff] %v6125_v45  ;;  %7782 = vst [vmem:[#allocation64_spill] sm:$0xff] %v6127_v30  ;;  %v4448_v30 = vld [vmem:[%s7450_s3 + $0x38] sm:$0xff]  }
 0x3d9   : > { %2224 = vrot.lane.b32.xlu1 %v5884_v43, %s4524_s24 }
 0x3da   : > { %4360 = vset.pattern.permute.xlu0 %v7729_v6 }
 0x3db   : > { %v6132_v53 = vpop.permute.xlu0 %2046  ;;  %v6134_v55 = vpop.permute.xlu1 %1908  ;;  %2413 = vperm.xlu0 %4360, %v6062_v11  }
 0x3dc   : > { %7783 = vst [vmem:[#allocation41_spill] sm:$0xff] %v6132_v53  ;;  %7784 = vst [vmem:[#allocation42_spill] sm:$0xff] %v6134_v55 }
 0x3dd   : > { %2247 = vperm.xlu1 %4357, %v6140_v52  }
 0x3df   : > { %v6143_v41 = vpop.permute.xlu0 %2064  ;;  %v6145_v40 = vpop.permute.xlu1 %1969  ;;  %2202 = vrot.lane.b32.xlu0 %v5833_v22, %s4506_s21 }
 0x3e0   : > { %7786 = vst [vmem:[#allocation66_spill] sm:$0xff] %v6143_v41  ;;  %7787 = vst [vmem:[#allocation28_spill] sm:$0xff] %v6145_v40 }
 0x3e1   : > { %2365 = vrot.lane.b32.xlu1 %v5935_v24, %s4508_s23 }
 0x3e2   : > { %4358 = vset.pattern.permute.xlu1 %v7729_v6 }
 0x3e3   : > { %v6152_v48 = vpop.permute.xlu0 %2125  ;;  %v6154_v42 = vpop.permute.xlu1 %1987  ;;  %2220 = vrot.lane.b32.xlu0 %v5833_v22, %s4524_s24 }
 0x3e4   : > { %7788 = vst [vmem:[#allocation71_spill] sm:$0xff] %v6152_v48  ;;  %7789 = vst [vmem:[#allocation69_spill] sm:$0xff] %v6154_v42 }
 0x3e5   : > { %2383 = vrot.lane.b32.xlu1 %v5935_v24, %s4526_s6 }
 0x3e7   : > { %v6160_v7 = vpop.permute.xlu0 %2143  ;;  %v6162_v61 = vpop.permute.xlu1 %2048  ;;  %2363 = vrot.lane.b32.xlu0 %v5884_v43, %s4508_s23 }
 0x3e8   : > { %7790 = vst [vmem:[#allocation32_spill] sm:$0xff] %v6160_v7  ;;  %7791 = vst [vmem:[#allocation68_spill] sm:$0xff] %v6162_v61  ;;  %v6188_v7 = vld [vmem:[%s7451_s4 + $0x58] sm:$0xff] }
 0x3e9   : > { %2409 = vperm.xlu1 %4358, %v6088_v59  }
 0x3eb   : > { %v6167_v58 = vpop.permute.xlu1 %2066  ;;  %v6169_v62 = vpop.permute.xlu0 %1831  ;;  %2381 = vrot.lane.b32.xlu0 %v5884_v43, %s4526_s6 }
 0x3ec   : > { %7792 = vst [vmem:[#allocation70_spill] sm:$0xff] %v6167_v58 }
 0x3ed   : > { %4359 = vset.pattern.permute.xlu1 %v7793_v26 }
 0x3ee   : > { %2453 = vperm.xlu1 %4359, %v6177_v63  }
 0x3ef   : > { %v6180_v51 = vpop.permute.xlu1 %2127  ;;  %v6182_v48 = vpop.permute.xlu0 %1910  ;;  %2405 = vperm.xlu0 %4360, %v6140_v52  }
 0x3f0   : > { %7794 = vst [vmem:[#allocation25_spill] sm:$0xff] %v6180_v51  ;;  %v4447_v51 = vld [vmem:[%s7450_s3 + $0x30] sm:$0xff]  }
 0x3f1   : > { %3966 = vmatmul.mubr.msk.bf16.vlgmr.msra.gmra.mxu0 %vm373_vm0, %v4447_v51 }
 0x3f2   : > { %2457 = vperm.xlu1 %4359, %v6188_v7   ;;  %1579 = vmatprep.mubr.bf16.mxu0 %v7726_v15 }
 0x3f3   : > { %v6191_v32 = vpop.permute.xlu1 %2145  ;;  %2278 = vrot.lane.b32.xlu0 %v5829_v13, %s4507_s22  ;;  %v6195_v47 = vpop.permute.xlu0 %1973 }
 0x3f4   : > { %7795 = vst [vmem:[#allocation18_spill] sm:$0xff] %v6191_v32  ;;  %4364 = vset.pattern.permute.xlu0 %v7793_v26 }
 0x3f6   : > { %2123 = vrot.lane.b32.xlu1 %v5833_v22, %s4522_s15 }
 0x3f7   : > { %v6205_v3 = vpop.permute.xlu1 %1813  ;;  %2296 = vrot.lane.b32.xlu0 %v5829_v13, %s4525_s25  ;;  %v6209_v32 = vpop.permute.xlu0 %1991  ;;  %4361 = vset.pattern.permute.xlu1 %v7728_v5 }
 0x3f9   : > { %3967 = vmatmul.mubr.msk.bf16.gmra.mxu0 %vm373_vm0, %v4448_v30  ;;  %v7799_v30 = vmov 0.0  }
 0x3fa   : > { %2141 = vrot.lane.b32.xlu1 %v5833_v22, %s4523_s16  ;;  %1589 = vmatprep.mubr.bf16.mxu0 %v7726_v15  ;;  %s4237_s16 = smul.u32 72, %s7950_s19  ;;  %s4533_s19 = smov 122  }
 0x3fb   : > { %v6214_v61 = vpop.permute.xlu1 %1892  ;;  %2357 = vrot.lane.b32.xlu0 %v5829_v13, %s4508_s23  ;;  %v6218_v51 = vpop.permute.xlu0 %2052 }
 0x3fe   : > { %2284 = vrot.lane.b32.xlu1 %v5884_v43, %s4507_s22 }
 0x3ff   : > { %v6222_v58 = vpop.permute.xlu1 %1971  ;;  %2375 = vrot.lane.b32.xlu0 %v5829_v13, %s4526_s6  ;;  %v6226_v53 = vpop.permute.xlu0 %2070 }
 0x401   : > { %3968 = vmatmul.mubr.msk.bf16.gmra.mxu0 %vm373_vm0, %v4449_v18 }
 0x402   : > { %2302 = vrot.lane.b32.xlu1 %v5884_v43, %s4525_s25  ;;  %4145 = vmatprep.mubr.msk.bf16.mxu0 %vm4515_vm9, %v7799_v30 }
 0x403   : > { %v6230_v5 = vpop.permute.xlu1 %1989  ;;  %2437 = vperm.xlu0 %4364, %v6047_v1   ;;  %v6233_v41 = vpop.permute.xlu0 %2131 }
 0x406   : > { %2326 = vperm.xlu1 %4361, %v6140_v52  }
 0x407   : > { %v6236_v4 = vpop.permute.xlu1 %2050  ;;  %4366 = vset.pattern.permute.xlu0 %v7796_v39  ;;  %v6244_v31 = vpop.permute.xlu0 %2149 }
 0x40a   : > { %2200 = vrot.lane.b32.xlu1 %v5829_v13, %s4506_s21  ;;  %s4529_s21 = smov 124  }
 0x40b   : > { %v6241_v12 = vpop.permute.xlu1 %2068  ;;  %4362 = vset.pattern.permute.xlu1 %v7729_v6  ;;  %v6250_v40 = vpop.permute.xlu0 %2210 }
 0x40e   : > { %2218 = vrot.lane.b32.xlu1 %v5829_v13, %s4524_s24  ;;  %s4531_s24 = smov 123  }
 0x40f   : > { %v6248_v43 = vpop.permute.xlu1 %2129  ;;  %v6260_v6 = vpop.permute.xlu0 %2228 }
 0x412   : > { %2361 = vrot.lane.b32.xlu1 %v5869_v9, %s4508_s23 }
 0x413   : > { %v6254_v42 = vpop.permute.xlu1 %2147  ;;  %v6265_v13 = vpop.permute.xlu0 %2288 }
 0x416   : > { %2379 = vrot.lane.b32.xlu1 %v5869_v9, %s4526_s6 }
 0x417   : > { %v6258_v60 = vpop.permute.xlu1 %2208  ;;  %v6272_v19 = vpop.permute.xlu0 %2306 }
 0x41a   : > { %2401 = vperm.xlu1 %4362, %v6047_v1  }
 0x41b   : > { %v6263_v45 = vpop.permute.xlu1 %2226 }
 0x41e   : > { %4363 = vset.pattern.permute.xlu1 %v7793_v26  ;;  %v6281_v26 = vpop.permute.xlu0 %2060 }
 0x41f   : > { %v6268_v14 = vpop.permute.xlu1 %2286  ;;  %2445 = vperm.xlu1 %4363, %v6088_v59   ;;  %7797 = vst [vmem:[#allocation62_spill] sm:$0xff] %v6281_v26 }
 0x422   : > { %v6290_v10 = vpop.permute.xlu0 %2204 }
 0x423   : > { %2449 = vperm.xlu1 %4363, %v6062_v11   ;;  %v1816_v9 = vpop.permute.xlu1 %1815  ;;  %7798 = vst [vmem:[#allocation26_spill] sm:$0xff] %v6290_v10 }
 0x426   : > { %v6297_v26 = vpop.permute.xlu0 %2222 }
 0x427   : > { %2280 = vrot.lane.b32.xlu1 %v5833_v22, %s4507_s22  ;;  %v1834_v55 = vpop.permute.xlu1 %1833  ;;  %7800 = vst [vmem:[#allocation30_spill] sm:$0xff] %v6297_v26  ;;  %s6656_s22 = scalar_lea.vmem %s7452_s5, %s4237_s16  ;;  %s4530_s16 = smov 12  }
 0x42b   : > { %2298 = vrot.lane.b32.xlu1 %v5833_v22, %s4525_s25  ;;  %v1895_v37 = vpop.permute.xlu1 %1894  ;;  %s6316_s25 = scalar_lea.vmem %s7449_s2, %s4236_s27  ;;  %s4537_s27 = smov 6  }
 0x42f   : > { %2359 = vrot.lane.b32.xlu1 %v5833_v22, %s4508_s23  ;;  %v1913_v54 = vpop.permute.xlu1 %1912  ;;  %s4534_s23 = smov 10  }
 0x430   : > { %v6300_v49 = vpop.permute.xlu0 %2243 }
 0x431   : > { %7801 = vst [vmem:[#allocation67_spill] sm:$0xff] %v6300_v49 }
 0x433   : > { %2377 = vrot.lane.b32.xlu1 %v5833_v22, %s4526_s6  ;;  %v6303_v0 = vpop.permute.xlu1 %2304  ;;  %s4535_s6 = smov 8  }
 0x435   : > { %v6305_v10 = vpop.permute.xlu0 %2334 }
 0x436   : > { %7802 = vst [vmem:[#allocation31_spill] sm:$0xff] %v6305_v10  ;;  %v1847_v10 = vsel %vm1841_vm10, %v1816_v9, %v1834_v55  ;;  %v1798_v55 = vmul.f32 %v5861_v33, %v5952_v46 }
 0x437   : > { %2441 = vperm.xlu1 %4363, %v6140_v52   ;;  %v1877_v34 = vmul.f32 %v5886_v38, %v1847_v10  ;;  %v1846_v52 = vsel %vm1841_vm10, %v6205_v3, %v6169_v62  ;;  %v2005_v38 = vsel %vm1999_vm12, %v6195_v47, %v6209_v32  ;;  %v6368_v3 = vld [vmem:[%s7451_s4 + $0x68] sm:$0xff]  ;;  %v2084_v10 = vsel %vm2078_vm13, %v6218_v51, %v6226_v53 }
 0x438   : > { %v1876_v32 = vmul.f32 %v5821_v36, %v1846_v52  ;;  %v2035_v46 = vmul.f32 %v5943_v16, %v2005_v38  ;;  %v2083_v52 = vsel %vm2078_vm13, %v6236_v4, %v6241_v12  ;;  %v2114_v53 = vmul.f32 %v5974_v56, %v2084_v10 }
 0x439   : > { %v6318_v22 = vpop.permute.xlu0 %2367  ;;  %v7807_v4 = vmov 11  }
 0x43b   : > { %4365 = vset.pattern.permute.xlu1 %v7796_v39 }
 0x43d   : > { %v6322_v39 = vpop.permute.xlu0 %2385 }
 0x440   : > { %v6307_v18 = vpop.permute.xlu1 %2330 }
 0x441   : > { %7803 = vst [vmem:[#allocation72_spill] sm:$0xff] %v6307_v18  ;;  %v1926_v18 = vsel %vm1920_vm11, %v1895_v37, %v1913_v54  ;;  %v6345_v11 = vpop.permute.xlu0 %2121  ;;  %v1883_v54 = vadd.f32 %v1877_v34, %v1798_v55  ;;  %v1925_v34 = vsel %vm1920_vm11, %v6214_v61, %v6182_v48  ;;  %v2004_v48 = vsel %vm1999_vm12, %v6222_v58, %v6230_v5 }
 0x442   : > { %v1956_v9 = vmul.f32 %v5825_v25, %v1926_v18  ;;  %v6359_v25 = vld [vmem:[%s7451_s4 + $0x78] sm:$0xff]  ;;  %v1797_v61 = vmul.f32 %v5819_v2, %v5935_v24  ;;  %v1955_v18 = vmul.f32 %v5823_v57, %v1925_v34  ;;  %v2034_v51 = vmul.f32 %v5835_v8, %v2004_v48 }
 0x443   : > { %v2163_v5 = vsel %vm2157_vm14, %v6233_v41, %v6244_v31  ;;  %v2162_v2 = vsel %vm2157_vm14, %v6248_v43, %v6254_v42  ;;  %v2113_v24 = vmul.f32 %v5854_v23, %v2083_v52  ;;  %v2240_v8 = vsel %vm373_vm0, %v6258_v60, %v6263_v45 }
 0x444   : > { %v6309_v1 = vpop.permute.xlu1 %2042  ;;  %v1962_v33 = vadd.f32 %v1956_v9, %v1883_v54  ;;  %v1882_v16 = vadd.f32 %v1876_v32, %v1797_v61  ;;  %v2193_v41 = vmul.f32 %v5900_v17, %v2163_v5  ;;  %v2192_v31 = vmul.f32 %v5892_v50, %v2162_v2 }
 0x445   : > { %7804 = vst [vmem:[#allocation73_spill] sm:$0xff] %v6309_v1  ;;  %v6330_v1 = vld [vmem:[%s7451_s4 + $0x80] sm:$0xff]  ;;  %v6372_v47 = vpop.permute.xlu0 %2139  ;;  %v2241_v23 = vsel %vm373_vm0, %v6250_v40, %v6260_v6  ;;  %v2319_v42 = vsel %vm2314_vm15, %v6268_v14, %v6303_v0  ;;  %v2270_v60 = vmul.f32 %v5927_v29, %v2240_v8  ;;  %v2320_v6 = vsel %vm2314_vm15, %v6265_v13, %v6272_v19 }
 0x446   : > { %2726 = vperm.xlu1 %4365, %v6330_v1   ;;  %v2041_v36 = vadd.f32 %v2035_v46, %v1962_v33  ;;  %v1961_v57 = vadd.f32 %v1955_v18, %v1882_v16  ;;  %v2271_v50 = vmul.f32 %v5941_v20, %v2241_v23  ;;  %v2349_v54 = vmul.f32 %v5972_v28, %v2319_v42  ;;  %v6439_v13 = vld [vmem:[%s7451_s4 + $0x60] sm:$0xff]  ;;  %v7815_v23 = vld [vmem:[#allocation65_spill] sm:$0xff] }
 0x447   : > { %v2399_v14 = vsel %vm2393_vm1, %v6318_v22, %v6322_v39  ;;  %v2350_v22 = vmul.f32 %v5980_v35, %v2320_v6  ;;  %v7810_v5 = vmov 2   ;;  %v7820_v6 = vld [vmem:[#allocation20_spill] sm:$0xff] }
 0x448   : > { %v6320_v26 = vpop.permute.xlu1 %2044  ;;  %v2120_v58 = vadd.f32 %v2114_v53, %v2041_v36  ;;  %v2040_v56 = vadd.f32 %v2034_v51, %v1961_v57  ;;  %v2429_v28 = vmul.f32 %v6020_v27, %v2399_v14  ;;  %v7808_v53 = vld [vmem:[#allocation8_spill] sm:$0xff]  ;;  %v7809_v51 = vld [vmem:[#allocation53_spill] sm:$0xff] }
 0x449   : > { %7805 = vst [vmem:[#allocation74_spill] sm:$0xff] %v6320_v26  ;;  %v6337_v26 = vld [vmem:[%s7451_s4 + $0x70] sm:$0xff]  ;;  %v6398_v12 = vpop.permute.xlu0 %2282 }
 0x44a   : > { %2716 = vperm.xlu1 %4365, %v6337_v26   ;;  %v2119_v9 = vadd.f32 %v2113_v24, %v2040_v56  ;;  %v2199_v45 = vadd.f32 %v2193_v41, %v2120_v58  ;;  %v7812_v56 = vld [vmem:[#allocation15_spill] sm:$0xff]  ;;  %v7813_v41 = vld [vmem:[#allocation37_spill] sm:$0xff] }
 0x44c   : > { %v6324_v49 = vpop.permute.xlu1 %2062  ;;  %v2198_v17 = vadd.f32 %v2192_v31, %v2119_v9  ;;  %v2277_v20 = vadd.f32 %v2271_v50, %v2199_v45  ;;  %v1844_v31 = vsel %vm1841_vm10, %v7813_v41, %v7812_v56  ;;  %v7816_v9 = vld [vmem:[#allocation29_spill] sm:$0xff]  ;;  %v7819_v50 = vld [vmem:[#allocation64_spill] sm:$0xff]  ;;  %v7832_v56 = vld [vmem:[#allocation66_spill] sm:$0xff] }
 0x44d   : > { %7806 = vst [vmem:[#allocation75_spill] sm:$0xff] %v6324_v49  ;;  %v6418_v38 = vpop.permute.xlu0 %2300  ;;  %v1874_v14 = vmul.f32 %v7820_v6, %v1844_v31  ;;  %v7833_v41 = vld [vmem:[#allocation41_spill] sm:$0xff] }
 0x44e   : > { %2721 = vperm.xlu1 %4365, %v6359_v25   ;;  %v2276_v0 = vadd.f32 %v2270_v60, %v2198_v17  ;;  %v2356_v34 = vadd.f32 %v2350_v22, %v2277_v20  ;;  %v7817_v60 = vld [vmem:[#allocation44_spill] sm:$0xff]  ;;  %v7822_v22 = vld [vmem:[#allocation22_spill] sm:$0xff]  ;;  %v2081_v31 = vsel %vm2078_vm13, %v7833_v41, %v7832_v56  ;;  %v7837_v6 = vld [vmem:[#allocation5_spill] sm:$0xff] }
 0x44f   : > { %v1923_v45 = vsel %vm1920_vm11, %v7817_v60, %v7816_v9 }
 0x450   : > { %v6340_v49 = vpop.permute.xlu1 %2206  ;;  %v2355_v19 = vadd.f32 %v2349_v54, %v2276_v0  ;;  %v2435_v46 = vadd.f32 %v2429_v28, %v2356_v34  ;;  %v7821_v0 = vld [vmem:[#allocation38_spill] sm:$0xff] }
 0x451   : > { %v6444_v33 = vpop.permute.xlu0 %2322 }
 0x452   : > { %2711 = vperm.xlu1 %4365, %v6368_v3  }
 0x454   : > { %v6348_v37 = vpop.permute.xlu1 %2224 }
 0x455   : > { %v2239_v56 = vsel %vm373_vm0, %v6340_v49, %v6348_v37  ;;  %v7849_v49 = vld [vmem:[#allocation55_spill] sm:$0xff] }
 0x456   : > { %4367 = vset.pattern.permute.xlu1 %v7807_v4  ;;  %v6451_v27 = vpop.permute.xlu0 %2413 }
 0x457   : > { %2496 = vperm.xlu1 %4367, %v6188_v7  }
 0x458   : > { %v6374_v62 = vpop.permute.xlu1 %2247 }
 0x45a   : > { %v6462_v16 = vpop.permute.xlu0 %2202 }
 0x45b   : > { %2484 = vperm.xlu1 %4367, %v6088_v59   ;;  %v6431_v59 = vld [vmem:[%s7451_s4 + $0x88] sm:$0xff] }
 0x45c   : > { %v2366_v55 = vpop.permute.xlu1 %2365  ;;  %2731 = vperm.xlu0 %4366, %v6431_v59  }
 0x45e   : > { %v6468_v2 = vpop.permute.xlu0 %2220 }
 0x45f   : > { %4368 = vset.pattern.permute.xlu1 %v7726_v15 }
 0x460   : > { %v2384_v43 = vpop.permute.xlu1 %2383  ;;  %2856 = vperm.xlu1 %4368, %v6330_v1   ;;  %2706 = vperm.xlu0 %4366, %v6439_v13  }
 0x461   : > { %v2398_v7 = vsel %vm2393_vm1, %v2366_v55, %v2384_v43  ;;  %v7814_v43 = vld [vmem:[#allocation19_spill] sm:$0xff] }
 0x462   : > { %v2428_v29 = vmul.f32 %v6012_v21, %v2398_v7  ;;  %v6477_v58 = vpop.permute.xlu0 %2363  ;;  %v1845_v42 = vsel %vm1841_vm10, %v7815_v23, %v7814_v43  ;;  %v7818_v7 = vld [vmem:[#allocation42_spill] sm:$0xff]  ;;  %v7835_v23 = vld [vmem:[#allocation68_spill] sm:$0xff] }
 0x463   : > { %v1924_v17 = vsel %vm1920_vm11, %v7819_v50, %v7818_v7  ;;  %v7834_v43 = vld [vmem:[#allocation70_spill] sm:$0xff]  ;;  %v7836_v7 = vld [vmem:[#allocation35_spill] sm:$0xff] }
 0x464   : > { %v6420_v40 = vpop.permute.xlu1 %2409  ;;  %v2434_v21 = vadd.f32 %v2428_v29, %v2355_v19  ;;  %4371 = vset.pattern.permute.xlu1 %v7694_v44  ;;  %4369 = vset.pattern.permute.xlu0 %v7726_v15  ;;  %v1875_v29 = vmul.f32 %v7821_v0, %v1845_v42  ;;  %v7823_v19 = vld [vmem:[#allocation52_spill] sm:$0xff]  ;;  %v2082_v42 = vsel %vm2078_vm13, %v7835_v23, %v7834_v43 }
 0x465   : > { %2935 = vperm.xlu1 %4371, %v6330_v1   ;;  %2860 = vperm.xlu0 %4369, %v6431_v59   ;;  %v2002_v28 = vsel %vm1999_vm12, %v7823_v19, %v7822_v22  ;;  %v7838_v19 = vmov 3   ;;  %v7847_v23 = vld [vmem:[#allocation12_spill] sm:$0xff] }
 0x466   : > { %v6495_v54 = vpop.permute.xlu0 %2381  ;;  %v2032_v50 = vmul.f32 %v7836_v7, %v2002_v28  ;;  %v7843_v28 = vld [vmem:[#allocation54_spill] sm:$0xff] }
 0x469   : > { %v2454_v39 = vpop.permute.xlu1 %2453  ;;  %2939 = vperm.xlu1 %4371, %v6431_v59   ;;  %4370 = vset.pattern.permute.xlu0 %v7807_v4 }
 0x46a   : > { %v2464_v32 = vadd.f32 %v2454_v39, %v2434_v21  ;;  %2492 = vperm.xlu0 %4370, %v6177_v63   ;;  %v7811_v63 = vld [vmem:[#allocation17_spill] sm:$0xff]  ;;  %v7825_v21 = vld [vmem:[#allocation28_spill] sm:$0xff] }
 0x46b   : > { %v7824_v39 = vld [vmem:[#allocation69_spill] sm:$0xff] }
 0x46c   : > { %v2470_v48 = vmax.f32 %v2464_v32, 0.0  ;;  %v2003_v34 = vsel %vm1999_vm12, %v7825_v21, %v7824_v39  ;;  %v7826_v32 = vld [vmem:[#allocation14_spill] sm:$0xff]  ;;  %v7840_v39 = vld [vmem:[#allocation71_spill] sm:$0xff] }
 0x46d   : > { %v2458_v10 = vpop.permute.xlu1 %2457  ;;  %4372 = vset.pattern.permute.xlu1 %v7807_v4  ;;  %v2033_v0 = vmul.f32 %v7837_v6, %v2003_v34  ;;  %v7841_v21 = vld [vmem:[#allocation18_spill] sm:$0xff]  ;;  %v2111_v34 = vmul.f32 %v7843_v28, %v2081_v31  ;;  %v7848_v6 = vld [vmem:[#allocation59_spill] sm:$0xff]  ;;  %v7855_v28 = vld [vmem:[#allocation57_spill] sm:$0xff] }
 0x46e   : > { %v2465_v35 = vadd.f32 %v2458_v10, %v2435_v46  ;;  %2480 = vperm.xlu1 %4372, %v7808_v53   ;;  %2488 = vperm.xlu0 %4370, %v7809_v51   ;;  %v7827_v46 = vld [vmem:[#allocation36_spill] sm:$0xff]  ;;  %v7831_v51 = vld [vmem:[#allocation2_spill] sm:$0xff] }
 0x46f   : > { %v1796_v10 = vmul.f32 %v7827_v46, %v7826_v32  ;;  %v7842_v32 = vld [vmem:[#allocation25_spill] sm:$0xff] }
 0x470   : > { %v2471_v61 = vmax.f32 %v2465_v35, 0.0  ;;  %v7828_v35 = vld [vmem:[#allocation49_spill] sm:$0xff]  ;;  %v2161_v46 = vsel %vm2157_vm14, %v7842_v32, %v7841_v21 }
 0x471   : > { %v6453_v18 = vpop.permute.xlu1 %2123  ;;  %v1881_v60 = vadd.f32 %v1875_v29, %v1796_v10  ;;  %v7844_v10 = vld [vmem:[#allocation40_spill] sm:$0xff] }
 0x472   : > { %v2474_v36 = vpack.c.bf16 %v2471_v61, %v2470_v48  ;;  %4373 = vset.pattern.permute.xlu1 %v7810_v5  ;;  %2476 = vperm.xlu0 %4370, %v7811_v63   ;;  %v7829_v48 = vld [vmem:[#allocation33_spill] sm:$0xff]  ;;  %v1954_v63 = vmul.f32 %v7831_v51, %v1924_v17 }
 0x473   : > { %3014 = vperm.xlu1 %4373, %v6330_v1   ;;  %v1795_v61 = vmul.f32 %v7829_v48, %v7828_v35  ;;  %v6532_v35 = vpop.permute.xlu0 %2405  ;;  %v2112_v48 = vmul.f32 %v7844_v10, %v2082_v42 }
 0x474   : > { %4140 = vmatpush3.bf16.msra.mxu0 %v2474_v36  ;;  %v7830_v36 = vld [vmem:[#allocation43_spill] sm:$0xff]  ;;  %v1960_v29 = vadd.f32 %v1954_v63, %v1881_v60  ;;  %v2317_v63 = vsel %vm2314_vm15, %v6398_v12, %v6418_v38  ;;  %v7850_v60 = vld [vmem:[#allocation61_spill] sm:$0xff] }
 0x475   : > { %v6458_v52 = vpop.permute.xlu1 %2141  ;;  %4141 = vmatprep.subr.bf16.mxu0 %v7799_v30  ;;  %v1953_v53 = vmul.f32 %v7830_v36, %v1923_v45  ;;  %v1880_v9 = vadd.f32 %v1874_v14, %v1795_v61  ;;  %v7839_v45 = vld [vmem:[#allocation32_spill] sm:$0xff]  ;;  %v7845_v61 = vld [vmem:[#allocation30_spill] sm:$0xff] }
 0x476   : > { %4375 = vset.pattern.permute.xlu0 %v7694_v44  ;;  %v2160_v17 = vsel %vm2157_vm14, %v7840_v39, %v7839_v45  ;;  %v7846_v36 = vld [vmem:[#allocation26_spill] sm:$0xff]  ;;  %v2039_v43 = vadd.f32 %v2033_v0, %v1960_v29  ;;  %v2191_v45 = vmul.f32 %v7848_v6, %v2161_v46  ;;  %v7851_v0 = vld [vmem:[#allocation51_spill] sm:$0xff] }
 0x477   : > { %4374 = vset.pattern.permute.xlu1 %v7726_v15  ;;  %2927 = vperm.xlu0 %4375, %v6337_v26   ;;  %v1959_v14 = vadd.f32 %v1953_v53, %v1880_v9  ;;  %v2238_v51 = vsel %vm373_vm0, %v7846_v36, %v7845_v61  ;;  %v2190_v7 = vmul.f32 %v7847_v23, %v2160_v17  ;;  %v7852_v39 = vld [vmem:[#allocation47_spill] sm:$0xff]  ;;  %v6558_v21 = vpop.permute.xlu0 %2278 }
 0x478   : > { %2848 = vperm.xlu1 %4374, %v6337_v26   ;;  %v2118_v9 = vadd.f32 %v2112_v48, %v2039_v43  ;;  %v2268_v37 = vmul.f32 %v7849_v49, %v2238_v51  ;;  %v1842_v17 = vsel %vm1841_vm10, %v7852_v39, %v7851_v0  ;;  %v7854_v46 = vld [vmem:[#allocation31_spill] sm:$0xff]  ;;  %v7857_v51 = vmov 4   ;;  %v7859_v43 = vld [vmem:[#allocation45_spill] sm:$0xff] }
 0x479   : > { %v2285_v55 = vpop.permute.xlu1 %2284  ;;  %v2038_v41 = vadd.f32 %v2032_v50, %v1959_v14  ;;  %v2269_v50 = vmul.f32 %v7850_v60, %v2239_v56  ;;  %v7860_v23 = vld [vmem:[#allocation23_spill] sm:$0xff]  ;;  %v7865_v60 = vld [vmem:[#allocation6_spill] sm:$0xff] }
 0x47b   : > { %2919 = vperm.xlu0 %4375, %v6439_v13   ;;  %v2117_v42 = vadd.f32 %v2111_v34, %v2038_v41  ;;  %v7856_v34 = vld [vmem:[#allocation13_spill] sm:$0xff]  ;;  %v2397_v41 = vsel %vm2393_vm1, %v6477_v58, %v6495_v54  ;;  %v7866_v58 = vld [vmem:[#allocation62_spill] sm:$0xff] }
 0x47c   : > { %2852 = vperm.xlu1 %4374, %v6359_v25   ;;  %v1921_v10 = vsel %vm1920_vm11, %v7856_v34, %v7855_v28  ;;  %v7867_v54 = vld [vmem:[#allocation73_spill] sm:$0xff]  ;;  %v2427_v39 = vmul.f32 %v6451_v27, %v2397_v41  ;;  %v7871_v34 = vld [vmem:[#allocation46_spill] sm:$0xff] }
 0x47d   : > { %v2303_v57 = vpop.permute.xlu1 %2302  ;;  %v2196_v38 = vadd.f32 %v2190_v7, %v2117_v42  ;;  %v2000_v7 = vsel %vm1999_vm12, %v7860_v23, %v7859_v43  ;;  %v2079_v0 = vsel %vm2078_vm13, %v7867_v54, %v7866_v58  ;;  %v7872_v27 = vld [vmem:[#allocation10_spill] sm:$0xff]  ;;  %v7875_v23 = vld [vmem:[#allocation4_spill] sm:$0xff] }
 0x47e   : > { %v2318_v31 = vsel %vm2314_vm15, %v2285_v55, %v2303_v57  ;;  %v2197_v55 = vadd.f32 %v2191_v45, %v2118_v9  ;;  %v7853_v57 = vld [vmem:[#allocation72_spill] sm:$0xff]  ;;  %v2297_v9 = vpop.permute.xlu0 %2296 }
 0x47f   : > { %4381 = vset.pattern.permute.xlu0 %v7810_v5  ;;  %v2347_v32 = vmul.f32 %v7853_v57, %v2317_v63  ;;  %v2348_v14 = vmul.f32 %v7854_v46, %v2318_v31  ;;  %v2274_v48 = vadd.f32 %v2268_v37, %v2196_v38  ;;  %v7863_v31 = vld [vmem:[#allocation24_spill] sm:$0xff]  ;;  %v7868_v38 = vld [vmem:[#allocation39_spill] sm:$0xff]  ;;  %v7869_v57 = vld [vmem:[#allocation58_spill] sm:$0xff] }
 0x480   : > { %4376 = vset.pattern.permute.xlu1 %v7694_v44  ;;  %3018 = vperm.xlu0 %4381, %v6431_v59   ;;  %v2275_v61 = vadd.f32 %v2269_v50, %v2197_v55  ;;  %v1951_v42 = vmul.f32 %v7863_v31, %v1921_v10  ;;  %v7864_v37 = vld [vmem:[#allocation56_spill] sm:$0xff]  ;;  %v2030_v55 = vmul.f32 %v7868_v38, %v2000_v7  ;;  %v7878_v31 = vld [vmem:[#allocation75_spill] sm:$0xff] }
 0x481   : > { %v6474_v24 = vpop.permute.xlu1 %2326  ;;  %2931 = vperm.xlu1 %4376, %v6359_v25   ;;  %v2353_v6 = vadd.f32 %v2347_v32, %v2274_v48  ;;  %v1843_v50 = vsel %vm1841_vm10, %v7865_v60, %v7864_v37  ;;  %v7870_v32 = vld [vmem:[#allocation60_spill] sm:$0xff]  ;;  %vm3464_vm10 = vcmask 48128  }
 0x482   : > { %v2354_v45 = vadd.f32 %v2348_v14, %v2275_v61  ;;  %v1922_v46 = vsel %vm1920_vm11, %v7870_v32, %v7869_v57  ;;  %v1873_v10 = vmul.f32 %v7871_v34, %v1843_v50  ;;  %v2109_v61 = vmul.f32 %v7872_v27, %v2079_v0  ;;  %v7876_v7 = vld [vmem:[#allocation16_spill] sm:$0xff]  ;;  %v7880_v50 = vld [vmem:[#allocation9_spill] sm:$0xff]  ;;  %v7881_v0 = vld [vmem:[#allocation11_spill] sm:$0xff] }
 0x483   : > { %v7883_v57 = vld [vmem:[#allocation67_spill] sm:$0xff] }
 0x484   : > { %3006 = vperm.xlu0 %4381, %v6337_v26   ;;  %v2433_v28 = vadd.f32 %v2427_v39, %v2354_v45  ;;  %v7877_v45 = vld [vmem:[#allocation3_spill] sm:$0xff] }
 0x485   : > { %v6480_v8 = vpop.permute.xlu1 %2200  ;;  %4377 = vset.pattern.permute.xlu1 %v7838_v19 }
 0x486   : > { %3093 = vperm.xlu1 %4377, %v6330_v1  }
 0x488   : > { %2998 = vperm.xlu0 %4381, %v6439_v13  }
 0x489   : > { %v6500_v20 = vpop.permute.xlu1 %2218 }
 0x48a   : > { %4378 = vset.pattern.permute.xlu1 %v7810_v5  ;;  %v2236_v37 = vsel %vm373_vm0, %v6480_v8, %v6500_v20  ;;  %v7882_v8 = vld [vmem:[#allocation27_spill] sm:$0xff] }
 0x48b   : > { %3010 = vperm.xlu1 %4378, %v6359_v25   ;;  %v2266_v32 = vmul.f32 %v7883_v57, %v2236_v37 }
 0x48c   : > { %4385 = vset.pattern.permute.xlu0 %v7838_v19 }
 0x48d   : > { %v2362_v22 = vpop.permute.xlu1 %2361  ;;  %3097 = vperm.xlu0 %4385, %v6431_v59  }
 0x48f   : > { %4379 = vset.pattern.permute.xlu1 %v7857_v51 }
 0x490   : > { %3172 = vperm.xlu1 %4379, %v6330_v1  }
 0x491   : > { %v2380_v53 = vpop.permute.xlu1 %2379  ;;  %3089 = vperm.xlu0 %4385, %v6359_v25  }
 0x492   : > { %v2396_v12 = vsel %vm2393_vm1, %v2362_v22, %v2380_v53  ;;  %v7858_v22 = vld [vmem:[#allocation21_spill] sm:$0xff]  ;;  %v7861_v53 = vld [vmem:[#allocation7_spill] sm:$0xff] }
 0x493   : > { %v2426_v36 = vmul.f32 %v6420_v40, %v2396_v12  ;;  %v1872_v56 = vmul.f32 %v7858_v22, %v1842_v17  ;;  %v7862_v40 = vld [vmem:[#allocation34_spill] sm:$0xff] }
 0x494   : > { %v1793_v63 = vmul.f32 %v7862_v40, %v7861_v53  ;;  %4380 = vset.pattern.permute.xlu1 %v7726_v15  ;;  %v7873_v22 = vld [vmem:[#allocation50_spill] sm:$0xff]  ;;  %v2158_v15 = vsel %vm2157_vm14, %v6345_v11, %v6372_v47  ;;  %v1952_v53 = vmul.f32 %v7877_v45, %v1922_v46 }
 0x495   : > { %v6563_v29 = vpop.permute.xlu1 %2401  ;;  %v2432_v17 = vadd.f32 %v2426_v36, %v2353_v6  ;;  %2840 = vperm.xlu1 %4380, %v6439_v13   ;;  %3077 = vperm.xlu0 %4385, %v6439_v13   ;;  %v1794_v6 = vmul.f32 %v7876_v7, %v7875_v23  ;;  %v2188_v39 = vmul.f32 %v7881_v0, %v2158_v15  ;;  %v4455_v0 = vld [vmem:[%s6316_s25] sm:$0xff]  }
 0x496   : > { %v1878_v12 = vadd.f32 %v1872_v56, %v1793_v63  ;;  %v7874_v56 = vld [vmem:[#allocation63_spill] sm:$0xff]  ;;  %v2358_v63 = vpop.permute.xlu0 %2357 }
 0x497   : > { %v2001_v41 = vsel %vm1999_vm12, %v7874_v56, %v7873_v22  ;;  %v1879_v47 = vadd.f32 %v1873_v10, %v1794_v6 }
 0x498   : > { %v1957_v48 = vadd.f32 %v1951_v42, %v1878_v12  ;;  %v7879_v42 = vld [vmem:[#allocation74_spill] sm:$0xff]  ;;  %v2031_v58 = vmul.f32 %v7880_v50, %v2001_v41  ;;  %v2159_v12 = vsel %vm2157_vm14, %v6453_v18, %v6458_v52  ;;  %v2315_v18 = vsel %vm2314_vm15, %v6558_v21, %v2297_v9  ;;  %v4452_v50 = vld [vmem:[%s6316_s25 + $0x10] sm:$0xff]  }
 0x499   : > { %2844 = vperm.xlu1 %4380, %v6368_v3   ;;  %4389 = vset.pattern.permute.xlu0 %v7857_v51  ;;  %v2345_v22 = vmul.f32 %v6444_v33, %v2315_v18 }
 0x49a   : > { %v2446_v49 = vpop.permute.xlu1 %2445  ;;  %v2036_v40 = vadd.f32 %v2030_v55, %v1957_v48  ;;  %v1958_v55 = vadd.f32 %v1952_v53, %v1879_v47  ;;  %3176 = vperm.xlu0 %4389, %v6431_v59   ;;  %v2376_v10 = vpop.permute.xlu0 %2375  ;;  %v7886_v47 = vmov 6  }
 0x49b   : > { %v2462_v14 = vadd.f32 %v2446_v49, %v2432_v17  ;;  %v2080_v49 = vsel %vm2078_vm13, %v7879_v42, %v7878_v31 }
 0x49c   : > { %v2115_v54 = vadd.f32 %v2109_v61, %v2036_v40  ;;  %v2110_v20 = vmul.f32 %v7882_v8, %v2080_v49  ;;  %v2037_v46 = vadd.f32 %v2031_v58, %v1958_v55  ;;  %v2394_v61 = vsel %vm2393_vm1, %v2358_v63, %v2376_v10 }
 0x49d   : > { %v2468_v60 = vmax.f32 %v2462_v14, 0.0  ;;  %4382 = vset.pattern.permute.xlu1 %v7694_v44  ;;  %v2237_v44 = vsel %vm373_vm0, %v6462_v16, %v6468_v2  ;;  %v2424_v41 = vmul.f32 %v6563_v29, %v2394_v61  ;;  %v7885_v29 = vmov 5  }
 0x49e   : > { %v2450_v36 = vpop.permute.xlu1 %2449  ;;  %v2194_v14 = vadd.f32 %v2188_v39, %v2115_v54  ;;  %2923 = vperm.xlu1 %4382, %v6368_v3   ;;  %v2116_v52 = vadd.f32 %v2110_v20, %v2037_v46  ;;  %3168 = vperm.xlu0 %4389, %v6359_v25   ;;  %v2267_v21 = vmul.f32 %v6374_v62, %v2237_v44  ;;  %v2438_v33 = vpop.permute.xlu0 %2437  ;;  %v4454_v54 = vld [vmem:[%s6316_s25 + $0x8] sm:$0xff]   ;;  %v4453_v39 = vld [vmem:[%s7450_s3 + $0x70] sm:$0xff]   ;;  %v7888_v8 = vmov 8  }
 0x49f   : > { %v2463_v43 = vadd.f32 %v2450_v36, %v2433_v28  ;;  %v7884_v28 = vld [vmem:[#allocation48_spill] sm:$0xff] }
 0x4a0   : > { %v2189_v34 = vmul.f32 %v7884_v28, %v2159_v12  ;;  %v2272_v27 = vadd.f32 %v2266_v32, %v2194_v14  ;;  %v4457_v12 = vld [vmem:[%s7450_s3 + $0x98] sm:$0xff]  }
 0x4a1   : > { %v2469_v11 = vmax.f32 %v2463_v43, 0.0 }
 0x4a2   : > { %v2281_v17 = vpop.permute.xlu1 %2280  ;;  %v2195_v56 = vadd.f32 %v2189_v34, %v2116_v52  ;;  %4383 = vset.pattern.permute.xlu1 %v7838_v19  ;;  %v2351_v9 = vadd.f32 %v2345_v22, %v2272_v27  ;;  %3156 = vperm.xlu0 %4389, %v6439_v13  }
 0x4a3   : > { %v2473_v38 = vpack.c.bf16 %v2469_v11, %v2468_v60  ;;  %3085 = vperm.xlu1 %4383, %v6337_v26   ;;  %v4450_v60 = vld [vmem:[%s7450_s3 + $0x60] sm:$0xff]  }
 0x4a4   : > { %v2430_v16 = vadd.f32 %v2424_v41, %v2351_v9  ;;  %v2273_v2 = vadd.f32 %v2267_v21, %v2195_v56 }
 0x4a5   : > { %4142 = vmatpush3.bf16.msra.mxu0 %v2473_v38  ;;  %v4458_v38 = vld [vmem:[%s7450_s3 + $0xa0] sm:$0xff]  }
 0x4a6   : > { %v2299_v48 = vpop.permute.xlu1 %2298  ;;  %4143 = vmatprep.subr.bf16.mxu0 %v7799_v30  ;;  %4393 = vset.pattern.permute.xlu0 %v7885_v29  ;;  %v2460_v62 = vadd.f32 %v2438_v33, %v2430_v16 }
 0x4a7   : > { %v2316_v36 = vsel %vm2314_vm15, %v2281_v17, %v2299_v48  ;;  %4384 = vset.pattern.permute.xlu1 %v7885_v29  ;;  %3247 = vperm.xlu0 %4393, %v6359_v25   ;;  %v4456_v17 = vld [vmem:[%s7450_s3 + $0x90] sm:$0xff]  }
 0x4a8   : > { %v2346_v43 = vmul.f32 %v6474_v24, %v2316_v36  ;;  %3251 = vperm.xlu1 %4384, %v6330_v1   ;;  %v2466_v31 = vmax.f32 %v2460_v62, 0.0 }
 0x4aa   : > { %v2360_v15 = vpop.permute.xlu1 %2359  ;;  %v2352_v6 = vadd.f32 %v2346_v43, %v2273_v2 }
 0x4ab   : > { %3235 = vperm.xlu0 %4393, %v6439_v13  }
 0x4ac   : > { %3255 = vperm.xlu1 %4384, %v6431_v59  }
 0x4ae   : > { %v2378_v23 = vpop.permute.xlu1 %2377 }
 0x4af   : > { %v2395_v7 = vsel %vm2393_vm1, %v2360_v15, %v2378_v23  ;;  %4397 = vset.pattern.permute.xlu0 %v7886_v47 }
 0x4b0   : > { %v2425_v45 = vmul.f32 %v6532_v35, %v2395_v7  ;;  %4386 = vset.pattern.permute.xlu1 %v7810_v5  ;;  %3326 = vperm.xlu0 %4397, %v6359_v25   ;;  %v4451_v25 = vld [vmem:[%s7450_s3 + $0x68] sm:$0xff]  }
 0x4b1   : > { %v1571_v63 = vpop.f32.mrf.mxu0  ;;  %3002 = vperm.xlu1 %4386, %v6368_v3  }
 0x4b2   : > { %v2431_v24 = vadd.f32 %v2425_v45, %v2352_v6  ;;  %v2442_v53 = vpop.permute.xlu1 %2441 }
 0x4b3   : > { %v1573_v35 = vpop.f32.mrf.mxu0 }
 0x4b4   : > { %v2461_v40 = vadd.f32 %v2442_v53, %v2431_v24  ;;  %v4073_v37 = vpack.c.bf16 %v1573_v35, %v1571_v63 }
 0x4b5   : > { %v1575_v11 = vpop.f32.mrf.mxu0  ;;  %4387 = vset.pattern.permute.xlu1 %v7857_v51 }
 0x4b6   : > { %v2467_v42 = vmax.f32 %v2461_v40, 0.0  ;;  %3832 = vst [vmem:[%s6656_s22] sm:$0xff] %v4073_v37  ;;  %3164 = vperm.xlu1 %4387, %v6337_v26  }
 0x4b7   : > { %v1577_v5 = vpop.f32.mrf.mxu0 }
 0x4b8   : > { %v2472_v49 = vpack.c.bf16 %v2467_v42, %v2466_v31  ;;  %v4075_v58 = vpack.c.bf16 %v1577_v5, %v1575_v11 }
 0x4b9   : > { %v1581_v55 = vpop.f32.mrf.mxu0 }
 0x4ba   : > { %4144 = vmatpush3.bf16.msra.mxu0 %v2472_v49  ;;  %3835 = vst [vmem:[%s6656_s22 + $0xc] sm:$0xff] %v4075_v58  ;;  %4388 = vset.pattern.permute.xlu1 %v7886_v47 }
 0x4bb   : > { %4175 = vmatprep.subr.bf16.mxu0 %v7799_v30  ;;  %3330 = vperm.xlu1 %4388, %v6330_v1  }
 0x4bd   : > { %4146 = vmatmul.mubr.msk.bf16.vlgmr.msra.gmra.mxu0 %vm373_vm0, %v4450_v60 }
 0x4be   : > { %4149 = vmatprep.mubr.msk.bf16.mxu0 %vm4515_vm9, %v7799_v30  ;;  %4176 = vmatpush3.bf16.msra.mxu0 %v4452_v50 }
 0x4bf   : > { %4177 = vmatprep.subr.bf16.mxu0 %v7799_v30  ;;  %3334 = vperm.xlu1 %4388, %v6431_v59  }
 0x4c2   : > { %4178 = vmatpush3.bf16.msra.mxu0 %v4454_v54 }
 0x4c3   : > { %4179 = vmatprep.subr.bf16.mxu0 %v7799_v30  ;;  %4390 = vset.pattern.permute.xlu1 %v7838_v19  ;;  %v7887_v19 = vmov 7  }
 0x4c4   : > { %3081 = vperm.xlu1 %4390, %v6368_v3  }
 0x4c5   : > { %4150 = vmatmul.mubr.msk.bf16.gmra.mxu0 %vm373_vm0, %v4451_v25 }
 0x4c6   : > { %4153 = vmatprep.mubr.msk.bf16.mxu0 %vm4515_vm9, %v7799_v30  ;;  %4180 = vmatpush3.bf16.msra.mxu0 %v4455_v0 }
 0x4c7   : > { %4211 = vmatprep.subr.bf16.mxu0 %v7799_v30 }
 0x4c8   : > { %4391 = vset.pattern.permute.xlu1 %v7885_v29 }
 0x4c9   : > { %3243 = vperm.xlu1 %4391, %v6337_v26  }
 0x4cd   : > { %4154 = vmatmul.mubr.msk.bf16.gmra.mxu0 %vm373_vm0, %v4453_v39  ;;  %4392 = vset.pattern.permute.xlu1 %v7887_v19 }
 0x4ce   : > { %4181 = vmatprep.mubr.msk.bf16.mxu0 %vm4515_vm9, %v7799_v30  ;;  %3409 = vperm.xlu1 %4392, %v6330_v1  }
 0x4d2   : > { %3413 = vperm.xlu1 %4392, %v6431_v59  }
 0x4d5   : > { %4182 = vmatmul.mubr.msk.bf16.vlgmr.msra.gmra.mxu0 %vm373_vm0, %v4456_v17 }
 0x4d6   : > { %4185 = vmatprep.mubr.msk.bf16.mxu0 %vm4515_vm9, %v7799_v30  ;;  %4394 = vset.pattern.permute.xlu1 %v7857_v51  ;;  %v1583_v51 = vpop.f32.mrf.mxu0 }
 0x4d7   : > { %3160 = vperm.xlu1 %4394, %v6368_v3   ;;  %v4077_v20 = vpack.c.bf16 %v1583_v51, %v1581_v55  ;;  %v6749_v41 = vpop.permute.xlu0 %2731 }
 0x4d8   : > { %v1585_v57 = vpop.f32.mrf.mxu0 }
 0x4d9   : > { %3837 = vst [vmem:[%s6656_s22 + $0x18] sm:$0xff] %v4077_v20 }
 0x4da   : > { %v1587_v32 = vpop.f32.mrf.mxu0 }
 0x4db   : > { %4395 = vset.pattern.permute.xlu1 %v7886_v47  ;;  %v4079_v46 = vpack.c.bf16 %v1587_v32, %v1585_v57  ;;  %v2707_v21 = vpop.permute.xlu0 %2706 }
 0x4dc   : > { %3322 = vperm.xlu1 %4395, %v6337_v26   ;;  %v1591_v14 = vpop.f32.mrf.mxu0 }
 0x4dd   : > { %4186 = vmatmul.mubr.msk.bf16.gmra.mxu0 %vm373_vm0, %v4457_v12  ;;  %3839 = vst [vmem:[%s6656_s22 + $0x24] sm:$0xff] %v4079_v46 }
 0x4de   : > { %4189 = vmatprep.mubr.msk.bf16.mxu0 %vm4515_vm9, %v7799_v30  ;;  %v1593_v28 = vpop.f32.mrf.mxu0 }
 0x4df   : > { %v4081_v34 = vpack.c.bf16 %v1593_v28, %v1591_v14 }
 0x4e0   : > { %4396 = vset.pattern.permute.xlu1 %v7888_v8  ;;  %v1595_v10 = vpop.f32.mrf.mxu0  ;;  %v6755_v23 = vpop.permute.xlu0 %2860 }
 0x4e1   : > { %3488 = vperm.xlu1 %4396, %v6330_v1   ;;  %3841 = vst [vmem:[%s6656_s22 + $0x30] sm:$0xff] %v4081_v34  ;;  %7890 = vst [vmem:[#allocation53_spill] sm:$0xff] %v6755_v23 }
 0x4e2   : > { %v1597_v48 = vpop.f32.mrf.mxu0 }
 0x4e3   : > { %v4083_v1 = vpack.c.bf16 %v1597_v48, %v1595_v10 }
 0x4e5   : > { %4190 = vmatmul.mubr.msk.bf16.gmra.mxu0 %vm373_vm0, %v4458_v38  ;;  %3492 = vperm.xlu1 %4396, %v6431_v59   ;;  %3843 = vst [vmem:[%s6656_s22 + $0x3c] sm:$0xff] %v4083_v1  ;;  %v6735_v59 = vpop.permute.xlu1 %2726  ;;  %v2493_v45 = vpop.permute.xlu0 %2492 }
 0x4e6   : > { %4217 = vmatprep.mubr.msk.bf16.mxu0 %vm4515_vm9, %v7799_v30 }
 0x4e9   : > { %4398 = vset.pattern.permute.xlu1 %v7885_v29  ;;  %v6737_v18 = vpop.permute.xlu1 %2716  ;;  %v2489_v63 = vpop.permute.xlu0 %2488 }
 0x4ea   : > { %3239 = vperm.xlu1 %4398, %v6368_v3  }
 0x4ed   : > { %v6739_v52 = vpop.permute.xlu1 %2721  ;;  %v2477_v58 = vpop.permute.xlu0 %2476 }
 0x4ee   : > { %4399 = vset.pattern.permute.xlu1 %v7887_v19 }
 0x4ef   : > { %3401 = vperm.xlu1 %4399, %v6337_v26  }
 0x4f1   : > { %v2712_v27 = vpop.permute.xlu1 %2711 }
 0x4f3   : > { %4401 = vset.pattern.permute.xlu1 %v7886_v47 }
 0x4f5   : > { %v2497_v44 = vpop.permute.xlu1 %2496 }
 0x4f9   : > { %v2485_v3 = vpop.permute.xlu1 %2484 }
 0x4fd   : > { %v6741_v61 = vpop.permute.xlu1 %2856 }
 0x501   : > { %v6743_v36 = vpop.permute.xlu1 %2935 }
 0x505   : > { %v6745_v22 = vpop.permute.xlu1 %2939 }
 0x506   : > { %7889 = vst [vmem:[#allocation8_spill] sm:$0xff] %v6745_v22 }
 0x509   : > { %v2481_v56 = vpop.permute.xlu1 %2480 }
 0x50d   : > { %v6747_v26 = vpop.permute.xlu1 %3014 }
 0x511   : > { %v6751_v15 = vpop.permute.xlu1 %2848 }
 0x515   : > { %v6753_v16 = vpop.permute.xlu1 %2852 }
 0x519   : > { %v6757_v29 = vpop.permute.xlu1 %2931 }
 0x51d   : > { %v6759_v53 = vpop.permute.xlu1 %3093 }
 0x521   : > { %v6761_v37 = vpop.permute.xlu1 %3010 }
 0x525   : > { %v6763_v51 = vpop.permute.xlu1 %3172 }
 0x57d   : > { %v2557_v9 = vpop.f32.mrf.mxu0 }
 0x57e   : > { %v2558_v38 = vadd.f32 %v2557_v9, %v2477_v58 }
 0x57f   : > { %v4147_v43 = vpop.f32.mrf.mxu0 }
 0x580   : > { %v2580_v34 = vmax.f32 %v2558_v38, 0.0 }
 0x581   : > { %v2560_v2 = vpop.f32.mrf.mxu0 }
 0x582   : > { %v2561_v25 = vadd.f32 %v2560_v2, %v2481_v56 }
 0x583   : > { %v4148_v33 = vpop.f32.mrf.mxu0 }
 0x584   : > { %v2581_v32 = vmax.f32 %v2561_v25, 0.0 }
 0x585   : > { %v2565_v7 = vpop.f32.mrf.mxu0 }
 0x586   : > { %v2566_v47 = vadd.f32 %v2565_v7, %v2485_v3  ;;  %v2586_v1 = vpack.c.bf16 %v2581_v32, %v2580_v34 }
 0x587   : > { %v4151_v6 = vpop.f32.mrf.mxu0 }
 0x588   : > { %v2582_v55 = vmax.f32 %v2566_v47, 0.0 }
 0x589   : > { %v2568_v62 = vpop.f32.mrf.mxu0 }
 0x58a   : > { %v2569_v49 = vadd.f32 %v2568_v62, %v2489_v63  ;;  %v6818_v63 = vpop.permute.xlu0 %2927 }
 0x58b   : > { %v4152_v24 = vpop.f32.mrf.mxu0 }
 0x58c   : > { %v2583_v0 = vmax.f32 %v2569_v49, 0.0 }
 0x58d   : > { %v2573_v40 = vpop.f32.mrf.mxu0 }
 0x58e   : > { %v2574_v42 = vadd.f32 %v2573_v40, %v2493_v45  ;;  %v2587_v46 = vpack.c.bf16 %v2583_v0, %v2582_v55 }
 0x58f   : > { %v4155_v31 = vpop.f32.mrf.mxu0 }
 0x590   : > { %v2584_v50 = vmax.f32 %v2574_v42, 0.0  ;;  %v6832_v42 = vpop.permute.xlu0 %2919 }
 0x591   : > { %v2576_v35 = vpop.f32.mrf.mxu0 }
 0x592   : > { %v2577_v60 = vadd.f32 %v2576_v35, %v2497_v44  ;;  %v6773_v44 = vpop.permute.xlu1 %2840 }
 0x593   : > { %v4156_v11 = vpop.f32.mrf.mxu0 }
 0x594   : > { %v2585_v5 = vmax.f32 %v2577_v60, 0.0  ;;  %v6840_v49 = vpop.permute.xlu0 %3018 }
 0x595   : > { %v2810_v54 = vpop.f32.mrf.mxu0  ;;  %7892 = vst [vmem:[#allocation15_spill] sm:$0xff] %v6840_v49 }
 0x596   : > { %v2588_v39 = vpack.c.bf16 %v2585_v5, %v2584_v50  ;;  %v2811_v17 = vadd.f32 %v2810_v54, %v2707_v21  ;;  %v6784_v21 = vpop.permute.xlu1 %2844 }
 0x597   : > { %v4183_v12 = vpop.f32.mrf.mxu0 }
 0x598   : > { %v6765_v20 = vmax.f32 %v2811_v17, 0.0  ;;  %4158 = vmatpush3.bf16.msra.mxu1 %v2588_v39  ;;  %v6852_v11 = vpop.permute.xlu0 %3006 }
 0x599   : > { %v2813_v57 = vpop.f32.mrf.mxu0  ;;  %4159 = vmatprep.subr.bf16.mxu1 %v7799_v30 }
 0x59a   : > { %v2814_v14 = vadd.f32 %v2813_v57, %v2712_v27  ;;  %2875 = vrot.lane.b32.xlu0 %v6765_v20, %s4505_s20  ;;  %v6790_v2 = vpop.permute.xlu1 %2923 }
 0x59b   : > { %v4184_v28 = vpop.f32.mrf.mxu0 }
 0x59c   : > { %v6770_v10 = vmax.f32 %v2814_v14, 0.0  ;;  %4160 = vmatpush3.bf16.msra.mxu1 %v2587_v46  ;;  %v6860_v50 = vpop.permute.xlu0 %2998 }
 0x59d   : > { %v2818_v48 = vpop.f32.mrf.mxu0  ;;  %4161 = vmatprep.subr.bf16.mxu1 %v7799_v30 }
 0x59e   : > { %2893 = vrot.lane.b32.xlu0 %v6765_v20, %s4527_s28  ;;  %2877 = vrot.lane.b32.xlu1 %v6770_v10, %s4505_s20  ;;  %v2819_v6 = vadd.f32 %v2818_v48, %v6737_v18  ;;  %v6801_v45 = vpop.permute.xlu1 %3085 }
 0x59f   : > { %v4187_v27 = vpop.f32.mrf.mxu0 }
 0x5a0   : > { %4162 = vmatpush3.bf16.msra.mxu1 %v2586_v1  ;;  %v6803_v62 = vmax.f32 %v2819_v6, 0.0  ;;  %v6873_v54 = vpop.permute.xlu0 %3097 }
 0x5a1   : > { %v2821_v3 = vpop.f32.mrf.mxu0  ;;  %4193 = vmatprep.subr.bf16.mxu1 %v7799_v30  ;;  %7895 = vst [vmem:[#allocation65_spill] sm:$0xff] %v6873_v54  ;;  %v7035_v54 = vld [vmem:[%s7451_s4 + $0x68] sm:$0xff] }
 0x5a2   : > { %2954 = vrot.lane.b32.xlu0 %v6765_v20, %s4504_s17  ;;  %2895 = vrot.lane.b32.xlu1 %v6770_v10, %s4527_s28  ;;  %v2822_v24 = vadd.f32 %v2821_v3, %v6739_v52  ;;  %v6812_v40 = vpop.permute.xlu1 %3251 }
 0x5a3   : > { %v4188_v56 = vpop.f32.mrf.mxu0 }
 0x5a4   : > { %v6810_v18 = vmax.f32 %v2822_v24, 0.0  ;;  %v6883_v0 = vpop.permute.xlu0 %3089 }
 0x5a5   : > { %v2826_v9 = vpop.f32.mrf.mxu0  ;;  %7896 = vst [vmem:[#allocation29_spill] sm:$0xff] %v6883_v0 }
 0x5a6   : > { %2972 = vrot.lane.b32.xlu0 %v6765_v20, %s4528_s29  ;;  %2956 = vrot.lane.b32.xlu1 %v6770_v10, %s4504_s17  ;;  %v6824_v52 = vpop.permute.xlu1 %3255  ;;  %v2827_v5 = vadd.f32 %v2826_v9, %v6735_v59 }
 0x5a7   : > { %v4191_v43 = vpop.f32.mrf.mxu0  ;;  %7891 = vst [vmem:[#allocation17_spill] sm:$0xff] %v6824_v52 }
 0x5a8   : > { %v6875_v25 = vmax.f32 %v2827_v5, 0.0  ;;  %v6896_v12 = vpop.permute.xlu0 %3077 }
 0x5a9   : > { %v2829_v33 = vpop.f32.mrf.mxu0 }
 0x5aa   : > { %3033 = vrot.lane.b32.xlu0 %v6765_v20, %s4529_s21  ;;  %2974 = vrot.lane.b32.xlu1 %v6770_v10, %s4528_s29  ;;  %v6830_v31 = vpop.permute.xlu1 %3002  ;;  %v2830_v39 = vadd.f32 %v2829_v33, %v6749_v41 }
 0x5ab   : > { %v4192_v7 = vpop.f32.mrf.mxu0 }
 0x5ac   : > { %v6898_v38 = vmax.f32 %v2830_v39, 0.0  ;;  %v6906_v41 = vpop.permute.xlu0 %3176 }
 0x5ad   : > { %7900 = vst [vmem:[#allocation20_spill] sm:$0xff] %v6906_v41 }
 0x5ae   : > { %3051 = vrot.lane.b32.xlu0 %v6765_v20, %s4530_s16  ;;  %3035 = vrot.lane.b32.xlu1 %v6770_v10, %s4529_s21  ;;  %v6838_v35 = vpop.permute.xlu1 %3164  ;;  %7898 = vst [vmem:[#allocation42_spill] sm:$0xff] %v6898_v38 }
 0x5b0   : > { %v6918_v32 = vpop.permute.xlu0 %3168 }
 0x5b1   : > { %7902 = vst [vmem:[#allocation22_spill] sm:$0xff] %v6918_v32 }
 0x5b2   : > { %3053 = vrot.lane.b32.xlu1 %v6770_v10, %s4530_s16  ;;  %2879 = vrot.lane.b32.xlu0 %v6803_v62, %s4505_s20  ;;  %v6850_v60 = vpop.permute.xlu1 %3330 }
 0x5b3   : > { %7893 = vst [vmem:[#allocation37_spill] sm:$0xff] %v6850_v60 }
 0x5b4   : > { %v6926_v14 = vpop.permute.xlu0 %3156 }
 0x5b6   : > { %2897 = vrot.lane.b32.xlu0 %v6803_v62, %s4527_s28  ;;  %2881 = vrot.lane.b32.xlu1 %v6810_v18, %s4505_s20  ;;  %v6858_v47 = vpop.permute.xlu1 %3334 }
 0x5b7   : > { %7894 = vst [vmem:[#allocation19_spill] sm:$0xff] %v6858_v47 }
 0x5b8   : > { %v6938_v34 = vpop.permute.xlu0 %3247 }
 0x5b9   : > { %7904 = vst [vmem:[#allocation69_spill] sm:$0xff] %v6938_v34  ;;  %v7091_v34 = vld [vmem:[%s7451_s4 + $0x88] sm:$0xff] }
 0x5ba   : > { %2958 = vrot.lane.b32.xlu0 %v6803_v62, %s4504_s17  ;;  %2899 = vrot.lane.b32.xlu1 %v6810_v18, %s4527_s28  ;;  %v6867_v58 = vpop.permute.xlu1 %3081 }
 0x5bc   : > { %v6946_v1 = vpop.permute.xlu0 %3235 }
 0x5bd   : > { %7906 = vst [vmem:[#allocation14_spill] sm:$0xff] %v6946_v1 }
 0x5be   : > { %2976 = vrot.lane.b32.xlu0 %v6803_v62, %s4528_s29  ;;  %2960 = vrot.lane.b32.xlu1 %v6810_v18, %s4504_s17  ;;  %v6881_v59 = vpop.permute.xlu1 %3243 }
 0x5c0   : > { %v6958_v3 = vpop.permute.xlu0 %3326 }
 0x5c1   : > { %7908 = vst [vmem:[#allocation49_spill] sm:$0xff] %v6958_v3 }
 0x5c2   : > { %3037 = vrot.lane.b32.xlu0 %v6803_v62, %s4529_s21  ;;  %2978 = vrot.lane.b32.xlu1 %v6810_v18, %s4528_s29  ;;  %v6890_v17 = vpop.permute.xlu1 %3409 }
 0x5c3   : > { %7897 = vst [vmem:[#allocation44_spill] sm:$0xff] %v6890_v17 }
 0x5c6   : > { %3055 = vrot.lane.b32.xlu0 %v6803_v62, %s4530_s16  ;;  %3039 = vrot.lane.b32.xlu1 %v6810_v18, %s4529_s21  ;;  %v6904_v55 = vpop.permute.xlu1 %3413 }
 0x5c7   : > { %7899 = vst [vmem:[#allocation64_spill] sm:$0xff] %v6904_v55 }
 0x5ca   : > { %3116 = vrot.lane.b32.xlu0 %v6803_v62, %s4531_s24  ;;  %3057 = vrot.lane.b32.xlu1 %v6810_v18, %s4530_s16  ;;  %v6912_v57 = vpop.permute.xlu1 %3160 }
 0x5cb   : > { %7901 = vst [vmem:[#allocation38_spill] sm:$0xff] %v6912_v57 }
 0x5ce   : > { %3134 = vrot.lane.b32.xlu0 %v6803_v62, %s4532_s7  ;;  %3118 = vrot.lane.b32.xlu1 %v6810_v18, %s4531_s24  ;;  %v6924_v46 = vpop.permute.xlu1 %3322 }
 0x5d2   : > { %3195 = vrot.lane.b32.xlu0 %v6803_v62, %s4533_s19  ;;  %3136 = vrot.lane.b32.xlu1 %v6810_v18, %s4532_s7  ;;  %v6932_v28 = vpop.permute.xlu1 %3488 }
 0x5d3   : > { %7903 = vst [vmem:[#allocation52_spill] sm:$0xff] %v6932_v28 }
 0x5d6   : > { %3213 = vrot.lane.b32.xlu0 %v6803_v62, %s4534_s23  ;;  %3197 = vrot.lane.b32.xlu1 %v6810_v18, %s4533_s19  ;;  %v6944_v48 = vpop.permute.xlu1 %3492 }
 0x5d7   : > { %7905 = vst [vmem:[#allocation28_spill] sm:$0xff] %v6944_v48 }
 0x5da   : > { %3215 = vrot.lane.b32.xlu1 %v6810_v18, %s4534_s23  ;;  %2883 = vrot.lane.b32.xlu0 %v6875_v25, %s4505_s20  ;;  %v6952_v27 = vpop.permute.xlu1 %3239 }
 0x5db   : > { %7907 = vst [vmem:[#allocation36_spill] sm:$0xff] %v6952_v27 }
 0x5de   : > { %2962 = vrot.lane.b32.xlu1 %v6875_v25, %s4504_s17  ;;  %2901 = vrot.lane.b32.xlu0 %v6875_v25, %s4527_s28  ;;  %v6964_v56 = vpop.permute.xlu1 %3401 }
 0x5df   : > { %7909 = vst [vmem:[#allocation33_spill] sm:$0xff] %v6964_v56  ;;  %v7005_v56 = vld [vmem:[%s7451_s4 + $0x78] sm:$0xff] }
 0x5e2   : > { %3041 = vrot.lane.b32.xlu1 %v6875_v25, %s4529_s21  ;;  %2980 = vrot.lane.b32.xlu0 %v6875_v25, %s4528_s29 }
 0x5e6   : > { %3059 = vrot.lane.b32.xlu1 %v6875_v25, %s4530_s16  ;;  %3043 = vrot.lane.b32.xlu0 %v6898_v38, %s4529_s21 }
 0x5ea   : > { %3120 = vrot.lane.b32.xlu1 %v6875_v25, %s4531_s24  ;;  %3061 = vrot.lane.b32.xlu0 %v6898_v38, %s4530_s16 }
 0x5ee   : > { %3138 = vrot.lane.b32.xlu1 %v6875_v25, %s4532_s7  ;;  %3122 = vrot.lane.b32.xlu0 %v6898_v38, %s4531_s24 }
 0x5f2   : > { %3199 = vrot.lane.b32.xlu1 %v6875_v25, %s4533_s19  ;;  %3140 = vrot.lane.b32.xlu0 %v6898_v38, %s4532_s7 }
 0x5f6   : > { %3217 = vrot.lane.b32.xlu1 %v6875_v25, %s4534_s23  ;;  %3201 = vrot.lane.b32.xlu0 %v6898_v38, %s4533_s19 }
 0x5fa   : > { %3278 = vrot.lane.b32.xlu1 %v6875_v25, %s4518_s11  ;;  %3219 = vrot.lane.b32.xlu0 %v6898_v38, %s4534_s23 }
 0x5fe   : > { %3296 = vrot.lane.b32.xlu1 %v6875_v25, %s4535_s6  ;;  %3280 = vrot.lane.b32.xlu0 %v6898_v38, %s4518_s11 }
 0x602   : > { %3357 = vrot.lane.b32.xlu1 %v6875_v25, %s4520_s13  ;;  %3298 = vrot.lane.b32.xlu0 %v6898_v38, %s4535_s6 }
 0x606   : > { %3375 = vrot.lane.b32.xlu1 %v6875_v25, %s4536_s8  ;;  %3359 = vrot.lane.b32.xlu0 %v6898_v38, %s4520_s13 }
 0x60a   : > { %3377 = vrot.lane.b32.xlu0 %v6898_v38, %s4536_s8  ;;  %2885 = vrot.lane.b32.xlu1 %v6898_v38, %s4505_s20 }
 0x60c   : > { %v6966_v9 = vpop.permute.xlu0 %2875 }
 0x60e   : > { %3130 = vrot.lane.b32.xlu0 %v6765_v20, %s4532_s7  ;;  %2903 = vrot.lane.b32.xlu1 %v6898_v38, %s4527_s28 }
 0x610   : > { %v6972_v43 = vpop.permute.xlu0 %2893  ;;  %v6974_v33 = vpop.permute.xlu1 %2877 }
 0x612   : > { %3274 = vrot.lane.b32.xlu0 %v6803_v62, %s4518_s11  ;;  %2964 = vrot.lane.b32.xlu1 %v6898_v38, %s4504_s17 }
 0x614   : > { %v6980_v7 = vpop.permute.xlu0 %2954  ;;  %v6982_v6 = vpop.permute.xlu1 %2895 }
 0x616   : > { %3292 = vrot.lane.b32.xlu0 %v6803_v62, %s4535_s6  ;;  %2982 = vrot.lane.b32.xlu1 %v6898_v38, %s4528_s29 }
 0x618   : > { %v6988_v24 = vpop.permute.xlu0 %2972  ;;  %v6990_v5 = vpop.permute.xlu1 %2956 }
 0x61a   : > { %3314 = vperm.xlu0 %4397, %v6439_v13   ;;  %3112 = vrot.lane.b32.xlu1 %v6765_v20, %s4531_s24 }
 0x61c   : > { %v6995_v39 = vpop.permute.xlu0 %3033  ;;  %v6997_v1 = vpop.permute.xlu1 %2974 }
 0x61e   : > { %4400 = vset.pattern.permute.xlu0 %v7887_v19  ;;  %3114 = vrot.lane.b32.xlu1 %v6770_v10, %s4531_s24 }
 0x61f   : > { %3405 = vperm.xlu0 %4400, %v7005_v56  }
 0x620   : > { %v7008_v13 = vpop.permute.xlu0 %3051  ;;  %v7010_v27 = vpop.permute.xlu1 %3035 }
 0x622   : > { %3132 = vrot.lane.b32.xlu1 %v6770_v10, %s4532_s7 }
 0x623   : > { %3438 = vrot.lane.b32.xlu0 %v6898_v38, %s4522_s15 }
 0x624   : > { %v7016_v48 = vpop.permute.xlu1 %3053  ;;  %v2880_v55 = vpop.permute.xlu0 %2879 }
 0x626   : > { %3276 = vrot.lane.b32.xlu1 %v6810_v18, %s4518_s11 }
 0x627   : > { %3456 = vrot.lane.b32.xlu0 %v6898_v38, %s4537_s27 }
 0x628   : > { %v2898_v28 = vpop.permute.xlu0 %2897  ;;  %v7022_v17 = vpop.permute.xlu1 %2881 }
 0x629   : > { %v2914_v47 = vsel %vm2911_vm2, %v2880_v55, %v2898_v28  ;;  %v2865_v55 = vmul.f32 %v6751_v15, %v6803_v62 }
 0x62a   : > { %3294 = vrot.lane.b32.xlu1 %v6810_v18, %s4535_s6  ;;  %v2944_v41 = vmul.f32 %v6818_v63, %v2914_v47 }
 0x62b   : > { %3191 = vrot.lane.b32.xlu0 %v6765_v20, %s4533_s19 }
 0x62c   : > { %v2959_v60 = vpop.permute.xlu0 %2958  ;;  %v7029_v52 = vpop.permute.xlu1 %2899  ;;  %v2950_v63 = vadd.f32 %v2944_v41, %v2865_v55  ;;  %v7064_v41 = vld [vmem:[%s7451_s4 + $0x70] sm:$0xff]  ;;  %v7070_v55 = vld [vmem:[%s7451_s4 + $0x60] sm:$0xff] }
 0x62e   : > { %3318 = vperm.xlu1 %4401, %v7035_v54  }
 0x62f   : > { %3209 = vrot.lane.b32.xlu0 %v6765_v20, %s4534_s23 }
 0x630   : > { %v2977_v28 = vpop.permute.xlu0 %2976  ;;  %v7042_v49 = vpop.permute.xlu1 %2960 }
 0x631   : > { %v2993_v23 = vsel %vm2990_vm3, %v2959_v60, %v2977_v28 }
 0x632   : > { %v3023_v47 = vmul.f32 %v6852_v11, %v2993_v23  ;;  %3436 = vrot.lane.b32.xlu1 %v6875_v25, %s4522_s15 }
 0x633   : > { %3353 = vrot.lane.b32.xlu0 %v6803_v62, %s4520_s13  ;;  %4402 = vset.pattern.permute.xlu1 %v7888_v8 }
 0x634   : > { %v3029_v38 = vadd.f32 %v3023_v47, %v2950_v63  ;;  %v3038_v22 = vpop.permute.xlu0 %3037  ;;  %v7051_v3 = vpop.permute.xlu1 %2978 }
 0x636   : > { %3454 = vrot.lane.b32.xlu1 %v6875_v25, %s4537_s27 }
 0x637   : > { %3371 = vrot.lane.b32.xlu0 %v6803_v62, %s4536_s8 }
 0x638   : > { %v3056_v15 = vpop.permute.xlu0 %3055  ;;  %v7057_v23 = vpop.permute.xlu1 %3039 }
 0x639   : > { %v3072_v60 = vsel %vm3069_vm4, %v3038_v22, %v3056_v15  ;;  %v7910_v22 = vmov 10  }
 0x63a   : > { %v3102_v11 = vmul.f32 %v6801_v45, %v3072_v60  ;;  %3480 = vperm.xlu1 %4402, %v7064_v41   ;;  %v7080_v45 = vld [vmem:[%s7451_s4 + $0x80] sm:$0xff] }
 0x63b   : > { %3393 = vperm.xlu0 %4400, %v7070_v55  }
 0x63c   : > { %v3108_v28 = vadd.f32 %v3102_v11, %v3029_v38  ;;  %v3117_v63 = vpop.permute.xlu0 %3116  ;;  %v7073_v47 = vpop.permute.xlu1 %3057 }
 0x63e   : > { %4403 = vset.pattern.permute.xlu1 %v7910_v22 }
 0x63f   : > { %4404 = vset.pattern.permute.xlu0 %v7888_v8  ;;  %3524 = vperm.xlu1 %4403, %v7080_v45  }
 0x640   : > { %v3135_v15 = vpop.permute.xlu0 %3134  ;;  %v7083_v60 = vpop.permute.xlu1 %3118  ;;  %3484 = vperm.xlu0 %4404, %v7005_v56  }
 0x641   : > { %7911 = vst [vmem:[#allocation43_spill] sm:$0xff] %v7083_v60  ;;  %v3151_v38 = vsel %vm3148_vm5, %v3117_v63, %v3135_v15  ;;  %v4459_v63 = vld [vmem:[%s7450_s3 + $0x78] sm:$0xff]  }
 0x642   : > { %v3181_v11 = vmul.f32 %v6838_v35, %v3151_v38  ;;  %4164 = vmatmul.mubr.msk.bf16.vlgmr.msra.gmra.mxu1 %vm373_vm0, %v4459_v63 }
 0x643   : > { %3528 = vperm.xlu1 %4403, %v7091_v34   ;;  %4167 = vmatprep.mubr.msk.bf16.mxu1 %vm4515_vm9, %v7799_v30 }
 0x644   : > { %v3187_v32 = vadd.f32 %v3181_v11, %v3108_v28  ;;  %v3196_v57 = vpop.permute.xlu0 %3195  ;;  %v7094_v0 = vpop.permute.xlu1 %3136  ;;  %3272 = vrot.lane.b32.xlu0 %v6770_v10, %s4518_s11 }
 0x645   : > { %7912 = vst [vmem:[#allocation2_spill] sm:$0xff] %v7094_v0 }
 0x647   : > { %3193 = vrot.lane.b32.xlu1 %v6770_v10, %s4533_s19 }
 0x648   : > { %v3214_v35 = vpop.permute.xlu0 %3213  ;;  %v7106_v28 = vpop.permute.xlu1 %3197  ;;  %3290 = vrot.lane.b32.xlu0 %v6770_v10, %s4535_s6  ;;  %4405 = vset.pattern.permute.xlu1 %v7887_v19 }
 0x649   : > { %7913 = vst [vmem:[#allocation66_spill] sm:$0xff] %v7106_v28  ;;  %v3230_v15 = vsel %vm3227_vm6, %v3196_v57, %v3214_v35 }
 0x64a   : > { %v3260_v38 = vmul.f32 %v6881_v59, %v3230_v15 }
 0x64b   : > { %3211 = vrot.lane.b32.xlu1 %v6770_v10, %s4534_s23 }
 0x64c   : > { %v7115_v11 = vadd.f32 %v3260_v38, %v3187_v32  ;;  %v7117_v63 = vpop.permute.xlu1 %3215  ;;  %v2884_v60 = vpop.permute.xlu0 %2883  ;;  %3434 = vrot.lane.b32.xlu0 %v6810_v18, %s4522_s15  ;;  %v2867_v38 = vmul.f32 %v6741_v61, %v6875_v25 }
 0x64d   : > { %7914 = vst [vmem:[#allocation41_spill] sm:$0xff] %v7117_v63 }
 0x64f   : > { %3355 = vrot.lane.b32.xlu1 %v6810_v18, %s4520_s13 }
 0x650   : > { %v2963_v28 = vpop.permute.xlu1 %2962  ;;  %v2902_v19 = vpop.permute.xlu0 %2901  ;;  %3452 = vrot.lane.b32.xlu0 %v6810_v18, %s4537_s27 }
 0x651   : > { %v2916_v59 = vsel %vm2911_vm2, %v2884_v60, %v2902_v19 }
 0x652   : > { %v2946_v57 = vmul.f32 %v6743_v36, %v2916_v59 }
 0x653   : > { %3373 = vrot.lane.b32.xlu1 %v6810_v18, %s4536_s8 }
 0x654   : > { %v3042_v32 = vpop.permute.xlu1 %3041  ;;  %v2981_v35 = vpop.permute.xlu0 %2980  ;;  %3476 = vperm.xlu0 %4404, %v7035_v54   ;;  %v2952_v0 = vadd.f32 %v2946_v57, %v2867_v38 }
 0x655   : > { %v2995_v15 = vsel %vm2990_vm3, %v2963_v28, %v2981_v35 }
 0x656   : > { %v3025_v63 = vmul.f32 %v6747_v26, %v2995_v15 }
 0x657   : > { %3397 = vperm.xlu1 %4405, %v7035_v54  }
 0x658   : > { %v3060_v60 = vpop.permute.xlu1 %3059  ;;  %3349 = vrot.lane.b32.xlu0 %v6765_v20, %s4520_s13  ;;  %v7137_v19 = vpop.permute.xlu0 %3043  ;;  %v3031_v59 = vadd.f32 %v3025_v63, %v2952_v0 }
 0x659   : > { %v3074_v36 = vsel %vm3069_vm4, %v3042_v32, %v3060_v60  ;;  %4408 = vset.pattern.permute.xlu0 %v7910_v22 }
 0x65a   : > { %v3104_v28 = vmul.f32 %v6759_v53, %v3074_v36 }
 0x65b   : > { %3270 = vrot.lane.b32.xlu1 %v6765_v20, %s4518_s11 }
 0x65c   : > { %v3110_v61 = vadd.f32 %v3104_v28, %v3031_v59  ;;  %v3121_v26 = vpop.permute.xlu1 %3120  ;;  %3367 = vrot.lane.b32.xlu0 %v6765_v20, %s4536_s8  ;;  %v7146_v25 = vpop.permute.xlu0 %3061  ;;  %4406 = vset.pattern.permute.xlu1 %v7888_v8 }
 0x65f   : > { %3288 = vrot.lane.b32.xlu1 %v6765_v20, %s4535_s6 }
 0x660   : > { %v3139_v57 = vpop.permute.xlu1 %3138  ;;  %3428 = vrot.lane.b32.xlu0 %v6765_v20, %s4522_s15  ;;  %v7153_v53 = vpop.permute.xlu0 %3122 }
 0x661   : > { %v3153_v0 = vsel %vm3148_vm5, %v3121_v26, %v3139_v57 }
 0x662   : > { %v3183_v63 = vmul.f32 %v6763_v51, %v3153_v0 }
 0x663   : > { %3432 = vrot.lane.b32.xlu1 %v6803_v62, %s4522_s15 }
 0x664   : > { %v3189_v32 = vadd.f32 %v3183_v63, %v3110_v61  ;;  %v3200_v35 = vpop.permute.xlu1 %3199  ;;  %3446 = vrot.lane.b32.xlu0 %v6765_v20, %s4537_s27  ;;  %v7161_v8 = vpop.permute.xlu0 %3140  ;;  %v4461_v63 = vld [vmem:[%s7450_s3 + $0x88] sm:$0xff]  }
 0x667   : > { %3450 = vrot.lane.b32.xlu1 %v6803_v62, %s4537_s27 }
 0x668   : > { %v3218_v15 = vpop.permute.xlu1 %3217  ;;  %v7165_v38 = vpop.permute.xlu0 %3201  ;;  %3508 = vperm.xlu0 %4408, %v7070_v55  }
 0x669   : > { %v3232_v51 = vsel %vm3227_vm6, %v3200_v35, %v3218_v15  ;;  %v2912_v15 = vsel %vm2911_vm2, %v6966_v9, %v6972_v43 }
 0x66a   : > { %v3262_v60 = vmul.f32 %v6812_v40, %v3232_v51 }
 0x66b   : > { %3472 = vperm.xlu1 %4406, %v7070_v55  }
 0x66c   : > { %v7171_v36 = vadd.f32 %v3262_v60, %v3189_v32  ;;  %v7173_v59 = vpop.permute.xlu1 %3278  ;;  %v7175_v28 = vpop.permute.xlu0 %3219  ;;  %4410 = vset.pattern.permute.xlu0 %v7807_v4 }
 0x66d   : > { %3567 = vperm.xlu0 %4410, %v7091_v34   ;;  %v4460_v34 = vld [vmem:[%s7450_s3 + $0x80] sm:$0xff]  }
 0x66e   : > { %7915 = vst [vmem:[#allocation70_spill] sm:$0xff] %v7171_v36  ;;  %4168 = vmatmul.mubr.msk.bf16.gmra.mxu1 %vm373_vm0, %v4460_v34  ;;  %v2991_v34 = vsel %vm2990_vm3, %v6980_v7, %v6988_v24  ;;  %v2942_v36 = vmul.f32 %v6832_v42, %v2912_v15  ;;  %v2913_v24 = vsel %vm2911_vm2, %v6974_v33, %v6982_v6  ;;  %v7925_v15 = vld [vmem:[#allocation22_spill] sm:$0xff] }
 0x66f   : > { %4407 = vset.pattern.permute.xlu1 %v7910_v22  ;;  %4171 = vmatprep.mubr.msk.bf16.mxu1 %vm4515_vm9, %v7799_v30  ;;  %v3021_v9 = vmul.f32 %v6860_v50, %v2991_v34  ;;  %v2992_v50 = vsel %vm2990_vm3, %v6990_v5, %v6997_v1  ;;  %v3071_v6 = vsel %vm3069_vm4, %v7010_v27, %v7016_v48 }
 0x670   : > { %v7180_v62 = vpop.permute.xlu1 %3296  ;;  %v7182_v61 = vpop.permute.xlu0 %3280  ;;  %3516 = vperm.xlu1 %4407, %v7064_v41   ;;  %v2864_v1 = vmul.f32 %v6784_v21, %v6770_v10  ;;  %v3022_v5 = vmul.f32 %v6830_v31, %v2992_v50  ;;  %v3101_v48 = vmul.f32 %v6867_v58, %v3071_v6  ;;  %v7928_v6 = vld [vmem:[#allocation8_spill] sm:$0xff] }
 0x671   : > { %3547 = vperm.xlu0 %4410, %v7070_v55  }
 0x674   : > { %v7186_v40 = vpop.permute.xlu1 %3357  ;;  %v7188_v26 = vpop.permute.xlu0 %3298  ;;  %3520 = vperm.xlu1 %4407, %v7005_v56  }
 0x675   : > { %7916 = vst [vmem:[#allocation68_spill] sm:$0xff] %v7186_v40 }
 0x676   : > { %4172 = vmatmul.mubr.msk.bf16.gmra.mxu1 %vm373_vm0, %v4461_v63  ;;  %v3070_v63 = vsel %vm3069_vm4, %v6995_v39, %v7008_v13 }
 0x677   : > { %4199 = vmatprep.mubr.msk.bf16.mxu1 %vm4515_vm9, %v7799_v30  ;;  %v2863_v30 = vmul.f32 %v6773_v44, %v6765_v20  ;;  %v3100_v7 = vmul.f32 %v6896_v12, %v3070_v63  ;;  %v2943_v12 = vmul.f32 %v6790_v2, %v2913_v24  ;;  %v2994_v2 = vsel %vm2990_vm3, %v7042_v49, %v7051_v3  ;;  %v7920_v49 = vld [vmem:[#allocation43_spill] sm:$0xff] }
 0x678   : > { %v7194_v57 = vpop.permute.xlu1 %3375  ;;  %v7196_v22 = vpop.permute.xlu0 %3359  ;;  %3351 = vrot.lane.b32.xlu1 %v6770_v10, %s4520_s13  ;;  %v3024_v31 = vmul.f32 %v6761_v37, %v2994_v2 }
 0x679   : > { %7917 = vst [vmem:[#allocation35_spill] sm:$0xff] %v7196_v22  ;;  %v2948_v40 = vadd.f32 %v2942_v36, %v2863_v30 }
 0x67b   : > { %v3027_v39 = vadd.f32 %v3021_v9, %v2948_v40  ;;  %v7922_v40 = vld [vmem:[#allocation38_spill] sm:$0xff] }
 0x67c   : > { %v7203_v55 = vpop.permute.xlu0 %3377  ;;  %3369 = vrot.lane.b32.xlu1 %v6770_v10, %s4536_s8  ;;  %v7207_v0 = vpop.permute.xlu1 %2885 }
 0x67d   : > { %7918 = vst [vmem:[#allocation5_spill] sm:$0xff] %v7203_v55 }
 0x680   : > { %v3131_v32 = vpop.permute.xlu0 %3130  ;;  %3430 = vrot.lane.b32.xlu1 %v6770_v10, %s4522_s15  ;;  %v7214_v35 = vpop.permute.xlu1 %2903 }
 0x681   : > { %v2917_v50 = vsel %vm2911_vm2, %v7207_v0, %v7214_v35  ;;  %v3075_v0 = vsel %vm3069_vm4, %v7137_v19, %v7146_v25  ;;  %v3233_v19 = vsel %vm3227_vm6, %v7165_v38, %v7175_v28  ;;  %v7936_v38 = vld [vmem:[#allocation37_spill] sm:$0xff] }
 0x684   : > { %v3275_v51 = vpop.permute.xlu0 %3274  ;;  %3448 = vrot.lane.b32.xlu1 %v6770_v10, %s4537_s27  ;;  %v7224_v60 = vpop.permute.xlu1 %2964  ;;  %v3073_v10 = vsel %vm3069_vm4, %v7057_v23, %v7073_v47  ;;  %v7921_v23 = vld [vmem:[#allocation29_spill] sm:$0xff] }
 0x685   : > { %v3103_v47 = vmul.f32 %v7921_v23, %v3073_v10 }
 0x688   : > { %v3293_v43 = vpop.permute.xlu0 %3292  ;;  %3512 = vperm.xlu1 %4407, %v7035_v54   ;;  %v2983_v22 = vpop.permute.xlu1 %2982 }
 0x689   : > { %v3309_v55 = vsel %vm3306_vm7, %v3275_v51, %v3293_v43 }
 0x68a   : > { %v3339_v42 = vmul.f32 %v6924_v46, %v3309_v55  ;;  %v3106_v46 = vadd.f32 %v3100_v7, %v3027_v39 }
 0x68c   : > { %v7244_v20 = vadd.f32 %v3339_v42, %v7115_v11  ;;  %v3113_v44 = vpop.permute.xlu1 %3112  ;;  %4409 = vset.pattern.permute.xlu1 %v7807_v4  ;;  %v2915_v4 = vsel %vm2911_vm2, %v7022_v17, %v7029_v52  ;;  %v2866_v52 = vmul.f32 %v6753_v16, %v6810_v18  ;;  %v7919_v11 = vld [vmem:[#allocation2_spill] sm:$0xff]  ;;  %v7923_v16 = vld [vmem:[#allocation41_spill] sm:$0xff] }
 0x68d   : > { %v3149_v30 = vsel %vm3148_vm5, %v3113_v44, %v3131_v32  ;;  %3563 = vperm.xlu1 %4409, %v7080_v45   ;;  %v2945_v27 = vmul.f32 %v6757_v29, %v2915_v4  ;;  %v3152_v3 = vsel %vm3148_vm5, %v7920_v49, %v7919_v11  ;;  %v7924_v18 = vld [vmem:[#allocation66_spill] sm:$0xff]  ;;  %v2947_v4 = vmul.f32 %v7928_v6, %v2917_v50  ;;  %v7933_v11 = vld [vmem:[#allocation20_spill] sm:$0xff] }
 0x68e   : > { %v3179_v33 = vmul.f32 %v6926_v14, %v3149_v30  ;;  %v2949_v14 = vadd.f32 %v2943_v12, %v2864_v1  ;;  %v3231_v37 = vsel %vm3227_vm6, %v7924_v18, %v7923_v16  ;;  %v3182_v51 = vmul.f32 %v7925_v15, %v3152_v3  ;;  %v7927_v30 = vld [vmem:[#allocation49_spill] sm:$0xff]  ;;  %v7944_v50 = vld [vmem:[#allocation28_spill] sm:$0xff] }
 0x68f   : > { %v2951_v36 = vadd.f32 %v2945_v27, %v2866_v52  ;;  %v3154_v52 = vsel %vm3148_vm5, %v7153_v53, %v7161_v8  ;;  %v3312_v8 = vsel %vm3306_vm7, %v7182_v61, %v7188_v26 }
 0x690   : > { %v7263_v13 = vadd.f32 %v3179_v33, %v3106_v46  ;;  %v3115_v45 = vpop.permute.xlu1 %3114  ;;  %v3028_v21 = vadd.f32 %v3022_v5, %v2949_v14  ;;  %v7929_v5 = vld [vmem:[#allocation42_spill] sm:$0xff]  ;;  %v7931_v14 = vld [vmem:[#allocation15_spill] sm:$0xff]  ;;  %v3184_v49 = vmul.f32 %v7933_v11, %v3154_v52  ;;  %v7945_v52 = vmov 0.0  }
 0x691   : > { %3555 = vperm.xlu1 %4409, %v7064_v41   ;;  %v3030_v32 = vadd.f32 %v3024_v31, %v2951_v36  ;;  %v7934_v36 = vld [vmem:[#allocation17_spill] sm:$0xff] }
 0x692   : > { %v3107_v29 = vadd.f32 %v3101_v48, %v3028_v21  ;;  %v7932_v21 = vld [vmem:[#allocation65_spill] sm:$0xff]  ;;  %v3263_v23 = vmul.f32 %v7934_v36, %v3233_v19 }
 0x693   : > { %v3109_v9 = vadd.f32 %v3103_v47, %v3030_v32  ;;  %v7935_v47 = vld [vmem:[#allocation68_spill] sm:$0xff] }
 0x694   : > { %v3133_v17 = vpop.permute.xlu1 %3132 }
 0x695   : > { %v3150_v41 = vsel %vm3148_vm5, %v3115_v45, %v3133_v17  ;;  %v7281_v58 = vpop.permute.xlu0 %3314  ;;  %3559 = vperm.xlu1 %4409, %v7005_v56   ;;  %v7926_v56 = vld [vmem:[#allocation69_spill] sm:$0xff]  ;;  %v3188_v42 = vadd.f32 %v3182_v51, %v3109_v9 }
 0x696   : > { %v3180_v55 = vmul.f32 %v7922_v40, %v3150_v41  ;;  %v3261_v43 = vmul.f32 %v7926_v56, %v3231_v37  ;;  %v7930_v45 = vld [vmem:[#allocation53_spill] sm:$0xff]  ;;  %v3390_v40 = vsel %vm3385_vm8, %v7935_v47, %v7194_v57  ;;  %v7937_v37 = vld [vmem:[#allocation19_spill] sm:$0xff]  ;;  %v7941_v57 = vld [vmem:[#allocation70_spill] sm:$0xff] }
 0x697   : > { %v2868_v2 = vmul.f32 %v7930_v45, %v7929_v5  ;;  %v7939_v51 = vld [vmem:[#allocation5_spill] sm:$0xff] }
 0x698   : > { %v7290_v34 = vadd.f32 %v3180_v55, %v3107_v29  ;;  %v3277_v63 = vpop.permute.xlu1 %3276  ;;  %v3267_v44 = vadd.f32 %v3261_v43, %v3188_v42  ;;  %v3311_v29 = vsel %vm3306_vm7, %v7173_v59, %v7180_v62  ;;  %v3342_v59 = vmul.f32 %v7937_v37, %v3312_v8  ;;  %v7938_v62 = vld [vmem:[#allocation44_spill] sm:$0xff] }
 0x699   : > { %3551 = vperm.xlu1 %4409, %v7035_v54   ;;  %v2996_v54 = vsel %vm2990_vm3, %v7224_v60, %v2983_v22  ;;  %v2953_v27 = vadd.f32 %v2947_v4, %v2868_v2  ;;  %v3105_v22 = vmul.f32 %v7932_v21, %v3075_v0  ;;  %v3341_v28 = vmul.f32 %v7936_v38, %v3311_v29  ;;  %v7942_v43 = vld [vmem:[#allocation52_spill] sm:$0xff] }
 0x69a   : > { %v7294_v7 = vpop.permute.xlu0 %3405  ;;  %v3026_v48 = vmul.f32 %v7931_v14, %v2996_v54  ;;  %v3420_v32 = vmul.f32 %v7938_v62, %v3390_v40 }
 0x69b   : > { %v3347_v56 = vadd.f32 %v3341_v28, %v7941_v57 }
 0x69c   : > { %v3295_v24 = vpop.permute.xlu1 %3294  ;;  %v3032_v10 = vadd.f32 %v3026_v48, %v2953_v27 }
 0x69d   : > { %v3310_v39 = vsel %vm3306_vm7, %v3277_v63, %v3295_v24  ;;  %v7940_v63 = vld [vmem:[#allocation35_spill] sm:$0xff] }
 0x69e   : > { %v3340_v12 = vmul.f32 %v7927_v30, %v3310_v39  ;;  %v3439_v46 = vpop.permute.xlu0 %3438  ;;  %v3111_v17 = vadd.f32 %v3105_v22, %v3032_v10  ;;  %v3391_v61 = vsel %vm3385_vm8, %v7940_v63, %v7939_v51  ;;  %v7943_v39 = vld [vmem:[#allocation64_spill] sm:$0xff] }
 0x6a0   : > { %v7303_v33 = vadd.f32 %v3340_v12, %v3267_v44  ;;  %v3190_v41 = vadd.f32 %v3184_v49, %v3111_v17  ;;  %v3421_v44 = vmul.f32 %v7943_v39, %v3391_v61  ;;  %v3426_v12 = vadd.f32 %v3420_v32, %v3347_v56  ;;  %v7946_v49 = vld [vmem:[#allocation36_spill] sm:$0xff]  ;;  %v7947_v32 = vld [vmem:[#allocation33_spill] sm:$0xff] }
 0x6a2   : > { %v3457_v1 = vpop.permute.xlu0 %3456  ;;  %v3269_v16 = vadd.f32 %v3263_v23, %v3190_v41 }
 0x6a3   : > { %v3470_v26 = vsel %vm3464_vm10, %v3439_v46, %v3457_v1 }
 0x6a4   : > { %v3348_v24 = vadd.f32 %v3342_v59, %v3269_v16  ;;  %v3500_v30 = vmul.f32 %v7944_v50, %v3470_v26 }
 0x6a6   : > { %v7312_v35 = vpop.permute.xlu0 %3191  ;;  %v3427_v5 = vadd.f32 %v3421_v44, %v3348_v24 }
 0x6a8   : > { %v3506_v2 = vadd.f32 %v3500_v30, %v3427_v5 }
 0x6a9   : > { %v3319_v60 = vpop.permute.xlu1 %3318 }
 0x6aa   : > { %v7318_v31 = vpop.permute.xlu0 %3209 }
 0x6ab   : > { %v3228_v50 = vsel %vm3227_vm6, %v7312_v35, %v7318_v31 }
 0x6ad   : > { %v3437_v3 = vpop.permute.xlu1 %3436 }
 0x6ae   : > { %v3354_v25 = vpop.permute.xlu0 %3353 }
 0x6b1   : > { %v3455_v53 = vpop.permute.xlu1 %3454 }
 0x6b2   : > { %v3372_v55 = vpop.permute.xlu0 %3371  ;;  %v3469_v18 = vsel %vm3464_vm10, %v3437_v3, %v3455_v53 }
 0x6b3   : > { %v3499_v42 = vmul.f32 %v7942_v43, %v3469_v18  ;;  %v3388_v37 = vsel %vm3385_vm8, %v3354_v25, %v3372_v55 }
 0x6b5   : > { %v3481_v15 = vpop.permute.xlu1 %3480  ;;  %v3505_v6 = vadd.f32 %v3499_v42, %v3426_v12 }
 0x6b6   : > { %v7342_v9 = vpop.permute.xlu0 %3393 }
 0x6ba   : > { %v3525_v54 = vpop.permute.xlu1 %3524 }
 0x6bb   : > { %v3485_v4 = vpop.permute.xlu0 %3484  ;;  %v3535_v45 = vadd.f32 %v3525_v54, %v3505_v6 }
 0x6bd   : > { %v3541_v48 = vmax.f32 %v3535_v45, 0.0 }
 0x6be   : > { %v3529_v14 = vpop.permute.xlu1 %3528 }
 0x6bf   : > { %v3536_v46 = vadd.f32 %v3529_v14, %v3506_v2  ;;  %v3273_v1 = vpop.permute.xlu0 %3272 }
 0x6c1   : > { %v3542_v27 = vmax.f32 %v3536_v46, 0.0 }
 0x6c2   : > { %v3194_v0 = vpop.permute.xlu1 %3193 }
 0x6c3   : > { %v3545_v10 = vpack.c.bf16 %v3542_v27, %v3541_v48  ;;  %v3291_v21 = vpop.permute.xlu0 %3290 }
 0x6c4   : > { %v3308_v17 = vsel %vm3306_vm7, %v3273_v1, %v3291_v21 }
 0x6c5   : > { %4194 = vmatpush3.bf16.msra.mxu1 %v3545_v10  ;;  %v3338_v19 = vmul.f32 %v3319_v60, %v3308_v17 }
 0x6c6   : > { %v3212_v22 = vpop.permute.xlu1 %3211  ;;  %4195 = vmatprep.subr.bf16.mxu1 %v7945_v52 }
 0x6c7   : > { %v3229_v11 = vsel %vm3227_vm6, %v3194_v0, %v3212_v22  ;;  %v3435_v8 = vpop.permute.xlu0 %3434 }
 0x6c8   : > { %v3259_v3 = vmul.f32 %v7946_v49, %v3229_v11 }
 0x6ca   : > { %v3265_v41 = vadd.f32 %v3259_v3, %v7290_v34  ;;  %v3356_v29 = vpop.permute.xlu1 %3355  ;;  %v3418_v34 = vmul.f32 %v7947_v32, %v3388_v37 }
 0x6cb   : > { %v3453_v40 = vpop.permute.xlu0 %3452 }
 0x6cc   : > { %v3344_v36 = vadd.f32 %v3338_v19, %v3265_v41  ;;  %v3468_v26 = vsel %vm3464_vm10, %v3435_v8, %v3453_v40  ;;  %v3424_v57 = vadd.f32 %v3418_v34, %v7244_v20  ;;  %v7948_v20 = vld [vmem:[#allocation14_spill] sm:$0xff] }
 0x6cd   : > { %v3498_v25 = vmul.f32 %v3485_v4, %v3468_v26  ;;  %v3258_v6 = vmul.f32 %v7948_v20, %v3228_v50 }
 0x6ce   : > { %v3374_v23 = vpop.permute.xlu1 %3373 }
 0x6cf   : > { %v3477_v16 = vpop.permute.xlu0 %3476  ;;  %v3389_v59 = vsel %vm3385_vm8, %v3356_v29, %v3374_v23  ;;  %v3264_v45 = vadd.f32 %v3258_v6, %v7263_v13 }
 0x6d0   : > { %v3419_v51 = vmul.f32 %v7294_v7, %v3389_v59 }
 0x6d2   : > { %v3398_v53 = vpop.permute.xlu1 %3397  ;;  %v3425_v56 = vadd.f32 %v3419_v51, %v7303_v33 }
 0x6d3   : > { %v3350_v62 = vpop.permute.xlu0 %3349 }
 0x6d4   : > { %v3504_v39 = vadd.f32 %v3498_v25, %v3425_v56 }
 0x6d6   : > { %v3271_v47 = vpop.permute.xlu1 %3270 }
 0x6d7   : > { %v3368_v43 = vpop.permute.xlu0 %3367 }
 0x6d8   : > { %v3386_v35 = vsel %vm3385_vm8, %v3350_v62, %v3368_v43 }
 0x6d9   : > { %v3416_v48 = vmul.f32 %v7342_v9, %v3386_v35 }
 0x6da   : > { %v3289_v38 = vpop.permute.xlu1 %3288 }
 0x6db   : > { %v3429_v30 = vpop.permute.xlu0 %3428 }
 0x6de   : > { %v3433_v28 = vpop.permute.xlu1 %3432 }
 0x6df   : > { %v3447_v2 = vpop.permute.xlu0 %3446 }
 0x6e0   : > { %v3465_v46 = vsel %vm3464_vm10, %v3429_v30, %v3447_v2 }
 0x6e2   : > { %v3451_v18 = vpop.permute.xlu1 %3450 }
 0x6e3   : > { %v3467_v60 = vsel %vm3464_vm10, %v3433_v28, %v3451_v18  ;;  %v3509_v13 = vpop.permute.xlu0 %3508 }
 0x6e4   : > { %v3497_v61 = vmul.f32 %v3481_v15, %v3467_v60  ;;  %v3307_v15 = vsel %vm3306_vm7, %v3271_v47, %v3289_v38 }
 0x6e5   : > { %v3337_v4 = vmul.f32 %v7281_v58, %v3307_v15 }
 0x6e6   : > { %v3473_v63 = vpop.permute.xlu1 %3472  ;;  %v3503_v55 = vadd.f32 %v3497_v61, %v3424_v57 }
 0x6e7   : > { %v3343_v31 = vadd.f32 %v3337_v4, %v3264_v45  ;;  %v3495_v27 = vmul.f32 %v3473_v63, %v3465_v46 }
 0x6e8   : > { %v3568_v50 = vpop.permute.xlu0 %3567 }
 0x6e9   : > { %v3422_v10 = vadd.f32 %v3416_v48, %v3343_v31 }
 0x6eb   : > { %v3517_v42 = vpop.permute.xlu1 %3516  ;;  %v3501_v21 = vadd.f32 %v3495_v27, %v3422_v10  ;;  %v4465_v10 = vld [vmem:[%s7450_s3 + $0xc0] sm:$0xff]  }
 0x6ec   : > { %v3533_v24 = vadd.f32 %v3517_v42, %v3503_v55  ;;  %v3548_v45 = vpop.permute.xlu0 %3547 }
 0x6ed   : > { %v3531_v3 = vadd.f32 %v3509_v13, %v3501_v21  ;;  %v4467_v21 = vld [vmem:[%s7450_s3 + $0xd0] sm:$0xff]  }
 0x6ee   : > { %v3539_v12 = vmax.f32 %v3533_v24, 0.0 }
 0x6ef   : > { %v3521_v44 = vpop.permute.xlu1 %3520  ;;  %v3537_v8 = vmax.f32 %v3531_v3, 0.0 }
 0x6f0   : > { %v3534_v7 = vadd.f32 %v3521_v44, %v3504_v39 }
 0x6f2   : > { %v3540_v54 = vmax.f32 %v3534_v7, 0.0 }
 0x6f3   : > { %v3352_v33 = vpop.permute.xlu1 %3351 }
 0x6f4   : > { %v3544_v5 = vpack.c.bf16 %v3540_v54, %v3539_v12 }
 0x6f6   : > { %4196 = vmatpush3.bf16.msra.mxu1 %v3544_v5 }
 0x6f7   : > { %v3370_v14 = vpop.permute.xlu1 %3369  ;;  %4197 = vmatprep.subr.bf16.mxu1 %v7945_v52 }
 0x6f8   : > { %v3387_v1 = vsel %vm3385_vm8, %v3352_v33, %v3370_v14 }
 0x6f9   : > { %v3417_v58 = vmul.f32 %v3398_v53, %v3387_v1  ;;  %v4462_v53 = vld [vmem:[%s7450_s3 + $0xa8] sm:$0xff]  }
 0x6fb   : > { %v3431_v0 = vpop.permute.xlu1 %3430  ;;  %v3423_v49 = vadd.f32 %v3417_v58, %v3344_v36  ;;  %v4463_v36 = vld [vmem:[%s7450_s3 + $0xb0] sm:$0xff]   ;;  %v4466_v58 = vld [vmem:[%s7450_s3 + $0xc8] sm:$0xff]  }
 0x6ff   : > { %v3449_v22 = vpop.permute.xlu1 %3448 }
 0x700   : > { %v3466_v17 = vsel %vm3464_vm10, %v3431_v0, %v3449_v22 }
 0x701   : > { %v3496_v11 = vmul.f32 %v3477_v16, %v3466_v17  ;;  %v4464_v16 = vld [vmem:[%s7450_s3 + $0xb8] sm:$0xff]  }
 0x702   : > { %v7374_v23 = vpop.f32.mrf.mxu1 }
 0x703   : > { %v3502_v19 = vadd.f32 %v3496_v11, %v3423_v49  ;;  %v3513_v41 = vpop.permute.xlu1 %3512 }
 0x704   : > { %v4165_v9 = vpop.f32.mrf.mxu1 }
 0x705   : > { %v3532_v29 = vadd.f32 %v3513_v41, %v3502_v19 }
 0x706   : > { %v7379_v38 = vpop.f32.mrf.mxu1 }
 0x707   : > { %v3538_v47 = vmax.f32 %v3532_v29, 0.0 }
 0x708   : > { %v4166_v28 = vpop.f32.mrf.mxu1  ;;  %v3564_v26 = vpop.permute.xlu1 %3563 }
 0x709   : > { %v3543_v40 = vpack.c.bf16 %v3538_v47, %v3537_v8 }
 0x70b   : > { %4198 = vmatpush3.bf16.msra.mxu1 %v3543_v40 }
 0x70c   : > { %v3556_v42 = vpop.permute.xlu1 %3555 }
 0x70e   : > { %4200 = vmatmul.mubr.msk.bf16.vlgmr.msra.gmra.mxu1 %vm373_vm0, %v4462_v53 }
 0x70f   : > { %4203 = vmatprep.mubr.msk.bf16.mxu1 %vm4515_vm9, %v7945_v52 }
 0x710   : > { %v3560_v39 = vpop.permute.xlu1 %3559 }
 0x714   : > { %v3552_v20 = vpop.permute.xlu1 %3551 }
 0x716   : > { %4204 = vmatmul.mubr.msk.bf16.gmra.mxu1 %vm373_vm0, %v4463_v36 }
 0x717   : > { %4207 = vmatprep.mubr.msk.bf16.mxu1 %vm4515_vm9, %v7945_v52 }
 0x71e   : > { %4208 = vmatmul.mubr.msk.bf16.gmra.mxu1 %vm373_vm0, %v4464_v16 }
 0x72e   : > { %v7394_v18 = vpop.f32.mrf.mxu1 }
 0x730   : > { %v4169_v37 = vpop.f32.mrf.mxu1 }
 0x732   : > { %v7396_v59 = vpop.f32.mrf.mxu1 }
 0x734   : > { %v4170_v62 = vpop.f32.mrf.mxu1 }
 0x736   : > { %v7398_v60 = vpop.f32.mrf.mxu1 }
 0x738   : > { %v4173_v32 = vpop.f32.mrf.mxu1 }
 0x73a   : > { %v7400_v34 = vpop.f32.mrf.mxu1 }
 0x73c   : > { %v4174_v51 = vpop.f32.mrf.mxu1 }
 0x7ce   : > { %v3628_v63 = vpop.f32.mrf.mxu1 }
 0x7cf   : > { %v3629_v31 = vadd.f32 %v3628_v63, %v3548_v45 }
 0x7d0   : > { %v4201_v61 = vpop.f32.mrf.mxu1 }
 0x7d1   : > { %v3651_v27 = vmax.f32 %v3629_v31, 0.0 }
 0x7d2   : > { %v3631_v57 = vpop.f32.mrf.mxu1 }
 0x7d3   : > { %v3632_v2 = vadd.f32 %v3631_v57, %v3552_v20 }
 0x7d4   : > { %v4202_v56 = vpop.f32.mrf.mxu1 }
 0x7d5   : > { %v3652_v1 = vmax.f32 %v3632_v2, 0.0 }
 0x7d6   : > { %v3636_v43 = vpop.f32.mrf.mxu1 }
 0x7d7   : > { %v3637_v33 = vadd.f32 %v3636_v43, %v3556_v42  ;;  %v3657_v0 = vpack.c.bf16 %v3652_v1, %v3651_v27 }
 0x7d8   : > { %v4205_v25 = vpop.f32.mrf.mxu1 }
 0x7d9   : > { %v3653_v46 = vmax.f32 %v3637_v33, 0.0 }
 0x7da   : > { %v3639_v55 = vpop.f32.mrf.mxu1 }
 0x7db   : > { %v3640_v12 = vadd.f32 %v3639_v55, %v3560_v39 }
 0x7dc   : > { %v4206_v24 = vpop.f32.mrf.mxu1 }
 0x7dd   : > { %v3654_v14 = vmax.f32 %v3640_v12, 0.0 }
 0x7de   : > { %v3644_v44 = vpop.f32.mrf.mxu1 }
 0x7df   : > { %v3645_v30 = vadd.f32 %v3644_v44, %v3564_v26  ;;  %v3658_v48 = vpack.c.bf16 %v3654_v14, %v3653_v46 }
 0x7e0   : > { %v4209_v7 = vpop.f32.mrf.mxu1 }
 0x7e1   : > { %v3655_v5 = vmax.f32 %v3645_v30, 0.0 }
 0x7e2   : > { %v3647_v15 = vpop.f32.mrf.mxu1 }
 0x7e3   : > { %v3648_v54 = vadd.f32 %v3647_v15, %v3568_v50 }
 0x7e4   : > { %v4210_v6 = vpop.f32.mrf.mxu1 }
 0x7e5   : > { %v3656_v4 = vmax.f32 %v3648_v54, 0.0 }
 0x7e7   : > { %v3659_v35 = vpack.c.bf16 %v3656_v4, %v3655_v5 }
 0x7e9   : > { %4212 = vmatpush3.bf16.msra.mxu0 %v3659_v35 }
 0x7ea   : > { %4213 = vmatprep.subr.bf16.mxu0 %v7945_v52 }
 0x7ed   : > { %4214 = vmatpush3.bf16.msra.mxu0 %v3658_v48 }
 0x7ee   : > { %4215 = vmatprep.subr.bf16.mxu0 %v7945_v52 }
 0x7f1   : > { %4216 = vmatpush3.bf16.msra.mxu0 %v3657_v0 }
 0x7f4   : > { %4218 = vmatmul.mubr.msk.bf16.vlgmr.msra.gmra.mxu0 %vm373_vm0, %v4465_v10 }
 0x7f5   : > { %4221 = vmatprep.mubr.msk.bf16.mxu0 %vm4515_vm9, %v7945_v52 }
 0x7fc   : > { %4222 = vmatmul.mubr.msk.bf16.gmra.mxu0 %vm373_vm0, %v4466_v58 }
 0x7fd   : > { %4225 = vmatprep.mubr.msk.bf16.mxu0 %vm4515_vm9, %v7945_v52  ;;  %vm3833_vm9 = vcmask 650240  }
 0x804   : > { %4226 = vmatmul.mubr.msk.bf16.gmra.mxu0 %vm373_vm0, %v4467_v21  ;;  %vm3765_vm0 = vcmask 523264  }
 0x8b4   : > { %v3718_v22 = vpop.f32.mrf.mxu0 }
 0x8b6   : > { %v4219_v13 = vpop.f32.mrf.mxu0 }
 0x8b8   : > { %v3721_v17 = vpop.f32.mrf.mxu0 }
 0x8b9   : > { %v4411_v11 = vpack.i.bf16 %v3721_v17, %v3718_v22 }
 0x8ba   : > { %v4220_v49 = vpop.f32.mrf.mxu0 }
 0x8bb   : > { %4412 = vrot.lane.b32.xlu0 %v4411_v11, %s4538_s26 }
 0x8bc   : > { %v3726_v3 = vpop.f32.mrf.mxu0 }
 0x8be   : > { %v4223_v19 = vpop.f32.mrf.mxu0 }
 0x8c0   : > { %v3729_v41 = vpop.f32.mrf.mxu0 }
 0x8c1   : > { %v4416_v29 = vpack.i.bf16 %v3729_v41, %v3726_v3 }
 0x8c2   : > { %v4224_v8 = vpop.f32.mrf.mxu0 }
 0x8c3   : > { %4417 = vrot.lane.b32.xlu1 %v4416_v29, %s4538_s26 }
 0x8c4   : > { %v3734_v52 = vpop.f32.mrf.mxu0 }
 0x8c6   : > { %v4227_v47 = vpop.f32.mrf.mxu0 }
 0x8c8   : > { %v3737_v9 = vpop.f32.mrf.mxu0 }
 0x8c9   : > { %v4421_v40 = vpack.i.bf16 %v3737_v9, %v3734_v52 }
 0x8ca   : > { %v4228_v53 = vpop.f32.mrf.mxu0 }
 0x8cb   : > { %4422 = vrot.lane.b32.xlu0 %v4421_v40, %s4538_s26 }
 0x92d   : > { %v4413_v28 = vpop.permute.xlu0 %4412 }
 0x92e   : > { %v4415_v36 = vunpack.i.h.bf16 %v4413_v28  ;;  %v4414_v16 = vunpack.i.l.bf16 %v4413_v28 }
 0x930   : > { %v3767_v37 = vsel %vm3765_vm0, %v7379_v38, %v4415_v36  ;;  %v3766_v62 = vsel %vm3765_vm0, %v7374_v23, %v4414_v16 }
 0x931   : > { %v4076_v32 = vpack.c.bf16 %v3767_v37, %v3767_v37  ;;  %v4074_v51 = vpack.c.bf16 %v3766_v62, %v3766_v62 }
 0x933   : > { %3836 = vst.msk [vmem:[%s6656_s22 + $0x14] sm:$0xf] %vm3833_vm9, %v4076_v32  ;;  %3834 = vst.msk [vmem:[%s6656_s22 + $0x8] sm:$0xf] %vm3833_vm9, %v4074_v51 }
 0x935   : > { %v4418_v63 = vpop.permute.xlu1 %4417 }
 0x936   : > { %v4420_v61 = vunpack.i.h.bf16 %v4418_v63  ;;  %v4419_v26 = vunpack.i.l.bf16 %v4418_v63 }
 0x938   : > { %v3769_v57 = vsel %vm3765_vm0, %v7396_v59, %v4420_v61  ;;  %v3768_v38 = vsel %vm3765_vm0, %v7394_v18, %v4419_v26 }
 0x939   : > { %v4080_v56 = vpack.c.bf16 %v3769_v57, %v3769_v57  ;;  %v4078_v43 = vpack.c.bf16 %v3768_v38, %v3768_v38 }
 0x93b   : > { %3840 = vst.msk [vmem:[%s6656_s22 + $0x2c] sm:$0xf] %vm3833_vm9, %v4080_v56  ;;  %3838 = vst.msk [vmem:[%s6656_s22 + $0x20] sm:$0xf] %vm3833_vm9, %v4078_v43 }
 0x93d   : > { %v4423_v23 = vpop.permute.xlu0 %4422 }
 0x93e   : > { %v4425_v42 = vunpack.i.h.bf16 %v4423_v23  ;;  %v4424_v25 = vunpack.i.l.bf16 %v4423_v23 }
 0x940   : > { %v3771_v55 = vsel %vm3765_vm0, %v7400_v34, %v4425_v42  ;;  %v3770_v24 = vsel %vm3765_vm0, %v7398_v60, %v4424_v25 }
 0x941   : > { %v4084_v39 = vpack.c.bf16 %v3771_v55, %v3771_v55  ;;  %v4082_v59 = vpack.c.bf16 %v3770_v24, %v3770_v24 }
 0x943   : > { %3844 = vst.msk [vmem:[%s6656_s22 + $0x44] sm:$0xf] %vm3833_vm9, %v4084_v39  ;;  %3842 = vst.msk [vmem:[%s6656_s22 + $0x38] sm:$0xf] %vm3833_vm9, %v4082_v59 }
 0x944 PF: > { %s15_s18 = sadd.s32 1, %s4492_s18  }
 0x945   : > { %p12_p4 = scmp.ge.s32.totalorder %s15_s18, 4  }
 0x947   :  { %14 = sbr.rel (!%p12_p4) target bundleno = 1 (0x1), region = 86 }

// kernel: rpp_forward.3
= control target key start
LH: loop header
LB: loop body
LE: loop exit
PB: predicated region body
PF: predicated region fallthrough
CT: control target
= control target key end

     0   :  { %s3455_s24 = smov 0   ;;  %s3457_s25 = smov 0   ;;  %s4588_s0 = inlined_call_operand.vmem [shape: bf16[2,48,1024], index: 0, kind: input, shape index: {}]   ;;  %s4589_s1 = inlined_call_operand.vmem [shape: bf16[2,48,336], index: 1, kind: input, shape index: {}]   ;;  %s4590_s2 = inlined_call_operand.vmem [shape: f32[2,48,1], index: 2, kind: input, shape index: {}]   ;;  %s4591_s3 = inlined_call_operand.vmem [shape: bf16[336,1024], index: 3, kind: input, shape index: {}]   ;;  %s4592_s4 = inlined_call_operand.vmem [shape: bf16[48,48], index: 4, kind: input, shape index: {}]   ;;  %s4593_s5 = inlined_call_operand.vmem [shape: bf16[48,48], index: 5, kind: input, shape index: {}]   ;;  %s4594_s6 = inlined_call_operand.vmem [shape: f32[48,1], index: 6, kind: input, shape index: {}]   ;;  %s4595_s7 = inlined_call_operand.vmem [shape: f32[2,48,1024], index: 7, kind: output, shape index: {}]  }
   0x1   :  { %s3459_s26 = smov 0  }
   0x2 LB: > { %s29_s27 = sadd.s32 1, %s3408_s25  ;;  %p3088_p0 = scmp.ge.s32.totalorder %s3412_s26, 1  ;;  %s3412_s26 = sphi %s3459_s26, %s17_s26   ;;  %s3408_s25 = sphi %s3457_s25, %s4597_s25   ;;  %s3404_s24 = sphi %s3455_s24, %s4596_s24  }
   0x3   : > { %p31_p1 = scmp.ge.s32.totalorder %s29_s27, 2  ;;  %p289_p2 = scmp.lt.s32.totalorder %s3412_s26, 3 }
   0x5   : > { %s4599_s27 = smov (%p31_p1, %s29_s27), 0  ;;  %p290_p3 = pnand %p3088_p0, %p289_p2 }
   0x6   : > { %p345_p4 = scmp.lt.s32.totalorder (!%p290_p3), %s3404_s24, 1 }
   0x7   : > { %293 = sbr.rel (%p290_p3) target bundleno = 649 (0x289), region = 48 }
   0xc   : > { %v449_v0 = vld [vmem:[%s4591_s3 + $0x1c0] sm:$0xff]  ;;  %v3414_v8 = vmov 0   ;;  %s4601_s24 = smov (!%p345_p4, %s3404_s24), 1  ;;  %v450_v41 = vld [vmem:[%s4591_s3 + $0x1c8] sm:$0xff]  ;;  %vm1482_vm0 = vcmask 654336   ;;  %vm2239_vm1 = vcmask 392192  }
   0xd   : > { %v453_v1 = vld [vmem:[%s4591_s3 + $0x1e0] sm:$0xff]  ;;  %1587 = vmatprep.mubr.bf16.mxu1 %v3414_v8  ;;  %3367 = vset.pattern.permute.xlu0 %v3414_v8  ;;  %s3339_s10 = smul.u32 72, %s4601_s24  ;;  %v454_v42 = vld [vmem:[%s4591_s3 + $0x1e8] sm:$0xff] }
   0xe   : > { %v553_v2 = vld [vmem:[%s4591_s3 + $0x500] sm:$0xff]  ;;  %v3159_v3 = vcombine.high %v449_v0, %v453_v1  ;;  %v3158_v5 = vcombine.low %v449_v0, %v453_v1  ;;  %3368 = vset.pattern.permute.xlu1 %v3414_v8  ;;  %v3161_v46 = vcombine.high %v450_v41, %v454_v42  ;;  %v442_v49 = vld [vmem:[%s4591_s3 + $0x188] sm:$0xff]  ;;  %v3160_v53 = vcombine.low %v450_v41, %v454_v42  ;;  %s3340_s13 = smul.u32 48, %s4601_s24 }
   0xf   : > { %v557_v4 = vld [vmem:[%s4591_s3 + $0x520] sm:$0xff]  ;;  %s3531_s21 = scalar_lea.vmem %s4589_s1, %s3339_s10  ;;  %v446_v50 = vld [vmem:[%s4591_s3 + $0x1a8] sm:$0xff] }
  0x10   : > { %v441_v6 = vld [vmem:[%s4591_s3 + $0x180] sm:$0xff]  ;;  %v3263_v9 = vcombine.high %v553_v2, %v557_v4  ;;  %v3262_v10 = vcombine.low %v553_v2, %v557_v4  ;;  %1492 = vmatprep.subr.bf16.mxu0 %v3159_v3  ;;  %v3570_v51 = vld [vmem:[%s3531_s21 + $0x8] ss:$12 sps:$4 sm:$0xff]   ;;  %v3153_v56 = vcombine.high %v442_v49, %v446_v50  ;;  %v3152_v62 = vcombine.low %v442_v49, %v446_v50  ;;  %s3667_s29 = scalar_lea.vmem %s4590_s2, %s3340_s13  ;;  %s3341_s13 = smul.u32 384, %s4601_s24 }
  0x11   : > { %v445_v7 = vld [vmem:[%s4591_s3 + $0x1a0] sm:$0xff]  ;;  %1493 = vmatpush1.bf16.msra.mxu0 %v3158_v5  ;;  %v434_v58 = vld [vmem:[%s4591_s3 + $0x148] sm:$0xff] }
  0x12   : > { %v3151_v11 = vcombine.high %v441_v6, %v445_v7  ;;  %v545_v12 = vld [vmem:[%s4591_s3 + $0x4c0] sm:$0xff]  ;;  %1561 = vmatprep.subr.bf16.mxu1 %v3263_v9  ;;  %v3150_v19 = vcombine.low %v441_v6, %v445_v7  ;;  %v438_v59 = vld [vmem:[%s4591_s3 + $0x168] sm:$0xff]  ;;  %s4418_s18 = scalar_lea.vmem %s4595_s7, %s3341_s13 }
  0x13   : > { %v549_v13 = vld [vmem:[%s4591_s3 + $0x4e0] sm:$0xff]  ;;  %1562 = vmatpush1.bf16.msra.mxu1 %v3262_v10  ;;  %v3145_v0 = vcombine.high %v434_v58, %v438_v59  ;;  %v426_v3 = vld [vmem:[%s4591_s3 + $0x108] sm:$0xff]  ;;  %v3144_v7 = vcombine.low %v434_v58, %v438_v59 }
  0x14   : > { %v433_v14 = vld [vmem:[%s4591_s3 + $0x140] sm:$0xff]  ;;  %v3255_v15 = vcombine.high %v545_v12, %v549_v13  ;;  %1494 = vmatprep.subr.bf16.mxu0 %v3151_v11  ;;  %v3254_v20 = vcombine.low %v545_v12, %v549_v13  ;;  %v430_v4 = vld [vmem:[%s4591_s3 + $0x128] sm:$0xff] }
  0x15   : > { %v437_v16 = vld [vmem:[%s4591_s3 + $0x160] sm:$0xff]  ;;  %1495 = vmatpush1.bf16.msra.mxu0 %v3150_v19  ;;  %v3137_v10 = vcombine.high %v426_v3, %v430_v4  ;;  %v418_v13 = vld [vmem:[%s4591_s3 + $0xc8] sm:$0xff] }
  0x16   : > { %v537_v17 = vld [vmem:[%s4591_s3 + $0x480] sm:$0xff]  ;;  %v3143_v21 = vcombine.high %v433_v14, %v437_v16  ;;  %1563 = vmatprep.subr.bf16.mxu1 %v3255_v15  ;;  %v3142_v27 = vcombine.low %v433_v14, %v437_v16  ;;  %v422_v14 = vld [vmem:[%s4591_s3 + $0xe8] sm:$0xff]  ;;  %v3136_v16 = vcombine.low %v426_v3, %v430_v4 }
  0x17   : > { %v541_v18 = vld [vmem:[%s4591_s3 + $0x4a0] sm:$0xff]  ;;  %1564 = vmatpush1.bf16.msra.mxu1 %v3254_v20  ;;  %v510_v58 = vld [vmem:[%s4591_s3 + $0x3a8] sm:$0xff] }
  0x18   : > { %v3247_v22 = vcombine.high %v537_v17, %v541_v18  ;;  %v425_v23 = vld [vmem:[%s4591_s3 + $0x100] sm:$0xff]  ;;  %1496 = vmatprep.subr.bf16.mxu0 %v3143_v21  ;;  %v3246_v28 = vcombine.low %v537_v17, %v541_v18  ;;  %v3129_v18 = vcombine.high %v418_v13, %v422_v14  ;;  %v410_v21 = vld [vmem:[%s4591_s3 + $0x88] sm:$0xff] }
  0x19   : > { %v429_v24 = vld [vmem:[%s4591_s3 + $0x120] sm:$0xff]  ;;  %1497 = vmatpush1.bf16.msra.mxu0 %v3142_v27  ;;  %v566_v59 = vld [vmem:[%s3667_s29 + $0x28] sm:$0xff] }
  0x1a   : > { %v529_v25 = vld [vmem:[%s4591_s3 + $0x440] sm:$0xff]  ;;  %v3135_v29 = vcombine.high %v425_v23, %v429_v24  ;;  %1565 = vmatprep.subr.bf16.mxu1 %v3247_v22  ;;  %v3134_v35 = vcombine.low %v425_v23, %v429_v24  ;;  %v414_v22 = vld [vmem:[%s4591_s3 + $0xa8] sm:$0xff] }
  0x1b   : > { %v533_v26 = vld [vmem:[%s4591_s3 + $0x460] sm:$0xff]  ;;  %1566 = vmatpush1.bf16.msra.mxu1 %v3246_v28  ;;  %v3121_v27 = vcombine.high %v410_v21, %v414_v22  ;;  %v498_v4 = vld [vmem:[%s4591_s3 + $0x348] sm:$0xff] }
  0x1c   : > { %v3239_v30 = vcombine.high %v529_v25, %v533_v26  ;;  %v417_v31 = vld [vmem:[%s4591_s3 + $0xc0] sm:$0xff]  ;;  %1498 = vmatprep.subr.bf16.mxu0 %v3135_v29  ;;  %v3238_v36 = vcombine.low %v529_v25, %v533_v26  ;;  %v3128_v25 = vcombine.low %v418_v13, %v422_v14  ;;  %v554_v14 = vld [vmem:[%s4591_s3 + $0x508] sm:$0xff] }
  0x1d   : > { %v421_v32 = vld [vmem:[%s4591_s3 + $0xe0] sm:$0xff]  ;;  %1499 = vmatpush1.bf16.msra.mxu0 %v3134_v35 }
  0x1e   : > { %v521_v33 = vld [vmem:[%s4591_s3 + $0x400] sm:$0xff]  ;;  %v3127_v37 = vcombine.high %v417_v31, %v421_v32  ;;  %1567 = vmatprep.subr.bf16.mxu1 %v3239_v30  ;;  %v3126_v43 = vcombine.low %v417_v31, %v421_v32  ;;  %v402_v30 = vld [vmem:[%s4591_s3 + $0x48] sm:$0xff] }
  0x1f   : > { %v525_v34 = vld [vmem:[%s4591_s3 + $0x420] sm:$0xff]  ;;  %1568 = vmatpush1.bf16.msra.mxu1 %v3238_v36  ;;  %v406_v31 = vld [vmem:[%s4591_s3 + $0x68] sm:$0xff] }
  0x20   : > { %v3231_v38 = vcombine.high %v521_v33, %v525_v34  ;;  %v409_v39 = vld [vmem:[%s4591_s3 + $0x80] sm:$0xff]  ;;  %1500 = vmatprep.subr.bf16.mxu0 %v3127_v37  ;;  %v3230_v44 = vcombine.low %v521_v33, %v525_v34  ;;  %v3120_v33 = vcombine.low %v410_v21, %v414_v22  ;;  %v3113_v35 = vcombine.high %v402_v30, %v406_v31  ;;  %v546_v22 = vld [vmem:[%s4591_s3 + $0x4c8] sm:$0xff] }
  0x21   : > { %v413_v40 = vld [vmem:[%s4591_s3 + $0xa0] sm:$0xff]  ;;  %1501 = vmatpush1.bf16.msra.mxu0 %v3126_v43  ;;  %v3112_v41 = vcombine.low %v402_v30, %v406_v31  ;;  %v538_v30 = vld [vmem:[%s4591_s3 + $0x488] sm:$0xff] }
  0x22   : > { %v3119_v45 = vcombine.high %v409_v39, %v413_v40  ;;  %1569 = vmatprep.subr.bf16.mxu1 %v3231_v38  ;;  %v401_v47 = vld [vmem:[%s4591_s3 + $0x40] sm:$0xff]  ;;  %v3118_v52 = vcombine.low %v409_v39, %v413_v40  ;;  %v394_v38 = vld [vmem:[%s4591_s3 + $0x8] sm:$0xff] }
  0x23   : > { %v405_v48 = vld [vmem:[%s4591_s3 + $0x60] sm:$0xff]  ;;  %1570 = vmatpush1.bf16.msra.mxu1 %v3230_v44  ;;  %v398_v39 = vld [vmem:[%s4591_s3 + $0x28] sm:$0xff] }
  0x24   : > { %1502 = vmatprep.subr.bf16.mxu0 %v3119_v45  ;;  %v3111_v54 = vcombine.high %v401_v47, %v405_v48  ;;  %v393_v55 = vld [vmem:[%s4591_s3] sm:$0xff]  ;;  %1618 = vmatprep.subr.bf16.mxu1 %v3161_v46  ;;  %v3110_v61 = vcombine.low %v401_v47, %v405_v48  ;;  %v3105_v43 = vcombine.high %v394_v38, %v398_v39  ;;  %v514_v46 = vld [vmem:[%s4591_s3 + $0x3c8] sm:$0xff] }
  0x25   : > { %v397_v57 = vld [vmem:[%s4591_s3 + $0x20] sm:$0xff]  ;;  %1503 = vmatpush1.bf16.msra.mxu0 %v3118_v52  ;;  %v518_v47 = vld [vmem:[%s4591_s3 + $0x3e8] sm:$0xff]  ;;  %v3104_v50 = vcombine.low %v394_v38, %v398_v39 }
  0x26   : > { %v3585_v60 = vld [vmem:[%s3531_s21 + $0x4] ss:$12 sps:$4 sm:$0xff]   ;;  %3270 = vmatmul.mubr.msk.bf16.vlgmr.msra.gmra.mxu1 %vm1482_vm0, %v3570_v51  ;;  %1504 = vmatprep.subr.bf16.mxu0 %v3111_v54  ;;  %v3103_v63 = vcombine.high %v393_v55, %v397_v57  ;;  %v3102_v5 = vcombine.low %v393_v55, %v397_v57  ;;  %v3604_v6 = vld [vmem:[%s3531_s21 + $0x20] ss:$12 sps:$4 sm:$0xff]  }
  0x27   : > { %1619 = vmatpush1.bf16.msra.mxu1 %v3160_v53  ;;  %v513_v1 = vld [vmem:[%s4591_s3 + $0x3c0] sm:$0xff]  ;;  %1524 = vmatprep.mubr.bf16.mxu0 %v3585_v60  ;;  %v3225_v53 = vcombine.high %v514_v46, %v518_v47  ;;  %v506_v57 = vld [vmem:[%s4591_s3 + $0x388] sm:$0xff] }
  0x28   : > { %1620 = vmatprep.subr.bf16.mxu1 %v3153_v56  ;;  %v517_v2 = vld [vmem:[%s4591_s3 + $0x3e0] sm:$0xff]  ;;  %1597 = vmatprep.mubr.bf16.mxu1 %v3414_v8  ;;  %v563_v56 = vld [vmem:[%s3667_s29 + $0x10] sm:$0xff]  ;;  %v542_v31 = vld [vmem:[%s4591_s3 + $0x4a8] sm:$0xff] }
  0x29   : > { %1505 = vmatpush1.bf16.msra.mxu0 %v3110_v61  ;;  %v3223_v9 = vcombine.high %v513_v1, %v517_v2  ;;  %v505_v11 = vld [vmem:[%s4591_s3 + $0x380] sm:$0xff]  ;;  %v3222_v15 = vcombine.low %v513_v1, %v517_v2  ;;  %579 = vperm.xlu1 %3368, %v563_v56   ;;  %v3217_v1 = vcombine.high %v506_v57, %v510_v58 }
  0x2a   : > { %1506 = vmatprep.subr.bf16.mxu0 %v3103_v63  ;;  %v509_v12 = vld [vmem:[%s4591_s3 + $0x3a0] sm:$0xff]  ;;  %v3224_v63 = vcombine.low %v514_v46, %v518_v47  ;;  %v3249_v39 = vcombine.high %v538_v30, %v542_v31  ;;  %v3248_v46 = vcombine.low %v538_v30, %v542_v31  ;;  %v531_v30 = vld [vmem:[%s4591_s3 + $0x450] sm:$0xff] }
  0x2b   : > { %1621 = vmatpush1.bf16.msra.mxu1 %v3152_v62  ;;  %v3215_v17 = vcombine.high %v505_v11, %v509_v12  ;;  %v497_v19 = vld [vmem:[%s4591_s3 + $0x340] sm:$0xff]  ;;  %v3214_v23 = vcombine.low %v505_v11, %v509_v12  ;;  %v564_v62 = vld [vmem:[%s3667_s29 + $0x18] sm:$0xff]  ;;  %v3216_v11 = vcombine.low %v506_v57, %v510_v58 }
  0x2c   : > { %1622 = vmatprep.subr.bf16.mxu1 %v3145_v0  ;;  %v501_v20 = vld [vmem:[%s4591_s3 + $0x360] sm:$0xff] }
  0x2d   : > { %1507 = vmatpush1.bf16.msra.mxu0 %v3102_v5  ;;  %v3634_v24 = vld [vmem:[%s3531_s21 + $0x38] ss:$12 sps:$4 sm:$0xff]   ;;  %v3207_v26 = vcombine.high %v497_v19, %v501_v20  ;;  %v3206_v32 = vcombine.low %v497_v19, %v501_v20  ;;  %v502_v5 = vld [vmem:[%s4591_s3 + $0x368] sm:$0xff]  ;;  %584 = vperm.xlu1 %3368, %v564_v62   ;;  %v3771_v47 = vld [vmem:[%s3531_s21 + $0x34] ss:$12 sps:$4 sm:$0xff]  }
  0x2e   : > { %3271 = vmatmul.mubr.msk.bf16.gmra.mxu1 %vm1482_vm0, %v3604_v6  ;;  %1508 = vmatprep.subr.bf16.mxu0 %v3223_v9  ;;  %v489_v28 = vld [vmem:[%s4591_s3 + $0x300] sm:$0xff]  ;;  %v3209_v13 = vcombine.high %v498_v4, %v502_v5  ;;  %v3208_v19 = vcombine.low %v498_v4, %v502_v5  ;;  %v559_v62 = vld [vmem:[%s4591_s3 + $0x530] sm:$0xff] }
  0x2f   : > { %1623 = vmatpush1.bf16.msra.mxu1 %v3144_v7  ;;  %1607 = vmatprep.mubr.bf16.mxu1 %v3414_v8  ;;  %v493_v29 = vld [vmem:[%s4591_s3 + $0x320] sm:$0xff] }
  0x30   : > { %1624 = vmatprep.subr.bf16.mxu1 %v3137_v10  ;;  %v3199_v34 = vcombine.high %v489_v28, %v493_v29  ;;  %v481_v36 = vld [vmem:[%s4591_s3 + $0x2c0] sm:$0xff]  ;;  %v3198_v40 = vcombine.low %v489_v28, %v493_v29  ;;  %v562_v10 = vld [vmem:[%s3667_s29 + $0x8] sm:$0xff] }
  0x31   : > { %1509 = vmatpush2.bf16.msra.mxu0 %v3222_v15  ;;  %v485_v37 = vld [vmem:[%s4591_s3 + $0x2e0] sm:$0xff]  ;;  %v558_v15 = vld [vmem:[%s4591_s3 + $0x528] sm:$0xff]  ;;  %574 = vperm.xlu1 %3368, %v562_v10  }
  0x32   : > { %1510 = vmatprep.subr.bf16.mxu0 %v3215_v17  ;;  %v3191_v42 = vcombine.high %v481_v36, %v485_v37  ;;  %v473_v44 = vld [vmem:[%s4591_s3 + $0x280] sm:$0xff]  ;;  %v3190_v48 = vcombine.low %v481_v36, %v485_v37  ;;  %v494_v17 = vld [vmem:[%s4591_s3 + $0x328] sm:$0xff]  ;;  %v3265_v20 = vcombine.high %v554_v14, %v558_v15  ;;  %v3264_v28 = vcombine.low %v554_v14, %v558_v15  ;;  %v435_v14 = vld [vmem:[%s4591_s3 + $0x150] sm:$0xff] }
  0x33   : > { %1625 = vmatpush1.bf16.msra.mxu1 %v3136_v16  ;;  %v477_v45 = vld [vmem:[%s4591_s3 + $0x2a0] sm:$0xff]  ;;  %v490_v16 = vld [vmem:[%s4591_s3 + $0x308] sm:$0xff]  ;;  %v439_v15 = vld [vmem:[%s4591_s3 + $0x170] sm:$0xff] }
  0x34   : > { %1626 = vmatprep.subr.bf16.mxu1 %v3129_v18  ;;  %v565_v49 = vld [vmem:[%s3667_s29 + $0x20] sm:$0xff]  ;;  %v3183_v52 = vcombine.high %v473_v44, %v477_v45  ;;  %v3182_v61 = vcombine.low %v473_v44, %v477_v45  ;;  %v3201_v21 = vcombine.high %v490_v16, %v494_v17  ;;  %v3739_v29 = vld [vmem:[%s3531_s21 + $0x1c] ss:$12 sps:$4 sm:$0xff]  }
  0x35   : > { %1511 = vmatpush2.bf16.msra.mxu0 %v3214_v23  ;;  %v465_v54 = vld [vmem:[%s4591_s3 + $0x240] sm:$0xff]  ;;  %589 = vperm.xlu0 %3367, %v565_v49   ;;  %v550_v23 = vld [vmem:[%s4591_s3 + $0x4e8] sm:$0xff] }
  0x36   : > { %3272 = vmatmul.mubr.msk.bf16.gmra.mxu1 %vm1482_vm0, %v3634_v24  ;;  %1512 = vmatprep.subr.bf16.mxu0 %v3207_v26  ;;  %v469_v55 = vld [vmem:[%s4591_s3 + $0x260] sm:$0xff]  ;;  %v482_v26 = vld [vmem:[%s4591_s3 + $0x2c8] sm:$0xff]  ;;  %v3256_v37 = vcombine.low %v546_v22, %v550_v23 }
  0x37   : > { %1627 = vmatpush1.bf16.msra.mxu1 %v3128_v25  ;;  %1650 = vmatprep.mubr.bf16.mxu1 %v3585_v60  ;;  %v3175_v0 = vcombine.high %v465_v54, %v469_v55  ;;  %v457_v2 = vld [vmem:[%s4591_s3 + $0x200] sm:$0xff]  ;;  %v3174_v9 = vcombine.low %v465_v54, %v469_v55  ;;  %v466_v44 = vld [vmem:[%s4591_s3 + $0x248] sm:$0xff] }
  0x38   : > { %1628 = vmatprep.subr.bf16.mxu1 %v3121_v27  ;;  %v461_v3 = vld [vmem:[%s4591_s3 + $0x220] sm:$0xff]  ;;  %v486_v27 = vld [vmem:[%s4591_s3 + $0x2e8] sm:$0xff] }
  0x39   : > { %1513 = vmatpush2.bf16.msra.mxu0 %v3206_v32  ;;  %594 = vperm.xlu0 %3367, %v566_v59   ;;  %v561_v7 = vld [vmem:[%s3667_s29] sm:$0xff]  ;;  %v3167_v12 = vcombine.high %v457_v2, %v461_v3  ;;  %v3166_v18 = vcombine.low %v457_v2, %v461_v3  ;;  %v3200_v32 = vcombine.low %v490_v16, %v494_v17  ;;  %v470_v45 = vld [vmem:[%s4591_s3 + $0x268] sm:$0xff]  ;;  %s3338_s29 = smul.u32 192, %s4601_s24 }
  0x3a   : > { %1514 = vmatprep.subr.bf16.mxu0 %v3199_v34  ;;  %v3730_v25 = vld [vmem:[%s3531_s21] ss:$12 sps:$4 sm:$0xff]   ;;  %v3193_v36 = vcombine.high %v482_v26, %v486_v27  ;;  %v3192_v38 = vcombine.low %v482_v26, %v486_v27  ;;  %v3176_v57 = vcombine.low %v466_v44, %v470_v45  ;;  %v3146_v27 = vcombine.low %v435_v14, %v439_v15 }
  0x3b   : > { %1629 = vmatpush1.bf16.msra.mxu1 %v3120_v33  ;;  %v474_v33 = vld [vmem:[%s4591_s3 + $0x288] sm:$0xff]  ;;  %s4080_s14 = scalar_lea.vmem %s4588_s0, %s3338_s29 }
  0x3c   : > { %1630 = vmatprep.subr.bf16.mxu1 %v3113_v35  ;;  %v478_v34 = vld [vmem:[%s4591_s3 + $0x2a8] sm:$0xff]  ;;  %v3257_v35 = vcombine.high %v546_v22, %v550_v23  ;;  %v427_v22 = vld [vmem:[%s4591_s3 + $0x110] sm:$0xff] }
  0x3d   : > { %1515 = vmatpush2.bf16.msra.mxu0 %v3198_v40  ;;  %569 = vperm.xlu0 %3367, %v561_v7   ;;  %v3185_v40 = vcombine.high %v474_v33, %v478_v34  ;;  %v458_v54 = vld [vmem:[%s4591_s3 + $0x208] sm:$0xff]  ;;  %v443_v7 = vld [vmem:[%s4591_s3 + $0x190] sm:$0xff] }
  0x3e   : > { %1516 = vmatprep.subr.bf16.mxu0 %v3191_v42  ;;  %v534_v42 = vld [vmem:[%s4591_s3 + $0x468] sm:$0xff]  ;;  %v431_v23 = vld [vmem:[%s4591_s3 + $0x130] sm:$0xff] }
  0x3f   : > { %1631 = vmatpush1.bf16.msra.mxu1 %v3112_v41  ;;  %v530_v41 = vld [vmem:[%s4591_s3 + $0x448] sm:$0xff]  ;;  %v3139_v31 = vcombine.high %v427_v22, %v431_v23 }
  0x40   : > { %1632 = vmatprep.subr.bf16.mxu1 %v3105_v43  ;;  %v3762_v43 = vld [vmem:[%s3531_s21 + $0x18] ss:$12 sps:$4 sm:$0xff]   ;;  %v3241_v49 = vcombine.high %v530_v41, %v534_v42  ;;  %v462_v55 = vld [vmem:[%s4591_s3 + $0x228] sm:$0xff]  ;;  %v3240_v56 = vcombine.low %v530_v41, %v534_v42  ;;  %v523_v42 = vld [vmem:[%s4591_s3 + $0x410] sm:$0xff] }
  0x41   : > { %1517 = vmatpush2.bf16.msra.mxu0 %v3190_v48  ;;  %v3184_v48 = vcombine.low %v474_v33, %v478_v34  ;;  %v3169_v59 = vcombine.high %v458_v54, %v462_v55  ;;  %v3168_v3 = vcombine.low %v458_v54, %v462_v55  ;;  %v2777_v33 = vld [vmem:[%s4594_s6] sm:$0xff]  ;;  %v2778_v34 = vld [vmem:[%s4594_s6 + $0x8] sm:$0xff]  ;;  %v452_v55 = vld [vmem:[%s4591_s3 + $0x1d8] sm:$0xff] }
  0x42   : > { %1518 = vmatprep.subr.bf16.mxu0 %v3183_v52  ;;  %v522_v52 = vld [vmem:[%s4591_s3 + $0x408] sm:$0xff]  ;;  %2785 = vperm.xlu0 %3367, %v2777_v33  }
  0x43   : > { %1633 = vmatpush1.bf16.msra.mxu1 %v3104_v50  ;;  %v3177_v50 = vcombine.high %v466_v44, %v470_v45  ;;  %2790 = vperm.xlu1 %3368, %v2778_v34   ;;  %v527_v44 = vld [vmem:[%s4591_s3 + $0x430] sm:$0xff]  ;;  %v420_v34 = vld [vmem:[%s4591_s3 + $0xd8] sm:$0xff] }
  0x44   : > { %1634 = vmatprep.subr.bf16.mxu1 %v3225_v53  ;;  %v526_v53 = vld [vmem:[%s4591_s3 + $0x428] sm:$0xff]  ;;  %v411_v45 = vld [vmem:[%s4591_s3 + $0x90] sm:$0xff] }
  0x45   : > { %1519 = vmatpush2.bf16.msra.mxu0 %v3182_v61  ;;  %v3233_v58 = vcombine.high %v522_v52, %v526_v53  ;;  %v555_v61 = vld [vmem:[%s4591_s3 + $0x510] sm:$0xff]  ;;  %v3232_v2 = vcombine.low %v522_v52, %v526_v53  ;;  %v3235_v53 = vcombine.high %v523_v42, %v527_v44 }
  0x46   : > { %1520 = vmatprep.subr.bf16.mxu0 %v3175_v0  ;;  %v451_v0 = vld [vmem:[%s4591_s3 + $0x1d0] sm:$0xff]  ;;  %v3267_v4 = vcombine.high %v555_v61, %v559_v62  ;;  %v3266_v16 = vcombine.low %v555_v61, %v559_v62  ;;  %v2782_v61 = vld [vmem:[%s4594_s6 + $0x28] sm:$0xff] }
  0x47   : > { %1635 = vmatpush2.bf16.msra.mxu1 %v3224_v63  ;;  %v3794_v63 = vld [vmem:[%s3531_s21 + $0x30] ss:$12 sps:$4 sm:$0xff]  }
  0x48   : > { %1636 = vmatprep.subr.bf16.mxu1 %v3217_v1  ;;  %v455_v1 = vld [vmem:[%s4591_s3 + $0x1f0] sm:$0xff] }
  0x49   : > { %1521 = vmatpush2.bf16.msra.mxu0 %v3174_v9  ;;  %v3163_v5 = vcombine.high %v451_v0, %v455_v1  ;;  %v447_v9 = vld [vmem:[%s4591_s3 + $0x1b0] sm:$0xff]  ;;  %v3162_v10 = vcombine.low %v451_v0, %v455_v1 }
  0x4a   : > { %1522 = vmatprep.subr.bf16.mxu0 %v3167_v12  ;;  %v547_v12 = vld [vmem:[%s4591_s3 + $0x4d0] sm:$0xff]  ;;  %v3154_v17 = vcombine.low %v443_v7, %v447_v9 }
  0x4b   : > { %1637 = vmatpush2.bf16.msra.mxu1 %v3216_v11  ;;  %v3155_v11 = vcombine.high %v443_v7, %v447_v9  ;;  %v444_v7 = vld [vmem:[%s4591_s3 + $0x198] sm:$0xff] }
  0x4c   : > { %1638 = vmatprep.subr.bf16.mxu1 %v3209_v13  ;;  %v551_v13 = vld [vmem:[%s4591_s3 + $0x4f0] sm:$0xff]  ;;  %v448_v9 = vld [vmem:[%s4591_s3 + $0x1b8] sm:$0xff] }
  0x4d   : > { %1523 = vmatpush2.bf16.msra.mxu0 %v3166_v18  ;;  %v3259_v18 = vcombine.high %v547_v12, %v551_v13  ;;  %v3258_v26 = vcombine.low %v547_v12, %v551_v13 }
  0x4e   : > { %1687 = vmatprep.subr.bf16.mxu0 %v3265_v20  ;;  %v539_v20 = vld [vmem:[%s4591_s3 + $0x490] sm:$0xff] }
  0x4f   : > { %1639 = vmatpush2.bf16.msra.mxu1 %v3208_v19  ;;  %v3147_v19 = vcombine.high %v435_v14, %v439_v15  ;;  %v3157_v14 = vcombine.high %v444_v7, %v448_v9 }
  0x50   : > { %1640 = vmatprep.subr.bf16.mxu1 %v3201_v21  ;;  %1525 = vmatmul.mubr.bf16.vlgmr.msra.gmra.mxu0 %v3730_v25  ;;  %v543_v21 = vld [vmem:[%s4591_s3 + $0x4b0] sm:$0xff] }
  0x51   : > { %1688 = vmatpush1.bf16.msra.mxu0 %v3264_v28  ;;  %1534 = vmatprep.mubr.bf16.mxu0 %v3739_v29  ;;  %v3251_v28 = vcombine.high %v539_v20, %v543_v21 }
  0x52   : > { %1689 = vmatprep.subr.bf16.mxu0 %v3257_v35  ;;  %v419_v35 = vld [vmem:[%s4591_s3 + $0xd0] sm:$0xff] }
  0x53   : > { %1641 = vmatpush2.bf16.msra.mxu1 %v3200_v32  ;;  %v535_v32 = vld [vmem:[%s4591_s3 + $0x470] sm:$0xff] }
  0x54   : > { %1642 = vmatprep.subr.bf16.mxu1 %v3193_v36  ;;  %v423_v36 = vld [vmem:[%s4591_s3 + $0xf0] sm:$0xff] }
  0x55   : > { %1690 = vmatpush1.bf16.msra.mxu0 %v3256_v37  ;;  %v3250_v37 = vcombine.low %v539_v20, %v543_v21  ;;  %v3131_v41 = vcombine.high %v419_v35, %v423_v36  ;;  %v3130_v52 = vcombine.low %v419_v35, %v423_v36  ;;  %v3156_v20 = vcombine.low %v444_v7, %v448_v9  ;;  %v424_v35 = vld [vmem:[%s4591_s3 + $0xf8] sm:$0xff]  ;;  %v491_v36 = vld [vmem:[%s4591_s3 + $0x310] sm:$0xff] }
  0x56   : > { %1691 = vmatprep.subr.bf16.mxu0 %v3249_v39  ;;  %v3138_v39 = vcombine.low %v427_v22, %v431_v23  ;;  %v459_v7 = vld [vmem:[%s4591_s3 + $0x210] sm:$0xff] }
  0x57   : > { %1643 = vmatpush2.bf16.msra.mxu1 %v3192_v38  ;;  %v2779_v38 = vld [vmem:[%s4594_s6 + $0x10] sm:$0xff] }
  0x58   : > { %1644 = vmatprep.subr.bf16.mxu1 %v3185_v40  ;;  %1535 = vmatmul.mubr.bf16.gmra.mxu0 %v3762_v43  ;;  %v3243_v40 = vcombine.high %v531_v30, %v535_v32  ;;  %v463_v9 = vld [vmem:[%s4591_s3 + $0x230] sm:$0xff] }
  0x59   : > { %1692 = vmatpush1.bf16.msra.mxu0 %v3248_v46  ;;  %1544 = vmatprep.mubr.bf16.mxu0 %v3771_v47  ;;  %v415_v46 = vld [vmem:[%s4591_s3 + $0xb0] sm:$0xff] }
  0x5a   : > { %1693 = vmatprep.subr.bf16.mxu0 %v3241_v49  ;;  %2795 = vperm.xlu0 %3367, %v2779_v38   ;;  %v3242_v49 = vcombine.low %v531_v30, %v535_v32  ;;  %v3123_v54 = vcombine.high %v411_v45, %v415_v46  ;;  %v3122_v62 = vcombine.low %v411_v45, %v415_v46  ;;  %v487_v45 = vld [vmem:[%s4591_s3 + $0x2f0] sm:$0xff] }
  0x5b   : > { %1645 = vmatpush2.bf16.msra.mxu1 %v3184_v48  ;;  %v2780_v48 = vld [vmem:[%s4594_s6 + $0x18] sm:$0xff]  ;;  %v3132_v46 = vcombine.low %v420_v34, %v424_v35 }
  0x5c   : > { %1646 = vmatprep.subr.bf16.mxu1 %v3177_v50  ;;  %v2781_v50 = vld [vmem:[%s4594_s6 + $0x20] sm:$0xff]  ;;  %2800 = vperm.xlu1 %3368, %v2780_v48  }
  0x5d   : > { %1694 = vmatpush1.bf16.msra.mxu0 %v3240_v56  ;;  %v456_v56 = vld [vmem:[%s4591_s3 + $0x1f8] sm:$0xff] }
  0x5e   : > { %1695 = vmatprep.subr.bf16.mxu0 %v3233_v58  ;;  %v407_v58 = vld [vmem:[%s4591_s3 + $0x70] sm:$0xff]  ;;  %2805 = vperm.xlu0 %3367, %v2781_v50   ;;  %v3165_v0 = vcombine.high %v452_v55, %v456_v56  ;;  %v3164_v12 = vcombine.low %v452_v55, %v456_v56 }
  0x5f   : > { %1647 = vmatpush2.bf16.msra.mxu1 %v3176_v57  ;;  %v403_v57 = vld [vmem:[%s4591_s3 + $0x50] sm:$0xff] }
  0x60   : > { %1648 = vmatprep.subr.bf16.mxu1 %v3169_v59  ;;  %1545 = vmatmul.mubr.bf16.gmra.mxu0 %v3794_v63  ;;  %v3234_v59 = vcombine.low %v523_v42, %v527_v44  ;;  %v3115_v1 = vcombine.high %v403_v57, %v407_v58  ;;  %v412_v42 = vld [vmem:[%s4591_s3 + $0x98] sm:$0xff]  ;;  %v479_v55 = vld [vmem:[%s4591_s3 + $0x2b0] sm:$0xff] }
  0x61   : > { %1696 = vmatpush1.bf16.msra.mxu0 %v3232_v2  ;;  %1713 = vmatprep.mubr.bf16.mxu0 %v3414_v8  ;;  %v395_v2 = vld [vmem:[%s4591_s3 + $0x10] sm:$0xff]  ;;  %v416_v44 = vld [vmem:[%s4591_s3 + $0xb8] sm:$0xff] }
  0x62   : > { %1813 = vmatprep.subr.bf16.mxu0 %v3267_v4  ;;  %2810 = vperm.xlu1 %3368, %v2782_v61   ;;  %v3114_v4 = vcombine.low %v403_v57, %v407_v58  ;;  %v3124_v56 = vcombine.low %v412_v42, %v416_v44  ;;  %v396_v61 = vld [vmem:[%s4591_s3 + $0x18] sm:$0xff] }
  0x63   : > { %1649 = vmatpush2.bf16.msra.mxu1 %v3168_v3  ;;  %v399_v3 = vld [vmem:[%s4591_s3 + $0x30] sm:$0xff] }
  0x64   : > { %1744 = vmatprep.subr.bf16.mxu1 %v3163_v5  ;;  %v3107_v5 = vcombine.high %v395_v2, %v399_v3  ;;  %v3106_v13 = vcombine.low %v395_v2, %v399_v3 }
  0x66   : > { %1651 = vmatmul.mubr.bf16.vlgmr.msra.gmra.mxu1 %v3730_v25 }
  0x67   : > { %1745 = vmatpush1.bf16.msra.mxu1 %v3162_v10  ;;  %1660 = vmatprep.mubr.bf16.mxu1 %v3739_v29  ;;  %v515_v10 = vld [vmem:[%s4591_s3 + $0x3d0] sm:$0xff] }
  0x68   : > { %1746 = vmatprep.subr.bf16.mxu1 %v3155_v11  ;;  %3273 = vmatmul.mubr.msk.bf16.vlgmr.msra.gmra.mxu0 %vm1482_vm0, %v3570_v51  ;;  %v519_v11 = vld [vmem:[%s4591_s3 + $0x3f0] sm:$0xff] }
  0x69   : > { %1814 = vmatpush1.bf16.msra.mxu0 %v3266_v16  ;;  %1723 = vmatprep.mubr.bf16.mxu0 %v3414_v8  ;;  %v3227_v15 = vcombine.high %v515_v10, %v519_v11  ;;  %v436_v16 = vld [vmem:[%s4591_s3 + $0x158] sm:$0xff]  ;;  %v3226_v21 = vcombine.low %v515_v10, %v519_v11 }
  0x6a   : > { %1815 = vmatprep.subr.bf16.mxu0 %v3259_v18  ;;  %v507_v18 = vld [vmem:[%s4591_s3 + $0x390] sm:$0xff] }
  0x6b   : > { %1747 = vmatpush1.bf16.msra.mxu1 %v3154_v17  ;;  %v440_v17 = vld [vmem:[%s4591_s3 + $0x178] sm:$0xff] }
  0x6c   : > { %1748 = vmatprep.subr.bf16.mxu1 %v3147_v19  ;;  %v511_v19 = vld [vmem:[%s4591_s3 + $0x3b0] sm:$0xff]  ;;  %v3149_v22 = vcombine.high %v436_v16, %v440_v17  ;;  %v3148_v30 = vcombine.low %v436_v16, %v440_v17  ;;  %v556_v16 = vld [vmem:[%s4591_s3 + $0x518] sm:$0xff] }
  0x6d   : > { %1816 = vmatpush1.bf16.msra.mxu0 %v3258_v26  ;;  %v3219_v23 = vcombine.high %v507_v18, %v511_v19  ;;  %v432_v26 = vld [vmem:[%s4591_s3 + $0x138] sm:$0xff] }
  0x6e   : > { %1661 = vmatmul.mubr.bf16.gmra.mxu1 %v3762_v43  ;;  %1817 = vmatprep.subr.bf16.mxu0 %v3251_v28  ;;  %v503_v28 = vld [vmem:[%s4591_s3 + $0x370] sm:$0xff]  ;;  %v560_v17 = vld [vmem:[%s4591_s3 + $0x538] sm:$0xff] }
  0x6f   : > { %1749 = vmatpush1.bf16.msra.mxu1 %v3146_v27  ;;  %1670 = vmatprep.mubr.bf16.mxu1 %v3771_v47  ;;  %v499_v27 = vld [vmem:[%s4591_s3 + $0x350] sm:$0xff] }
  0x70   : > { %1750 = vmatprep.subr.bf16.mxu1 %v3139_v31  ;;  %3274 = vmatmul.mubr.msk.bf16.gmra.mxu0 %vm1482_vm0, %v3604_v6  ;;  %v3218_v31 = vcombine.low %v507_v18, %v511_v19  ;;  %v3211_v33 = vcombine.high %v499_v27, %v503_v28  ;;  %v3170_v19 = vcombine.low %v459_v7, %v463_v9 }
  0x71   : > { %1818 = vmatpush1.bf16.msra.mxu0 %v3250_v37  ;;  %1733 = vmatprep.mubr.bf16.mxu0 %v3414_v8  ;;  %v495_v37 = vld [vmem:[%s4591_s3 + $0x330] sm:$0xff] }
  0x72   : > { %1819 = vmatprep.subr.bf16.mxu0 %v3243_v40  ;;  %v3133_v40 = vcombine.high %v420_v34, %v424_v35  ;;  %v3202_v48 = vcombine.low %v491_v36, %v495_v37  ;;  %v540_v34 = vld [vmem:[%s4591_s3 + $0x498] sm:$0xff] }
  0x73   : > { %1751 = vmatpush1.bf16.msra.mxu1 %v3138_v39  ;;  %v3210_v39 = vcombine.low %v499_v27, %v503_v28  ;;  %v544_v35 = vld [vmem:[%s4591_s3 + $0x4b8] sm:$0xff] }
  0x74   : > { %1752 = vmatprep.subr.bf16.mxu1 %v3131_v41  ;;  %v3203_v41 = vcombine.high %v491_v36, %v495_v37 }
  0x75   : > { %1820 = vmatpush1.bf16.msra.mxu0 %v3242_v49  ;;  %v3125_v49 = vcombine.high %v412_v42, %v416_v44  ;;  %v532_v42 = vld [vmem:[%s4591_s3 + $0x458] sm:$0xff] }
  0x76   : > { %1671 = vmatmul.mubr.bf16.gmra.mxu1 %v3794_v63  ;;  %1821 = vmatprep.subr.bf16.mxu0 %v3235_v53  ;;  %v408_v53 = vld [vmem:[%s4591_s3 + $0x78] sm:$0xff] }
  0x77   : > { %1753 = vmatpush1.bf16.msra.mxu1 %v3130_v52  ;;  %1776 = vmatprep.mubr.bf16.mxu1 %v3585_v60  ;;  %v404_v52 = vld [vmem:[%s4591_s3 + $0x58] sm:$0xff] }
  0x78   : > { %1754 = vmatprep.subr.bf16.mxu1 %v3123_v54  ;;  %3275 = vmatmul.mubr.msk.bf16.gmra.mxu0 %vm1482_vm0, %v3634_v24  ;;  %v475_v54 = vld [vmem:[%s4591_s3 + $0x290] sm:$0xff]  ;;  %v3117_v58 = vcombine.high %v404_v52, %v408_v53  ;;  %v536_v44 = vld [vmem:[%s4591_s3 + $0x478] sm:$0xff] }
  0x79   : > { %1822 = vmatpush1.bf16.msra.mxu0 %v3234_v59  ;;  %1839 = vmatprep.mubr.bf16.mxu0 %v3414_v8  ;;  %v3187_v59 = vcombine.high %v475_v54, %v479_v55 }
  0x7a   : > { %1870 = vmatprep.subr.bf16.mxu0 %v3165_v0  ;;  %v3116_v0 = vcombine.low %v404_v52, %v408_v53  ;;  %v524_v52 = vld [vmem:[%s4591_s3 + $0x418] sm:$0xff] }
  0x7b   : > { %1755 = vmatpush1.bf16.msra.mxu1 %v3122_v62  ;;  %v400_v62 = vld [vmem:[%s4591_s3 + $0x38] sm:$0xff] }
  0x7c   : > { %1756 = vmatprep.subr.bf16.mxu1 %v3115_v1  ;;  %v3186_v1 = vcombine.low %v475_v54, %v479_v55  ;;  %v3109_v2 = vcombine.high %v396_v61, %v400_v62  ;;  %v3108_v10 = vcombine.low %v396_v61, %v400_v62  ;;  %v528_v53 = vld [vmem:[%s4591_s3 + $0x438] sm:$0xff]  ;;  %v2096_v61 = vld [vmem:[%s4080_s14 + $0x80] sm:$0xff] }
  0x7d   : > { %v2100_v62 = vld [vmem:[%s4080_s14 + $0xa0] sm:$0xff] }
  0x7f   : > { %1757 = vmatpush1.bf16.msra.mxu1 %v3114_v4  ;;  %v516_v4 = vld [vmem:[%s4591_s3 + $0x3d8] sm:$0xff] }
  0x80   : > { %1758 = vmatprep.subr.bf16.mxu1 %v3107_v5  ;;  %3276 = vmatmul.mubr.msk.bf16.vlgmr.msra.gmra.mxu0 %vm1482_vm0, %v3570_v51  ;;  %v428_v51 = vld [vmem:[%s4591_s3 + $0x118] sm:$0xff] }
  0x81   : > { %1871 = vmatpush1.bf16.msra.mxu0 %v3164_v12  ;;  %1849 = vmatprep.mubr.bf16.mxu0 %v3414_v8  ;;  %v3141_v32 = vcombine.high %v428_v51, %v432_v26  ;;  %v3140_v38 = vcombine.low %v428_v51, %v432_v26  ;;  %v520_v5 = vld [vmem:[%s4591_s3 + $0x3f8] sm:$0xff] }
  0x82   : > { %1872 = vmatprep.subr.bf16.mxu0 %v3157_v14  ;;  %v3229_v12 = vcombine.high %v516_v4, %v520_v5  ;;  %v508_v14 = vld [vmem:[%s4591_s3 + $0x398] sm:$0xff]  ;;  %v3228_v18 = vcombine.low %v516_v4, %v520_v5 }
  0x83   : > { %1759 = vmatpush1.bf16.msra.mxu1 %v3106_v13  ;;  %v3171_v13 = vcombine.high %v459_v7, %v463_v9  ;;  %v548_v51 = vld [vmem:[%s4591_s3 + $0x4d8] sm:$0xff]  ;;  %v2088_v7 = vld [vmem:[%s4080_s14 + $0x40] sm:$0xff] }
  0x84   : > { %1760 = vmatprep.subr.bf16.mxu1 %v3227_v15  ;;  %v512_v15 = vld [vmem:[%s4591_s3 + $0x3b8] sm:$0xff]  ;;  %v2092_v9 = vld [vmem:[%s4080_s14 + $0x60] sm:$0xff] }
  0x85   : > { %1873 = vmatpush1.bf16.msra.mxu0 %v3156_v20  ;;  %v3221_v20 = vcombine.high %v508_v14, %v512_v15  ;;  %v552_v26 = vld [vmem:[%s4591_s3 + $0x4f8] sm:$0xff]  ;;  %v3220_v27 = vcombine.low %v508_v14, %v512_v15  ;;  %v3294_v14 = vcombine.high %v2088_v7, %v2092_v9 }
  0x86   : > { %1874 = vmatprep.subr.bf16.mxu0 %v3149_v22  ;;  %v504_v22 = vld [vmem:[%s4591_s3 + $0x378] sm:$0xff] }
  0x87   : > { %1761 = vmatpush2.bf16.msra.mxu1 %v3226_v21  ;;  %v500_v21 = vld [vmem:[%s4591_s3 + $0x358] sm:$0xff] }
  0x88   : > { %1762 = vmatprep.subr.bf16.mxu1 %v3219_v23  ;;  %3277 = vmatmul.mubr.msk.bf16.gmra.mxu0 %vm1482_vm0, %v3604_v6  ;;  %v483_v6 = vld [vmem:[%s4591_s3 + $0x2d0] sm:$0xff]  ;;  %v3269_v23 = vcombine.high %v556_v16, %v560_v17  ;;  %v3213_v28 = vcombine.high %v500_v21, %v504_v22  ;;  %v3212_v36 = vcombine.low %v500_v21, %v504_v22 }
  0x89   : > { %1875 = vmatpush1.bf16.msra.mxu0 %v3148_v30  ;;  %1859 = vmatprep.mubr.bf16.mxu0 %v3414_v8  ;;  %v3195_v50 = vcombine.high %v483_v6, %v487_v45  ;;  %v3194_v57 = vcombine.low %v483_v6, %v487_v45  ;;  %v3268_v30 = vcombine.low %v556_v16, %v560_v17  ;;  %v2089_v16 = vld [vmem:[%s4080_s14 + $0x48] sm:$0xff] }
  0x8a   : > { %1876 = vmatprep.subr.bf16.mxu0 %v3141_v32  ;;  %v496_v32 = vld [vmem:[%s4591_s3 + $0x338] sm:$0xff]  ;;  %v2093_v17 = vld [vmem:[%s4080_s14 + $0x68] sm:$0xff]  ;;  %v3293_v22 = vcombine.low %v2088_v7, %v2092_v9 }
  0x8b   : > { %1763 = vmatpush2.bf16.msra.mxu1 %v3218_v31  ;;  %v492_v31 = vld [vmem:[%s4591_s3 + $0x318] sm:$0xff] }
  0x8c   : > { %1764 = vmatprep.subr.bf16.mxu1 %v3211_v33  ;;  %v3261_v33 = vcombine.high %v548_v51, %v552_v26  ;;  %v3205_v37 = vcombine.high %v492_v31, %v496_v32  ;;  %v3204_v6 = vcombine.low %v492_v31, %v496_v32  ;;  %v3295_v31 = vcombine.low %v2089_v16, %v2093_v17 }
  0x8d   : > { %1877 = vmatpush1.bf16.msra.mxu0 %v3140_v38  ;;  %v3260_v38 = vcombine.low %v548_v51, %v552_v26  ;;  %v2098_v26 = vld [vmem:[%s4080_s14 + $0x90] sm:$0xff] }
  0x8e   : > { %1878 = vmatprep.subr.bf16.mxu0 %v3133_v40  ;;  %v488_v40 = vld [vmem:[%s4591_s3 + $0x2f8] sm:$0xff] }
  0x8f   : > { %1765 = vmatpush2.bf16.msra.mxu1 %v3210_v39  ;;  %v484_v39 = vld [vmem:[%s4591_s3 + $0x2d8] sm:$0xff] }
  0x90   : > { %1766 = vmatprep.subr.bf16.mxu1 %v3203_v41  ;;  %3278 = vmatmul.mubr.msk.bf16.gmra.mxu0 %vm1482_vm0, %v3634_v24  ;;  %v467_v24 = vld [vmem:[%s4591_s3 + $0x250] sm:$0xff]  ;;  %v3253_v41 = vcombine.high %v540_v34, %v544_v35  ;;  %v3197_v45 = vcombine.high %v484_v39, %v488_v40  ;;  %v3196_v54 = vcombine.low %v484_v39, %v488_v40 }
  0x91   : > { %1879 = vmatpush1.bf16.msra.mxu0 %v3132_v46  ;;  %1902 = vmatprep.mubr.bf16.mxu0 %v3585_v60  ;;  %v471_v60 = vld [vmem:[%s4591_s3 + $0x270] sm:$0xff]  ;;  %v3252_v46 = vcombine.low %v540_v34, %v544_v35  ;;  %v2099_v35 = vld [vmem:[%s4080_s14 + $0x98] sm:$0xff] }
  0x92   : > { %1880 = vmatprep.subr.bf16.mxu0 %v3125_v49  ;;  %v3179_v3 = vcombine.high %v467_v24, %v471_v60  ;;  %v3178_v11 = vcombine.low %v467_v24, %v471_v60  ;;  %v480_v49 = vld [vmem:[%s4591_s3 + $0x2b8] sm:$0xff]  ;;  %v2090_v39 = vld [vmem:[%s4080_s14 + $0x50] sm:$0xff] }
  0x93   : > { %1767 = vmatpush2.bf16.msra.mxu1 %v3202_v48  ;;  %v476_v48 = vld [vmem:[%s4591_s3 + $0x298] sm:$0xff]  ;;  %v2094_v40 = vld [vmem:[%s4080_s14 + $0x70] sm:$0xff] }
  0x94   : > { %1768 = vmatprep.subr.bf16.mxu1 %v3195_v50  ;;  %v3245_v50 = vcombine.high %v532_v42, %v536_v44  ;;  %v3189_v55 = vcombine.high %v476_v48, %v480_v49  ;;  %v3188_v24 = vcombine.low %v476_v48, %v480_v49 }
  0x95   : > { %1881 = vmatpush1.bf16.msra.mxu0 %v3124_v56  ;;  %v3244_v56 = vcombine.low %v532_v42, %v536_v44  ;;  %v2091_v42 = vld [vmem:[%s4080_s14 + $0x58] sm:$0xff] }
  0x96   : > { %1882 = vmatprep.subr.bf16.mxu0 %v3117_v58  ;;  %v472_v58 = vld [vmem:[%s4591_s3 + $0x278] sm:$0xff] }
  0x97   : > { %1769 = vmatpush2.bf16.msra.mxu1 %v3194_v57  ;;  %v468_v57 = vld [vmem:[%s4591_s3 + $0x258] sm:$0xff] }
  0x98   : > { %1770 = vmatprep.subr.bf16.mxu1 %v3187_v59  ;;  %v3237_v59 = vcombine.high %v524_v52, %v528_v53  ;;  %v3181_v60 = vcombine.high %v468_v57, %v472_v58  ;;  %v3180_v4 = vcombine.low %v468_v57, %v472_v58  ;;  %v2095_v44 = vld [vmem:[%s4080_s14 + $0x78] sm:$0xff]  ;;  %v3383_v58 = vld [vmem:[%s4593_s5 + $0x10] sm:$0xff]  }
  0x99   : > { %1883 = vmatpush1.bf16.msra.mxu0 %v3116_v0  ;;  %v3236_v0 = vcombine.low %v524_v52, %v528_v53  ;;  %v3300_v48 = vcombine.high %v2091_v42, %v2095_v44  ;;  %v2087_v52 = vld [vmem:[%s4080_s14 + $0x38] sm:$0xff]  ;;  %v3382_v53 = vld [vmem:[%s4593_s5 + $0x8] sm:$0xff]  }
  0x9a   : > { %1884 = vmatprep.subr.bf16.mxu0 %v3109_v2  ;;  %v464_v2 = vld [vmem:[%s4591_s3 + $0x238] sm:$0xff] }
  0x9b   : > { %1771 = vmatpush2.bf16.msra.mxu1 %v3186_v1  ;;  %v460_v1 = vld [vmem:[%s4591_s3 + $0x218] sm:$0xff] }
  0x9c   : > { %1772 = vmatprep.subr.bf16.mxu1 %v3179_v3  ;;  %v3302_v3 = vcombine.high %v2096_v61, %v2100_v62  ;;  %v3173_v5 = vcombine.high %v460_v1, %v464_v2 }
  0x9d   : > { %1885 = vmatpush1.bf16.msra.mxu0 %v3108_v10  ;;  %v2097_v10 = vld [vmem:[%s4080_s14 + $0x88] sm:$0xff] }
  0x9e   : > { %1886 = vmatprep.subr.bf16.mxu0 %v3229_v12  ;;  %v3172_v12 = vcombine.low %v460_v1, %v464_v2 }
  0x9f   : > { %1773 = vmatpush2.bf16.msra.mxu1 %v3178_v11  ;;  %v2101_v11 = vld [vmem:[%s4080_s14 + $0xa8] sm:$0xff] }
  0xa0   : > { %1774 = vmatprep.subr.bf16.mxu1 %v3171_v13  ;;  %v3301_v13 = vcombine.low %v2096_v61, %v2100_v62  ;;  %v3304_v15 = vcombine.high %v2097_v10, %v2101_v11  ;;  %v3303_v21 = vcombine.low %v2097_v10, %v2101_v11 }
  0xa1   : > { %1887 = vmatpush2.bf16.msra.mxu0 %v3228_v18  ;;  %v2080_v18 = vld [vmem:[%s4080_s14] sm:$0xff] }
  0xa2   : > { %1888 = vmatprep.subr.bf16.mxu0 %v3221_v20  ;;  %v3387_v20 = vld [vmem:[%s3531_s21 + $0x8] ss:$12 sps:$4 sm:$0xff]  }
  0xa3   : > { %1775 = vmatpush2.bf16.msra.mxu1 %v3170_v19  ;;  %v2084_v19 = vld [vmem:[%s4080_s14 + $0x20] sm:$0xff] }
  0xa4   : > { %1939 = vmatprep.subr.bf16.mxu1 %v3269_v23  ;;  %v3296_v23 = vcombine.high %v2089_v16, %v2093_v17  ;;  %v3286_v51 = vcombine.high %v2080_v18, %v2084_v19  ;;  %v3285_v32 = vcombine.low %v2080_v18, %v2084_v19  ;;  %v4176_v11 = vpop.permute.xlu1 %579 }
  0xa5   : > { %1889 = vmatpush2.bf16.msra.mxu0 %v3220_v27  ;;  %v2102_v27 = vld [vmem:[%s4080_s14 + $0xb0] sm:$0xff] }
  0xa6   : > { %1777 = vmatmul.mubr.bf16.vlgmr.msra.gmra.mxu1 %v3730_v25  ;;  %1890 = vmatprep.subr.bf16.mxu0 %v3213_v28  ;;  %v2081_v28 = vld [vmem:[%s4080_s14 + $0x8] sm:$0xff] }
  0xa7   : > { %1940 = vmatpush1.bf16.msra.mxu1 %v3268_v30  ;;  %1786 = vmatprep.mubr.bf16.mxu1 %v3739_v29  ;;  %v2085_v30 = vld [vmem:[%s4080_s14 + $0x28] sm:$0xff] }
  0xa8   : > { %1941 = vmatprep.subr.bf16.mxu1 %v3261_v33  ;;  %v3306_v33 = vcombine.high %v2098_v26, %v2102_v27  ;;  %v3288_v34 = vcombine.high %v2081_v28, %v2085_v30  ;;  %v4180_v18 = vpop.permute.xlu1 %584 }
  0xa9   : > { %1891 = vmatpush2.bf16.msra.mxu0 %v3212_v36  ;;  %v2103_v36 = vld [vmem:[%s4080_s14 + $0xb8] sm:$0xff] }
  0xaa   : > { %1892 = vmatprep.subr.bf16.mxu0 %v3205_v37  ;;  %v3388_v37 = vld [vmem:[%s3531_s21 + $0x20] ss:$12 sps:$4 sm:$0xff]  }
  0xab   : > { %1942 = vmatpush1.bf16.msra.mxu1 %v3260_v38  ;;  %v3389_v38 = vld [vmem:[%s3531_s21 + $0x38] ss:$12 sps:$4 sm:$0xff]  }
  0xac   : > { %1943 = vmatprep.subr.bf16.mxu1 %v3253_v41  ;;  %v3298_v41 = vcombine.high %v2090_v39, %v2094_v40 }
  0xad   : > { %1893 = vmatpush2.bf16.msra.mxu0 %v3204_v6  ;;  %v2082_v6 = vld [vmem:[%s4080_s14 + $0x10] sm:$0xff] }
  0xae   : > { %1787 = vmatmul.mubr.bf16.gmra.mxu1 %v3762_v43  ;;  %1894 = vmatprep.subr.bf16.mxu0 %v3197_v45  ;;  %v2086_v45 = vld [vmem:[%s4080_s14 + $0x30] sm:$0xff] }
  0xaf   : > { %1944 = vmatpush1.bf16.msra.mxu1 %v3252_v46  ;;  %1796 = vmatprep.mubr.bf16.mxu1 %v3771_v47  ;;  %v3297_v46 = vcombine.low %v2090_v39, %v2094_v40  ;;  %v3290_v49 = vcombine.high %v2082_v6, %v2086_v45 }
  0xb0   : > { %1945 = vmatprep.subr.bf16.mxu1 %v3245_v50  ;;  %v2083_v50 = vld [vmem:[%s4080_s14 + $0x18] sm:$0xff] }
  0xb1   : > { %1895 = vmatpush2.bf16.msra.mxu0 %v3196_v54  ;;  %v3299_v54 = vcombine.low %v2091_v42, %v2095_v44  ;;  %v3291_v57 = vcombine.low %v2083_v50, %v2087_v52 }
  0xb2   : > { %1896 = vmatprep.subr.bf16.mxu0 %v3189_v55  ;;  %v3289_v55 = vcombine.low %v2082_v6, %v2086_v45 }
  0xb3   : > { %1946 = vmatpush1.bf16.msra.mxu1 %v3244_v56  ;;  %v3292_v56 = vcombine.high %v2083_v50, %v2087_v52 }
  0xb4   : > { %1947 = vmatprep.subr.bf16.mxu1 %v3237_v59 }
  0xb5   : > { %1897 = vmatpush2.bf16.msra.mxu0 %v3188_v24 }
  0xb6   : > { %1797 = vmatmul.mubr.bf16.gmra.mxu1 %v3794_v63  ;;  %1898 = vmatprep.subr.bf16.mxu0 %v3181_v60 }
  0xb7   : > { %1948 = vmatpush1.bf16.msra.mxu1 %v3236_v0  ;;  %1965 = vmatprep.mubr.bf16.mxu1 %v3414_v8 }
  0xb8   : > { %2259 = vmatprep.subr.bf16.mxu1 %v3302_v3 }
  0xb9   : > { %1899 = vmatpush2.bf16.msra.mxu0 %v3180_v4 }
  0xba   : > { %1900 = vmatprep.subr.bf16.mxu0 %v3173_v5 }
  0xbd   : > { %1901 = vmatpush2.bf16.msra.mxu0 %v3172_v12 }
  0xbe   : > { %3279 = vmatmul.mubr.msk.bf16.vlgmr.msra.gmra.mxu1 %vm1482_vm0, %v3387_v20  ;;  %2322 = vmatprep.subr.bf16.mxu0 %v3304_v15 }
  0xbf   : > { %1975 = vmatprep.mubr.bf16.mxu1 %v3414_v8  ;;  %2260 = vmatpush1.bf16.msra.mxu1 %v3301_v13 }
  0xc0   : > { %2261 = vmatprep.subr.bf16.mxu1 %v3294_v14  ;;  %1903 = vmatmul.mubr.bf16.vlgmr.msra.gmra.mxu0 %v3730_v25  ;;  %v3287_v25 = vcombine.low %v2081_v28, %v2085_v30  ;;  %v4178_v14 = vpop.permute.xlu0 %589  ;;  %v4187_v28 = vpop.permute.xlu1 %574 }
  0xc1   : > { %1912 = vmatprep.mubr.bf16.mxu0 %v3739_v29  ;;  %2323 = vmatpush1.bf16.msra.mxu0 %v3303_v21  ;;  %v3308_v29 = vcombine.high %v2099_v35, %v2103_v36 }
  0xc2   : > { %2324 = vmatprep.subr.bf16.mxu0 %v3296_v23 }
  0xc3   : > { %2262 = vmatpush1.bf16.msra.mxu1 %v3293_v22 }
  0xc4   : > { %2263 = vmatprep.subr.bf16.mxu1 %v3286_v51  ;;  %v4182_v21 = vpop.permute.xlu0 %594 }
  0xc5   : > { %2325 = vmatpush1.bf16.msra.mxu0 %v3295_v31 }
  0xc6   : > { %3280 = vmatmul.mubr.msk.bf16.gmra.mxu1 %vm1482_vm0, %v3388_v37  ;;  %2326 = vmatprep.subr.bf16.mxu0 %v3288_v34 }
  0xc7   : > { %1985 = vmatprep.mubr.bf16.mxu1 %v3414_v8  ;;  %2264 = vmatpush1.bf16.msra.mxu1 %v3285_v32 }
  0xc8   : > { %2385 = vmatprep.subr.bf16.mxu1 %v3306_v33  ;;  %1913 = vmatmul.mubr.bf16.gmra.mxu0 %v3762_v43  ;;  %v3381_v43 = vld [vmem:[%s4593_s5] sm:$0xff]   ;;  %v4198_v39 = vpop.permute.xlu0 %569 }
  0xc9   : > { %1922 = vmatprep.mubr.bf16.mxu0 %v3771_v47  ;;  %2327 = vmatpush1.bf16.msra.mxu0 %v3287_v25  ;;  %v3305_v47 = vcombine.low %v2098_v26, %v2102_v27 }
  0xca   : > { %2448 = vmatprep.subr.bf16.mxu0 %v3308_v29 }
  0xce   : > { %3281 = vmatmul.mubr.msk.bf16.gmra.mxu1 %vm1482_vm0, %v3389_v38 }
  0xcf   : > { %2281 = vmatprep.mubr.bf16.mxu1 %v3414_v8 }
  0xd0   : > { %1923 = vmatmul.mubr.bf16.gmra.mxu0 %v3794_v63  ;;  %v3307_v63 = vcombine.low %v2099_v35, %v2103_v36 }
  0xd1   : > { %2344 = vmatprep.mubr.bf16.mxu0 %v3414_v8 }
  0xd6   : > { %3309 = vmatmul.mubr.msk.bf16.vlgmr.msra.gmra.mxu1 %vm2239_vm1, %v3381_v43 }
  0xd7   : > { %2291 = vmatprep.mubr.bf16.mxu1 %v3414_v8  ;;  %2386 = vmatpush1.bf16.msra.mxu1 %v3305_v47 }
  0xd8   : > { %2387 = vmatprep.subr.bf16.mxu1 %v3298_v41  ;;  %3312 = vmatmul.mubr.msk.bf16.vlgmr.msra.gmra.mxu0 %vm2239_vm1, %v3381_v43 }
  0xd9   : > { %2354 = vmatprep.mubr.bf16.mxu0 %v3414_v8  ;;  %2449 = vmatpush1.bf16.msra.mxu0 %v3307_v63 }
  0xda   : > { %2450 = vmatprep.subr.bf16.mxu0 %v3300_v48 }
  0xdb   : > { %2388 = vmatpush1.bf16.msra.mxu1 %v3297_v46 }
  0xdc   : > { %2389 = vmatprep.subr.bf16.mxu1 %v3290_v49 }
  0xdd   : > { %2451 = vmatpush1.bf16.msra.mxu0 %v3299_v54 }
  0xde   : > { %3310 = vmatmul.mubr.msk.bf16.gmra.mxu1 %vm2239_vm1, %v3382_v53  ;;  %2452 = vmatprep.subr.bf16.mxu0 %v3292_v56 }
  0xdf   : > { %2301 = vmatprep.mubr.bf16.mxu1 %v3414_v8  ;;  %2390 = vmatpush1.bf16.msra.mxu1 %v3289_v55 }
  0xe0   : > { %3313 = vmatmul.mubr.msk.bf16.gmra.mxu0 %vm2239_vm1, %v3382_v53 }
  0xe1   : > { %2364 = vmatprep.mubr.bf16.mxu0 %v3414_v8  ;;  %2453 = vmatpush1.bf16.msra.mxu0 %v3291_v57 }
  0xe6   : > { %3311 = vmatmul.mubr.msk.bf16.gmra.mxu1 %vm2239_vm1, %v3383_v58  ;;  %v4164_v59 = vpop.f32.mrf.mxu1 }
  0xe7   : > { %2407 = vmatprep.mubr.bf16.mxu1 %v3414_v8 }
  0xe8   : > { %3314 = vmatmul.mubr.msk.bf16.gmra.mxu0 %vm2239_vm1, %v3383_v58  ;;  %v4168_v61 = vpop.f32.mrf.mxu1 }
  0xe9   : > { %2470 = vmatprep.mubr.bf16.mxu0 %v3414_v8 }
  0xea   : > { %v4172_v62 = vpop.f32.mrf.mxu1 }
  0xec   : > { %v1595_v24 = vpop.f32.mrf.mxu1 }
  0xee   : > { %3315 = vmatmul.mubr.msk.bf16.vlgmr.msra.gmra.mxu1 %vm2239_vm1, %v3381_v43  ;;  %v1599_v60 = vpop.f32.mrf.mxu1 }
  0xef   : > { %2417 = vmatprep.mubr.bf16.mxu1 %v3414_v8 }
  0xf0   : > { %3318 = vmatmul.mubr.msk.bf16.vlgmr.msra.gmra.mxu0 %vm2239_vm1, %v3381_v43  ;;  %v1601_v0 = vpop.f32.mrf.mxu1 }
  0xf1   : > { %2480 = vmatprep.mubr.bf16.mxu0 %v3414_v8 }
  0xf2   : > { %v1603_v1 = vpop.f32.mrf.mxu1 }
  0xf4   : > { %v1605_v3 = vpop.f32.mrf.mxu1 }
  0xf6   : > { %3316 = vmatmul.mubr.msk.bf16.gmra.mxu1 %vm2239_vm1, %v3382_v53  ;;  %v1609_v7 = vpop.f32.mrf.mxu1 }
  0xf7   : > { %2427 = vmatprep.mubr.bf16.mxu1 %v3414_v8 }
  0xf8   : > { %3319 = vmatmul.mubr.msk.bf16.gmra.mxu0 %vm2239_vm1, %v3382_v53  ;;  %v1611_v12 = vpop.f32.mrf.mxu1 }
  0xf9   : > { %2490 = vmatprep.mubr.bf16.mxu0 %v3414_v8 }
  0xfa   : > { %v1613_v16 = vpop.f32.mrf.mxu1 }
  0xfc   : > { %v1615_v20 = vpop.f32.mrf.mxu1 }
  0xfe   : > { %3317 = vmatmul.mubr.msk.bf16.gmra.mxu1 %vm2239_vm1, %v3383_v58 }
  0xff   : > { %2557 = vmatprep.mubr.bf16.mxu1 %v3414_v8 }
 0x100   : > { %3320 = vmatmul.mubr.msk.bf16.gmra.mxu0 %vm2239_vm1, %v3383_v58 }
 0x101   : > { %2620 = vmatprep.mubr.bf16.mxu0 %v3414_v8 }
 0x110   : > { %v1526_v2 = vpop.f32.mrf.mxu0 }
 0x111   : > { %v1527_v55 = vadd.f32 %v1526_v2, %v4198_v39 }
 0x112   : > { %v1528_v4 = vpop.f32.mrf.mxu0 }
 0x113   : > { %v1529_v41 = vadd.f32 %v1528_v4, %v4198_v39  ;;  %v1590_v2 = vadd.f32 %v4164_v59, %v1527_v55  ;;  %v4218_v59 = vld [vmem:[%s4592_s4] sm:$0xff]  }
 0x114   : > { %v1530_v5 = vpop.f32.mrf.mxu0 }
 0x115   : > { %v1531_v45 = vadd.f32 %v1530_v5, %v4187_v28 }
 0x116   : > { %v1532_v9 = vpop.f32.mrf.mxu0 }
 0x117   : > { %v1533_v33 = vadd.f32 %v1532_v9, %v4187_v28 }
 0x118   : > { %v1536_v10 = vpop.f32.mrf.mxu0 }
 0x119   : > { %v1537_v40 = vadd.f32 %v1536_v10, %v4176_v11  ;;  %v1596_v49 = vadd.f32 %v1595_v24, %v1533_v33 }
 0x11a   : > { %v1538_v13 = vpop.f32.mrf.mxu0 }
 0x11b   : > { %v1539_v30 = vadd.f32 %v1538_v13, %v4176_v11  ;;  %v1600_v56 = vadd.f32 %v1599_v60, %v1537_v40  ;;  %v2005_v10 = vmax.f32 %v1596_v49, 0.0 }
 0x11c   : > { %v1540_v15 = vpop.f32.mrf.mxu0 }
 0x11d   : > { %v1541_v34 = vadd.f32 %v1540_v15, %v4180_v18  ;;  %v1602_v42 = vadd.f32 %v1601_v0, %v1539_v30  ;;  %v1592_v0 = vadd.f32 %v4168_v61, %v1529_v41  ;;  %v2012_v60 = vmax.f32 %v1600_v56, 0.0 }
 0x11e   : > { %v1542_v17 = vpop.f32.mrf.mxu0 }
 0x11f   : > { %v1543_v23 = vadd.f32 %v1542_v17, %v4180_v18  ;;  %v1604_v63 = vadd.f32 %v1603_v1, %v1541_v34  ;;  %v1594_v1 = vadd.f32 %v4172_v62, %v1531_v45 }
 0x120   : > { %v1546_v19 = vpop.f32.mrf.mxu0 }
 0x121   : > { %v1547_v26 = vadd.f32 %v1546_v19, %v4178_v14  ;;  %v1606_v36 = vadd.f32 %v1605_v3, %v1543_v23  ;;  %v2013_v3 = vmax.f32 %v1602_v42, 0.0  ;;  %v2004_v17 = vmax.f32 %v1594_v1, 0.0 }
 0x122   : > { %v1548_v22 = vpop.f32.mrf.mxu0  ;;  %v1996_v23 = vmax.f32 %v1590_v2, 0.0 }
 0x123   : > { %v1549_v51 = vadd.f32 %v1548_v22, %v4178_v14  ;;  %v1610_v43 = vadd.f32 %v1609_v7, %v1547_v26  ;;  %v2021_v50 = vmax.f32 %v1606_v36, 0.0  ;;  %v2020_v7 = vmax.f32 %v1604_v63, 0.0 }
 0x124   : > { %v1550_v27 = vpop.f32.mrf.mxu0 }
 0x125   : > { %v1551_v31 = vadd.f32 %v1550_v27, %v4182_v21  ;;  %v1612_v37 = vadd.f32 %v1611_v12, %v1549_v51  ;;  %v2028_v57 = vmax.f32 %v1610_v43, 0.0  ;;  %v2059_v13 = vpack.c.bf16 %v2021_v50, %v2013_v3 }
 0x126   : > { %v4191_v32 = vpop.f32.mrf.mxu1  ;;  %v1552_v35 = vpop.f32.mrf.mxu0  ;;  %v2058_v19 = vpack.c.bf16 %v2020_v7, %v2012_v60  ;;  %v2050_v27 = vpack.c.bf16 %v2004_v17, %v1996_v23 }
 0x127   : > { %v1614_v25 = vadd.f32 %v1613_v16, %v1551_v31  ;;  %v1553_v29 = vadd.f32 %v1552_v35, %v4182_v21  ;;  %v2029_v52 = vmax.f32 %v1612_v37, 0.0  ;;  %v1997_v16 = vmax.f32 %v1592_v0, 0.0  ;;  %v4237_v0 = vld [vmem:[%s4592_s4 + $0x8] sm:$0xff]  }
 0x128   : > { %v4196_v38 = vpop.f32.mrf.mxu1  ;;  %v4201_v47 = vpop.f32.mrf.mxu0 }
 0x129   : > { %v1616_v44 = vadd.f32 %v1615_v20, %v1553_v29  ;;  %v2036_v46 = vmax.f32 %v1614_v25, 0.0  ;;  %v2051_v62 = vpack.c.bf16 %v2005_v10, %v1997_v16 }
 0x12a   : > { %v4204_v6 = vpop.f32.mrf.mxu1  ;;  %v4207_v48 = vpop.f32.mrf.mxu0 }
 0x12b   : > { %v2037_v53 = vmax.f32 %v1616_v44, 0.0  ;;  %v2066_v9 = vpack.c.bf16 %v2036_v46, %v2028_v57  ;;  %v1657_v3 = vadd.f32 %v4204_v6, %v4187_v28 }
 0x12c   : > { %v1658_v54 = vpop.f32.mrf.mxu1  ;;  %v4210_v58 = vpop.f32.mrf.mxu0 }
 0x12d   : > { %v2067_v5 = vpack.c.bf16 %v2037_v53, %v2029_v52  ;;  %v1655_v53 = vadd.f32 %v4196_v38, %v4198_v39  ;;  %v1659_v55 = vadd.f32 %v1658_v54, %v4187_v28  ;;  %v1653_v38 = vadd.f32 %v4191_v32, %v4198_v39 }
 0x12e   : > { %v1662_v4 = vpop.f32.mrf.mxu1  ;;  %v1721_v24 = vpop.f32.mrf.mxu0  ;;  %v1720_v6 = vadd.f32 %v4210_v58, %v1657_v3 }
 0x12f   : > { %2535 = vmatprep.subr.bf16.mxu1 %v2067_v5  ;;  %v1663_v49 = vadd.f32 %v1662_v4, %v4176_v11  ;;  %v1722_v4 = vadd.f32 %v1721_v24, %v1659_v55  ;;  %v1716_v32 = vadd.f32 %v4201_v47, %v1653_v38 }
 0x130   : > { %v1664_v12 = vpop.f32.mrf.mxu1  ;;  %v1725_v15 = vpop.f32.mrf.mxu0  ;;  %2536 = vmatpush1.bf16.msra.mxu1 %v2066_v9 }
 0x131   : > { %2537 = vmatprep.subr.bf16.mxu1 %v2059_v13  ;;  %v1665_v40 = vadd.f32 %v1664_v12, %v4176_v11  ;;  %v1726_v54 = vadd.f32 %v1725_v15, %v1663_v49  ;;  %v1718_v13 = vadd.f32 %v4207_v48, %v1655_v53  ;;  %v2007_v24 = vmax.f32 %v1722_v4, 0.0  ;;  %v4252_v48 = vld [vmem:[%s4592_s4 + $0x10] sm:$0xff]  }
 0x132   : > { %v1666_v61 = vpop.f32.mrf.mxu1  ;;  %v1727_v20 = vpop.f32.mrf.mxu0 }
 0x133   : > { %v1667_v41 = vadd.f32 %v1666_v61, %v4180_v18  ;;  %v1728_v56 = vadd.f32 %v1727_v20, %v1665_v40  ;;  %v2014_v15 = vmax.f32 %v1726_v54, 0.0  ;;  %v2006_v20 = vmax.f32 %v1720_v6, 0.0 }
 0x134   : > { %v1668_v22 = vpop.f32.mrf.mxu1  ;;  %v1729_v51 = vpop.f32.mrf.mxu0  ;;  %2538 = vmatpush1.bf16.msra.mxu1 %v2058_v19  ;;  %v1999_v19 = vmax.f32 %v1718_v13, 0.0 }
 0x135   : > { %2539 = vmatprep.subr.bf16.mxu1 %v2051_v62  ;;  %v1669_v34 = vadd.f32 %v1668_v22, %v4180_v18  ;;  %v1730_v5 = vadd.f32 %v1729_v51, %v1667_v41  ;;  %v2015_v2 = vmax.f32 %v1728_v56, 0.0  ;;  %v1998_v62 = vmax.f32 %v1716_v32, 0.0 }
 0x136   : > { %v1672_v26 = vpop.f32.mrf.mxu1  ;;  %v1731_v30 = vpop.f32.mrf.mxu0  ;;  %v2053_v22 = vpack.c.bf16 %v2007_v24, %v1999_v19 }
 0x137   : > { %v1673_v37 = vadd.f32 %v1672_v26, %v4178_v14  ;;  %v1732_v45 = vadd.f32 %v1731_v30, %v1669_v34  ;;  %v2022_v16 = vmax.f32 %v1730_v5, 0.0  ;;  %v2052_v23 = vpack.c.bf16 %v2006_v20, %v1998_v62 }
 0x138   : > { %v1674_v31 = vpop.f32.mrf.mxu1  ;;  %v1735_v33 = vpop.f32.mrf.mxu0  ;;  %2540 = vmatpush1.bf16.msra.mxu1 %v2050_v27 }
 0x139   : > { %v1675_v35 = vadd.f32 %v1674_v31, %v4178_v14  ;;  %v1736_v50 = vadd.f32 %v1735_v33, %v1673_v37  ;;  %v2023_v7 = vmax.f32 %v1732_v45, 0.0  ;;  %v2060_v58 = vpack.c.bf16 %v2022_v16, %v2014_v15 }
 0x13a   : > { %v1676_v36 = vpop.f32.mrf.mxu1  ;;  %v1737_v29 = vpop.f32.mrf.mxu0 }
 0x13b   : > { %v1677_v25 = vadd.f32 %v1676_v36, %v4182_v21  ;;  %3324 = vmatmul.mubr.msk.bf16.vlgmr.msra.gmra.mxu1 %vm2239_vm1, %v4218_v59  ;;  %v1738_v63 = vadd.f32 %v1737_v29, %v1675_v35  ;;  %v2030_v12 = vmax.f32 %v1736_v50, 0.0  ;;  %v2061_v17 = vpack.c.bf16 %v2023_v7, %v2015_v2 }
 0x13c   : > { %v1678_v43 = vpop.f32.mrf.mxu1  ;;  %v1739_v44 = vpop.f32.mrf.mxu0  ;;  %2567 = vmatprep.mubr.bf16.mxu1 %v3414_v8 }
 0x13d   : > { %v1679_v42 = vadd.f32 %v1678_v43, %v4182_v21  ;;  %v1740_v46 = vadd.f32 %v1739_v44, %v1677_v25  ;;  %v2031_v9 = vmax.f32 %v1738_v63, 0.0 }
 0x13e   : > { %v1741_v52 = vpop.f32.mrf.mxu0 }
 0x13f   : > { %v1742_v57 = vadd.f32 %v1741_v52, %v1679_v42  ;;  %v2038_v1 = vmax.f32 %v1740_v46, 0.0 }
 0x140   : > { %v4260_v47 = vpop.f32.mrf.mxu0 }
 0x141   : > { %v2039_v10 = vmax.f32 %v1742_v57, 0.0  ;;  %v2068_v61 = vpack.c.bf16 %v2038_v1, %v2030_v12 }
 0x142   : > { %v1843_v51 = vpop.f32.mrf.mxu0 }
 0x143   : > { %v2069_v60 = vpack.c.bf16 %v2039_v10, %v2031_v9  ;;  %3325 = vmatmul.mubr.msk.bf16.gmra.mxu1 %vm2239_vm1, %v4237_v0 }
 0x144   : > { %2577 = vmatprep.mubr.bf16.mxu1 %v3414_v8  ;;  %v1845_v26 = vpop.f32.mrf.mxu0 }
 0x145   : > { %2598 = vmatprep.subr.bf16.mxu0 %v2069_v60 }
 0x146   : > { %2599 = vmatpush1.bf16.msra.mxu0 %v2068_v61  ;;  %v1847_v27 = vpop.f32.mrf.mxu0 }
 0x147   : > { %2600 = vmatprep.subr.bf16.mxu0 %v2061_v17 }
 0x148   : > { %v1851_v30 = vpop.f32.mrf.mxu0 }
 0x14a   : > { %2601 = vmatpush1.bf16.msra.mxu0 %v2060_v58  ;;  %v1853_v33 = vpop.f32.mrf.mxu0 }
 0x14b   : > { %3326 = vmatmul.mubr.msk.bf16.gmra.mxu1 %vm2239_vm1, %v4252_v48  ;;  %2602 = vmatprep.subr.bf16.mxu0 %v2053_v22 }
 0x14c   : > { %2683 = vmatprep.mubr.bf16.mxu1 %v3414_v8  ;;  %v1855_v36 = vpop.f32.mrf.mxu0 }
 0x14e   : > { %2603 = vmatpush1.bf16.msra.mxu0 %v2052_v23  ;;  %v1857_v29 = vpop.f32.mrf.mxu0 }
 0x150   : > { %v1861_v41 = vpop.f32.mrf.mxu0 }
 0x151   : > { %3327 = vmatmul.mubr.msk.bf16.vlgmr.msra.gmra.mxu0 %vm2239_vm1, %v4218_v59 }
 0x152   : > { %2630 = vmatprep.mubr.bf16.mxu0 %v3414_v8  ;;  %v1863_v44 = vpop.f32.mrf.mxu0 }
 0x154   : > { %v1865_v52 = vpop.f32.mrf.mxu0 }
 0x156   : > { %v1867_v54 = vpop.f32.mrf.mxu0 }
 0x159   : > { %3328 = vmatmul.mubr.msk.bf16.gmra.mxu0 %vm2239_vm1, %v4237_v0 }
 0x15a   : > { %2640 = vmatprep.mubr.bf16.mxu0 %v3414_v8 }
 0x161   : > { %3329 = vmatmul.mubr.msk.bf16.gmra.mxu0 %vm2239_vm1, %v4252_v48 }
 0x162   : > { %2746 = vmatprep.mubr.bf16.mxu0 %v3414_v8 }
 0x166   : > { %v1778_v31 = vpop.f32.mrf.mxu1 }
 0x167   : > { %v1779_v58 = vadd.f32 %v1778_v31, %v4198_v39 }
 0x168   : > { %v1780_v34 = vpop.f32.mrf.mxu1 }
 0x169   : > { %v1781_v13 = vadd.f32 %v1780_v34, %v4198_v39 }
 0x16a   : > { %v1782_v35 = vpop.f32.mrf.mxu1 }
 0x16b   : > { %v1783_v6 = vadd.f32 %v1782_v35, %v4187_v28 }
 0x16c   : > { %v1784_v37 = vpop.f32.mrf.mxu1 }
 0x16d   : > { %v1785_v57 = vadd.f32 %v1784_v37, %v4187_v28 }
 0x16e   : > { %v1788_v25 = vpop.f32.mrf.mxu1 }
 0x16f   : > { %v1789_v10 = vadd.f32 %v1788_v25, %v4176_v11  ;;  %v1848_v17 = vadd.f32 %v1847_v27, %v1785_v57 }
 0x170   : > { %v1790_v40 = vpop.f32.mrf.mxu1 }
 0x171   : > { %v1791_v55 = vadd.f32 %v1790_v40, %v4176_v11  ;;  %v1852_v22 = vadd.f32 %v1851_v30, %v1789_v10  ;;  %v2009_v27 = vmax.f32 %v1848_v17, 0.0 }
 0x172   : > { %v1792_v43 = vpop.f32.mrf.mxu1 }
 0x173   : > { %v1793_v3 = vadd.f32 %v1792_v43, %v4180_v18  ;;  %v1854_v2 = vadd.f32 %v1853_v33, %v1791_v55  ;;  %v1844_v33 = vadd.f32 %v1843_v51, %v1781_v13 }
 0x174   : > { %v1794_v42 = vpop.f32.mrf.mxu1 }
 0x175   : > { %v1795_v46 = vadd.f32 %v1794_v42, %v4180_v18  ;;  %v1856_v16 = vadd.f32 %v1855_v36, %v1793_v3  ;;  %v2017_v34 = vmax.f32 %v1854_v2, 0.0  ;;  %v1846_v36 = vadd.f32 %v1845_v26, %v1783_v6 }
 0x176   : > { %v1798_v45 = vpop.f32.mrf.mxu1  ;;  %v1842_v42 = vadd.f32 %v4260_v47, %v1779_v58  ;;  %v2001_v30 = vmax.f32 %v1844_v33, 0.0 }
 0x177   : > { %v1799_v50 = vadd.f32 %v1798_v45, %v4178_v14  ;;  %v1858_v1 = vadd.f32 %v1857_v29, %v1795_v46  ;;  %v2024_v25 = vmax.f32 %v1856_v16, 0.0  ;;  %v2008_v51 = vmax.f32 %v1846_v36, 0.0 }
 0x178   : > { %v1800_v63 = vpop.f32.mrf.mxu1  ;;  %v2055_v26 = vpack.c.bf16 %v2009_v27, %v2001_v30 }
 0x179   : > { %v1801_v49 = vadd.f32 %v1800_v63, %v4178_v14  ;;  %v1862_v38 = vadd.f32 %v1861_v41, %v1799_v50  ;;  %v2025_v32 = vmax.f32 %v1858_v1, 0.0  ;;  %v2000_v50 = vmax.f32 %v1842_v42, 0.0 }
 0x17a   : > { %v1802_v53 = vpop.f32.mrf.mxu1 }
 0x17b   : > { %v1803_v56 = vadd.f32 %v1802_v53, %v4182_v21  ;;  %v1864_v4 = vadd.f32 %v1863_v44, %v1801_v49  ;;  %v2032_v62 = vmax.f32 %v1862_v38, 0.0  ;;  %v2063_v41 = vpack.c.bf16 %v2025_v32, %v2017_v34 }
 0x17c   : > { %v1804_v5 = vpop.f32.mrf.mxu1  ;;  %v2016_v44 = vmax.f32 %v1852_v22, 0.0  ;;  %v2054_v55 = vpack.c.bf16 %v2008_v51, %v2000_v50 }
 0x17d   : > { %v1866_v7 = vadd.f32 %v1865_v52, %v1803_v56  ;;  %v1805_v9 = vadd.f32 %v1804_v5, %v4182_v21  ;;  %v2033_v15 = vmax.f32 %v1864_v4, 0.0 }
 0x17e   : > { %v4277_v12 = vpop.f32.mrf.mxu1  ;;  %v2062_v63 = vpack.c.bf16 %v2024_v25, %v2016_v44 }
 0x17f   : > { %v1868_v60 = vadd.f32 %v1867_v54, %v1805_v9  ;;  %v2040_v61 = vmax.f32 %v1866_v7, 0.0 }
 0x180   : > { %v4281_v24 = vpop.f32.mrf.mxu1  ;;  %v4283_v20 = vpop.f32.mrf.mxu0 }
 0x181   : > { %v2041_v19 = vmax.f32 %v1868_v60, 0.0  ;;  %v2070_v29 = vpack.c.bf16 %v2040_v61, %v2032_v62  ;;  %v1905_v27 = vadd.f32 %v4283_v20, %v4198_v39 }
 0x182   : > { %v4286_v23 = vpop.f32.mrf.mxu1  ;;  %v1906_v37 = vpop.f32.mrf.mxu0 }
 0x183   : > { %v2071_v35 = vpack.c.bf16 %v2041_v19, %v2033_v15  ;;  %v1907_v22 = vadd.f32 %v1906_v37, %v4198_v39 }
 0x184   : > { %v1973_v40 = vpop.f32.mrf.mxu1  ;;  %v1908_v43 = vpop.f32.mrf.mxu0 }
 0x185   : > { %2661 = vmatprep.subr.bf16.mxu1 %v2071_v35  ;;  %v1970_v37 = vadd.f32 %v4281_v24, %v1907_v22 }
 0x186   : > { %v1977_v31 = vpop.f32.mrf.mxu1  ;;  %2662 = vmatpush1.bf16.msra.mxu1 %v2070_v29  ;;  %v1910_v45 = vpop.f32.mrf.mxu0 }
 0x187   : > { %2663 = vmatprep.subr.bf16.mxu1 %v2063_v41  ;;  %v1911_v60 = vadd.f32 %v1910_v45, %v4187_v28  ;;  %v2003_v39 = vmax.f32 %v1970_v37, 0.0 }
 0x188   : > { %v1979_v46 = vpop.f32.mrf.mxu1  ;;  %v1914_v49 = vpop.f32.mrf.mxu0 }
 0x189   : > { %v1915_v19 = vadd.f32 %v1914_v49, %v4176_v11  ;;  %v1974_v36 = vadd.f32 %v1973_v40, %v1911_v60 }
 0x18a   : > { %v1981_v52 = vpop.f32.mrf.mxu1  ;;  %2664 = vmatpush1.bf16.msra.mxu1 %v2062_v63  ;;  %v1916_v53 = vpop.f32.mrf.mxu0 }
 0x18b   : > { %2665 = vmatprep.subr.bf16.mxu1 %v2055_v26  ;;  %v1917_v13 = vadd.f32 %v1916_v53, %v4176_v11  ;;  %v1978_v41 = vadd.f32 %v1977_v31, %v1915_v19  ;;  %v2011_v51 = vmax.f32 %v1974_v36, 0.0 }
 0x18c   : > { %v1983_v56 = vpop.f32.mrf.mxu1  ;;  %v1918_v57 = vpop.f32.mrf.mxu0 }
 0x18d   : > { %v1919_v6 = vadd.f32 %v1918_v57, %v4180_v18  ;;  %v1980_v62 = vadd.f32 %v1979_v46, %v1917_v13  ;;  %v1968_v46 = vadd.f32 %v4277_v12, %v1905_v27  ;;  %v2018_v49 = vmax.f32 %v1978_v41, 0.0 }
 0x18e   : > { %v1987_v47 = vpop.f32.mrf.mxu1  ;;  %2666 = vmatpush1.bf16.msra.mxu1 %v2054_v55  ;;  %v1920_v3 = vpop.f32.mrf.mxu0  ;;  %v2057_v31 = vpack.c.bf16 %v2011_v51, %v2003_v39 }
 0x18f   : > { %v1921_v7 = vadd.f32 %v1920_v3, %v4180_v18  ;;  %v1909_v18 = vadd.f32 %v1908_v43, %v4187_v28  ;;  %v1982_v34 = vadd.f32 %v1981_v52, %v1919_v6  ;;  %v2019_v44 = vmax.f32 %v1980_v62, 0.0 }
 0x190   : > { %v1989_v5 = vpop.f32.mrf.mxu1  ;;  %v1924_v1 = vpop.f32.mrf.mxu0  ;;  %v2002_v26 = vmax.f32 %v1968_v46, 0.0 }
 0x191   : > { %3330 = vmatmul.mubr.msk.bf16.vlgmr.msra.gmra.mxu1 %vm2239_vm1, %v4218_v59  ;;  %v1925_v10 = vadd.f32 %v1924_v1, %v4178_v14  ;;  %v1984_v61 = vadd.f32 %v1983_v56, %v1921_v7  ;;  %v1972_v45 = vadd.f32 %v4286_v23, %v1909_v18  ;;  %v2026_v28 = vmax.f32 %v1982_v34, 0.0 }
 0x192   : > { %2693 = vmatprep.mubr.bf16.mxu1 %v3414_v8  ;;  %v1926_v4 = vpop.f32.mrf.mxu0  ;;  %v1991_v38 = vpop.f32.mrf.mxu1 }
 0x193   : > { %v1927_v9 = vadd.f32 %v1926_v4, %v4178_v14  ;;  %v1988_v58 = vadd.f32 %v1987_v47, %v1925_v10  ;;  %v2027_v25 = vmax.f32 %v1984_v61, 0.0  ;;  %v2010_v24 = vmax.f32 %v1972_v45, 0.0  ;;  %v4420_v45 = vpop.permute.xlu1 %2790 }
 0x194   : > { %v1928_v54 = vpop.f32.mrf.mxu0  ;;  %v1993_v14 = vpop.f32.mrf.mxu1  ;;  %v2064_v20 = vpack.c.bf16 %v2026_v28, %v2018_v49 }
 0x195   : > { %v1929_v2 = vadd.f32 %v1928_v54, %v4182_v21  ;;  %v1990_v17 = vadd.f32 %v1989_v5, %v1927_v9  ;;  %v2034_v42 = vmax.f32 %v1988_v58, 0.0  ;;  %v2065_v40 = vpack.c.bf16 %v2027_v25, %v2019_v44 }
 0x196   : > { %v1930_v16 = vpop.f32.mrf.mxu0  ;;  %v4306_v11 = vpop.f32.mrf.mxu1  ;;  %v2056_v50 = vpack.c.bf16 %v2010_v24, %v2002_v26 }
 0x197   : > { %v1992_v32 = vadd.f32 %v1991_v38, %v1929_v2  ;;  %v1931_v15 = vadd.f32 %v1930_v16, %v4182_v21  ;;  %v2035_v21 = vmax.f32 %v1990_v17, 0.0 }
 0x198   : > { %v4312_v63 = vpop.f32.mrf.mxu1  ;;  %v4328_v55 = vpop.f32.mrf.mxu0 }
 0x199   : > { %3331 = vmatmul.mubr.msk.bf16.gmra.mxu1 %vm2239_vm1, %v4237_v0  ;;  %v1994_v33 = vadd.f32 %v1993_v14, %v1931_v15  ;;  %v2042_v35 = vmax.f32 %v1992_v32, 0.0 }
 0x19a   : > { %2703 = vmatprep.mubr.bf16.mxu1 %v3414_v8  ;;  %v4317_v23 = vpop.f32.mrf.mxu1  ;;  %v4335_v57 = vpop.f32.mrf.mxu0 }
 0x19b   : > { %v2043_v29 = vmax.f32 %v1994_v33, 0.0  ;;  %v2072_v43 = vpack.c.bf16 %v2042_v35, %v2034_v42 }
 0x19c   : > { %v4319_v52 = vpop.f32.mrf.mxu1 }
 0x19d   : > { %v2073_v30 = vpack.c.bf16 %v2043_v29, %v2035_v21  ;;  %v4408_v29 = vpop.permute.xlu0 %2785 }
 0x19e   : > { %v4323_v12 = vpop.f32.mrf.mxu1 }
 0x19f   : > { %2724 = vmatprep.subr.bf16.mxu0 %v2073_v30 }
 0x1a0   : > { %2725 = vmatpush1.bf16.msra.mxu0 %v2072_v43  ;;  %v4326_v53 = vpop.f32.mrf.mxu1 }
 0x1a1   : > { %3332 = vmatmul.mubr.msk.bf16.gmra.mxu1 %vm2239_vm1, %v4252_v48  ;;  %2726 = vmatprep.subr.bf16.mxu0 %v2065_v40  ;;  %v4429_v24 = vpop.permute.xlu0 %2795 }
 0x1a2   : > { %v4332_v56 = vpop.f32.mrf.mxu1 }
 0x1a4   : > { %2727 = vmatpush1.bf16.msra.mxu0 %v2064_v20  ;;  %v4337_v47 = vpop.f32.mrf.mxu1 }
 0x1a5   : > { %2728 = vmatprep.subr.bf16.mxu0 %v2057_v31 }
 0x1a6   : > { %v4343_v3 = vpop.f32.mrf.mxu1 }
 0x1a8   : > { %2729 = vmatpush1.bf16.msra.mxu0 %v2056_v50  ;;  %v4347_v1 = vpop.f32.mrf.mxu1 }
 0x1aa   : > { %v4351_v4 = vpop.f32.mrf.mxu1 }
 0x1ab   : > { %3333 = vmatmul.mubr.msk.bf16.vlgmr.msra.gmra.mxu0 %vm2239_vm1, %v4218_v59  ;;  %v4339_v59 = vpop.f32.mrf.mxu0 }
 0x1ac   : > { %2756 = vmatprep.mubr.bf16.mxu0 %v3414_v8  ;;  %v4355_v7 = vpop.f32.mrf.mxu1 }
 0x1ad   : > { %v4345_v5 = vpop.f32.mrf.mxu0 }
 0x1ae   : > { %v4359_v10 = vpop.f32.mrf.mxu1 }
 0x1b3   : > { %3334 = vmatmul.mubr.msk.bf16.gmra.mxu0 %vm2239_vm1, %v4237_v0  ;;  %v4349_v0 = vpop.f32.mrf.mxu0 }
 0x1b4   : > { %2766 = vmatprep.mubr.bf16.mxu0 %v3414_v8 }
 0x1b5   : > { %v4353_v8 = vpop.f32.mrf.mxu0 }
 0x1b7   : > { %v4357_v9 = vpop.f32.mrf.mxu0 }
 0x1b9   : > { %v4361_v38 = vpop.f32.mrf.mxu0 }
 0x1bb   : > { %3335 = vmatmul.mubr.msk.bf16.gmra.mxu0 %vm2239_vm1, %v4252_v48  ;;  %v4363_v48 = vpop.f32.mrf.mxu1  ;;  %v4365_v54 = vpop.f32.mrf.mxu0 }
 0x1bd   : > { %v4367_v13 = vpop.f32.mrf.mxu1  ;;  %v4369_v2 = vpop.f32.mrf.mxu0 }
 0x1bf   : > { %v4371_v60 = vpop.f32.mrf.mxu1  ;;  %v4373_v6 = vpop.f32.mrf.mxu0 }
 0x1c1   : > { %v4375_v16 = vpop.f32.mrf.mxu1  ;;  %v4377_v61 = vpop.f32.mrf.mxu0 }
 0x1c3   : > { %v4379_v17 = vpop.f32.mrf.mxu1  ;;  %v4381_v32 = vpop.f32.mrf.mxu0 }
 0x1c5   : > { %v4383_v15 = vpop.f32.mrf.mxu1  ;;  %v4385_v19 = vpop.f32.mrf.mxu0 }
 0x1c7   : > { %v4387_v58 = vpop.f32.mrf.mxu1  ;;  %v4389_v14 = vpop.f32.mrf.mxu0 }
 0x1c9   : > { %v4391_v22 = vpop.f32.mrf.mxu1  ;;  %v4393_v62 = vpop.f32.mrf.mxu0 }
 0x1cb   : > { %v4395_v33 = vpop.f32.mrf.mxu1  ;;  %v4397_v18 = vpop.f32.mrf.mxu0 }
 0x1cd   : > { %v4399_v34 = vpop.f32.mrf.mxu1  ;;  %v4401_v35 = vpop.f32.mrf.mxu0 }
 0x1cf   : > { %v4403_v36 = vpop.f32.mrf.mxu1  ;;  %v4405_v25 = vpop.f32.mrf.mxu0 }
 0x1d1   : > { %v4411_v42 = vpop.f32.mrf.mxu0 }
 0x1d3   : > { %v4424_v40 = vpop.f32.mrf.mxu0 }
 0x1d5   : > { %v4434_v50 = vpop.f32.mrf.mxu0 }
 0x1fb   : > { %v2559_v21 = vpop.f32.mrf.mxu1 }
 0x1fc   : > { %v2560_v27 = vadd.f32 %v2559_v21, %v4306_v11 }
 0x1fd   : > { %v2561_v41 = vpop.f32.mrf.mxu1 }
 0x1fe   : > { %v2813_v37 = vadd.f32 %v4408_v29, %v2560_v27  ;;  %v2562_v44 = vadd.f32 %v2561_v41, %v4312_v63 }
 0x1ff   : > { %v2563_v30 = vpop.f32.mrf.mxu1 }
 0x200   : > { %v2861_v28 = vmax.f32 %v2813_v37, 0.0  ;;  %v2814_v11 = vadd.f32 %v4408_v29, %v2562_v44  ;;  %v2564_v43 = vadd.f32 %v2563_v30, %v4317_v23  ;;  %v4439_v37 = vpop.permute.xlu1 %2800 }
 0x201   : > { %v2565_v51 = vpop.f32.mrf.mxu1 }
 0x202   : > { %2909 = vst [vmem:[%s4418_s18] sm:$0xff] %v2861_v28  ;;  %v2862_v63 = vmax.f32 %v2814_v11, 0.0  ;;  %v2821_v46 = vadd.f32 %v4420_v45, %v2564_v43  ;;  %v2566_v49 = vadd.f32 %v2565_v51, %v4319_v52  ;;  %v4444_v11 = vpop.f32.mrf.mxu0 }
 0x203   : > { %v2569_v39 = vpop.f32.mrf.mxu1 }
 0x204   : > { %2910 = vst [vmem:[%s4418_s18 + $0x8] sm:$0xff] %v2862_v63  ;;  %v2869_v20 = vmax.f32 %v2821_v46, 0.0  ;;  %v2822_v31 = vadd.f32 %v4420_v45, %v2566_v49  ;;  %v2570_v23 = vadd.f32 %v2569_v39, %v4323_v12  ;;  %v4449_v46 = vpop.permute.xlu0 %2805 }
 0x205   : > { %v2571_v26 = vpop.f32.mrf.mxu1 }
 0x206   : > { %2917 = vst [vmem:[%s4418_s18 + $0x40] sm:$0xff] %v2869_v20  ;;  %v2870_v21 = vmax.f32 %v2822_v31, 0.0  ;;  %v2829_v27 = vadd.f32 %v4429_v24, %v2570_v23  ;;  %v2572_v52 = vadd.f32 %v2571_v26, %v4326_v53  ;;  %v4454_v31 = vpop.f32.mrf.mxu0 }
 0x207   : > { %v2573_v41 = vpop.f32.mrf.mxu1 }
 0x208   : > { %2918 = vst [vmem:[%s4418_s18 + $0x48] sm:$0xff] %v2870_v21  ;;  %v2877_v44 = vmax.f32 %v2829_v27, 0.0  ;;  %v2830_v30 = vadd.f32 %v4429_v24, %v2572_v52  ;;  %v2574_v12 = vadd.f32 %v2573_v41, %v4332_v56  ;;  %v4459_v27 = vpop.permute.xlu1 %2810 }
 0x209   : > { %v2575_v28 = vpop.f32.mrf.mxu1 }
 0x20a   : > { %2925 = vst [vmem:[%s4418_s18 + $0x80] sm:$0xff] %v2877_v44  ;;  %v2878_v43 = vmax.f32 %v2830_v30, 0.0  ;;  %v2837_v51 = vadd.f32 %v4439_v37, %v2574_v12  ;;  %v2576_v53 = vadd.f32 %v2575_v28, %v4337_v47 }
 0x20b   : > { %v2579_v63 = vpop.f32.mrf.mxu1 }
 0x20c   : > { %2926 = vst [vmem:[%s4418_s18 + $0x88] sm:$0xff] %v2878_v43  ;;  %v2885_v49 = vmax.f32 %v2837_v51, 0.0  ;;  %v2838_v39 = vadd.f32 %v4439_v37, %v2576_v53  ;;  %v2580_v56 = vadd.f32 %v2579_v63, %v4343_v3 }
 0x20d   : > { %v2581_v20 = vpop.f32.mrf.mxu1 }
 0x20e   : > { %2933 = vst [vmem:[%s4418_s18 + $0xc0] sm:$0xff] %v2885_v49  ;;  %v2886_v23 = vmax.f32 %v2838_v39, 0.0  ;;  %v2845_v26 = vadd.f32 %v4449_v46, %v2580_v56  ;;  %v2582_v47 = vadd.f32 %v2581_v20, %v4347_v1 }
 0x20f   : > { %v2583_v21 = vpop.f32.mrf.mxu1 }
 0x210   : > { %2934 = vst [vmem:[%s4418_s18 + $0xc8] sm:$0xff] %v2886_v23  ;;  %v2893_v52 = vmax.f32 %v2845_v26, 0.0  ;;  %v2846_v41 = vadd.f32 %v4449_v46, %v2582_v47  ;;  %v2584_v3 = vadd.f32 %v2583_v21, %v4351_v4 }
 0x211   : > { %v2585_v44 = vpop.f32.mrf.mxu1  ;;  %v2622_v30 = vpop.f32.mrf.mxu0 }
 0x212   : > { %2941 = vst [vmem:[%s4418_s18 + $0x100] sm:$0xff] %v2893_v52  ;;  %v2894_v12 = vmax.f32 %v2846_v41, 0.0  ;;  %v2853_v28 = vadd.f32 %v4459_v27, %v2584_v3  ;;  %v2586_v43 = vadd.f32 %v2585_v44, %v4355_v7  ;;  %v2623_v1 = vadd.f32 %v2622_v30, %v4328_v55 }
 0x213   : > { %v2624_v51 = vpop.f32.mrf.mxu0 }
 0x214   : > { %2942 = vst [vmem:[%s4418_s18 + $0x108] sm:$0xff] %v2894_v12  ;;  %v2901_v53 = vmax.f32 %v2853_v28, 0.0  ;;  %v2854_v63 = vadd.f32 %v4459_v27, %v2586_v43  ;;  %v2815_v4 = vadd.f32 %v4408_v29, %v2623_v1  ;;  %v2625_v49 = vadd.f32 %v2624_v51, %v4335_v57 }
 0x215   : > { %v2626_v39 = vpop.f32.mrf.mxu0 }
 0x216   : > { %2949 = vst [vmem:[%s4418_s18 + $0x140] sm:$0xff] %v2901_v53  ;;  %v2902_v56 = vmax.f32 %v2854_v63, 0.0  ;;  %v2863_v20 = vmax.f32 %v2815_v4, 0.0  ;;  %v2816_v7 = vadd.f32 %v4408_v29, %v2625_v49  ;;  %v2627_v23 = vadd.f32 %v2626_v39, %v4339_v59 }
 0x217   : > { %v2628_v55 = vpop.f32.mrf.mxu0 }
 0x218   : > { %2950 = vst [vmem:[%s4418_s18 + $0x148] sm:$0xff] %v2902_v56  ;;  %2911 = vst [vmem:[%s4418_s18 + $0x10] sm:$0xff] %v2863_v20  ;;  %v2864_v26 = vmax.f32 %v2816_v7, 0.0  ;;  %v2823_v47 = vadd.f32 %v4420_v45, %v2627_v23  ;;  %v2629_v21 = vadd.f32 %v2628_v55, %v4345_v5 }
 0x219   : > { %v2632_v52 = vpop.f32.mrf.mxu0 }
 0x21a   : > { %2912 = vst [vmem:[%s4418_s18 + $0x18] sm:$0xff] %v2864_v26  ;;  %v2871_v57 = vmax.f32 %v2823_v47, 0.0  ;;  %v2824_v41 = vadd.f32 %v4420_v45, %v2629_v21  ;;  %v2633_v3 = vadd.f32 %v2632_v52, %v4349_v0 }
 0x21b   : > { %v2634_v44 = vpop.f32.mrf.mxu0 }
 0x21c   : > { %2919 = vst [vmem:[%s4418_s18 + $0x50] sm:$0xff] %v2871_v57  ;;  %v2872_v59 = vmax.f32 %v2824_v41, 0.0  ;;  %v2831_v30 = vadd.f32 %v4429_v24, %v2633_v3  ;;  %v2635_v12 = vadd.f32 %v2634_v44, %v4353_v8 }
 0x21d   : > { %v2636_v28 = vpop.f32.mrf.mxu0 }
 0x21e   : > { %2920 = vst [vmem:[%s4418_s18 + $0x58] sm:$0xff] %v2872_v59  ;;  %v2879_v5 = vmax.f32 %v2831_v30, 0.0  ;;  %v2832_v43 = vadd.f32 %v4429_v24, %v2635_v12  ;;  %v2637_v1 = vadd.f32 %v2636_v28, %v4357_v9 }
 0x21f   : > { %v2638_v51 = vpop.f32.mrf.mxu0 }
 0x220   : > { %2927 = vst [vmem:[%s4418_s18 + $0x90] sm:$0xff] %v2879_v5  ;;  %v2880_v0 = vmax.f32 %v2832_v43, 0.0  ;;  %v2839_v53 = vadd.f32 %v4439_v37, %v2637_v1  ;;  %v2639_v63 = vadd.f32 %v2638_v51, %v4361_v38 }
 0x221   : > { %v2642_v4 = vpop.f32.mrf.mxu0 }
 0x222   : > { %2928 = vst [vmem:[%s4418_s18 + $0x98] sm:$0xff] %v2880_v0  ;;  %v2887_v8 = vmax.f32 %v2839_v53, 0.0  ;;  %v2840_v49 = vadd.f32 %v4439_v37, %v2639_v63  ;;  %v2643_v39 = vadd.f32 %v2642_v4, %v4365_v54 }
 0x223   : > { %v2644_v56 = vpop.f32.mrf.mxu0 }
 0x224   : > { %2935 = vst [vmem:[%s4418_s18 + $0xd0] sm:$0xff] %v2887_v8  ;;  %v2888_v9 = vmax.f32 %v2840_v49, 0.0  ;;  %v2847_v20 = vadd.f32 %v4449_v46, %v2643_v39  ;;  %v2645_v7 = vadd.f32 %v2644_v56, %v4369_v2 }
 0x225   : > { %v2646_v23 = vpop.f32.mrf.mxu0 }
 0x226   : > { %2936 = vst [vmem:[%s4418_s18 + $0xd8] sm:$0xff] %v2888_v9  ;;  %v2895_v38 = vmax.f32 %v2847_v20, 0.0  ;;  %v2848_v55 = vadd.f32 %v4449_v46, %v2645_v7  ;;  %v2647_v26 = vadd.f32 %v2646_v23, %v4373_v6 }
 0x227   : > { %v2648_v47 = vpop.f32.mrf.mxu0 }
 0x228   : > { %2943 = vst [vmem:[%s4418_s18 + $0x110] sm:$0xff] %v2895_v38  ;;  %v2896_v54 = vmax.f32 %v2848_v55, 0.0  ;;  %v2855_v21 = vadd.f32 %v4459_v27, %v2647_v26  ;;  %v2649_v52 = vadd.f32 %v2648_v47, %v4377_v61 }
 0x22a   : > { %2944 = vst [vmem:[%s4418_s18 + $0x118] sm:$0xff] %v2896_v54  ;;  %v2903_v57 = vmax.f32 %v2855_v21, 0.0  ;;  %v2856_v2 = vadd.f32 %v4459_v27, %v2649_v52 }
 0x22c   : > { %2951 = vst [vmem:[%s4418_s18 + $0x150] sm:$0xff] %v2903_v57  ;;  %v2904_v41 = vmax.f32 %v2856_v2, 0.0 }
 0x22e   : > { %2952 = vst [vmem:[%s4418_s18 + $0x158] sm:$0xff] %v2904_v41 }
 0x251   : > { %v2685_v3 = vpop.f32.mrf.mxu1 }
 0x252   : > { %v2686_v44 = vadd.f32 %v2685_v3, %v4359_v10 }
 0x253   : > { %v2687_v6 = vpop.f32.mrf.mxu1 }
 0x254   : > { %v2817_v59 = vadd.f32 %v4408_v29, %v2686_v44  ;;  %v2688_v30 = vadd.f32 %v2687_v6, %v4363_v48 }
 0x255   : > { %v2689_v12 = vpop.f32.mrf.mxu1 }
 0x256   : > { %v2865_v61 = vmax.f32 %v2817_v59, 0.0  ;;  %v2818_v28 = vadd.f32 %v4408_v29, %v2688_v30  ;;  %v2690_v5 = vadd.f32 %v2689_v12, %v4367_v13 }
 0x257   : > { %v2691_v43 = vpop.f32.mrf.mxu1 }
 0x258   : > { %2913 = vst [vmem:[%s4418_s18 + $0x20] sm:$0xff] %v2865_v61  ;;  %v2866_v1 = vmax.f32 %v2818_v28, 0.0  ;;  %v2825_v51 = vadd.f32 %v4420_v45, %v2690_v5  ;;  %v2692_v10 = vadd.f32 %v2691_v43, %v4371_v60 }
 0x259   : > { %v2695_v0 = vpop.f32.mrf.mxu1 }
 0x25a   : > { %2914 = vst [vmem:[%s4418_s18 + $0x28] sm:$0xff] %v2866_v1  ;;  %v2873_v53 = vmax.f32 %v2825_v51, 0.0  ;;  %v2826_v48 = vadd.f32 %v4420_v45, %v2692_v10  ;;  %v2696_v63 = vadd.f32 %v2695_v0, %v4375_v16 }
 0x25b   : > { %v2697_v4 = vpop.f32.mrf.mxu1 }
 0x25c   : > { %2921 = vst [vmem:[%s4418_s18 + $0x60] sm:$0xff] %v2873_v53  ;;  %v2874_v13 = vmax.f32 %v2826_v48, 0.0  ;;  %v2833_v8 = vadd.f32 %v4429_v24, %v2696_v63  ;;  %v2698_v49 = vadd.f32 %v2697_v4, %v4379_v17 }
 0x25d   : > { %v2699_v39 = vpop.f32.mrf.mxu1 }
 0x25e   : > { %2922 = vst [vmem:[%s4418_s18 + $0x68] sm:$0xff] %v2874_v13  ;;  %v2881_v60 = vmax.f32 %v2833_v8, 0.0  ;;  %v2834_v56 = vadd.f32 %v4429_v24, %v2698_v49  ;;  %v2700_v9 = vadd.f32 %v2699_v39, %v4383_v15 }
 0x25f   : > { %v2701_v20 = vpop.f32.mrf.mxu1 }
 0x260   : > { %2929 = vst [vmem:[%s4418_s18 + $0xa0] sm:$0xff] %v2881_v60  ;;  %v2882_v16 = vmax.f32 %v2834_v56, 0.0  ;;  %v2841_v7 = vadd.f32 %v4439_v37, %v2700_v9  ;;  %v2702_v23 = vadd.f32 %v2701_v20, %v4387_v58 }
 0x261   : > { %v2705_v38 = vpop.f32.mrf.mxu1 }
 0x262   : > { %2930 = vst [vmem:[%s4418_s18 + $0xa8] sm:$0xff] %v2882_v16  ;;  %v2889_v17 = vmax.f32 %v2841_v7, 0.0  ;;  %v2842_v55 = vadd.f32 %v4439_v37, %v2702_v23  ;;  %v2706_v26 = vadd.f32 %v2705_v38, %v4391_v22 }
 0x263   : > { %v2707_v47 = vpop.f32.mrf.mxu1 }
 0x264   : > { %2937 = vst [vmem:[%s4418_s18 + $0xe0] sm:$0xff] %v2889_v17  ;;  %v2890_v15 = vmax.f32 %v2842_v55, 0.0  ;;  %v2849_v54 = vadd.f32 %v4449_v46, %v2706_v26  ;;  %v2708_v21 = vadd.f32 %v2707_v47, %v4395_v33 }
 0x265   : > { %v2709_v52 = vpop.f32.mrf.mxu1 }
 0x266   : > { %2938 = vst [vmem:[%s4418_s18 + $0xe8] sm:$0xff] %v2890_v15  ;;  %v2897_v58 = vmax.f32 %v2849_v54, 0.0  ;;  %v2850_v57 = vadd.f32 %v4449_v46, %v2708_v21  ;;  %v2710_v2 = vadd.f32 %v2709_v52, %v4399_v34 }
 0x267   : > { %v2711_v41 = vpop.f32.mrf.mxu1 }
 0x268   : > { %2945 = vst [vmem:[%s4418_s18 + $0x120] sm:$0xff] %v2897_v58  ;;  %v2898_v22 = vmax.f32 %v2850_v57, 0.0  ;;  %v2857_v3 = vadd.f32 %v4459_v27, %v2710_v2  ;;  %v2712_v44 = vadd.f32 %v2711_v41, %v4403_v36 }
 0x26a   : > { %2946 = vst [vmem:[%s4418_s18 + $0x128] sm:$0xff] %v2898_v22  ;;  %v2905_v6 = vmax.f32 %v2857_v3, 0.0  ;;  %v2858_v33 = vadd.f32 %v4459_v27, %v2712_v44 }
 0x26b   : > { %v2748_v30 = vpop.f32.mrf.mxu0 }
 0x26c   : > { %2953 = vst [vmem:[%s4418_s18 + $0x160] sm:$0xff] %v2905_v6  ;;  %v2906_v59 = vmax.f32 %v2858_v33, 0.0  ;;  %v2749_v12 = vadd.f32 %v2748_v30, %v4381_v32 }
 0x26d   : > { %v2750_v34 = vpop.f32.mrf.mxu0 }
 0x26e   : > { %2954 = vst [vmem:[%s4418_s18 + $0x168] sm:$0xff] %v2906_v59  ;;  %v2819_v61 = vadd.f32 %v4408_v29, %v2749_v12  ;;  %v2751_v28 = vadd.f32 %v2750_v34, %v4385_v19 }
 0x26f   : > { %v2752_v5 = vpop.f32.mrf.mxu0 }
 0x270   : > { %v2867_v36 = vmax.f32 %v2819_v61, 0.0  ;;  %v2820_v43 = vadd.f32 %v4408_v29, %v2751_v28  ;;  %v2753_v1 = vadd.f32 %v2752_v5, %v4389_v14 }
 0x271   : > { %v2754_v51 = vpop.f32.mrf.mxu0 }
 0x272   : > { %2915 = vst [vmem:[%s4418_s18 + $0x30] sm:$0xff] %v2867_v36  ;;  %v2868_v10 = vmax.f32 %v2820_v43, 0.0  ;;  %v2827_v0 = vadd.f32 %v4420_v45, %v2753_v1  ;;  %v2755_v32 = vadd.f32 %v2754_v51, %v4393_v62 }
 0x273   : > { %v2758_v53 = vpop.f32.mrf.mxu0 }
 0x274   : > { %2916 = vst [vmem:[%s4418_s18 + $0x38] sm:$0xff] %v2868_v10  ;;  %v2875_v48 = vmax.f32 %v2827_v0, 0.0  ;;  %v2828_v19 = vadd.f32 %v4420_v45, %v2755_v32  ;;  %v2759_v63 = vadd.f32 %v2758_v53, %v4397_v18 }
 0x275   : > { %v2760_v4 = vpop.f32.mrf.mxu0 }
 0x276   : > { %2923 = vst [vmem:[%s4418_s18 + $0x70] sm:$0xff] %v2875_v48  ;;  %v2876_v14 = vmax.f32 %v2828_v19, 0.0  ;;  %v2835_v29 = vadd.f32 %v4429_v24, %v2759_v63  ;;  %v2761_v13 = vadd.f32 %v2760_v4, %v4401_v35 }
 0x277   : > { %v2762_v8 = vpop.f32.mrf.mxu0 }
 0x278   : > { %2924 = vst [vmem:[%s4418_s18 + $0x78] sm:$0xff] %v2876_v14  ;;  %v2883_v62 = vmax.f32 %v2835_v29, 0.0  ;;  %v2836_v49 = vadd.f32 %v4429_v24, %v2761_v13  ;;  %v2763_v39 = vadd.f32 %v2762_v8, %v4405_v25 }
 0x279   : > { %v2764_v60 = vpop.f32.mrf.mxu0 }
 0x27a   : > { %2931 = vst [vmem:[%s4418_s18 + $0xb0] sm:$0xff] %v2883_v62  ;;  %v2884_v18 = vmax.f32 %v2836_v49, 0.0  ;;  %v2843_v45 = vadd.f32 %v4439_v37, %v2763_v39  ;;  %v2765_v56 = vadd.f32 %v2764_v60, %v4411_v42 }
 0x27b   : > { %v2768_v9 = vpop.f32.mrf.mxu0 }
 0x27c   : > { %2932 = vst [vmem:[%s4418_s18 + $0xb8] sm:$0xff] %v2884_v18  ;;  %v2891_v35 = vmax.f32 %v2843_v45, 0.0  ;;  %v2844_v20 = vadd.f32 %v4439_v37, %v2765_v56  ;;  %v2769_v16 = vadd.f32 %v2768_v9, %v4424_v40 }
 0x27d   : > { %v2770_v24 = vpop.f32.mrf.mxu0 }
 0x27e   : > { %2939 = vst [vmem:[%s4418_s18 + $0xf0] sm:$0xff] %v2891_v35  ;;  %v2892_v25 = vmax.f32 %v2844_v20, 0.0  ;;  %v2851_v7 = vadd.f32 %v4449_v46, %v2769_v16  ;;  %v2771_v23 = vadd.f32 %v2770_v24, %v4434_v50 }
 0x27f   : > { %v2772_v38 = vpop.f32.mrf.mxu0 }
 0x280   : > { %2940 = vst [vmem:[%s4418_s18 + $0xf8] sm:$0xff] %v2892_v25  ;;  %v2899_v42 = vmax.f32 %v2851_v7, 0.0  ;;  %v2852_v17 = vadd.f32 %v4449_v46, %v2771_v23  ;;  %v2773_v55 = vadd.f32 %v2772_v38, %v4444_v11 }
 0x281   : > { %v2774_v37 = vpop.f32.mrf.mxu0 }
 0x282   : > { %2947 = vst [vmem:[%s4418_s18 + $0x130] sm:$0xff] %v2899_v42  ;;  %v2900_v40 = vmax.f32 %v2852_v17, 0.0  ;;  %v2859_v26 = vadd.f32 %v4459_v27, %v2773_v55  ;;  %v2775_v47 = vadd.f32 %v2774_v37, %v4454_v31 }
 0x284   : > { %2948 = vst [vmem:[%s4418_s18 + $0x138] sm:$0xff] %v2900_v40  ;;  %v2907_v15 = vmax.f32 %v2859_v26, 0.0  ;;  %v2860_v54 = vadd.f32 %v4459_v27, %v2775_v47 }
 0x286   : > { %2955 = vst [vmem:[%s4418_s18 + $0x170] sm:$0xff] %v2907_v15  ;;  %v2908_v50 = vmax.f32 %v2860_v54, 0.0 }
 0x288   : > { %2956 = vst [vmem:[%s4418_s18 + $0x178] sm:$0xff] %v2908_v50 }
 0x289 PF: > { %s17_s26 = sadd.s32 1, %s3412_s26   ;;  %s4596_s24 = smov %s3408_s25 }
 0x28a   : > { %p14_p5 = scmp.ge.s32.totalorder %s17_s26, 4   ;;  %s4597_s25 = smov %s4599_s27 }
 0x28c   :  { %16 = sbr.rel (!%p14_p5) target bundleno = 2 (0x2), region = 87 }

</bundles_post_ra>
